<compile_context>
chip_gen: v5e
topology: v5e:2x2
jax: 0.10.0
libtpu: 0.0.40
codegen_flags: <defaults>
</compile_context>

<pallas_src>
import functools

import jax
import jax.numpy as jnp
from jax import lax
from jax.experimental import pallas as pl
from jax.experimental.pallas import tpu as pltpu

IN_FEATURES = 2048
OUT_FEATURES = 1000


def _num_tensorcores_per_chip():
    """2 on v7x (two TensorCores share a chip), 1 on v5e/v6e."""
    try:
        kind = jax.devices()[0].device_kind.lower()
    except Exception:
        return 1
    return 2 if "v7" in kind else 1


def linear_kernel(x_ref, w_ref, b_ref, o_ref):
    # x_ref: (B, K) f32, w_ref: (Nt, K) bf16 [PyTorch (out, in) layout tile],
    # b_ref: (1, Nt) f32, o_ref: (B, Nt) f32.
    # Cast activations to the weight dtype (tiny, VPU) so the MXU sees matched
    # bf16 operands; accumulate in f32.  Contract on K of both operands -> no
    # weight transpose anywhere.
    x = x_ref[...].astype(w_ref.dtype)
    acc = lax.dot_general(
        x,
        w_ref[...],
        dimension_numbers=(((1,), (1,)), ((), ())),
        preferred_element_type=jnp.float32,
    )
    o_ref[...] = (acc + b_ref[...]).astype(o_ref.dtype)


def prepare_params(w_pt, b_pt, *, weight_dtype=jnp.bfloat16, n_split=1):
    """One-time (init-time) parameter prep: pad N so a lane-dense 128-aligned
    n_split-way split exists (1000 -> 1024) and cast the weight to the
    streaming dtype.  No transpose, no per-call work."""
    N, K = w_pt.shape
    align = 128 * n_split
    n_pad = int(pl.cdiv(N, align)) * align  # 1000 -> 1024 for n_split in {1, 2}
    w_p = jnp.zeros((n_pad, K), dtype=weight_dtype).at[:N, :].set(
        w_pt.astype(weight_dtype))
    b_p = jnp.zeros((1, n_pad), dtype=jnp.float32).at[0, :N].set(
        b_pt.astype(jnp.float32))
    return w_p, b_p, N


@functools.partial(jax.jit, static_argnames=("n_out", "n_split"))
def linear_pallas(x, w_p, b_p, n_out, n_split):
    """x: (B, K) f32, w_p: (N_pad, K) bf16/f32, b_p: (1, N_pad) f32
    -> (B, n_out) f32."""
    B, K = x.shape
    N_pad, Kw = w_p.shape
    assert K == Kw and N_pad % (128 * n_split) == 0
    Nt = N_pad // n_split  # 1024 (1 TC) or 512 per grid step (v7x)

    w_bytes = N_pad * K * jnp.dtype(w_p.dtype).itemsize
    cost = pl.CostEstimate(
        flops=2 * B * K * N_pad,
        transcendentals=0,
        bytes_accessed=w_bytes + B * K * 4 + N_pad * 4 + B * N_pad * 4,
    )

    out_pad = pl.pallas_call(
        linear_kernel,
        out_shape=jax.ShapeDtypeStruct((B, N_pad), jnp.float32),
        grid_spec=pltpu.PrefetchScalarGridSpec(
            num_scalar_prefetch=0,
            grid=(n_split,),
            in_specs=[
                pl.BlockSpec((B, K), lambda j: (0, 0)),    # activations (tiny)
                pl.BlockSpec((Nt, K), lambda j: (j, 0)),   # weight tile, (N, K) layout
                pl.BlockSpec((1, Nt), lambda j: (0, j)),   # bias tile
            ],
            out_specs=pl.BlockSpec((B, Nt), lambda j: (0, j)),
        ),
        compiler_params=pltpu.CompilerParams(
            # TODO(synk): if xprof shows the 2-step axis is NOT core-sharded on
            # v7x, switch this to pltpu.CORE_PARALLEL for that axis.
            dimension_semantics=("parallel",),
            vmem_limit_bytes=32 << 20,
        ),
        cost_estimate=cost,
    )(x, w_p, b_p)

    # Drop the zero-padded output columns (1024 -> 1000); tiny slice, outside kernel.
    return out_pad[:, :n_out]


def forward(x513, w_p, b_p, n_out, n_split):
    """Mirrors M.forward: x513 is (B, 2048, 1, 1); flatten(1) then Linear."""
    B = x513.shape[0]
    x514 = x513.reshape(B, -1)            # torch.flatten(x513, 1)
    return linear_pallas(x514, w_p, b_p, n_out, n_split)


if __name__ == "__main__":
    key = jax.random.PRNGKey(0)
    kx, kw, kb = jax.random.split(key, 3)

    # Deterministic synthetic parameters (same shapes as nn.Linear(2048, 1000)).
    x513 = jax.random.normal(kx, (1, IN_FEATURES, 1, 1), dtype=jnp.float32)
    w_pt = jax.random.normal(kw, (OUT_FEATURES, IN_FEATURES), dtype=jnp.float32) * 0.02
    b_pt = jax.random.normal(kb, (OUT_FEATURES,), dtype=jnp.float32) * 0.02

    # Generation-dependent split: both TCs on v7x, single big DMA on v5e/v6e.
    n_split = _num_tensorcores_per_chip()

    # One-time parameter prep (init-time, not on the per-call hot path).
    # bf16 weight streaming halves the dominant HBM traffic of this GEMV.
    w_p, b_p, n_out = prepare_params(
        w_pt, b_pt, weight_dtype=jnp.bfloat16, n_split=n_split)

    out = forward(x513, w_p, b_p, n_out, n_split)
    out = jax.block_until_ready(out)
    assert out.shape == (1, OUT_FEATURES)

    # Reference 1: bf16-rounded-weight reference (matches kernel numerics closely).
    x_bf = x513.reshape(1, -1).astype(jnp.bfloat16).astype(jnp.float32)
    w_bf = w_pt.astype(jnp.bfloat16).astype(jnp.float32)
    ref_bf = x_bf @ w_bf.T + b_pt
    assert jnp.allclose(out, ref_bf, atol=5e-3, rtol=5e-3)

    # Reference 2: exact f32 module output (loose tolerance for the bf16 stream).
    ref_f32 = x513.reshape(1, -1) @ w_pt.T + b_pt
    assert jnp.allclose(out, ref_f32, atol=5e-2, rtol=5e-2)

    print("KERNEL_OK")
</pallas_src>

<mosaic_0001>
module attributes {stable_mosaic.version = 11 : i64} {
  func.func @linear_kernel(%arg0: i32, %arg1: memref<1x2048xf32, #tpu.memory_space<vmem>>, %arg2: memref<1024x2048xbf16, #tpu.memory_space<vmem>>, %arg3: memref<1x1024xf32, #tpu.memory_space<vmem>>, %arg4: memref<1x1024xf32, #tpu.memory_space<vmem>>) attributes {dimension_semantics = [#tpu.dimension_semantics<parallel>], iteration_bounds = array<i64: 1>, scalar_prefetch = 0 : i64, scratch_operands = 0 : i64, tpu.core_type = #tpu.core_type<tc>, window_params = [{pipeline_mode = #tpu.pipeline_mode<synchronous>, transform_indices = @transform_0, window_bounds = array<i64: 1, 2048>}, {transform_indices = @transform_1, window_bounds = array<i64: 1024, 2048>}, {transform_indices = @transform_2, window_bounds = array<i64: 1, 1024>}, {transform_indices = @transform_3, window_bounds = array<i64: 1, 1024>}]} {
    %c0 = arith.constant 0 : index
    %c0_0 = arith.constant 0 : index
    %0 = vector.load %arg1[%c0, %c0_0] : memref<1x2048xf32, #tpu.memory_space<vmem>>, vector<1x2048xf32>
    %1 = arith.truncf %0 : vector<1x2048xf32> to vector<1x2048xbf16>
    %c0_1 = arith.constant 0 : index
    %c0_2 = arith.constant 0 : index
    %2 = vector.load %arg2[%c0_1, %c0_2] : memref<1024x2048xbf16, #tpu.memory_space<vmem>>, vector<1024x2048xbf16>
    %cst = arith.constant dense<0.000000e+00> : vector<1x1024xf32>
    %3 = tpu.matmul %1, %2, %cst {dimension_numbers = #tpu.dot_dimension_numbers<[1], [1], [0], [0], [0, 0, 1, 0], [], []>} : vector<1x2048xbf16>, vector<1024x2048xbf16>, vector<1x1024xf32> -> vector<1x1024xf32>
    %c0_3 = arith.constant 0 : index
    %c0_4 = arith.constant 0 : index
    %4 = vector.load %arg3[%c0_3, %c0_4] : memref<1x1024xf32, #tpu.memory_space<vmem>>, vector<1x1024xf32>
    %5 = arith.addf %3, %4 : vector<1x1024xf32>
    %c0_5 = arith.constant 0 : index
    %c0_6 = arith.constant 0 : index
    %6 = vector.load %arg4[%c0_5, %c0_6] : memref<1x1024xf32, #tpu.memory_space<vmem>>, vector<1x1024xf32>
    tpu.vector_store %arg4[%c0_5, %c0_6], %5 {strides = array<i32>} : memref<1x1024xf32, #tpu.memory_space<vmem>>, vector<1x1024xf32>,
    return
  }
  func.func @transform_0(%arg0: i32) -> (i32, i32) {
    %c0_i32 = arith.constant 0 : i32
    %c0_i32_0 = arith.constant 0 : i32
    %c0_i32_1 = arith.constant 0 : i32
    return %c0_i32, %c0_i32_0 : i32, i32
  }
  func.func @transform_1(%arg0: i32) -> (i32, i32) {
    %c0_i32 = arith.constant 0 : i32
    %c0_i32_0 = arith.constant 0 : i32
    return %arg0, %c0_i32 : i32, i32
  }
  func.func @transform_2(%arg0: i32) -> (i32, i32) {
    %c0_i32 = arith.constant 0 : i32
    %c0_i32_0 = arith.constant 0 : i32
    return %c0_i32, %arg0 : i32, i32
  }
  func.func @transform_3(%arg0: i32) -> (i32, i32) {
    %c0_i32 = arith.constant 0 : i32
    %c0_i32_0 = arith.constant 0 : i32
    return %c0_i32, %arg0 : i32, i32
  }
}

</mosaic_0001>

<bundles_post_ra>
// kernel: linear_pallas.1
= control target key start
LH: loop header
LB: loop body
LE: loop exit
PB: predicated region body
PF: predicated region fallthrough
CT: control target
= control target key end

     0   :  { %8 = vsyncpa [#allocation3], 0  ;;  %s13522_s0 = inlined_call_operand.hbm [shape: f32[1,2048], index: 0, kind: input, shape index: {}]   ;;  %s13523_s1 = inlined_call_operand.hbm [shape: bf16[1024,2048], index: 1, kind: input, shape index: {}]   ;;  %s13524_s2 = inlined_call_operand.hbm [shape: f32[1,1024], index: 2, kind: input, shape index: {}]   ;;  %s13525_s3 = inlined_call_operand.hbm [shape: f32[1,1024], index: 3, kind: output, shape index: {}]  }
   0x1   :  { %9 = vsyncpa [#allocation6], 0  ;;  %s26_s14 = sshll.u32 %s13523_s1, 4  ;;  %s27_s14 = int_to_ptr.hbm [resolvable:$true] %s26_s14 }
   0x2   :  { %10 = vsyncpa [#allocation4], 0  ;;  %s13220_s15 = smov [#allocation5]   ;;  %s16_s19 = sshll.u32 %s13522_s0, 4  ;;  %s17_s19 = int_to_ptr.hbm [resolvable:$true] %s16_s19 }
   0x3   :  { %s28_s16 = sshll.u32 %s13220_s15, 4  ;;  %s13221_s20 = smov 1024   ;;  %s29_s16 = int_to_ptr.vmem [resolvable:$true] %s28_s16 }
   0x4   :  { %s13222_s21 = smov 64   ;;  %s13223_s22 = smov [#allocation2]  }
   0x5   :  { %34 = dma.hbm_to_vmem [thread:$0]  %s27_s14, 131072, %s29_s16, [#allocation6], %s13221_s20, %s13221_s20, %s13222_s21  }
   0x6   :  { %s18_s23 = sshll.u32 %s13223_s22, 4  ;;  %s40_s26 = sshll.u32 %s13524_s2, 4  ;;  %s19_s23 = int_to_ptr.vmem [resolvable:$true] %s18_s23  ;;  %s41_s26 = int_to_ptr.hbm [resolvable:$true] %s40_s26 }
   0x7   :  { %21 = dma.hbm_to_vmem [thread:$0]  %s17_s19, 256, %s19_s23, [#allocation3]  }
   0x8   :  { %s13224_s1 = smov [#allocation7]  }
   0x9   :  { %s42_s27 = sshll.u32 %s13224_s1, 4  ;;  %s43_s27 = int_to_ptr.vmem [resolvable:$true] %s42_s27 }
   0xa   :  { %45 = dma.hbm_to_vmem [thread:$0]  %s41_s26, 128, %s43_s27, [#allocation6]  }
   0xb   :  { %13214 = dma.done.wait [#allocation3], 256  }
   0xc   :  { %13215 = vsyncadd [#allocation3], 4294967040 }
   0xd   :  { %13216 = dma.done.wait [#allocation6], 131200  }
   0xe   :  { %13217 = vsyncadd [#allocation6], 4294836096  ;;  %v8435_v0 = vld [vmem:[#allocation5 + $0x380] sm:$0xf]  ;;  %v12193_v2 = vld [vmem:[#allocation5 + $0x384] sm:$0xf] }
   0xf   :  { %v12201_v1 = vld [vmem:[#allocation5 + $0x3bc] sm:$0xf0]  ;;  %v8437_v4 = vld [vmem:[#allocation5 + $0x3c0] sm:$0xf0]  ;;  %v8443_v5 = vld [vmem:[#allocation5 + $0x388] sm:$0xf] }
  0x10   :  { %v8436_v3 = vor.u32 %v12201_v1, %v8435_v0  ;;  %v12202_v6 = vld [vmem:[#allocation5 + $0x3c4] sm:$0xf0]  ;;  %v8440_v7 = vor.u32 %v12193_v2, %v8437_v4  ;;  %v12194_v9 = vld [vmem:[#allocation5 + $0x38c] sm:$0xf]  ;;  %v8371_v12 = vld [vmem:[#allocation5 + $0x300] sm:$0xf] }
  0x11   :  { %v8444_v8 = vor.u32 %v12202_v6, %v8443_v5  ;;  %v8445_v10 = vld [vmem:[#allocation5 + $0x3c8] sm:$0xf0]  ;;  %v12185_v13 = vld [vmem:[#allocation5 + $0x33c] sm:$0xf0]  ;;  %v12177_v14 = vld [vmem:[#allocation5 + $0x304] sm:$0xf] }
  0x12   :  { %6272 = vmatpush.bf16.xpose.msra.mxu0 %v8436_v3  ;;  %v8448_v11 = vor.u32 %v12194_v9, %v8445_v10  ;;  %6285 = vmatpush.bf16.xpose.msra.mxu1 %v8440_v7  ;;  %v8373_v15 = vld [vmem:[#allocation5 + $0x340] sm:$0xf0]  ;;  %v8379_v16 = vld [vmem:[#allocation5 + $0x308] sm:$0xf]  ;;  %v12178_v18 = vld [vmem:[#allocation5 + $0x30c] sm:$0xf]  ;;  %v8372_v20 = vor.u32 %v12185_v13, %v8371_v12 }
  0x13   :  { %6298 = vmatpush.bf16.xpose.msra.mxu2 %v8444_v8  ;;  %v12186_v17 = vld [vmem:[#allocation5 + $0x344] sm:$0xf0]  ;;  %v8381_v19 = vld [vmem:[#allocation5 + $0x348] sm:$0xf0]  ;;  %v8376_v21 = vor.u32 %v12177_v14, %v8373_v15  ;;  %v8307_v24 = vld [vmem:[#allocation5 + $0x280] sm:$0xf] }
  0x14   :  { %6311 = vmatpush.bf16.xpose.msra.mxu3 %v8448_v11  ;;  %v8380_v22 = vor.u32 %v12186_v17, %v8379_v16  ;;  %v8384_v23 = vor.u32 %v12178_v18, %v8381_v19  ;;  %v12169_v25 = vld [vmem:[#allocation5 + $0x2bc] sm:$0xf0]  ;;  %v12161_v26 = vld [vmem:[#allocation5 + $0x284] sm:$0xf]  ;;  %v8315_v28 = vld [vmem:[#allocation5 + $0x288] sm:$0xf] }
  0x15   :  { %v8309_v27 = vld [vmem:[#allocation5 + $0x2c0] sm:$0xf0]  ;;  %v12170_v29 = vld [vmem:[#allocation5 + $0x2c4] sm:$0xf0]  ;;  %v12162_v30 = vld [vmem:[#allocation5 + $0x28c] sm:$0xf]  ;;  %v8308_v32 = vor.u32 %v12169_v25, %v8307_v24 }
  0x16   :  { %v8317_v31 = vld [vmem:[#allocation5 + $0x2c8] sm:$0xf0]  ;;  %v8312_v33 = vor.u32 %v12161_v26, %v8309_v27  ;;  %v8316_v34 = vor.u32 %v12170_v29, %v8315_v28  ;;  %v8243_v36 = vld [vmem:[#allocation5 + $0x200] sm:$0xf]  ;;  %v12145_v38 = vld [vmem:[#allocation5 + $0x204] sm:$0xf] }
  0x17   :  { %v8320_v35 = vor.u32 %v12162_v30, %v8317_v31  ;;  %v12153_v37 = vld [vmem:[#allocation5 + $0x23c] sm:$0xf0]  ;;  %v8245_v39 = vld [vmem:[#allocation5 + $0x240] sm:$0xf0]  ;;  %v8251_v40 = vld [vmem:[#allocation5 + $0x208] sm:$0xf] }
  0x18   :  { %v12154_v41 = vld [vmem:[#allocation5 + $0x244] sm:$0xf0]  ;;  %v12146_v42 = vld [vmem:[#allocation5 + $0x20c] sm:$0xf]  ;;  %v8244_v44 = vor.u32 %v12153_v37, %v8243_v36  ;;  %v8248_v45 = vor.u32 %v12145_v38, %v8245_v39  ;;  %v8179_v48 = vld [vmem:[#allocation5 + $0x180] sm:$0xf] }
  0x19   :  { %v8253_v43 = vld [vmem:[#allocation5 + $0x248] sm:$0xf0]  ;;  %v8252_v46 = vor.u32 %v12154_v41, %v8251_v40  ;;  %v12137_v49 = vld [vmem:[#allocation5 + $0x1bc] sm:$0xf0]  ;;  %v12129_v50 = vld [vmem:[#allocation5 + $0x184] sm:$0xf] }
  0x1a   :  { %6273 = vmatpush.bf16.xpose.msra.mxu0 %v8372_v20  ;;  %6286 = vmatpush.bf16.xpose.msra.mxu1 %v8376_v21  ;;  %v8256_v47 = vor.u32 %v12146_v42, %v8253_v43  ;;  %v8181_v51 = vld [vmem:[#allocation5 + $0x1c0] sm:$0xf0]  ;;  %v8187_v52 = vld [vmem:[#allocation5 + $0x188] sm:$0xf]  ;;  %v12130_v54 = vld [vmem:[#allocation5 + $0x18c] sm:$0xf]  ;;  %v8180_v56 = vor.u32 %v12137_v49, %v8179_v48 }
  0x1b   :  { %6299 = vmatpush.bf16.xpose.msra.mxu2 %v8380_v22  ;;  %v12138_v53 = vld [vmem:[#allocation5 + $0x1c4] sm:$0xf0]  ;;  %v8189_v55 = vld [vmem:[#allocation5 + $0x1c8] sm:$0xf0]  ;;  %v8184_v57 = vor.u32 %v12129_v50, %v8181_v51  ;;  %v8115_v60 = vld [vmem:[#allocation5 + $0x100] sm:$0xf] }
  0x1c   :  { %6312 = vmatpush.bf16.xpose.msra.mxu3 %v8384_v23  ;;  %v8188_v58 = vor.u32 %v12138_v53, %v8187_v52  ;;  %v8192_v59 = vor.u32 %v12130_v54, %v8189_v55  ;;  %v12121_v61 = vld [vmem:[#allocation5 + $0x13c] sm:$0xf0]  ;;  %v12113_v62 = vld [vmem:[#allocation5 + $0x104] sm:$0xf]  ;;  %v8123_v0 = vld [vmem:[#allocation5 + $0x108] sm:$0xf] }
  0x1d   :  { %v8117_v63 = vld [vmem:[#allocation5 + $0x140] sm:$0xf0]  ;;  %v12122_v1 = vld [vmem:[#allocation5 + $0x144] sm:$0xf0]  ;;  %v12114_v2 = vld [vmem:[#allocation5 + $0x10c] sm:$0xf]  ;;  %v8116_v4 = vor.u32 %v12121_v61, %v8115_v60 }
  0x1e   :  { %v8125_v3 = vld [vmem:[#allocation5 + $0x148] sm:$0xf0]  ;;  %v8120_v5 = vor.u32 %v12113_v62, %v8117_v63  ;;  %v8124_v6 = vor.u32 %v12122_v1, %v8123_v0  ;;  %v8051_v8 = vld [vmem:[#allocation5 + $0x80] sm:$0xf]  ;;  %v12097_v10 = vld [vmem:[#allocation5 + $0x84] sm:$0xf] }
  0x1f   :  { %v8128_v7 = vor.u32 %v12114_v2, %v8125_v3  ;;  %v12105_v9 = vld [vmem:[#allocation5 + $0xbc] sm:$0xf0]  ;;  %v8053_v11 = vld [vmem:[#allocation5 + $0xc0] sm:$0xf0]  ;;  %v8059_v12 = vld [vmem:[#allocation5 + $0x88] sm:$0xf] }
  0x20   :  { %v12106_v13 = vld [vmem:[#allocation5 + $0xc4] sm:$0xf0]  ;;  %v12098_v14 = vld [vmem:[#allocation5 + $0x8c] sm:$0xf]  ;;  %v8052_v16 = vor.u32 %v12105_v9, %v8051_v8  ;;  %v8056_v17 = vor.u32 %v12097_v10, %v8053_v11  ;;  %v7987_v20 = vld [vmem:[#allocation5] sm:$0xf] }
  0x21   :  { %v8061_v15 = vld [vmem:[#allocation5 + $0xc8] sm:$0xf0]  ;;  %v8060_v18 = vor.u32 %v12106_v13, %v8059_v12  ;;  %v12089_v21 = vld [vmem:[#allocation5 + $0x3c] sm:$0xf0]  ;;  %v12081_v22 = vld [vmem:[#allocation5 + $0x4] sm:$0xf] }
  0x22   :  { %6274 = vmatpush.bf16.xpose.msra.mxu0 %v8308_v32  ;;  %6287 = vmatpush.bf16.xpose.msra.mxu1 %v8312_v33  ;;  %v8064_v19 = vor.u32 %v12098_v14, %v8061_v15  ;;  %v7989_v23 = vld [vmem:[#allocation5 + $0x40] sm:$0xf0]  ;;  %v7995_v24 = vld [vmem:[#allocation5 + $0x8] sm:$0xf]  ;;  %v12082_v26 = vld [vmem:[#allocation5 + $0xc] sm:$0xf]  ;;  %v7988_v31 = vor.u32 %v12089_v21, %v7987_v20 }
  0x23   :  { %6300 = vmatpush.bf16.xpose.msra.mxu2 %v8316_v34  ;;  %v12090_v25 = vld [vmem:[#allocation5 + $0x44] sm:$0xf0]  ;;  %v7997_v27 = vld [vmem:[#allocation5 + $0x48] sm:$0xf0]  ;;  %v8451_v28 = vld [vmem:[#allocation5 + $0x390] sm:$0xf] }
  0x24   :  { %6313 = vmatpush.bf16.xpose.msra.mxu3 %v8320_v35  ;;  %v12203_v29 = vld [vmem:[#allocation5 + $0x3cc] sm:$0xf0]  ;;  %v12195_v30 = vld [vmem:[#allocation5 + $0x394] sm:$0xf]  ;;  %v8459_v33 = vld [vmem:[#allocation5 + $0x398] sm:$0xf]  ;;  %v7992_v35 = vor.u32 %v12081_v22, %v7989_v23  ;;  %v7996_v36 = vor.u32 %v12090_v25, %v7995_v24  ;;  %v8000_v39 = vor.u32 %v12082_v26, %v7997_v27 }
  0x25   :  { %v8453_v32 = vld [vmem:[#allocation5 + $0x3d0] sm:$0xf0]  ;;  %v12204_v34 = vld [vmem:[#allocation5 + $0x3d4] sm:$0xf0]  ;;  %v12196_v37 = vld [vmem:[#allocation5 + $0x39c] sm:$0xf]  ;;  %v8452_v40 = vor.u32 %v12203_v29, %v8451_v28 }
  0x26   :  { %v8461_v38 = vld [vmem:[#allocation5 + $0x3d8] sm:$0xf0]  ;;  %v8456_v41 = vor.u32 %v12195_v30, %v8453_v32  ;;  %v8460_v42 = vor.u32 %v12204_v34, %v8459_v33  ;;  %v8395_v48 = vld [vmem:[#allocation5 + $0x318] sm:$0xf]  ;;  %v8261_v8 = vld [vmem:[#allocation5 + $0x250] sm:$0xf0] }
  0x27   :  { %v8464_v43 = vor.u32 %v12196_v37, %v8461_v38  ;;  %v12188_v49 = vld [vmem:[#allocation5 + $0x354] sm:$0xf0]  ;;  %v12180_v50 = vld [vmem:[#allocation5 + $0x31c] sm:$0xf]  ;;  %v8195_v25 = vld [vmem:[#allocation5 + $0x190] sm:$0xf] }
  0x28   :  { %v8397_v51 = vld [vmem:[#allocation5 + $0x358] sm:$0xf0]  ;;  %v8396_v54 = vor.u32 %v12188_v49, %v8395_v48  ;;  %v8331_v60 = vld [vmem:[#allocation5 + $0x298] sm:$0xf]  ;;  %v12139_v26 = vld [vmem:[#allocation5 + $0x1cc] sm:$0xf0] }
  0x29   :  { %v8400_v55 = vor.u32 %v12180_v50, %v8397_v51  ;;  %v12172_v61 = vld [vmem:[#allocation5 + $0x2d4] sm:$0xf0]  ;;  %v12164_v62 = vld [vmem:[#allocation5 + $0x29c] sm:$0xf]  ;;  %v12131_v27 = vld [vmem:[#allocation5 + $0x194] sm:$0xf]  ;;  %v8196_v33 = vor.u32 %v12139_v26, %v8195_v25 }
  0x2a   :  { %6275 = vmatpush.bf16.xpose.msra.mxu0 %v8244_v44  ;;  %6288 = vmatpush.bf16.xpose.msra.mxu1 %v8248_v45  ;;  %v8387_v44 = vld [vmem:[#allocation5 + $0x310] sm:$0xf]  ;;  %v8333_v63 = vld [vmem:[#allocation5 + $0x2d8] sm:$0xf0]  ;;  %v8332_v2 = vor.u32 %v12172_v61, %v8331_v60  ;;  %v8267_v11 = vld [vmem:[#allocation5 + $0x218] sm:$0xf] }
  0x2b   :  { %6301 = vmatpush.bf16.xpose.msra.mxu2 %v8252_v46  ;;  %v12187_v45 = vld [vmem:[#allocation5 + $0x34c] sm:$0xf0]  ;;  %v12179_v46 = vld [vmem:[#allocation5 + $0x314] sm:$0xf]  ;;  %v8336_v3 = vor.u32 %v12164_v62, %v8333_v63  ;;  %v12156_v12 = vld [vmem:[#allocation5 + $0x254] sm:$0xf0] }
  0x2c   :  { %6314 = vmatpush.bf16.xpose.msra.mxu3 %v8256_v47  ;;  %v8389_v47 = vld [vmem:[#allocation5 + $0x350] sm:$0xf0]  ;;  %v8388_v52 = vor.u32 %v12187_v45, %v8387_v44  ;;  %v12148_v15 = vld [vmem:[#allocation5 + $0x21c] sm:$0xf]  ;;  %v8268_v23 = vor.u32 %v12156_v12, %v8267_v11  ;;  %v8203_v29 = vld [vmem:[#allocation5 + $0x198] sm:$0xf] }
  0x2d   :  { %v8392_v53 = vor.u32 %v12179_v46, %v8389_v47  ;;  %v8197_v28 = vld [vmem:[#allocation5 + $0x1d0] sm:$0xf0]  ;;  %v12140_v30 = vld [vmem:[#allocation5 + $0x1d4] sm:$0xf0]  ;;  %v8205_v32 = vld [vmem:[#allocation5 + $0x1d8] sm:$0xf0] }
  0x2e   :  { %v8200_v34 = vor.u32 %v12131_v27, %v8197_v28  ;;  %v8131_v37 = vld [vmem:[#allocation5 + $0x110] sm:$0xf]  ;;  %v8141_v44 = vld [vmem:[#allocation5 + $0x158] sm:$0xf0]  ;;  %v12099_v51 = vld [vmem:[#allocation5 + $0x94] sm:$0xf] }
  0x2f   :  { %v12123_v38 = vld [vmem:[#allocation5 + $0x14c] sm:$0xf0]  ;;  %v12083_v63 = vld [vmem:[#allocation5 + $0x14] sm:$0xf]  ;;  %v8475_v11 = vld [vmem:[#allocation5 + $0x3a8] sm:$0xf] }
  0x30   :  { %v8132_v45 = vor.u32 %v12123_v38, %v8131_v37  ;;  %v8067_v49 = vld [vmem:[#allocation5 + $0x90] sm:$0xf]  ;;  %v12206_v12 = vld [vmem:[#allocation5 + $0x3e4] sm:$0xf0]  ;;  %vm7951_vm0 = vcmask 1040384   ;;  %vm7953_vm1 = vcmask 1042434  }
  0x31   :  { %v12107_v50 = vld [vmem:[#allocation5 + $0xcc] sm:$0xf0]  ;;  %v12190_v37 = vld [vmem:[#allocation5 + $0x364] sm:$0xf0]  ;;  %vm7955_vm2 = vcmask 1041408   ;;  %vm7957_vm3 = vcmask 1044484  }
  0x32   :  { %6276 = vmatpush.bf16.xpose.msra.mxu0 %v8180_v56  ;;  %6289 = vmatpush.bf16.xpose.msra.mxu1 %v8184_v57  ;;  %v8323_v56 = vld [vmem:[#allocation5 + $0x290] sm:$0xf]  ;;  %vm7959_vm4 = vcmask 1046534   ;;  %vm7961_vm5 = vcmask 1045508   ;;  %s13225_s0 = smov [#allocation8]   ;;  %s7974_s30 = sshll.u32 %s13525_s3, 4  ;;  %s7975_s30 = int_to_ptr.hbm [resolvable:$true] %s7974_s30 }
  0x33   :  { %6302 = vmatpush.bf16.xpose.msra.mxu2 %v8188_v58  ;;  %v12171_v57 = vld [vmem:[#allocation5 + $0x2cc] sm:$0xf0]  ;;  %v12163_v58 = vld [vmem:[#allocation5 + $0x294] sm:$0xf]  ;;  %s7972_s2 = sshll.u32 %s13225_s0, 4  ;;  %vm7963_vm6 = vcmask 1043456   ;;  %s7973_s2 = int_to_ptr.vmem [resolvable:$true] %s7972_s2 }
  0x34   :  { %6315 = vmatpush.bf16.xpose.msra.mxu3 %v8192_v59  ;;  %v8325_v59 = vld [vmem:[#allocation5 + $0x2d0] sm:$0xf0]  ;;  %v8324_v0 = vor.u32 %v12171_v57, %v8323_v56  ;;  %v8077_v56 = vld [vmem:[#allocation5 + $0xd8] sm:$0xf0]  ;;  %v8068_v57 = vor.u32 %v12107_v50, %v8067_v49  ;;  %v8003_v61 = vld [vmem:[#allocation5 + $0x10] sm:$0xf] }
  0x35   :  { %v8328_v1 = vor.u32 %v12163_v58, %v8325_v59  ;;  %v12091_v62 = vld [vmem:[#allocation5 + $0x4c] sm:$0xf0]  ;;  %v8347_v49 = vld [vmem:[#allocation5 + $0x2a8] sm:$0xf] }
  0x36   :  { %v12174_v50 = vld [vmem:[#allocation5 + $0x2e4] sm:$0xf0] }
  0x3a   :  { %6277 = vmatpush.bf16.xpose.msra.mxu0 %v8116_v4  ;;  %6290 = vmatpush.bf16.xpose.msra.mxu1 %v8120_v5  ;;  %v13255_v4 = vld [vmem:[#allocation2] sm:$0xff] }
  0x3b   :  { %6303 = vmatpush.bf16.xpose.msra.mxu2 %v8124_v6  ;;  %v8259_v5 = vld [vmem:[#allocation5 + $0x210] sm:$0xf]  ;;  %v64_v9 = vperm.slane %v13255_v4, 2  ;;  %v62_v10 = vperm.slane %v13255_v4, 0  ;;  %v65_v13 = vperm.slane %v13255_v4, 3  ;;  %v63_v14 = vperm.slane %v13255_v4, 1 }
  0x3c   :  { %6316 = vmatpush.bf16.xpose.msra.mxu3 %v8128_v7  ;;  %v12155_v6 = vld [vmem:[#allocation5 + $0x24c] sm:$0xf0]  ;;  %v12147_v7 = vld [vmem:[#allocation5 + $0x214] sm:$0xf]  ;;  %v66_v25 = vperm.slane %v13255_v4, 4  ;;  %v68_v27 = vperm.slane %v13255_v4, 6 }
  0x3d   :  { %v13265_v20 = vpack.c.bf16 %v65_v13, %v65_v13  ;;  %v13267_v21 = vpack.c.bf16 %v63_v14, %v63_v14  ;;  %v8264_v22 = vor.u32 %v12147_v7, %v8261_v8  ;;  %v12205_v7 = vld [vmem:[#allocation5 + $0x3dc] sm:$0xf0]  ;;  %v12197_v8 = vld [vmem:[#allocation5 + $0x3a4] sm:$0xf]  ;;  %v67_v28 = vperm.slane %v13255_v4, 5 }
  0x3f   :  { %v13281_v38 = vpack.c.bf16 %v67_v28, %v67_v28  ;;  %v12118_v28 = vld [vmem:[#allocation5 + $0x12c] sm:$0xf] }
  0x42   :  { %6278 = vmatpush.bf16.xpose.msra.mxu0 %v8052_v16  ;;  %6291 = vmatpush.bf16.xpose.msra.mxu1 %v8056_v17  ;;  %v8269_v16 = vld [vmem:[#allocation5 + $0x258] sm:$0xf0]  ;;  %v13261_v17 = vpack.c.bf16 %v64_v9, %v64_v9  ;;  %v8004_v9 = vor.u32 %v12091_v62, %v8003_v61  ;;  %v8283_v61 = vld [vmem:[#allocation5 + $0x228] sm:$0xf] }
  0x43   :  { %6304 = vmatpush.bf16.xpose.msra.mxu2 %v8060_v18  ;;  %v13263_v18 = vpack.c.bf16 %v62_v10, %v62_v10  ;;  %v8272_v24 = vor.u32 %v12148_v15, %v8269_v16  ;;  %v8469_v10 = vld [vmem:[#allocation5 + $0x3e0] sm:$0xf0]  ;;  %v12198_v15 = vld [vmem:[#allocation5 + $0x3ac] sm:$0xf]  ;;  %v12158_v62 = vld [vmem:[#allocation5 + $0x264] sm:$0xf0] }
  0x44   :  { %6317 = vmatpush.bf16.xpose.msra.mxu3 %v8064_v19  ;;  %v8260_v19 = vor.u32 %v12155_v6, %v8259_v5  ;;  %v8013_v5 = vld [vmem:[#allocation5 + $0x58] sm:$0xf0]  ;;  %v8467_v6 = vld [vmem:[#allocation5 + $0x3a0] sm:$0xf]  ;;  %v8477_v16 = vld [vmem:[#allocation5 + $0x3e8] sm:$0xf0] }
  0x45   :  { %v8480_v26 = vor.u32 %v12198_v15, %v8477_v16 }
  0x4a   :  { %6279 = vmatpush.bf16.xpose.msra.mxu0 %v7988_v31  ;;  %6292 = vmatpush.bf16.xpose.msra.mxu1 %v7992_v35  ;;  %v12132_v31 = vld [vmem:[#allocation5 + $0x19c] sm:$0xf]  ;;  %v8204_v35 = vor.u32 %v12140_v30, %v8203_v29  ;;  %v69_v29 = vperm.slane %v13255_v4, 7  ;;  %v8403_v30 = vld [vmem:[#allocation5 + $0x320] sm:$0xf] }
  0x4b   :  { %6305 = vmatpush.bf16.xpose.msra.mxu2 %v7996_v36  ;;  %v8208_v36 = vor.u32 %v12132_v31, %v8205_v32  ;;  %v12189_v31 = vld [vmem:[#allocation5 + $0x35c] sm:$0xf0]  ;;  %v12181_v32 = vld [vmem:[#allocation5 + $0x324] sm:$0xf] }
  0x4c   :  { %6318 = vmatpush.bf16.xpose.msra.mxu3 %v8000_v39  ;;  %v12115_v39 = vld [vmem:[#allocation5 + $0x114] sm:$0xf]  ;;  %v13283_v4 = vpack.c.bf16 %v69_v29, %v69_v29  ;;  %v8157_v29 = vld [vmem:[#allocation5 + $0x168] sm:$0xf0] }
  0x51   :  { %6280 = vmatmul.bf16.vlgmr.msra.gmra.mxu0 %v13263_v18  ;;  %6293 = vmatmul.bf16.vlgmr.msra.gmra.mxu1 %v13267_v21 }
  0x52   :  { %6324 = vmatpush.bf16.xpose.msrb.mxu0 %v8452_v40  ;;  %6337 = vmatpush.bf16.xpose.msrb.mxu1 %v8456_v41  ;;  %v8133_v40 = vld [vmem:[#allocation5 + $0x150] sm:$0xf0]  ;;  %v8139_v41 = vld [vmem:[#allocation5 + $0x118] sm:$0xf] }
  0x53   :  { %6350 = vmatpush.bf16.xpose.msrb.mxu2 %v8460_v42  ;;  %6319 = vmatmul.bf16.vlgmr.msra.gmra.mxu3 %v13265_v20  ;;  %v12124_v42 = vld [vmem:[#allocation5 + $0x154] sm:$0xf0]  ;;  %v8136_v46 = vor.u32 %v12115_v39, %v8133_v40  ;;  %v12182_v39 = vld [vmem:[#allocation5 + $0x32c] sm:$0xf] }
  0x54   :  { %6363 = vmatpush.bf16.xpose.msrb.mxu3 %v8464_v43  ;;  %6306 = vmatmul.bf16.vlgmr.msra.gmra.mxu2 %v13261_v17  ;;  %v12116_v43 = vld [vmem:[#allocation5 + $0x11c] sm:$0xf]  ;;  %v8140_v47 = vor.u32 %v12124_v42, %v8139_v41  ;;  %v8413_v40 = vld [vmem:[#allocation5 + $0x368] sm:$0xf0]  ;;  %v8404_v41 = vor.u32 %v12189_v31, %v8403_v30 }
  0x55   :  { %v8144_v48 = vor.u32 %v12116_v43, %v8141_v44  ;;  %v8416_v44 = vor.u32 %v12182_v39, %v8413_v40  ;;  %v12101_v39 = vld [vmem:[#allocation5 + $0xa4] sm:$0xf] }
  0x56   :  { %v8085_v40 = vld [vmem:[#allocation5 + $0xe0] sm:$0xf0] }
  0x5a   :  { %6325 = vmatpush.bf16.xpose.msrb.mxu0 %v8388_v52  ;;  %6338 = vmatpush.bf16.xpose.msrb.mxu1 %v8392_v53  ;;  %v8069_v52 = vld [vmem:[#allocation5 + $0xd0] sm:$0xf0]  ;;  %v8075_v53 = vld [vmem:[#allocation5 + $0x98] sm:$0xf] }
  0x5b   :  { %6351 = vmatpush.bf16.xpose.msrb.mxu2 %v8396_v54  ;;  %v12108_v54 = vld [vmem:[#allocation5 + $0xd4] sm:$0xf0]  ;;  %v8072_v58 = vor.u32 %v12099_v51, %v8069_v52  ;;  %v12166_v51 = vld [vmem:[#allocation5 + $0x2ac] sm:$0xf] }
  0x5c   :  { %6364 = vmatpush.bf16.xpose.msrb.mxu3 %v8400_v55  ;;  %v12100_v55 = vld [vmem:[#allocation5 + $0x9c] sm:$0xf]  ;;  %v8076_v59 = vor.u32 %v12108_v54, %v8075_v53  ;;  %v8349_v52 = vld [vmem:[#allocation5 + $0x2e8] sm:$0xf0] }
  0x5d   :  { %v8080_v60 = vor.u32 %v12100_v55, %v8077_v56  ;;  %v8348_v55 = vor.u32 %v12174_v50, %v8347_v49  ;;  %v8352_v56 = vor.u32 %v12166_v51, %v8349_v52  ;;  %v8019_v49 = vld [vmem:[#allocation5 + $0x20] sm:$0xf]  ;;  %v12085_v51 = vld [vmem:[#allocation5 + $0x24] sm:$0xf] }
  0x5e   :  { %v12093_v50 = vld [vmem:[#allocation5 + $0x5c] sm:$0xf0]  ;;  %v8021_v52 = vld [vmem:[#allocation5 + $0x60] sm:$0xf0] }
  0x62   :  { %6326 = vmatpush.bf16.xpose.msrb.mxu0 %v8324_v0  ;;  %6339 = vmatpush.bf16.xpose.msrb.mxu1 %v8328_v1  ;;  %v8005_v0 = vld [vmem:[#allocation5 + $0x50] sm:$0xf0]  ;;  %v8011_v1 = vld [vmem:[#allocation5 + $0x18] sm:$0xf] }
  0x63   :  { %6352 = vmatpush.bf16.xpose.msrb.mxu2 %v8332_v2  ;;  %v12092_v2 = vld [vmem:[#allocation5 + $0x54] sm:$0xf0]  ;;  %v8008_v13 = vor.u32 %v12083_v63, %v8005_v0  ;;  %v12150_v63 = vld [vmem:[#allocation5 + $0x22c] sm:$0xf] }
  0x64   :  { %6365 = vmatpush.bf16.xpose.msrb.mxu3 %v8336_v3  ;;  %v12084_v3 = vld [vmem:[#allocation5 + $0x1c] sm:$0xf]  ;;  %v8012_v14 = vor.u32 %v12092_v2, %v8011_v1  ;;  %v8285_v0 = vld [vmem:[#allocation5 + $0x268] sm:$0xf0] }
  0x6a   :  { %6327 = vmatpush.bf16.xpose.msrb.mxu0 %v8260_v19  ;;  %6340 = vmatpush.bf16.xpose.msrb.mxu1 %v8264_v22  ;;  %v8016_v19 = vor.u32 %v12084_v3, %v8013_v5  ;;  %v8468_v22 = vor.u32 %v12205_v7, %v8467_v6  ;;  %v8284_v3 = vor.u32 %v12158_v62, %v8283_v61  ;;  %v8211_v6 = vld [vmem:[#allocation5 + $0x1a0] sm:$0xf]  ;;  %v8491_v62 = vld [vmem:[#allocation5 + $0x3b8] sm:$0xf] }
  0x6b   :  { %6353 = vmatpush.bf16.xpose.msrb.mxu2 %v8268_v23  ;;  %v8472_v23 = vor.u32 %v12197_v8, %v8469_v10  ;;  %v8288_v5 = vor.u32 %v12150_v63, %v8285_v0  ;;  %v12141_v7 = vld [vmem:[#allocation5 + $0x1dc] sm:$0xf0]  ;;  %v12133_v8 = vld [vmem:[#allocation5 + $0x1a4] sm:$0xf]  ;;  %v8219_v10 = vld [vmem:[#allocation5 + $0x1a8] sm:$0xf]  ;;  %v8020_v61 = vor.u32 %v12093_v50, %v8019_v49 }
  0x6c   :  { %6366 = vmatpush.bf16.xpose.msrb.mxu3 %v8272_v24  ;;  %v8476_v24 = vor.u32 %v12206_v12, %v8475_v11  ;;  %v12142_v11 = vld [vmem:[#allocation5 + $0x1e4] sm:$0xf0]  ;;  %v12134_v12 = vld [vmem:[#allocation5 + $0x1ac] sm:$0xf]  ;;  %v12208_v63 = vld [vmem:[#allocation5 + $0x3f4] sm:$0xf0] }
  0x6d   :  { %v8220_v16 = vor.u32 %v12142_v11, %v8219_v10  ;;  %v13289_v0 = vld [vmem:[#allocation2 + $0x8] sm:$0xff]  ;;  %v8291_v50 = vld [vmem:[#allocation5 + $0x230] sm:$0xf] }
  0x6e   :  { %v70_v10 = vperm.slane %v13289_v0, 0 }
  0x72   :  { %6328 = vmatpush.bf16.xpose.msrb.mxu0 %v8196_v33  ;;  %6341 = vmatpush.bf16.xpose.msrb.mxu1 %v8200_v34  ;;  %v13277_v33 = vpack.c.bf16 %v66_v25, %v66_v25  ;;  %v13279_v34 = vpack.c.bf16 %v68_v27, %v68_v27  ;;  %v8149_v25 = vld [vmem:[#allocation5 + $0x160] sm:$0xf0]  ;;  %v12126_v27 = vld [vmem:[#allocation5 + $0x164] sm:$0xf0] }
  0x73   :  { %6354 = vmatpush.bf16.xpose.msrb.mxu2 %v8204_v35  ;;  %v8405_v35 = vld [vmem:[#allocation5 + $0x360] sm:$0xf0] }
  0x74   :  { %6367 = vmatpush.bf16.xpose.msrb.mxu3 %v8208_v36  ;;  %v8411_v36 = vld [vmem:[#allocation5 + $0x328] sm:$0xf]  ;;  %v8408_v42 = vor.u32 %v12181_v32, %v8405_v35  ;;  %v8160_v35 = vor.u32 %v12118_v28, %v8157_v29  ;;  %v12184_v29 = vld [vmem:[#allocation5 + $0x33c] sm:$0xf] }
  0x75   :  { %v8412_v43 = vor.u32 %v12190_v37, %v8411_v36  ;;  %v8083_v36 = vld [vmem:[#allocation5 + $0xa0] sm:$0xf] }
  0x76   :  { %v12109_v37 = vld [vmem:[#allocation5 + $0xdc] sm:$0xf0] }
  0x7a   :  { %6329 = vmatpush.bf16.xpose.msrb.mxu0 %v8132_v45  ;;  %6342 = vmatpush.bf16.xpose.msrb.mxu1 %v8136_v46  ;;  %v8339_v45 = vld [vmem:[#allocation5 + $0x2a0] sm:$0xf] }
  0x7b   :  { %6355 = vmatpush.bf16.xpose.msrb.mxu2 %v8140_v47  ;;  %v12173_v46 = vld [vmem:[#allocation5 + $0x2dc] sm:$0xf0]  ;;  %v12165_v47 = vld [vmem:[#allocation5 + $0x2a4] sm:$0xf] }
  0x7c   :  { %6368 = vmatpush.bf16.xpose.msrb.mxu3 %v8144_v48  ;;  %v8341_v48 = vld [vmem:[#allocation5 + $0x2e0] sm:$0xf0]  ;;  %v8340_v53 = vor.u32 %v12173_v46, %v8339_v45  ;;  %v8084_v45 = vor.u32 %v12109_v37, %v8083_v36  ;;  %v8088_v46 = vor.u32 %v12101_v39, %v8085_v40  ;;  %v8355_v37 = vld [vmem:[#allocation5 + $0x2b0] sm:$0xf]  ;;  %v12167_v40 = vld [vmem:[#allocation5 + $0x2b4] sm:$0xf] }
  0x7d   :  { %v8344_v54 = vor.u32 %v12165_v47, %v8341_v48  ;;  %v12175_v39 = vld [vmem:[#allocation5 + $0x2ec] sm:$0xf0] }
  0x82   :  { %6330 = vmatpush.bf16.xpose.msrb.mxu0 %v8068_v57  ;;  %6343 = vmatpush.bf16.xpose.msrb.mxu1 %v8072_v58  ;;  %v8275_v57 = vld [vmem:[#allocation5 + $0x220] sm:$0xf] }
  0x83   :  { %6356 = vmatpush.bf16.xpose.msrb.mxu2 %v8076_v59  ;;  %v12157_v58 = vld [vmem:[#allocation5 + $0x25c] sm:$0xf0]  ;;  %v12149_v59 = vld [vmem:[#allocation5 + $0x224] sm:$0xf] }
  0x84   :  { %6369 = vmatpush.bf16.xpose.msrb.mxu3 %v8080_v60  ;;  %v8277_v60 = vld [vmem:[#allocation5 + $0x260] sm:$0xf0]  ;;  %v8276_v1 = vor.u32 %v12157_v58, %v8275_v57  ;;  %v8483_v57 = vld [vmem:[#allocation5 + $0x3b0] sm:$0xf] }
  0x85   :  { %v8280_v2 = vor.u32 %v12149_v59, %v8277_v60  ;;  %v12207_v58 = vld [vmem:[#allocation5 + $0x3ec] sm:$0xf0]  ;;  %v12199_v59 = vld [vmem:[#allocation5 + $0x3b4] sm:$0xf] }
  0x86   :  { %v8485_v60 = vld [vmem:[#allocation5 + $0x3f0] sm:$0xf0] }
  0x8a   :  { %6331 = vmatpush.bf16.xpose.msrb.mxu0 %v8004_v9  ;;  %6344 = vmatpush.bf16.xpose.msrb.mxu1 %v8008_v13  ;;  %v8213_v9 = vld [vmem:[#allocation5 + $0x1e0] sm:$0xf0]  ;;  %v8221_v13 = vld [vmem:[#allocation5 + $0x1e8] sm:$0xf0] }
  0x8b   :  { %6357 = vmatpush.bf16.xpose.msrb.mxu2 %v8012_v14  ;;  %v8212_v14 = vor.u32 %v12141_v7, %v8211_v6  ;;  %v8216_v15 = vor.u32 %v12133_v8, %v8213_v9  ;;  %v8484_v7 = vor.u32 %v12207_v58, %v8483_v57  ;;  %v8488_v8 = vor.u32 %v12199_v59, %v8485_v60  ;;  %v8301_v57 = vld [vmem:[#allocation5 + $0x278] sm:$0xf0] }
  0x8c   :  { %6370 = vmatpush.bf16.xpose.msrb.mxu3 %v8016_v19  ;;  %v8224_v19 = vor.u32 %v12134_v12, %v8221_v13  ;;  %v8492_v9 = vor.u32 %v12208_v63, %v8491_v62  ;;  %v72_v12 = vperm.slane %v13289_v0, 2  ;;  %v71_v13 = vperm.slane %v13289_v0, 1  ;;  %v8227_v62 = vld [vmem:[#allocation5 + $0x1b0] sm:$0xf] }
  0x8d   :  { %v12143_v63 = vld [vmem:[#allocation5 + $0x1ec] sm:$0xf0] }
  0x91   :  { %6332 = vmatmul.bf16.vlgmr.msrb.gmra.mxu0 %v13277_v33  ;;  %6345 = vmatmul.bf16.vlgmr.msrb.gmra.mxu1 %v13281_v38 }
  0x92   :  { %6376 = vmatpush.bf16.xpose.msra.mxu0 %v8468_v22  ;;  %6389 = vmatpush.bf16.xpose.msra.mxu1 %v8472_v23  ;;  %v8147_v22 = vld [vmem:[#allocation5 + $0x120] sm:$0xf] }
  0x93   :  { %6402 = vmatpush.bf16.xpose.msra.mxu2 %v8476_v24  ;;  %6371 = vmatmul.bf16.vlgmr.msrb.gmra.mxu3 %v13283_v4  ;;  %v12125_v23 = vld [vmem:[#allocation5 + $0x15c] sm:$0xf0]  ;;  %v12117_v24 = vld [vmem:[#allocation5 + $0x124] sm:$0xf] }
  0x94   :  { %6415 = vmatpush.bf16.xpose.msra.mxu3 %v8480_v26  ;;  %6358 = vmatmul.bf16.vlgmr.msrb.gmra.mxu2 %v13279_v34  ;;  %v8155_v26 = vld [vmem:[#allocation5 + $0x128] sm:$0xf]  ;;  %v8148_v30 = vor.u32 %v12125_v23, %v8147_v22  ;;  %v8152_v31 = vor.u32 %v12117_v24, %v8149_v25  ;;  %v12183_v22 = vld [vmem:[#allocation5 + $0x334] sm:$0xf]  ;;  %v13297_v23 = vpack.c.bf16 %v72_v12, %v72_v12 }
  0x95   :  { %v8156_v32 = vor.u32 %v12126_v27, %v8155_v26  ;;  %v13299_v24 = vpack.c.bf16 %v71_v13, %v71_v13  ;;  %v8421_v25 = vld [vmem:[#allocation5 + $0x370] sm:$0xf0]  ;;  %v8427_v26 = vld [vmem:[#allocation5 + $0x338] sm:$0xf] }
  0x96   :  { %v12192_v27 = vld [vmem:[#allocation5 + $0x374] sm:$0xf0] }
  0x9a   :  { %6377 = vmatpush.bf16.xpose.msra.mxu0 %v8404_v41  ;;  %6390 = vmatpush.bf16.xpose.msra.mxu1 %v8408_v42  ;;  %v8091_v41 = vld [vmem:[#allocation5 + $0xa8] sm:$0xf] }
  0x9b   :  { %6403 = vmatpush.bf16.xpose.msra.mxu2 %v8412_v43  ;;  %v12110_v42 = vld [vmem:[#allocation5 + $0xe4] sm:$0xf0]  ;;  %v12102_v43 = vld [vmem:[#allocation5 + $0xac] sm:$0xf] }
  0x9c   :  { %6416 = vmatpush.bf16.xpose.msra.mxu3 %v8416_v44  ;;  %v8093_v44 = vld [vmem:[#allocation5 + $0xe8] sm:$0xf0]  ;;  %v8092_v47 = vor.u32 %v12110_v42, %v8091_v41  ;;  %v8357_v41 = vld [vmem:[#allocation5 + $0x2f0] sm:$0xf0]  ;;  %v8363_v42 = vld [vmem:[#allocation5 + $0x2b8] sm:$0xf] }
  0x9d   :  { %v8096_v48 = vor.u32 %v12102_v43, %v8093_v44  ;;  %v12176_v43 = vld [vmem:[#allocation5 + $0x2f4] sm:$0xf0]  ;;  %v12168_v44 = vld [vmem:[#allocation5 + $0x2bc] sm:$0xf] }
  0xa2   :  { %6378 = vmatpush.bf16.xpose.msra.mxu0 %v8340_v53  ;;  %6391 = vmatpush.bf16.xpose.msra.mxu1 %v8344_v54  ;;  %v8027_v53 = vld [vmem:[#allocation5 + $0x28] sm:$0xf] }
  0xa3   :  { %6404 = vmatpush.bf16.xpose.msra.mxu2 %v8348_v55  ;;  %v12094_v54 = vld [vmem:[#allocation5 + $0x64] sm:$0xf0]  ;;  %v12086_v55 = vld [vmem:[#allocation5 + $0x2c] sm:$0xf] }
  0xa4   :  { %6417 = vmatpush.bf16.xpose.msra.mxu3 %v8352_v56  ;;  %v8029_v56 = vld [vmem:[#allocation5 + $0x68] sm:$0xf0] }
  0xa5   :  { %v8032_v6 = vor.u32 %v12086_v55, %v8029_v56  ;;  %v12160_v55 = vld [vmem:[#allocation5 + $0x274] sm:$0xf0]  ;;  %v12152_v56 = vld [vmem:[#allocation5 + $0x23c] sm:$0xf] }
  0xaa   :  { %6379 = vmatpush.bf16.xpose.msra.mxu0 %v8276_v1  ;;  %6392 = vmatpush.bf16.xpose.msra.mxu1 %v8280_v2  ;;  %v8024_v1 = vor.u32 %v12085_v51, %v8021_v52  ;;  %v8028_v2 = vor.u32 %v12094_v54, %v8027_v53  ;;  %v12159_v51 = vld [vmem:[#allocation5 + $0x26c] sm:$0xf0]  ;;  %v12151_v52 = vld [vmem:[#allocation5 + $0x234] sm:$0xf]  ;;  %v8299_v54 = vld [vmem:[#allocation5 + $0x238] sm:$0xf] }
  0xab   :  { %6405 = vmatpush.bf16.xpose.msra.mxu2 %v8284_v3  ;;  %v12200_v3 = vld [vmem:[#allocation5 + $0x3bc] sm:$0xf]  ;;  %v8293_v53 = vld [vmem:[#allocation5 + $0x270] sm:$0xf0]  ;;  %v8292_v58 = vor.u32 %v12159_v51, %v8291_v50  ;;  %v8300_v60 = vor.u32 %v12160_v55, %v8299_v54  ;;  %v8107_v51 = vld [vmem:[#allocation5 + $0xb8] sm:$0xf] }
  0xac   :  { %6418 = vmatpush.bf16.xpose.msra.mxu3 %v8288_v5  ;;  %v8493_v5 = vld [vmem:[#allocation5 + $0x3f8] sm:$0xf0]  ;;  %v8296_v59 = vor.u32 %v12151_v52, %v8293_v53  ;;  %v8101_v50 = vld [vmem:[#allocation5 + $0xf0] sm:$0xf0]  ;;  %v12112_v52 = vld [vmem:[#allocation5 + $0xf4] sm:$0xf0] }
  0xad   :  { %v8496_v11 = vor.u32 %v12200_v3, %v8493_v5  ;;  %v8235_v3 = vld [vmem:[#allocation5 + $0x1b8] sm:$0xf]  ;;  %v12104_v53 = vld [vmem:[#allocation5 + $0xbc] sm:$0xf] }
  0xae   :  { %v12144_v5 = vld [vmem:[#allocation5 + $0x1f4] sm:$0xf0]  ;;  %v8109_v54 = vld [vmem:[#allocation5 + $0xf8] sm:$0xf0] }
  0xb2   :  { %6380 = vmatpush.bf16.xpose.msra.mxu0 %v8212_v14  ;;  %6393 = vmatpush.bf16.xpose.msra.mxu1 %v8216_v15  ;;  %v73_v14 = vperm.slane %v13289_v0, 3  ;;  %v13295_v15 = vpack.c.bf16 %v70_v10, %v70_v10 }
  0xb3   :  { %6406 = vmatpush.bf16.xpose.msra.mxu2 %v8220_v16  ;;  %v8419_v16 = vld [vmem:[#allocation5 + $0x330] sm:$0xf] }
  0xb4   :  { %6419 = vmatpush.bf16.xpose.msra.mxu3 %v8224_v19  ;;  %v12191_v19 = vld [vmem:[#allocation5 + $0x36c] sm:$0xf0]  ;;  %v13301_v28 = vpack.c.bf16 %v73_v14, %v73_v14 }
  0xba   :  { %6381 = vmatpush.bf16.xpose.msra.mxu0 %v8148_v30  ;;  %6394 = vmatpush.bf16.xpose.msra.mxu1 %v8152_v31  ;;  %v8429_v30 = vld [vmem:[#allocation5 + $0x378] sm:$0xf0]  ;;  %v8420_v31 = vor.u32 %v12191_v19, %v8419_v16 }
  0xbb   :  { %6407 = vmatpush.bf16.xpose.msra.mxu2 %v8156_v32  ;;  %v8424_v32 = vor.u32 %v12183_v22, %v8421_v25  ;;  %v8432_v36 = vor.u32 %v12184_v29, %v8429_v30  ;;  %v8163_v22 = vld [vmem:[#allocation5 + $0x130] sm:$0xf]  ;;  %v8165_v29 = vld [vmem:[#allocation5 + $0x170] sm:$0xf0]  ;;  %v8171_v30 = vld [vmem:[#allocation5 + $0x138] sm:$0xf] }
  0xbc   :  { %6420 = vmatpush.bf16.xpose.msra.mxu3 %v8160_v35  ;;  %v8428_v35 = vor.u32 %v12192_v27, %v8427_v26  ;;  %v12127_v25 = vld [vmem:[#allocation5 + $0x16c] sm:$0xf0]  ;;  %v12119_v26 = vld [vmem:[#allocation5 + $0x134] sm:$0xf] }
  0xc2   :  { %6382 = vmatpush.bf16.xpose.msra.mxu0 %v8084_v45  ;;  %6395 = vmatpush.bf16.xpose.msra.mxu1 %v8088_v46  ;;  %v8365_v45 = vld [vmem:[#allocation5 + $0x2f8] sm:$0xf0]  ;;  %v8356_v46 = vor.u32 %v12175_v39, %v8355_v37  ;;  %v8168_v39 = vor.u32 %v12119_v26, %v8165_v29 }
  0xc3   :  { %6408 = vmatpush.bf16.xpose.msra.mxu2 %v8092_v47  ;;  %v8360_v47 = vor.u32 %v12167_v40, %v8357_v41  ;;  %v8368_v49 = vor.u32 %v12168_v44, %v8365_v45 }
  0xc4   :  { %6421 = vmatpush.bf16.xpose.msra.mxu3 %v8096_v48  ;;  %v8364_v48 = vor.u32 %v12176_v43, %v8363_v42 }
  0xca   :  { %6383 = vmatpush.bf16.xpose.msra.mxu0 %v8020_v61  ;;  %6396 = vmatpush.bf16.xpose.msra.mxu1 %v8024_v1  ;;  %v8304_v61 = vor.u32 %v12152_v56, %v8301_v57  ;;  %v12135_v1 = vld [vmem:[#allocation5 + $0x1b4] sm:$0xf] }
  0xcb   :  { %6409 = vmatpush.bf16.xpose.msra.mxu2 %v8028_v2  ;;  %v8229_v2 = vld [vmem:[#allocation5 + $0x1f0] sm:$0xf0] }
  0xcc   :  { %6422 = vmatpush.bf16.xpose.msra.mxu3 %v8032_v6  ;;  %v12136_v6 = vld [vmem:[#allocation5 + $0x1bc] sm:$0xf]  ;;  %v8232_v10 = vor.u32 %v12135_v1, %v8229_v2  ;;  %v8037_v1 = vld [vmem:[#allocation5 + $0x70] sm:$0xf0]  ;;  %v8043_v2 = vld [vmem:[#allocation5 + $0x38] sm:$0xf] }
  0xce   :  { %v6281_v14 = vpop.f32.mrf.mxu0  ;;  %v6294_v19 = vpop.f32.mrf.mxu1 }
  0xd1   :  { %6384 = vmatmul.bf16.vlgmr.msra.gmra.mxu0 %v13295_v15  ;;  %6397 = vmatmul.bf16.vlgmr.msra.gmra.mxu1 %v13299_v24 }
  0xd2   :  { %6428 = vmatpush.bf16.xpose.msrb.mxu0 %v8484_v7  ;;  %6441 = vmatpush.bf16.xpose.msrb.mxu1 %v8488_v8  ;;  %v8237_v7 = vld [vmem:[#allocation5 + $0x1f8] sm:$0xf0]  ;;  %v8228_v8 = vor.u32 %v12143_v63, %v8227_v62  ;;  %v12095_v62 = vld [vmem:[#allocation5 + $0x6c] sm:$0xf0]  ;;  %v12087_v63 = vld [vmem:[#allocation5 + $0x34] sm:$0xf] }
  0xd3   :  { %6454 = vmatpush.bf16.xpose.msrb.mxu2 %v8492_v9  ;;  %6423 = vmatmul.bf16.vlgmr.msra.gmra.mxu3 %v13301_v28  ;;  %v1134_v9 = vld [vmem:[#allocation7] sm:$0xff]  ;;  %v8240_v13 = vor.u32 %v12136_v6, %v8237_v7  ;;  %v8045_v6 = vld [vmem:[#allocation5 + $0x78] sm:$0xf0] }
  0xd4   :  { %6467 = vmatpush.bf16.xpose.msrb.mxu3 %v8496_v11  ;;  %6410 = vmatmul.bf16.vlgmr.msra.gmra.mxu2 %v13297_v23  ;;  %v8236_v11 = vor.u32 %v12144_v5, %v8235_v3  ;;  %v6256_v12 = vperm.slane %v1134_v9, 0  ;;  %v12096_v3 = vld [vmem:[#allocation5 + $0x74] sm:$0xf0]  ;;  %v12088_v5 = vld [vmem:[#allocation5 + $0x3c] sm:$0xf] }
  0xd5   :  { %v8947_v7 = vld [vmem:[#allocation5 + $0x780] sm:$0xf]  ;;  %v12321_v9 = vld [vmem:[#allocation5 + $0x784] sm:$0xf] }
  0xd6   :  { %v6282_v16 = vadd.f32 %v6281_v14, %v6256_v12  ;;  %v6320_v42 = vpop.f32.mrf.mxu3  ;;  %v6283_v44 = vpop.f32.mrf.mxu0  ;;  %v8955_v12 = vld [vmem:[#allocation5 + $0x788] sm:$0xf]  ;;  %v8040_v14 = vor.u32 %v12087_v63, %v8037_v1 }
  0xd7   :  { %v6307_v37 = vpop.f32.mrf.mxu2  ;;  %v8885_v44 = vld [vmem:[#allocation5 + $0x740] sm:$0xf0] }
  0xd8   :  { %v6295_v27 = vadd.f32 %v6294_v19, %v6282_v16  ;;  %v8044_v16 = vor.u32 %v12096_v3, %v8043_v2  ;;  %v12322_v19 = vld [vmem:[#allocation5 + $0x78c] sm:$0xf] }
  0xda   :  { %6429 = vmatpush.bf16.xpose.msrb.mxu0 %v8420_v31  ;;  %6442 = vmatpush.bf16.xpose.msrb.mxu1 %v8424_v32  ;;  %v12128_v31 = vld [vmem:[#allocation5 + $0x174] sm:$0xf0]  ;;  %v12120_v32 = vld [vmem:[#allocation5 + $0x13c] sm:$0xf]  ;;  %v6308_v41 = vadd.f32 %v6307_v37, %v6295_v27 }
  0xdb   :  { %6455 = vmatpush.bf16.xpose.msrb.mxu2 %v8428_v35  ;;  %v8173_v35 = vld [vmem:[#allocation5 + $0x178] sm:$0xf0]  ;;  %v8172_v40 = vor.u32 %v12128_v31, %v8171_v30  ;;  %v74_v30 = vperm.slane %v13289_v0, 4 }
  0xdc   :  { %6468 = vmatpush.bf16.xpose.msrb.mxu3 %v8432_v36  ;;  %v8164_v36 = vor.u32 %v12127_v25, %v8163_v22  ;;  %v8176_v43 = vor.u32 %v12120_v32, %v8173_v35  ;;  %v13307_v45 = vadd.f32 %v6320_v42, %v6308_v41  ;;  %v8957_v22 = vld [vmem:[#allocation5 + $0x7c8] sm:$0xf0]  ;;  %v8048_v25 = vor.u32 %v12088_v5, %v8045_v6  ;;  %v12305_v41 = vld [vmem:[#allocation5 + $0x704] sm:$0xf] }
  0xdd   :  { %v8960_v31 = vor.u32 %v12322_v19, %v8957_v22  ;;  %v76_v32 = vperm.slane %v13289_v0, 6  ;;  %v75_v35 = vperm.slane %v13289_v0, 5  ;;  %v13313_v37 = vpack.c.bf16 %v74_v30, %v74_v30 }
  0xdf   :  { %v6309_v56 = vpop.f32.mrf.mxu2  ;;  %v13315_v42 = vpack.c.bf16 %v76_v32, %v76_v32 }
  0xe0   :  { %v12289_v56 = vld [vmem:[#allocation5 + $0x684] sm:$0xf] }
  0xe2   :  { %6430 = vmatpush.bf16.xpose.msrb.mxu0 %v8356_v46  ;;  %6443 = vmatpush.bf16.xpose.msrb.mxu1 %v8360_v47  ;;  %v6296_v46 = vpop.f32.mrf.mxu1  ;;  %v8099_v47 = vld [vmem:[#allocation5 + $0xb0] sm:$0xf] }
  0xe3   :  { %6456 = vmatpush.bf16.xpose.msrb.mxu2 %v8364_v48  ;;  %v12111_v48 = vld [vmem:[#allocation5 + $0xec] sm:$0xf0]  ;;  %v8891_v46 = vld [vmem:[#allocation5 + $0x708] sm:$0xf] }
  0xe4   :  { %6469 = vmatpush.bf16.xpose.msrb.mxu3 %v8368_v49  ;;  %v12103_v49 = vld [vmem:[#allocation5 + $0xb4] sm:$0xf]  ;;  %v8100_v55 = vor.u32 %v12111_v48, %v8099_v47  ;;  %v12314_v47 = vld [vmem:[#allocation5 + $0x744] sm:$0xf0] }
  0xe5   :  { %v8104_v57 = vor.u32 %v12103_v49, %v8101_v50  ;;  %v8893_v49 = vld [vmem:[#allocation5 + $0x748] sm:$0xf0] }
  0xea   :  { %6431 = vmatpush.bf16.xpose.msrb.mxu0 %v8292_v58  ;;  %6444 = vmatpush.bf16.xpose.msrb.mxu1 %v8296_v59  ;;  %v8108_v58 = vor.u32 %v12112_v52, %v8107_v51  ;;  %v6322_v59 = vpop.f32.mrf.mxu3  ;;  %v8888_v51 = vor.u32 %v12305_v41, %v8885_v44  ;;  %v8892_v52 = vor.u32 %v12314_v47, %v8891_v46  ;;  %v8699_v41 = vld [vmem:[#allocation5 + $0x588] sm:$0xf]  ;;  %v12258_v46 = vld [vmem:[#allocation5 + $0x58c] sm:$0xf] }
  0xeb   :  { %6457 = vmatpush.bf16.xpose.msrb.mxu2 %v8300_v60  ;;  %v8112_v60 = vor.u32 %v12104_v53, %v8109_v54  ;;  %v8819_v54 = vld [vmem:[#allocation5 + $0x680] sm:$0xf]  ;;  %v12298_v59 = vld [vmem:[#allocation5 + $0x6c4] sm:$0xf0]  ;;  %v8701_v47 = vld [vmem:[#allocation5 + $0x5c8] sm:$0xf0] }
  0xec   :  { %6470 = vmatpush.bf16.xpose.msrb.mxu3 %v8304_v61  ;;  %v8035_v61 = vld [vmem:[#allocation5 + $0x30] sm:$0xf]  ;;  %v12266_v44 = vld [vmem:[#allocation5 + $0x5c4] sm:$0xf0] }
  0xf2   :  { %6432 = vmatpush.bf16.xpose.msrb.mxu0 %v8228_v8  ;;  %6445 = vmatpush.bf16.xpose.msrb.mxu1 %v8232_v10  ;;  %v12329_v8 = vld [vmem:[#allocation5 + $0x7bc] sm:$0xf0]  ;;  %v8036_v10 = vor.u32 %v12095_v62, %v8035_v61  ;;  %v8829_v61 = vld [vmem:[#allocation5 + $0x6c8] sm:$0xf0] }
  0xf3   :  { %6458 = vmatpush.bf16.xpose.msrb.mxu2 %v8236_v11  ;;  %v8949_v11 = vld [vmem:[#allocation5 + $0x7c0] sm:$0xf0]  ;;  %v8948_v26 = vor.u32 %v12329_v8, %v8947_v7  ;;  %v8755_v8 = vld [vmem:[#allocation5 + $0x600] sm:$0xf] }
  0xf4   :  { %6471 = vmatpush.bf16.xpose.msrb.mxu3 %v8240_v13  ;;  %v12330_v13 = vld [vmem:[#allocation5 + $0x7c4] sm:$0xf0]  ;;  %v8952_v27 = vor.u32 %v12321_v9, %v8949_v11  ;;  %v12281_v9 = vld [vmem:[#allocation5 + $0x63c] sm:$0xf0]  ;;  %v8757_v11 = vld [vmem:[#allocation5 + $0x640] sm:$0xf0] }
  0xf5   :  { %v8956_v29 = vor.u32 %v12330_v13, %v8955_v12  ;;  %v8763_v12 = vld [vmem:[#allocation5 + $0x608] sm:$0xf]  ;;  %v8756_v19 = vor.u32 %v12281_v9, %v8755_v8 }
  0xf6   :  { %v12282_v13 = vld [vmem:[#allocation5 + $0x644] sm:$0xf0] }
  0xf7   :  { %v8571_v8 = vld [vmem:[#allocation5 + $0x488] sm:$0xf] }
  0xf8   :  { %v12234_v9 = vld [vmem:[#allocation5 + $0x4c4] sm:$0xf0] }
  0xfa   :  { %6433 = vmatpush.bf16.xpose.msrb.mxu0 %v8164_v36  ;;  %6446 = vmatpush.bf16.xpose.msrb.mxu1 %v8168_v39  ;;  %v77_v36 = vperm.slane %v13289_v0, 7  ;;  %v8883_v39 = vld [vmem:[#allocation5 + $0x700] sm:$0xf]  ;;  %v12306_v0 = vld [vmem:[#allocation5 + $0x70c] sm:$0xf] }
  0xfb   :  { %6459 = vmatpush.bf16.xpose.msrb.mxu2 %v8172_v40  ;;  %v12313_v40 = vld [vmem:[#allocation5 + $0x73c] sm:$0xf0]  ;;  %v8896_v53 = vor.u32 %v12306_v0, %v8893_v49 }
  0xfc   :  { %6472 = vmatpush.bf16.xpose.msrb.mxu3 %v8176_v43  ;;  %v13317_v43 = vpack.c.bf16 %v75_v35, %v75_v35  ;;  %v13319_v48 = vpack.c.bf16 %v77_v36, %v77_v36  ;;  %v8884_v50 = vor.u32 %v12313_v40, %v8883_v39  ;;  %v8691_v35 = vld [vmem:[#allocation5 + $0x580] sm:$0xf]  ;;  %v12257_v39 = vld [vmem:[#allocation5 + $0x584] sm:$0xf] }
  0xfd   :  { %v12265_v36 = vld [vmem:[#allocation5 + $0x5bc] sm:$0xf0]  ;;  %v8693_v40 = vld [vmem:[#allocation5 + $0x5c0] sm:$0xf0] }
  0xfe   :  { %v8692_v0 = vor.u32 %v12265_v36, %v8691_v35  ;;  %v8696_v49 = vor.u32 %v12257_v39, %v8693_v40  ;;  %v12331_v35 = vld [vmem:[#allocation5 + $0x7cc] sm:$0xf0]  ;;  %v12323_v36 = vld [vmem:[#allocation5 + $0x794] sm:$0xf] }
  0xff   :  { %v8965_v40 = vld [vmem:[#allocation5 + $0x7d0] sm:$0xf0] }
 0x102   :  { %6434 = vmatpush.bf16.xpose.msrb.mxu0 %v8100_v55  ;;  %6447 = vmatpush.bf16.xpose.msrb.mxu1 %v8104_v57  ;;  %v12297_v55 = vld [vmem:[#allocation5 + $0x6bc] sm:$0xf0]  ;;  %v8821_v57 = vld [vmem:[#allocation5 + $0x6c0] sm:$0xf0] }
 0x103   :  { %6460 = vmatpush.bf16.xpose.msrb.mxu2 %v8108_v58  ;;  %v8827_v58 = vld [vmem:[#allocation5 + $0x688] sm:$0xf]  ;;  %v8820_v62 = vor.u32 %v12297_v55, %v8819_v54  ;;  %v8824_v63 = vor.u32 %v12289_v56, %v8821_v57  ;;  %v8627_v54 = vld [vmem:[#allocation5 + $0x500] sm:$0xf]  ;;  %v12241_v56 = vld [vmem:[#allocation5 + $0x504] sm:$0xf] }
 0x104   :  { %6473 = vmatpush.bf16.xpose.msrb.mxu3 %v8112_v60  ;;  %v12290_v60 = vld [vmem:[#allocation5 + $0x68c] sm:$0xf]  ;;  %v8828_v1 = vor.u32 %v12298_v59, %v8827_v58  ;;  %v12249_v55 = vld [vmem:[#allocation5 + $0x53c] sm:$0xf0]  ;;  %v8629_v57 = vld [vmem:[#allocation5 + $0x540] sm:$0xf0] }
 0x105   :  { %v8832_v2 = vor.u32 %v12290_v60, %v8829_v61  ;;  %v8635_v58 = vld [vmem:[#allocation5 + $0x508] sm:$0xf]  ;;  %v12242_v60 = vld [vmem:[#allocation5 + $0x50c] sm:$0xf] }
 0x106   :  { %v12250_v59 = vld [vmem:[#allocation5 + $0x544] sm:$0xf0]  ;;  %v8637_v61 = vld [vmem:[#allocation5 + $0x548] sm:$0xf0] }
 0x10a   :  { %6435 = vmatpush.bf16.xpose.msrb.mxu0 %v8036_v10  ;;  %6448 = vmatpush.bf16.xpose.msrb.mxu1 %v8040_v14  ;;  %v12273_v10 = vld [vmem:[#allocation5 + $0x604] sm:$0xf]  ;;  %v12274_v14 = vld [vmem:[#allocation5 + $0x60c] sm:$0xf] }
 0x10b   :  { %6461 = vmatpush.bf16.xpose.msrb.mxu2 %v8044_v16  ;;  %v8765_v16 = vld [vmem:[#allocation5 + $0x648] sm:$0xf0]  ;;  %v8760_v22 = vor.u32 %v12273_v10, %v8757_v11 }
 0x10c   :  { %6474 = vmatpush.bf16.xpose.msrb.mxu3 %v8048_v25  ;;  %v8764_v25 = vor.u32 %v12282_v13, %v8763_v12  ;;  %v12226_v10 = vld [vmem:[#allocation5 + $0x48c] sm:$0xf] }
 0x10d   :  { %v8573_v11 = vld [vmem:[#allocation5 + $0x4c8] sm:$0xf0] }
 0x10e   :  { %v6333_v3 = vpop.f32.mrf.mxu0  ;;  %v6346_v6 = vpop.f32.mrf.mxu1 }
 0x10f   :  { %v6334_v5 = vadd.f32 %v6333_v3, %v13307_v45  ;;  %v8563_v3 = vld [vmem:[#allocation5 + $0x480] sm:$0xf] }
 0x111   :  { %6436 = vmatmul.bf16.vlgmr.msrb.gmra.mxu0 %v13313_v37  ;;  %6449 = vmatmul.bf16.vlgmr.msrb.gmra.mxu1 %v13317_v43  ;;  %v6347_v7 = vadd.f32 %v6346_v6, %v6334_v5  ;;  %v12233_v5 = vld [vmem:[#allocation5 + $0x4bc] sm:$0xf0]  ;;  %v12225_v6 = vld [vmem:[#allocation5 + $0x484] sm:$0xf] }
 0x112   :  { %6480 = vmatpush.bf16.xpose.msra.mxu0 %v8948_v26  ;;  %6493 = vmatpush.bf16.xpose.msra.mxu1 %v8952_v27  ;;  %v8768_v27 = vor.u32 %v12274_v14, %v8765_v16  ;;  %v8564_v12 = vor.u32 %v12233_v5, %v8563_v3  ;;  %v8572_v14 = vor.u32 %v12234_v9, %v8571_v8  ;;  %v8835_v5 = vld [vmem:[#allocation5 + $0x690] sm:$0xf]  ;;  %v8837_v8 = vld [vmem:[#allocation5 + $0x6d0] sm:$0xf0]  ;;  %v8843_v9 = vld [vmem:[#allocation5 + $0x698] sm:$0xf] }
 0x113   :  { %6506 = vmatpush.bf16.xpose.msra.mxu2 %v8956_v29  ;;  %6475 = vmatmul.bf16.vlgmr.msrb.gmra.mxu3 %v13319_v48  ;;  %v8576_v16 = vor.u32 %v12226_v10, %v8573_v11  ;;  %v12300_v10 = vld [vmem:[#allocation5 + $0x6d4] sm:$0xf0]  ;;  %v12292_v11 = vld [vmem:[#allocation5 + $0x69c] sm:$0xf] }
 0x114   :  { %6519 = vmatpush.bf16.xpose.msra.mxu3 %v8960_v31  ;;  %6462 = vmatmul.bf16.vlgmr.msrb.gmra.mxu2 %v13315_v42 }
 0x116   :  { %v6372_v29 = vpop.f32.mrf.mxu3  ;;  %v6335_v30 = vpop.f32.mrf.mxu0 }
 0x117   :  { %v6359_v26 = vpop.f32.mrf.mxu2  ;;  %v6348_v31 = vpop.f32.mrf.mxu1  ;;  %v8509_v30 = vld [vmem:[#allocation5 + $0x448] sm:$0xf0] }
 0x118   :  { %v6360_v45 = vadd.f32 %v6359_v26, %v6347_v7  ;;  %v8565_v7 = vld [vmem:[#allocation5 + $0x4c0] sm:$0xf0]  ;;  %v8963_v31 = vld [vmem:[#allocation5 + $0x790] sm:$0xf] }
 0x119   :  { %v8568_v13 = vor.u32 %v12225_v6, %v8565_v7  ;;  %v8501_v26 = vld [vmem:[#allocation5 + $0x440] sm:$0xf0]  ;;  %v12299_v6 = vld [vmem:[#allocation5 + $0x6cc] sm:$0xf0]  ;;  %v12291_v7 = vld [vmem:[#allocation5 + $0x694] sm:$0xf] }
 0x11a   :  { %6481 = vmatpush.bf16.xpose.msra.mxu0 %v8884_v50  ;;  %6494 = vmatpush.bf16.xpose.msra.mxu1 %v8888_v51  ;;  %v13326_v32 = vadd.f32 %v6372_v29, %v6360_v45  ;;  %v8700_v50 = vor.u32 %v12266_v44, %v8699_v41  ;;  %v12218_v45 = vld [vmem:[#allocation5 + $0x444] sm:$0xf0]  ;;  %v12210_v29 = vld [vmem:[#allocation5 + $0x40c] sm:$0xf]  ;;  %v8971_v41 = vld [vmem:[#allocation5 + $0x798] sm:$0xf] }
 0x11b   :  { %6507 = vmatpush.bf16.xpose.msra.mxu2 %v8892_v52  ;;  %v8704_v52 = vor.u32 %v12258_v46, %v8701_v47  ;;  %v12332_v44 = vld [vmem:[#allocation5 + $0x7d4] sm:$0xf0] }
 0x11c   :  { %6520 = vmatpush.bf16.xpose.msra.mxu3 %v8896_v53 }
 0x11e   :  { %v6374_v53 = vpop.f32.mrf.mxu3 }
 0x11f   :  { %v6361_v51 = vpop.f32.mrf.mxu2  ;;  %v8972_v53 = vor.u32 %v12332_v44, %v8971_v41 }
 0x120   :  { %v8964_v51 = vor.u32 %v12331_v35, %v8963_v31  ;;  %v8773_v31 = vld [vmem:[#allocation5 + $0x650] sm:$0xf0]  ;;  %v8779_v35 = vld [vmem:[#allocation5 + $0x618] sm:$0xf] }
 0x122   :  { %6482 = vmatpush.bf16.xpose.msra.mxu0 %v8820_v62  ;;  %6495 = vmatpush.bf16.xpose.msra.mxu1 %v8824_v63  ;;  %v8628_v62 = vor.u32 %v12249_v55, %v8627_v54  ;;  %v8632_v63 = vor.u32 %v12241_v56, %v8629_v57  ;;  %v8899_v55 = vld [vmem:[#allocation5 + $0x710] sm:$0xf]  ;;  %v12307_v57 = vld [vmem:[#allocation5 + $0x714] sm:$0xf] }
 0x123   :  { %6508 = vmatpush.bf16.xpose.msra.mxu2 %v8828_v1  ;;  %v8636_v1 = vor.u32 %v12250_v59, %v8635_v58  ;;  %v12315_v56 = vld [vmem:[#allocation5 + $0x74c] sm:$0xf0]  ;;  %v8901_v58 = vld [vmem:[#allocation5 + $0x750] sm:$0xf0]  ;;  %v8907_v59 = vld [vmem:[#allocation5 + $0x718] sm:$0xf] }
 0x124   :  { %6521 = vmatpush.bf16.xpose.msra.mxu3 %v8832_v2  ;;  %v8640_v2 = vor.u32 %v12242_v60, %v8637_v61  ;;  %v12316_v60 = vld [vmem:[#allocation5 + $0x754] sm:$0xf0]  ;;  %v12308_v61 = vld [vmem:[#allocation5 + $0x71c] sm:$0xf] }
 0x12a   :  { %6483 = vmatpush.bf16.xpose.msra.mxu0 %v8756_v19  ;;  %6496 = vmatpush.bf16.xpose.msra.mxu1 %v8760_v22  ;;  %v8499_v19 = vld [vmem:[#allocation5 + $0x400] sm:$0xf] }
 0x12b   :  { %6509 = vmatpush.bf16.xpose.msra.mxu2 %v8764_v25  ;;  %v12217_v22 = vld [vmem:[#allocation5 + $0x43c] sm:$0xf0]  ;;  %v12209_v25 = vld [vmem:[#allocation5 + $0x404] sm:$0xf] }
 0x12c   :  { %6522 = vmatpush.bf16.xpose.msra.mxu3 %v8768_v27  ;;  %v8507_v27 = vld [vmem:[#allocation5 + $0x408] sm:$0xf]  ;;  %v8500_v39 = vor.u32 %v12217_v22, %v8499_v19  ;;  %v8504_v46 = vor.u32 %v12209_v25, %v8501_v26 }
 0x12d   :  { %v8508_v47 = vor.u32 %v12218_v45, %v8507_v27  ;;  %v8771_v45 = vld [vmem:[#allocation5 + $0x610] sm:$0xf] }
 0x132   :  { %6484 = vmatpush.bf16.xpose.msra.mxu0 %v8692_v0  ;;  %6497 = vmatpush.bf16.xpose.msra.mxu1 %v8696_v49  ;;  %v12324_v0 = vld [vmem:[#allocation5 + $0x79c] sm:$0xf] }
 0x133   :  { %6510 = vmatpush.bf16.xpose.msra.mxu2 %v8700_v50  ;;  %v8973_v49 = vld [vmem:[#allocation5 + $0x7d8] sm:$0xf0]  ;;  %v8512_v50 = vor.u32 %v12210_v29, %v8509_v30  ;;  %v12283_v29 = vld [vmem:[#allocation5 + $0x64c] sm:$0xf0]  ;;  %v12275_v30 = vld [vmem:[#allocation5 + $0x614] sm:$0xf] }
 0x134   :  { %6523 = vmatpush.bf16.xpose.msra.mxu3 %v8704_v52  ;;  %v8968_v52 = vor.u32 %v12323_v36, %v8965_v40  ;;  %v8976_v54 = vor.u32 %v12324_v0, %v8973_v49  ;;  %v12284_v36 = vld [vmem:[#allocation5 + $0x654] sm:$0xf0]  ;;  %v8781_v40 = vld [vmem:[#allocation5 + $0x658] sm:$0xf0]  ;;  %v8772_v41 = vor.u32 %v12283_v29, %v8771_v45 }
 0x135   :  { %v8587_v45 = vld [vmem:[#allocation5 + $0x498] sm:$0xf] }
 0x136   :  { %v12236_v29 = vld [vmem:[#allocation5 + $0x4d4] sm:$0xf0] }
 0x13a   :  { %6485 = vmatpush.bf16.xpose.msra.mxu0 %v8628_v62  ;;  %6498 = vmatpush.bf16.xpose.msra.mxu1 %v8632_v63  ;;  %v8909_v62 = vld [vmem:[#allocation5 + $0x758] sm:$0xf0]  ;;  %v8900_v63 = vor.u32 %v12315_v56, %v8899_v55  ;;  %v12259_v55 = vld [vmem:[#allocation5 + $0x594] sm:$0xf] }
 0x13b   :  { %6511 = vmatpush.bf16.xpose.msra.mxu2 %v8636_v1  ;;  %v8904_v1 = vor.u32 %v12307_v57, %v8901_v58  ;;  %v8912_v3 = vor.u32 %v12308_v61, %v8909_v62  ;;  %v8709_v56 = vld [vmem:[#allocation5 + $0x5d0] sm:$0xf0]  ;;  %v8715_v57 = vld [vmem:[#allocation5 + $0x598] sm:$0xf] }
 0x13c   :  { %6524 = vmatpush.bf16.xpose.msra.mxu3 %v8640_v2  ;;  %v8908_v2 = vor.u32 %v12316_v60, %v8907_v59  ;;  %v12268_v58 = vld [vmem:[#allocation5 + $0x5d4] sm:$0xf0]  ;;  %v12260_v59 = vld [vmem:[#allocation5 + $0x59c] sm:$0xf]  ;;  %v8712_v62 = vor.u32 %v12259_v55, %v8709_v56  ;;  %v8981_v56 = vld [vmem:[#allocation5 + $0x7e0] sm:$0xf0] }
 0x13d   :  { %v8717_v60 = vld [vmem:[#allocation5 + $0x5d8] sm:$0xf0] }
 0x142   :  { %6486 = vmatpush.bf16.xpose.msra.mxu0 %v8564_v12  ;;  %6499 = vmatpush.bf16.xpose.msra.mxu1 %v8568_v13  ;;  %v8845_v12 = vld [vmem:[#allocation5 + $0x6d8] sm:$0xf0]  ;;  %v8836_v13 = vor.u32 %v12299_v6, %v8835_v5  ;;  %v8643_v5 = vld [vmem:[#allocation5 + $0x510] sm:$0xf] }
 0x143   :  { %6512 = vmatpush.bf16.xpose.msra.mxu2 %v8572_v14  ;;  %v8840_v14 = vor.u32 %v12291_v7, %v8837_v8  ;;  %v8848_v19 = vor.u32 %v12292_v11, %v8845_v12  ;;  %v12251_v6 = vld [vmem:[#allocation5 + $0x54c] sm:$0xf0]  ;;  %v12243_v7 = vld [vmem:[#allocation5 + $0x514] sm:$0xf]  ;;  %v12244_v11 = vld [vmem:[#allocation5 + $0x51c] sm:$0xf] }
 0x144   :  { %6525 = vmatpush.bf16.xpose.msra.mxu3 %v8576_v16  ;;  %v8844_v16 = vor.u32 %v12300_v10, %v8843_v9  ;;  %v8645_v8 = vld [vmem:[#allocation5 + $0x550] sm:$0xf0]  ;;  %v8651_v9 = vld [vmem:[#allocation5 + $0x518] sm:$0xf]  ;;  %v8653_v12 = vld [vmem:[#allocation5 + $0x558] sm:$0xf0] }
 0x145   :  { %v12252_v10 = vld [vmem:[#allocation5 + $0x554] sm:$0xf0] }
 0x14a   :  { %6487 = vmatpush.bf16.xpose.msra.mxu0 %v8500_v39  ;;  %6500 = vmatpush.bf16.xpose.msra.mxu1 %v8504_v46  ;;  %v12276_v39 = vld [vmem:[#allocation5 + $0x61c] sm:$0xf]  ;;  %v8776_v46 = vor.u32 %v12275_v30, %v8773_v31 }
 0x14b   :  { %6513 = vmatpush.bf16.xpose.msra.mxu2 %v8508_v47  ;;  %v8780_v47 = vor.u32 %v12284_v36, %v8779_v35  ;;  %v12228_v30 = vld [vmem:[#allocation5 + $0x49c] sm:$0xf] }
 0x14c   :  { %6526 = vmatpush.bf16.xpose.msra.mxu3 %v8512_v50  ;;  %v8589_v31 = vld [vmem:[#allocation5 + $0x4d8] sm:$0xf0] }
 0x14e   :  { %v6385_v22 = vpop.f32.mrf.mxu0  ;;  %v6398_v26 = vpop.f32.mrf.mxu1 }
 0x14f   :  { %v6386_v25 = vadd.f32 %v6385_v22, %v13326_v32  ;;  %v8784_v32 = vor.u32 %v12276_v39, %v8781_v40  ;;  %v8579_v22 = vld [vmem:[#allocation5 + $0x490] sm:$0xf]  ;;  %v8588_v39 = vor.u32 %v12236_v29, %v8587_v45  ;;  %v8592_v40 = vor.u32 %v12228_v30, %v8589_v31  ;;  %v8853_v45 = vld [vmem:[#allocation5 + $0x6e0] sm:$0xf0]  ;;  %v8859_v29 = vld [vmem:[#allocation5 + $0x6a8] sm:$0xf] }
 0x150   :  { %v12302_v30 = vld [vmem:[#allocation5 + $0x6e4] sm:$0xf0]  ;;  %v12294_v31 = vld [vmem:[#allocation5 + $0x6ac] sm:$0xf] }
 0x151   :  { %6488 = vmatmul.bf16.vlgmr.msra.gmra.mxu0 %v13263_v18  ;;  %6501 = vmatmul.bf16.vlgmr.msra.gmra.mxu1 %v13267_v21  ;;  %v6399_v27 = vadd.f32 %v6398_v26, %v6386_v25  ;;  %v12235_v25 = vld [vmem:[#allocation5 + $0x4cc] sm:$0xf0]  ;;  %v12227_v26 = vld [vmem:[#allocation5 + $0x494] sm:$0xf] }
 0x152   :  { %6532 = vmatpush.bf16.xpose.msrb.mxu0 %v8964_v51  ;;  %6545 = vmatpush.bf16.xpose.msrb.mxu1 %v8968_v52  ;;  %v8580_v35 = vor.u32 %v12235_v25, %v8579_v22  ;;  %v8851_v25 = vld [vmem:[#allocation5 + $0x6a0] sm:$0xf] }
 0x153   :  { %6558 = vmatpush.bf16.xpose.msrb.mxu2 %v8972_v53  ;;  %6527 = vmatmul.bf16.vlgmr.msra.gmra.mxu3 %v13265_v20  ;;  %v8707_v53 = vld [vmem:[#allocation5 + $0x590] sm:$0xf] }
 0x154   :  { %6571 = vmatpush.bf16.xpose.msrb.mxu3 %v8976_v54  ;;  %6514 = vmatmul.bf16.vlgmr.msra.gmra.mxu2 %v13261_v17  ;;  %v12267_v54 = vld [vmem:[#allocation5 + $0x5cc] sm:$0xf0] }
 0x155   :  { %v8708_v61 = vor.u32 %v12267_v54, %v8707_v53  ;;  %v12333_v53 = vld [vmem:[#allocation5 + $0x7dc] sm:$0xf0]  ;;  %v12325_v54 = vld [vmem:[#allocation5 + $0x7a4] sm:$0xf] }
 0x156   :  { %v6424_v49 = vpop.f32.mrf.mxu3  ;;  %v6387_v50 = vpop.f32.mrf.mxu0 }
 0x157   :  { %v6411_v44 = vpop.f32.mrf.mxu2  ;;  %v6400_v51 = vpop.f32.mrf.mxu1  ;;  %v8525_v50 = vld [vmem:[#allocation5 + $0x458] sm:$0xf0] }
 0x158   :  { %v6412_v0 = vadd.f32 %v6411_v44, %v6399_v27  ;;  %v8581_v27 = vld [vmem:[#allocation5 + $0x4d0] sm:$0xf0]  ;;  %v12219_v44 = vld [vmem:[#allocation5 + $0x44c] sm:$0xf0]  ;;  %v8979_v51 = vld [vmem:[#allocation5 + $0x7a0] sm:$0xf] }
 0x159   :  { %v8584_v36 = vor.u32 %v12227_v26, %v8581_v27  ;;  %v12301_v26 = vld [vmem:[#allocation5 + $0x6dc] sm:$0xf0]  ;;  %v12293_v27 = vld [vmem:[#allocation5 + $0x6a4] sm:$0xf] }
 0x15a   :  { %6533 = vmatpush.bf16.xpose.msrb.mxu0 %v8900_v63  ;;  %6546 = vmatpush.bf16.xpose.msrb.mxu1 %v8904_v1  ;;  %v13333_v52 = vadd.f32 %v6424_v49, %v6412_v0  ;;  %v8716_v63 = vor.u32 %v12268_v58, %v8715_v57  ;;  %v8523_v0 = vld [vmem:[#allocation5 + $0x418] sm:$0xf]  ;;  %v12212_v49 = vld [vmem:[#allocation5 + $0x41c] sm:$0xf]  ;;  %v8987_v57 = vld [vmem:[#allocation5 + $0x7a8] sm:$0xf] }
 0x15b   :  { %6559 = vmatpush.bf16.xpose.msrb.mxu2 %v8908_v2  ;;  %v8720_v2 = vor.u32 %v12260_v59, %v8717_v60  ;;  %v12334_v58 = vld [vmem:[#allocation5 + $0x7e4] sm:$0xf0] }
 0x15c   :  { %6572 = vmatpush.bf16.xpose.msrb.mxu3 %v8912_v3 }
 0x15e   :  { %v6426_v3 = vpop.f32.mrf.mxu3 }
 0x15f   :  { %v6413_v1 = vpop.f32.mrf.mxu2  ;;  %v8988_v3 = vor.u32 %v12334_v58, %v8987_v57 }
 0x160   :  { %v8980_v1 = vor.u32 %v12333_v53, %v8979_v51  ;;  %v8789_v51 = vld [vmem:[#allocation5 + $0x660] sm:$0xf0]  ;;  %v8795_v53 = vld [vmem:[#allocation5 + $0x628] sm:$0xf] }
 0x162   :  { %6534 = vmatpush.bf16.xpose.msrb.mxu0 %v8836_v13  ;;  %6547 = vmatpush.bf16.xpose.msrb.mxu1 %v8840_v14  ;;  %v8644_v13 = vor.u32 %v12251_v6, %v8643_v5  ;;  %v8648_v14 = vor.u32 %v12243_v7, %v8645_v8  ;;  %v8915_v6 = vld [vmem:[#allocation5 + $0x720] sm:$0xf]  ;;  %v12309_v8 = vld [vmem:[#allocation5 + $0x724] sm:$0xf] }
 0x163   :  { %6560 = vmatpush.bf16.xpose.msrb.mxu2 %v8844_v16  ;;  %v8652_v16 = vor.u32 %v12252_v10, %v8651_v9  ;;  %v12317_v7 = vld [vmem:[#allocation5 + $0x75c] sm:$0xf0]  ;;  %v8917_v9 = vld [vmem:[#allocation5 + $0x760] sm:$0xf0]  ;;  %v8923_v10 = vld [vmem:[#allocation5 + $0x728] sm:$0xf] }
 0x164   :  { %6573 = vmatpush.bf16.xpose.msrb.mxu3 %v8848_v19  ;;  %v8656_v19 = vor.u32 %v12244_v11, %v8653_v12  ;;  %v12318_v11 = vld [vmem:[#allocation5 + $0x764] sm:$0xf0]  ;;  %v12310_v12 = vld [vmem:[#allocation5 + $0x72c] sm:$0xf] }
 0x16a   :  { %6535 = vmatpush.bf16.xpose.msrb.mxu0 %v8772_v41  ;;  %6548 = vmatpush.bf16.xpose.msrb.mxu1 %v8776_v46  ;;  %v8515_v41 = vld [vmem:[#allocation5 + $0x410] sm:$0xf]  ;;  %v12211_v46 = vld [vmem:[#allocation5 + $0x414] sm:$0xf] }
 0x16b   :  { %6561 = vmatpush.bf16.xpose.msrb.mxu2 %v8780_v47  ;;  %v8517_v47 = vld [vmem:[#allocation5 + $0x450] sm:$0xf0]  ;;  %v8516_v55 = vor.u32 %v12219_v44, %v8515_v41 }
 0x16c   :  { %6574 = vmatpush.bf16.xpose.msrb.mxu3 %v8784_v32  ;;  %v12220_v32 = vld [vmem:[#allocation5 + $0x454] sm:$0xf0]  ;;  %v8520_v59 = vor.u32 %v12211_v46, %v8517_v47 }
 0x16d   :  { %v8524_v60 = vor.u32 %v12220_v32, %v8523_v0  ;;  %v8787_v32 = vld [vmem:[#allocation5 + $0x620] sm:$0xf] }
 0x172   :  { %6536 = vmatpush.bf16.xpose.msrb.mxu0 %v8708_v61  ;;  %6549 = vmatpush.bf16.xpose.msrb.mxu1 %v8712_v62  ;;  %v12326_v61 = vld [vmem:[#allocation5 + $0x7ac] sm:$0xf] }
 0x173   :  { %6562 = vmatpush.bf16.xpose.msrb.mxu2 %v8716_v63  ;;  %v8989_v62 = vld [vmem:[#allocation5 + $0x7e8] sm:$0xf0]  ;;  %v8528_v63 = vor.u32 %v12212_v49, %v8525_v50  ;;  %v12285_v49 = vld [vmem:[#allocation5 + $0x65c] sm:$0xf0]  ;;  %v12277_v50 = vld [vmem:[#allocation5 + $0x624] sm:$0xf] }
 0x174   :  { %6575 = vmatpush.bf16.xpose.msrb.mxu3 %v8720_v2  ;;  %v8984_v2 = vor.u32 %v12325_v54, %v8981_v56  ;;  %v8992_v5 = vor.u32 %v12326_v61, %v8989_v62  ;;  %v12286_v54 = vld [vmem:[#allocation5 + $0x664] sm:$0xf0]  ;;  %v8797_v56 = vld [vmem:[#allocation5 + $0x668] sm:$0xf0]  ;;  %v8788_v57 = vor.u32 %v12285_v49, %v8787_v32 }
 0x175   :  { %v8603_v32 = vld [vmem:[#allocation5 + $0x4a8] sm:$0xf] }
 0x176   :  { %v12238_v49 = vld [vmem:[#allocation5 + $0x4e4] sm:$0xf0] }
 0x17a   :  { %6537 = vmatpush.bf16.xpose.msrb.mxu0 %v8644_v13  ;;  %6550 = vmatpush.bf16.xpose.msrb.mxu1 %v8648_v14  ;;  %v8925_v13 = vld [vmem:[#allocation5 + $0x768] sm:$0xf0]  ;;  %v8916_v14 = vor.u32 %v12317_v7, %v8915_v6  ;;  %v12261_v6 = vld [vmem:[#allocation5 + $0x5a4] sm:$0xf] }
 0x17b   :  { %6563 = vmatpush.bf16.xpose.msrb.mxu2 %v8652_v16  ;;  %v8920_v16 = vor.u32 %v12309_v8, %v8917_v9  ;;  %v8928_v22 = vor.u32 %v12310_v12, %v8925_v13  ;;  %v8725_v7 = vld [vmem:[#allocation5 + $0x5e0] sm:$0xf0]  ;;  %v8731_v8 = vld [vmem:[#allocation5 + $0x5a8] sm:$0xf] }
 0x17c   :  { %6576 = vmatpush.bf16.xpose.msrb.mxu3 %v8656_v19  ;;  %v8924_v19 = vor.u32 %v12318_v11, %v8923_v10  ;;  %v12270_v9 = vld [vmem:[#allocation5 + $0x5e4] sm:$0xf0]  ;;  %v12262_v10 = vld [vmem:[#allocation5 + $0x5ac] sm:$0xf]  ;;  %v8728_v13 = vor.u32 %v12261_v6, %v8725_v7  ;;  %v8997_v7 = vld [vmem:[#allocation5 + $0x7f0] sm:$0xf0] }
 0x17d   :  { %v8733_v11 = vld [vmem:[#allocation5 + $0x5e8] sm:$0xf0] }
 0x182   :  { %6538 = vmatpush.bf16.xpose.msrb.mxu0 %v8580_v35  ;;  %6551 = vmatpush.bf16.xpose.msrb.mxu1 %v8584_v36  ;;  %v8861_v35 = vld [vmem:[#allocation5 + $0x6e8] sm:$0xf0]  ;;  %v8852_v36 = vor.u32 %v12301_v26, %v8851_v25  ;;  %v8659_v25 = vld [vmem:[#allocation5 + $0x520] sm:$0xf] }
 0x183   :  { %6564 = vmatpush.bf16.xpose.msrb.mxu2 %v8588_v39  ;;  %v8856_v39 = vor.u32 %v12293_v27, %v8853_v45  ;;  %v8864_v41 = vor.u32 %v12294_v31, %v8861_v35  ;;  %v12253_v26 = vld [vmem:[#allocation5 + $0x55c] sm:$0xf0]  ;;  %v12245_v27 = vld [vmem:[#allocation5 + $0x524] sm:$0xf]  ;;  %v12246_v31 = vld [vmem:[#allocation5 + $0x52c] sm:$0xf] }
 0x184   :  { %6577 = vmatpush.bf16.xpose.msrb.mxu3 %v8592_v40  ;;  %v8860_v40 = vor.u32 %v12302_v30, %v8859_v29  ;;  %v8661_v45 = vld [vmem:[#allocation5 + $0x560] sm:$0xf0]  ;;  %v8667_v29 = vld [vmem:[#allocation5 + $0x528] sm:$0xf]  ;;  %v8669_v35 = vld [vmem:[#allocation5 + $0x568] sm:$0xf0] }
 0x185   :  { %v12254_v30 = vld [vmem:[#allocation5 + $0x564] sm:$0xf0] }
 0x18a   :  { %6539 = vmatpush.bf16.xpose.msrb.mxu0 %v8516_v55  ;;  %6552 = vmatpush.bf16.xpose.msrb.mxu1 %v8520_v59  ;;  %v12278_v55 = vld [vmem:[#allocation5 + $0x62c] sm:$0xf]  ;;  %v8792_v59 = vor.u32 %v12277_v50, %v8789_v51 }
 0x18b   :  { %6565 = vmatpush.bf16.xpose.msrb.mxu2 %v8524_v60  ;;  %v8796_v60 = vor.u32 %v12286_v54, %v8795_v53  ;;  %v12230_v50 = vld [vmem:[#allocation5 + $0x4ac] sm:$0xf] }
 0x18c   :  { %6578 = vmatpush.bf16.xpose.msrb.mxu3 %v8528_v63  ;;  %v8605_v51 = vld [vmem:[#allocation5 + $0x4e8] sm:$0xf0] }
 0x18e   :  { %v6437_v44 = vpop.f32.mrf.mxu0  ;;  %v6450_v47 = vpop.f32.mrf.mxu1 }
 0x18f   :  { %v6438_v46 = vadd.f32 %v6437_v44, %v13333_v52  ;;  %v8800_v52 = vor.u32 %v12278_v55, %v8797_v56  ;;  %v8595_v44 = vld [vmem:[#allocation5 + $0x4a0] sm:$0xf]  ;;  %v8604_v55 = vor.u32 %v12238_v49, %v8603_v32  ;;  %v8608_v56 = vor.u32 %v12230_v50, %v8605_v51  ;;  %v8869_v32 = vld [vmem:[#allocation5 + $0x6f0] sm:$0xf0]  ;;  %v8875_v49 = vld [vmem:[#allocation5 + $0x6b8] sm:$0xf] }
 0x190   :  { %v12304_v50 = vld [vmem:[#allocation5 + $0x6f4] sm:$0xf0]  ;;  %v12296_v51 = vld [vmem:[#allocation5 + $0x6bc] sm:$0xf] }
 0x191   :  { %6540 = vmatmul.bf16.vlgmr.msrb.gmra.mxu0 %v13277_v33  ;;  %6553 = vmatmul.bf16.vlgmr.msrb.gmra.mxu1 %v13281_v38  ;;  %v6451_v0 = vadd.f32 %v6450_v47, %v6438_v46  ;;  %v12237_v46 = vld [vmem:[#allocation5 + $0x4dc] sm:$0xf0]  ;;  %v12229_v47 = vld [vmem:[#allocation5 + $0x4a4] sm:$0xf] }
 0x192   :  { %6584 = vmatpush.bf16.xpose.msra.mxu0 %v8980_v1  ;;  %6597 = vmatpush.bf16.xpose.msra.mxu1 %v8984_v2  ;;  %v8596_v53 = vor.u32 %v12237_v46, %v8595_v44  ;;  %v8867_v46 = vld [vmem:[#allocation5 + $0x6b0] sm:$0xf] }
 0x193   :  { %6610 = vmatpush.bf16.xpose.msra.mxu2 %v8988_v3  ;;  %6579 = vmatmul.bf16.vlgmr.msrb.gmra.mxu3 %v13283_v4  ;;  %v8723_v3 = vld [vmem:[#allocation5 + $0x5a0] sm:$0xf] }
 0x194   :  { %6623 = vmatpush.bf16.xpose.msra.mxu3 %v8992_v5  ;;  %6566 = vmatmul.bf16.vlgmr.msrb.gmra.mxu2 %v13279_v34  ;;  %v12269_v5 = vld [vmem:[#allocation5 + $0x5dc] sm:$0xf0] }
 0x195   :  { %v8724_v12 = vor.u32 %v12269_v5, %v8723_v3  ;;  %v12335_v3 = vld [vmem:[#allocation5 + $0x7ec] sm:$0xf0]  ;;  %v12327_v5 = vld [vmem:[#allocation5 + $0x7b4] sm:$0xf] }
 0x196   :  { %v6476_v62 = vpop.f32.mrf.mxu3  ;;  %v6439_v63 = vpop.f32.mrf.mxu0 }
 0x197   :  { %v6463_v58 = vpop.f32.mrf.mxu2  ;;  %v6452_v1 = vpop.f32.mrf.mxu1  ;;  %v8541_v63 = vld [vmem:[#allocation5 + $0x468] sm:$0xf0] }
 0x198   :  { %v6464_v61 = vadd.f32 %v6463_v58, %v6451_v0  ;;  %v8597_v0 = vld [vmem:[#allocation5 + $0x4e0] sm:$0xf0]  ;;  %v12221_v58 = vld [vmem:[#allocation5 + $0x45c] sm:$0xf0]  ;;  %v8995_v1 = vld [vmem:[#allocation5 + $0x7b0] sm:$0xf] }
 0x199   :  { %v8600_v54 = vor.u32 %v12229_v47, %v8597_v0  ;;  %v12303_v47 = vld [vmem:[#allocation5 + $0x6ec] sm:$0xf0]  ;;  %v12295_v0 = vld [vmem:[#allocation5 + $0x6b4] sm:$0xf] }
 0x19a   :  { %6585 = vmatpush.bf16.xpose.msra.mxu0 %v8916_v14  ;;  %6598 = vmatpush.bf16.xpose.msra.mxu1 %v8920_v16  ;;  %v13340_v2 = vadd.f32 %v6476_v62, %v6464_v61  ;;  %v8732_v14 = vor.u32 %v12270_v9, %v8731_v8  ;;  %v8539_v61 = vld [vmem:[#allocation5 + $0x428] sm:$0xf]  ;;  %v12214_v62 = vld [vmem:[#allocation5 + $0x42c] sm:$0xf]  ;;  %v9003_v8 = vld [vmem:[#allocation5 + $0x7b8] sm:$0xf] }
 0x19b   :  { %6611 = vmatpush.bf16.xpose.msra.mxu2 %v8924_v19  ;;  %v8736_v19 = vor.u32 %v12262_v10, %v8733_v11  ;;  %v12336_v9 = vld [vmem:[#allocation5 + $0x7f4] sm:$0xf0] }
 0x19c   :  { %6624 = vmatpush.bf16.xpose.msra.mxu3 %v8928_v22 }
 0x19e   :  { %v6478_v22 = vpop.f32.mrf.mxu3 }
 0x19f   :  { %v6465_v16 = vpop.f32.mrf.mxu2  ;;  %v9004_v22 = vor.u32 %v12336_v9, %v9003_v8  ;;  %v8739_v8 = vld [vmem:[#allocation5 + $0x5b0] sm:$0xf] }
 0x1a0   :  { %v8996_v16 = vor.u32 %v12335_v3, %v8995_v1  ;;  %v8813_v1 = vld [vmem:[#allocation5 + $0x678] sm:$0xf0]  ;;  %v12271_v9 = vld [vmem:[#allocation5 + $0x5ec] sm:$0xf0] }
 0x1a2   :  { %6586 = vmatpush.bf16.xpose.msra.mxu0 %v8852_v36  ;;  %6599 = vmatpush.bf16.xpose.msra.mxu1 %v8856_v39  ;;  %v8660_v36 = vor.u32 %v12253_v26, %v8659_v25  ;;  %v8664_v39 = vor.u32 %v12245_v27, %v8661_v45  ;;  %v8931_v26 = vld [vmem:[#allocation5 + $0x730] sm:$0xf]  ;;  %v12311_v45 = vld [vmem:[#allocation5 + $0x734] sm:$0xf] }
 0x1a3   :  { %6612 = vmatpush.bf16.xpose.msra.mxu2 %v8860_v40  ;;  %v8668_v40 = vor.u32 %v12254_v30, %v8667_v29  ;;  %v12319_v27 = vld [vmem:[#allocation5 + $0x76c] sm:$0xf0]  ;;  %v8933_v29 = vld [vmem:[#allocation5 + $0x770] sm:$0xf0]  ;;  %v8939_v30 = vld [vmem:[#allocation5 + $0x738] sm:$0xf] }
 0x1a4   :  { %6625 = vmatpush.bf16.xpose.msra.mxu3 %v8864_v41  ;;  %v8672_v41 = vor.u32 %v12246_v31, %v8669_v35  ;;  %v12320_v31 = vld [vmem:[#allocation5 + $0x774] sm:$0xf0]  ;;  %v12312_v35 = vld [vmem:[#allocation5 + $0x73c] sm:$0xf] }
 0x1aa   :  { %6587 = vmatpush.bf16.xpose.msra.mxu0 %v8788_v57  ;;  %6600 = vmatpush.bf16.xpose.msra.mxu1 %v8792_v59  ;;  %v8531_v57 = vld [vmem:[#allocation5 + $0x420] sm:$0xf]  ;;  %v12213_v59 = vld [vmem:[#allocation5 + $0x424] sm:$0xf] }
 0x1ab   :  { %6613 = vmatpush.bf16.xpose.msra.mxu2 %v8796_v60  ;;  %v8533_v60 = vld [vmem:[#allocation5 + $0x460] sm:$0xf0]  ;;  %v8532_v6 = vor.u32 %v12221_v58, %v8531_v57  ;;  %v8803_v58 = vld [vmem:[#allocation5 + $0x630] sm:$0xf] }
 0x1ac   :  { %6626 = vmatpush.bf16.xpose.msra.mxu3 %v8800_v52  ;;  %v12222_v52 = vld [vmem:[#allocation5 + $0x464] sm:$0xf0]  ;;  %v8536_v10 = vor.u32 %v12213_v59, %v8533_v60  ;;  %v12287_v59 = vld [vmem:[#allocation5 + $0x66c] sm:$0xf0]  ;;  %v12279_v60 = vld [vmem:[#allocation5 + $0x634] sm:$0xf] }
 0x1ad   :  { %v8540_v11 = vor.u32 %v12222_v52, %v8539_v61  ;;  %v8805_v61 = vld [vmem:[#allocation5 + $0x670] sm:$0xf0]  ;;  %v8811_v52 = vld [vmem:[#allocation5 + $0x638] sm:$0xf]  ;;  %v8804_v3 = vor.u32 %v12287_v59, %v8803_v58  ;;  %v8611_v59 = vld [vmem:[#allocation5 + $0x4b0] sm:$0xf] }
 0x1b2   :  { %6588 = vmatpush.bf16.xpose.msra.mxu0 %v8724_v12  ;;  %6601 = vmatpush.bf16.xpose.msra.mxu1 %v8728_v13  ;;  %v12328_v12 = vld [vmem:[#allocation5 + $0x7bc] sm:$0xf] }
 0x1b3   :  { %6614 = vmatpush.bf16.xpose.msra.mxu2 %v8732_v14  ;;  %v9005_v13 = vld [vmem:[#allocation5 + $0x7f8] sm:$0xf0]  ;;  %v8544_v14 = vor.u32 %v12214_v62, %v8541_v63  ;;  %v12288_v62 = vld [vmem:[#allocation5 + $0x674] sm:$0xf0] }
 0x1b4   :  { %6627 = vmatpush.bf16.xpose.msra.mxu3 %v8736_v19  ;;  %v9000_v19 = vor.u32 %v12327_v5, %v8997_v7  ;;  %v9008_v25 = vor.u32 %v12328_v12, %v9005_v13  ;;  %v12280_v63 = vld [vmem:[#allocation5 + $0x63c] sm:$0xf]  ;;  %v8808_v5 = vor.u32 %v12279_v60, %v8805_v61  ;;  %v8747_v12 = vld [vmem:[#allocation5 + $0x5b8] sm:$0xf]  ;;  %v12239_v60 = vld [vmem:[#allocation5 + $0x4ec] sm:$0xf0] }
 0x1b5   :  { %v8816_v7 = vor.u32 %v12280_v63, %v8813_v1  ;;  %v12272_v13 = vld [vmem:[#allocation5 + $0x5f4] sm:$0xf0]  ;;  %v12231_v61 = vld [vmem:[#allocation5 + $0x4b4] sm:$0xf]  ;;  %v12232_v1 = vld [vmem:[#allocation5 + $0x4bc] sm:$0xf] }
 0x1b6   :  { %v12240_v63 = vld [vmem:[#allocation5 + $0x4f4] sm:$0xf0] }
 0x1ba   :  { %6589 = vmatpush.bf16.xpose.msra.mxu0 %v8660_v36  ;;  %6602 = vmatpush.bf16.xpose.msra.mxu1 %v8664_v39  ;;  %v8941_v36 = vld [vmem:[#allocation5 + $0x778] sm:$0xf0]  ;;  %v8932_v39 = vor.u32 %v12319_v27, %v8931_v26 }
 0x1bb   :  { %6615 = vmatpush.bf16.xpose.msra.mxu2 %v8668_v40  ;;  %v8936_v40 = vor.u32 %v12311_v45, %v8933_v29  ;;  %v8944_v44 = vor.u32 %v12312_v35, %v8941_v36  ;;  %v8748_v45 = vor.u32 %v12272_v13, %v8747_v12  ;;  %v8675_v35 = vld [vmem:[#allocation5 + $0x530] sm:$0xf]  ;;  %v12215_v13 = vld [vmem:[#allocation5 + $0x434] sm:$0xf] }
 0x1bc   :  { %6628 = vmatpush.bf16.xpose.msra.mxu3 %v8672_v41  ;;  %v8940_v41 = vor.u32 %v12320_v31, %v8939_v30  ;;  %v12255_v36 = vld [vmem:[#allocation5 + $0x56c] sm:$0xf0] }
 0x1bd   :  { %v12223_v12 = vld [vmem:[#allocation5 + $0x46c] sm:$0xf0] }
 0x1c2   :  { %6590 = vmatpush.bf16.xpose.msra.mxu0 %v8596_v53  ;;  %6603 = vmatpush.bf16.xpose.msra.mxu1 %v8600_v54  ;;  %v8877_v53 = vld [vmem:[#allocation5 + $0x6f8] sm:$0xf0]  ;;  %v8868_v54 = vor.u32 %v12303_v47, %v8867_v46  ;;  %v12256_v46 = vld [vmem:[#allocation5 + $0x574] sm:$0xf0] }
 0x1c3   :  { %6616 = vmatpush.bf16.xpose.msra.mxu2 %v8604_v55  ;;  %v8872_v55 = vor.u32 %v12295_v0, %v8869_v32  ;;  %v8880_v57 = vor.u32 %v12296_v51, %v8877_v53  ;;  %v12248_v47 = vld [vmem:[#allocation5 + $0x53c] sm:$0xf]  ;;  %v8676_v32 = vor.u32 %v12255_v36, %v8675_v35  ;;  %v12458_v35 = vld [vmem:[#allocation5 + $0xbc4] sm:$0xf0] }
 0x1c4   :  { %6629 = vmatpush.bf16.xpose.msra.mxu3 %v8608_v56  ;;  %v8876_v56 = vor.u32 %v12304_v50, %v8875_v49  ;;  %v8685_v0 = vld [vmem:[#allocation5 + $0x578] sm:$0xf0] }
 0x1ca   :  { %6591 = vmatpush.bf16.xpose.msra.mxu0 %v8532_v6  ;;  %6604 = vmatpush.bf16.xpose.msra.mxu1 %v8536_v10  ;;  %v8812_v6 = vor.u32 %v12288_v62, %v8811_v52  ;;  %v12263_v10 = vld [vmem:[#allocation5 + $0x5b4] sm:$0xf]  ;;  %v8619_v62 = vld [vmem:[#allocation5 + $0x4b8] sm:$0xf] }
 0x1cb   :  { %6617 = vmatpush.bf16.xpose.msra.mxu2 %v8540_v11  ;;  %v8741_v11 = vld [vmem:[#allocation5 + $0x5f0] sm:$0xf0] }
 0x1cc   :  { %6630 = vmatpush.bf16.xpose.msra.mxu3 %v8544_v14  ;;  %v12264_v14 = vld [vmem:[#allocation5 + $0x5bc] sm:$0xf]  ;;  %v8744_v27 = vor.u32 %v12263_v10, %v8741_v11  ;;  %v8613_v52 = vld [vmem:[#allocation5 + $0x4f0] sm:$0xf0]  ;;  %v8547_v11 = vld [vmem:[#allocation5 + $0x430] sm:$0xf] }
 0x1ce   :  { %v6489_v26 = vpop.f32.mrf.mxu0  ;;  %v6502_v31 = vpop.f32.mrf.mxu1 }
 0x1d1   :  { %6592 = vmatmul.bf16.vlgmr.msra.gmra.mxu0 %v13295_v15  ;;  %6605 = vmatmul.bf16.vlgmr.msra.gmra.mxu1 %v13299_v24 }
 0x1d2   :  { %6636 = vmatpush.bf16.xpose.msrb.mxu0 %v8996_v16  ;;  %6649 = vmatpush.bf16.xpose.msrb.mxu1 %v9000_v19  ;;  %v8749_v16 = vld [vmem:[#allocation5 + $0x5f8] sm:$0xf0]  ;;  %v8740_v19 = vor.u32 %v12271_v9, %v8739_v8  ;;  %v8616_v8 = vor.u32 %v12231_v61, %v8613_v52  ;;  %v8620_v9 = vor.u32 %v12240_v63, %v8619_v62  ;;  %v9331_v62 = vld [vmem:[#allocation5 + $0xa80] sm:$0xf] }
 0x1d3   :  { %6662 = vmatpush.bf16.xpose.msrb.mxu2 %v9004_v22  ;;  %6631 = vmatmul.bf16.vlgmr.msra.gmra.mxu3 %v13301_v28  ;;  %v13111_v22 = vld [vmem:[#allocation7] sm:$0xff]  ;;  %v8752_v29 = vor.u32 %v12264_v14, %v8749_v16  ;;  %v8549_v14 = vld [vmem:[#allocation5 + $0x470] sm:$0xf0]  ;;  %v8555_v16 = vld [vmem:[#allocation5 + $0x438] sm:$0xf] }
 0x1d4   :  { %6675 = vmatpush.bf16.xpose.msrb.mxu3 %v9008_v25  ;;  %6618 = vmatmul.bf16.vlgmr.msra.gmra.mxu2 %v13297_v23  ;;  %v6257_v25 = vperm.slane %v13111_v22, 1  ;;  %v12216_v22 = vld [vmem:[#allocation5 + $0x43c] sm:$0xf]  ;;  %v8552_v36 = vor.u32 %v12215_v13, %v8549_v14  ;;  %v12425_v63 = vld [vmem:[#allocation5 + $0xabc] sm:$0xf0] }
 0x1d6   :  { %v6490_v30 = vadd.f32 %v6489_v26, %v6257_v25  ;;  %v6528_v50 = vpop.f32.mrf.mxu3  ;;  %v6504_v58 = vpop.f32.mrf.mxu1  ;;  %v8557_v25 = vld [vmem:[#allocation5 + $0x478] sm:$0xf0]  ;;  %v9459_v26 = vld [vmem:[#allocation5 + $0xb80] sm:$0xf] }
 0x1d7   :  { %v6515_v49 = vpop.f32.mrf.mxu2  ;;  %v9405_v58 = vld [vmem:[#allocation5 + $0xb48] sm:$0xf0] }
 0x1da   :  { %6637 = vmatpush.bf16.xpose.msrb.mxu0 %v8932_v39  ;;  %6650 = vmatpush.bf16.xpose.msrb.mxu1 %v8936_v40  ;;  %v12247_v39 = vld [vmem:[#allocation5 + $0x534] sm:$0xf]  ;;  %v6503_v40 = vadd.f32 %v6502_v31, %v6490_v30  ;;  %v9461_v30 = vld [vmem:[#allocation5 + $0xbc0] sm:$0xf0]  ;;  %v9467_v31 = vld [vmem:[#allocation5 + $0xb88] sm:$0xf] }
 0x1db   :  { %6663 = vmatpush.bf16.xpose.msrb.mxu2 %v8940_v41  ;;  %v8677_v41 = vld [vmem:[#allocation5 + $0x570] sm:$0xf0] }
 0x1dc   :  { %6676 = vmatpush.bf16.xpose.msrb.mxu3 %v8944_v44  ;;  %v8683_v44 = vld [vmem:[#allocation5 + $0x538] sm:$0xf]  ;;  %v8680_v51 = vor.u32 %v12247_v39, %v8677_v41  ;;  %v9469_v41 = vld [vmem:[#allocation5 + $0xbc8] sm:$0xf0] }
 0x1dd   :  { %v8684_v53 = vor.u32 %v12256_v46, %v8683_v44  ;;  %v8560_v44 = vor.u32 %v12216_v22, %v8557_v25  ;;  %v9267_v22 = vld [vmem:[#allocation5 + $0xa00] sm:$0xf] }
 0x1de   :  { %v12409_v25 = vld [vmem:[#allocation5 + $0xa3c] sm:$0xf0] }
 0x1e2   :  { %6638 = vmatpush.bf16.xpose.msrb.mxu0 %v8868_v54  ;;  %6651 = vmatpush.bf16.xpose.msrb.mxu1 %v8872_v55  ;;  %v6516_v54 = vadd.f32 %v6515_v49, %v6503_v40  ;;  %v6491_v55 = vpop.f32.mrf.mxu0  ;;  %v12450_v40 = vld [vmem:[#allocation5 + $0xb8c] sm:$0xf]  ;;  %v9395_v49 = vld [vmem:[#allocation5 + $0xb00] sm:$0xf] }
 0x1e3   :  { %6664 = vmatpush.bf16.xpose.msrb.mxu2 %v8876_v56  ;;  %v8688_v56 = vor.u32 %v12248_v47, %v8685_v0  ;;  %v9468_v0 = vor.u32 %v12458_v35, %v9467_v31  ;;  %v12442_v55 = vld [vmem:[#allocation5 + $0xb44] sm:$0xf0]  ;;  %v9277_v31 = vld [vmem:[#allocation5 + $0xa48] sm:$0xf0]  ;;  %v9268_v35 = vor.u32 %v12409_v25, %v9267_v22  ;;  %v9077_v22 = vld [vmem:[#allocation5 + $0x8c0] sm:$0xf0] }
 0x1e4   :  { %6677 = vmatpush.bf16.xpose.msrb.mxu3 %v8880_v57  ;;  %v13346_v57 = vadd.f32 %v6528_v50, %v6516_v54  ;;  %v12441_v50 = vld [vmem:[#allocation5 + $0xb3c] sm:$0xf0]  ;;  %v9403_v54 = vld [vmem:[#allocation5 + $0xb08] sm:$0xf] }
 0x1e5   :  { %v9404_v61 = vor.u32 %v12442_v55, %v9403_v54  ;;  %v12394_v54 = vld [vmem:[#allocation5 + $0x9c4] sm:$0xf0]  ;;  %v12386_v55 = vld [vmem:[#allocation5 + $0x98c] sm:$0xf] }
 0x1e6   :  { %v9083_v25 = vld [vmem:[#allocation5 + $0x888] sm:$0xf] }
 0x1ea   :  { %6639 = vmatpush.bf16.xpose.msrb.mxu0 %v8804_v3  ;;  %6652 = vmatpush.bf16.xpose.msrb.mxu1 %v8808_v5  ;;  %v8621_v3 = vld [vmem:[#allocation5 + $0x4f8] sm:$0xf0]  ;;  %v8612_v5 = vor.u32 %v12239_v60, %v8611_v59  ;;  %v9396_v59 = vor.u32 %v12441_v50, %v9395_v49  ;;  %v12393_v49 = vld [vmem:[#allocation5 + $0x9bc] sm:$0xf0]  ;;  %v12385_v50 = vld [vmem:[#allocation5 + $0x984] sm:$0xf] }
 0x1eb   :  { %6665 = vmatpush.bf16.xpose.msrb.mxu2 %v8812_v6  ;;  %v6517_v6 = vpop.f32.mrf.mxu2  ;;  %v8624_v10 = vor.u32 %v12232_v1, %v8621_v3  ;;  %v12417_v1 = vld [vmem:[#allocation5 + $0xa84] sm:$0xf] }
 0x1ec   :  { %6678 = vmatpush.bf16.xpose.msrb.mxu3 %v8816_v7  ;;  %v6530_v7 = vpop.f32.mrf.mxu3  ;;  %v9333_v3 = vld [vmem:[#allocation5 + $0xac0] sm:$0xf0]  ;;  %v12426_v6 = vld [vmem:[#allocation5 + $0xac4] sm:$0xf0] }
 0x1ed   :  { %v12418_v7 = vld [vmem:[#allocation5 + $0xa8c] sm:$0xf] }
 0x1f2   :  { %6640 = vmatpush.bf16.xpose.msrb.mxu0 %v8740_v19  ;;  %6653 = vmatpush.bf16.xpose.msrb.mxu1 %v8744_v27  ;;  %v12224_v19 = vld [vmem:[#allocation5 + $0x474] sm:$0xf0]  ;;  %v12457_v27 = vld [vmem:[#allocation5 + $0xbbc] sm:$0xf0] }
 0x1f3   :  { %6666 = vmatpush.bf16.xpose.msrb.mxu2 %v8748_v45  ;;  %v12449_v45 = vld [vmem:[#allocation5 + $0xb84] sm:$0xf]  ;;  %v8556_v39 = vor.u32 %v12224_v19, %v8555_v16  ;;  %v9460_v46 = vor.u32 %v12457_v27, %v9459_v26 }
 0x1f4   :  { %6679 = vmatpush.bf16.xpose.msrb.mxu3 %v8752_v29  ;;  %v8548_v29 = vor.u32 %v12223_v12, %v8547_v11  ;;  %v9464_v47 = vor.u32 %v12449_v45, %v9461_v30  ;;  %v12401_v26 = vld [vmem:[#allocation5 + $0xa04] sm:$0xf]  ;;  %v9275_v45 = vld [vmem:[#allocation5 + $0xa08] sm:$0xf]  ;;  %v12402_v30 = vld [vmem:[#allocation5 + $0xa0c] sm:$0xf] }
 0x1f5   :  { %v9269_v27 = vld [vmem:[#allocation5 + $0xa40] sm:$0xf0] }
 0x1fa   :  { %6641 = vmatpush.bf16.xpose.msrb.mxu0 %v8676_v32  ;;  %6654 = vmatpush.bf16.xpose.msrb.mxu1 %v8680_v51  ;;  %v9472_v32 = vor.u32 %v12450_v40, %v9469_v41  ;;  %v12433_v51 = vld [vmem:[#allocation5 + $0xb04] sm:$0xf]  ;;  %v9280_v41 = vor.u32 %v12402_v30, %v9277_v31 }
 0x1fb   :  { %6667 = vmatpush.bf16.xpose.msrb.mxu2 %v8684_v53  ;;  %v9397_v53 = vld [vmem:[#allocation5 + $0xb40] sm:$0xf0] }
 0x1fc   :  { %6680 = vmatpush.bf16.xpose.msrb.mxu3 %v8688_v56  ;;  %v12434_v56 = vld [vmem:[#allocation5 + $0xb0c] sm:$0xf]  ;;  %v9400_v60 = vor.u32 %v12433_v51, %v9397_v53  ;;  %v9205_v51 = vld [vmem:[#allocation5 + $0x9c0] sm:$0xf0]  ;;  %v9211_v53 = vld [vmem:[#allocation5 + $0x988] sm:$0xf] }
 0x1fd   :  { %v9408_v52 = vor.u32 %v12434_v56, %v9405_v58  ;;  %v9213_v56 = vld [vmem:[#allocation5 + $0x9c8] sm:$0xf0] }
 0x202   :  { %6642 = vmatpush.bf16.xpose.msrb.mxu0 %v8612_v5  ;;  %6655 = vmatpush.bf16.xpose.msrb.mxu1 %v8616_v8  ;;  %v9339_v5 = vld [vmem:[#allocation5 + $0xa88] sm:$0xf]  ;;  %v9341_v8 = vld [vmem:[#allocation5 + $0xac8] sm:$0xf0] }
 0x203   :  { %6668 = vmatpush.bf16.xpose.msrb.mxu2 %v8620_v9  ;;  %v9332_v9 = vor.u32 %v12425_v63, %v9331_v62  ;;  %v9340_v11 = vor.u32 %v12426_v6, %v9339_v5  ;;  %v9344_v12 = vor.u32 %v12418_v7, %v9341_v8  ;;  %v9139_v63 = vld [vmem:[#allocation5 + $0x900] sm:$0xf]  ;;  %v9141_v5 = vld [vmem:[#allocation5 + $0x940] sm:$0xf0]  ;;  %v9147_v6 = vld [vmem:[#allocation5 + $0x908] sm:$0xf] }
 0x204   :  { %6681 = vmatpush.bf16.xpose.msrb.mxu3 %v8624_v10  ;;  %v9336_v10 = vor.u32 %v12417_v1, %v9333_v3  ;;  %v12377_v1 = vld [vmem:[#allocation5 + $0x93c] sm:$0xf0]  ;;  %v12369_v3 = vld [vmem:[#allocation5 + $0x904] sm:$0xf]  ;;  %v12378_v7 = vld [vmem:[#allocation5 + $0x944] sm:$0xf0] }
 0x205   :  { %v12370_v8 = vld [vmem:[#allocation5 + $0x90c] sm:$0xf] }
 0x20a   :  { %6643 = vmatpush.bf16.xpose.msrb.mxu0 %v8548_v29  ;;  %6656 = vmatpush.bf16.xpose.msrb.mxu1 %v8552_v36  ;;  %v12410_v29 = vld [vmem:[#allocation5 + $0xa44] sm:$0xf0]  ;;  %v9272_v36 = vor.u32 %v12401_v26, %v9269_v27  ;;  %v12354_v27 = vld [vmem:[#allocation5 + $0x88c] sm:$0xf] }
 0x20b   :  { %6669 = vmatpush.bf16.xpose.msrb.mxu2 %v8556_v39  ;;  %v9276_v39 = vor.u32 %v12410_v29, %v9275_v45  ;;  %v12362_v26 = vld [vmem:[#allocation5 + $0x8c4] sm:$0xf0]  ;;  %v9085_v45 = vld [vmem:[#allocation5 + $0x8c8] sm:$0xf0] }
 0x20c   :  { %6682 = vmatpush.bf16.xpose.msrb.mxu3 %v8560_v44  ;;  %v9084_v31 = vor.u32 %v12362_v26, %v9083_v25  ;;  %v12419_v25 = vld [vmem:[#allocation5 + $0xa94] sm:$0xf] }
 0x20d   :  { %v9349_v26 = vld [vmem:[#allocation5 + $0xad0] sm:$0xf0] }
 0x20e   :  { %v6541_v13 = vpop.f32.mrf.mxu0  ;;  %v6554_v16 = vpop.f32.mrf.mxu1 }
 0x20f   :  { %v6542_v14 = vadd.f32 %v6541_v13, %v13346_v57 }
 0x211   :  { %6644 = vmatmul.bf16.vlgmr.msrb.gmra.mxu0 %v13313_v37  ;;  %6657 = vmatmul.bf16.vlgmr.msrb.gmra.mxu1 %v13317_v43  ;;  %v6555_v19 = vadd.f32 %v6554_v16, %v6542_v14  ;;  %v9075_v14 = vld [vmem:[#allocation5 + $0x880] sm:$0xf] }
 0x212   :  { %6688 = vmatpush.bf16.xpose.msra.mxu0 %v9460_v46  ;;  %6701 = vmatpush.bf16.xpose.msra.mxu1 %v9464_v47  ;;  %v12361_v16 = vld [vmem:[#allocation5 + $0x8bc] sm:$0xf0] }
 0x213   :  { %6714 = vmatpush.bf16.xpose.msra.mxu2 %v9468_v0  ;;  %6683 = vmatmul.bf16.vlgmr.msrb.gmra.mxu3 %v13319_v48  ;;  %v9076_v29 = vor.u32 %v12361_v16, %v9075_v14 }
 0x214   :  { %6727 = vmatpush.bf16.xpose.msra.mxu3 %v9472_v32  ;;  %6670 = vmatmul.bf16.vlgmr.msrb.gmra.mxu2 %v13315_v42  ;;  %v9203_v32 = vld [vmem:[#allocation5 + $0x980] sm:$0xf] }
 0x215   :  { %v9204_v58 = vor.u32 %v12393_v49, %v9203_v32  ;;  %v9475_v32 = vld [vmem:[#allocation5 + $0xb90] sm:$0xf] }
 0x216   :  { %v6580_v44 = vpop.f32.mrf.mxu3  ;;  %v6543_v46 = vpop.f32.mrf.mxu0  ;;  %v12459_v49 = vld [vmem:[#allocation5 + $0xbcc] sm:$0xf0] }
 0x217   :  { %v6567_v40 = vpop.f32.mrf.mxu2  ;;  %v6556_v47 = vpop.f32.mrf.mxu1  ;;  %v12338_v46 = vld [vmem:[#allocation5 + $0x80c] sm:$0xf] }
 0x218   :  { %v6568_v57 = vadd.f32 %v6567_v40, %v6555_v19  ;;  %v12353_v19 = vld [vmem:[#allocation5 + $0x884] sm:$0xf]  ;;  %v9021_v47 = vld [vmem:[#allocation5 + $0x848] sm:$0xf0] }
 0x219   :  { %v9080_v30 = vor.u32 %v12353_v19, %v9077_v22  ;;  %v12337_v40 = vld [vmem:[#allocation5 + $0x804] sm:$0xf]  ;;  %v9347_v19 = vld [vmem:[#allocation5 + $0xa90] sm:$0xf] }
 0x21a   :  { %6689 = vmatpush.bf16.xpose.msra.mxu0 %v9396_v59  ;;  %6702 = vmatpush.bf16.xpose.msra.mxu1 %v9400_v60  ;;  %v13353_v0 = vadd.f32 %v6580_v44, %v6568_v57  ;;  %v9208_v59 = vor.u32 %v12385_v50, %v9205_v51  ;;  %v9212_v60 = vor.u32 %v12394_v54, %v9211_v53  ;;  %v9019_v57 = vld [vmem:[#allocation5 + $0x808] sm:$0xf]  ;;  %v12451_v50 = vld [vmem:[#allocation5 + $0xb94] sm:$0xf]  ;;  %v9483_v54 = vld [vmem:[#allocation5 + $0xb98] sm:$0xf] }
 0x21b   :  { %6715 = vmatpush.bf16.xpose.msra.mxu2 %v9404_v61  ;;  %v12346_v44 = vld [vmem:[#allocation5 + $0x844] sm:$0xf0]  ;;  %v9477_v53 = vld [vmem:[#allocation5 + $0xbd0] sm:$0xf0]  ;;  %v12427_v22 = vld [vmem:[#allocation5 + $0xacc] sm:$0xf0] }
 0x21c   :  { %6728 = vmatpush.bf16.xpose.msra.mxu3 %v9408_v52  ;;  %v9216_v52 = vor.u32 %v12386_v55, %v9213_v56  ;;  %v12460_v55 = vld [vmem:[#allocation5 + $0xbd4] sm:$0xf0] }
 0x21e   :  { %v6582_v62 = vpop.f32.mrf.mxu3 }
 0x21f   :  { %v6569_v61 = vpop.f32.mrf.mxu2  ;;  %v9480_v62 = vor.u32 %v12451_v50, %v9477_v53  ;;  %v9291_v50 = vld [vmem:[#allocation5 + $0xa18] sm:$0xf]  ;;  %v12404_v53 = vld [vmem:[#allocation5 + $0xa1c] sm:$0xf] }
 0x220   :  { %v9024_v61 = vor.u32 %v12338_v46, %v9021_v47  ;;  %v9283_v46 = vld [vmem:[#allocation5 + $0xa10] sm:$0xf] }
 0x221   :  { %v12411_v47 = vld [vmem:[#allocation5 + $0xa4c] sm:$0xf0] }
 0x222   :  { %6690 = vmatpush.bf16.xpose.msra.mxu0 %v9332_v9  ;;  %6703 = vmatpush.bf16.xpose.msra.mxu1 %v9336_v10  ;;  %v9149_v9 = vld [vmem:[#allocation5 + $0x948] sm:$0xf0]  ;;  %v9140_v10 = vor.u32 %v12377_v1, %v9139_v63  ;;  %v9484_v63 = vor.u32 %v12460_v55, %v9483_v54  ;;  %v9293_v54 = vld [vmem:[#allocation5 + $0xa58] sm:$0xf0]  ;;  %v9284_v55 = vor.u32 %v12411_v47, %v9283_v46  ;;  %v9093_v46 = vld [vmem:[#allocation5 + $0x8d0] sm:$0xf0] }
 0x223   :  { %6716 = vmatpush.bf16.xpose.msra.mxu2 %v9340_v11  ;;  %v9144_v11 = vor.u32 %v12369_v3, %v9141_v5  ;;  %v9152_v13 = vor.u32 %v12370_v8, %v9149_v9  ;;  %v9411_v3 = vld [vmem:[#allocation5 + $0xb10] sm:$0xf]  ;;  %v9419_v8 = vld [vmem:[#allocation5 + $0xb18] sm:$0xf] }
 0x224   :  { %6729 = vmatpush.bf16.xpose.msra.mxu3 %v9344_v12  ;;  %v9148_v12 = vor.u32 %v12378_v7, %v9147_v6  ;;  %v12443_v5 = vld [vmem:[#allocation5 + $0xb4c] sm:$0xf0]  ;;  %v12435_v6 = vld [vmem:[#allocation5 + $0xb14] sm:$0xf]  ;;  %v12444_v9 = vld [vmem:[#allocation5 + $0xb54] sm:$0xf0] }
 0x225   :  { %v9413_v7 = vld [vmem:[#allocation5 + $0xb50] sm:$0xf0]  ;;  %v9420_v14 = vor.u32 %v12444_v9, %v9419_v8  ;;  %v12396_v8 = vld [vmem:[#allocation5 + $0x9d4] sm:$0xf0]  ;;  %v12388_v9 = vld [vmem:[#allocation5 + $0x99c] sm:$0xf] }
 0x226   :  { %v9099_v47 = vld [vmem:[#allocation5 + $0x898] sm:$0xf] }
 0x22a   :  { %6691 = vmatpush.bf16.xpose.msra.mxu0 %v9268_v35  ;;  %6704 = vmatpush.bf16.xpose.msra.mxu1 %v9272_v36  ;;  %v9088_v35 = vor.u32 %v12354_v27, %v9085_v45  ;;  %v9011_v36 = vld [vmem:[#allocation5 + $0x800] sm:$0xf]  ;;  %v9355_v27 = vld [vmem:[#allocation5 + $0xa98] sm:$0xf] }
 0x22b   :  { %6717 = vmatpush.bf16.xpose.msra.mxu2 %v9276_v39  ;;  %v12345_v39 = vld [vmem:[#allocation5 + $0x83c] sm:$0xf0]  ;;  %v12428_v45 = vld [vmem:[#allocation5 + $0xad4] sm:$0xf0] }
 0x22c   :  { %6730 = vmatpush.bf16.xpose.msra.mxu3 %v9280_v41  ;;  %v9013_v41 = vld [vmem:[#allocation5 + $0x840] sm:$0xf0]  ;;  %v9012_v51 = vor.u32 %v12345_v39, %v9011_v36  ;;  %v9356_v36 = vor.u32 %v12428_v45, %v9355_v27  ;;  %v9157_v27 = vld [vmem:[#allocation5 + $0x950] sm:$0xf0]  ;;  %v9163_v45 = vld [vmem:[#allocation5 + $0x918] sm:$0xf] }
 0x22d   :  { %v9016_v56 = vor.u32 %v12337_v40, %v9013_v41 }
 0x232   :  { %6692 = vmatpush.bf16.xpose.msra.mxu0 %v9204_v58  ;;  %6705 = vmatpush.bf16.xpose.msra.mxu1 %v9208_v59  ;;  %v9020_v58 = vor.u32 %v12346_v44, %v9019_v57  ;;  %v12452_v59 = vld [vmem:[#allocation5 + $0xb9c] sm:$0xf] }
 0x233   :  { %6718 = vmatpush.bf16.xpose.msra.mxu2 %v9212_v60  ;;  %v9485_v60 = vld [vmem:[#allocation5 + $0xbd8] sm:$0xf0] }
 0x234   :  { %6731 = vmatpush.bf16.xpose.msra.mxu3 %v9216_v52  ;;  %v9476_v52 = vor.u32 %v12459_v49, %v9475_v32  ;;  %v9488_v1 = vor.u32 %v12452_v59, %v9485_v60  ;;  %v12403_v32 = vld [vmem:[#allocation5 + $0xa14] sm:$0xf] }
 0x235   :  { %v9285_v49 = vld [vmem:[#allocation5 + $0xa50] sm:$0xf0] }
 0x23a   :  { %6693 = vmatpush.bf16.xpose.msra.mxu0 %v9140_v10  ;;  %6706 = vmatpush.bf16.xpose.msra.mxu1 %v9144_v11  ;;  %v12436_v10 = vld [vmem:[#allocation5 + $0xb1c] sm:$0xf] }
 0x23b   :  { %6719 = vmatpush.bf16.xpose.msra.mxu2 %v9148_v12  ;;  %v9421_v11 = vld [vmem:[#allocation5 + $0xb58] sm:$0xf0]  ;;  %v9412_v12 = vor.u32 %v12443_v5, %v9411_v3  ;;  %v12395_v3 = vld [vmem:[#allocation5 + $0x9cc] sm:$0xf0]  ;;  %v12387_v5 = vld [vmem:[#allocation5 + $0x994] sm:$0xf] }
 0x23c   :  { %6732 = vmatpush.bf16.xpose.msra.mxu3 %v9152_v13  ;;  %v9416_v13 = vor.u32 %v12435_v6, %v9413_v7  ;;  %v9424_v16 = vor.u32 %v12436_v10, %v9421_v11  ;;  %v9221_v6 = vld [vmem:[#allocation5 + $0x9d0] sm:$0xf0]  ;;  %v9227_v7 = vld [vmem:[#allocation5 + $0x998] sm:$0xf]  ;;  %v9229_v10 = vld [vmem:[#allocation5 + $0x9d8] sm:$0xf0] }
 0x242   :  { %6694 = vmatpush.bf16.xpose.msra.mxu0 %v9076_v29  ;;  %6707 = vmatpush.bf16.xpose.msra.mxu1 %v9080_v30  ;;  %v12420_v29 = vld [vmem:[#allocation5 + $0xa9c] sm:$0xf] }
 0x243   :  { %6720 = vmatpush.bf16.xpose.msra.mxu2 %v9084_v31  ;;  %v9357_v30 = vld [vmem:[#allocation5 + $0xad8] sm:$0xf0]  ;;  %v9348_v31 = vor.u32 %v12427_v22, %v9347_v19  ;;  %v9155_v22 = vld [vmem:[#allocation5 + $0x910] sm:$0xf] }
 0x244   :  { %6733 = vmatpush.bf16.xpose.msra.mxu3 %v9088_v35  ;;  %v9352_v35 = vor.u32 %v12419_v25, %v9349_v26  ;;  %v9360_v39 = vor.u32 %v12420_v29, %v9357_v30  ;;  %v12379_v25 = vld [vmem:[#allocation5 + $0x94c] sm:$0xf0]  ;;  %v12371_v26 = vld [vmem:[#allocation5 + $0x914] sm:$0xf]  ;;  %v12380_v29 = vld [vmem:[#allocation5 + $0x954] sm:$0xf0] }
 0x245   :  { %v12372_v30 = vld [vmem:[#allocation5 + $0x91c] sm:$0xf] }
 0x24a   :  { %6695 = vmatpush.bf16.xpose.msra.mxu0 %v9012_v51  ;;  %6708 = vmatpush.bf16.xpose.msra.mxu1 %v9016_v56  ;;  %v12412_v51 = vld [vmem:[#allocation5 + $0xa54] sm:$0xf0] }
 0x24b   :  { %6721 = vmatpush.bf16.xpose.msra.mxu2 %v9020_v58  ;;  %v9288_v58 = vor.u32 %v12403_v32, %v9285_v49  ;;  %v9292_v59 = vor.u32 %v12412_v51, %v9291_v50  ;;  %v12364_v32 = vld [vmem:[#allocation5 + $0x8d4] sm:$0xf0]  ;;  %v12356_v49 = vld [vmem:[#allocation5 + $0x89c] sm:$0xf] }
 0x24c   :  { %6734 = vmatpush.bf16.xpose.msra.mxu3 %v9024_v61  ;;  %v9101_v50 = vld [vmem:[#allocation5 + $0x8d8] sm:$0xf0] }
 0x24e   :  { %v6593_v40 = vpop.f32.mrf.mxu0  ;;  %v6606_v57 = vpop.f32.mrf.mxu1 }
 0x24f   :  { %v6594_v41 = vadd.f32 %v6593_v40, %v13353_v0  ;;  %v9296_v0 = vor.u32 %v12404_v53, %v9293_v54  ;;  %v9100_v54 = vor.u32 %v12364_v32, %v9099_v47  ;;  %v12421_v47 = vld [vmem:[#allocation5 + $0xaa4] sm:$0xf] }
 0x250   :  { %v9365_v32 = vld [vmem:[#allocation5 + $0xae0] sm:$0xf0] }
 0x251   :  { %6696 = vmatmul.bf16.vlgmr.msra.gmra.mxu0 %v13263_v18  ;;  %6709 = vmatmul.bf16.vlgmr.msra.gmra.mxu1 %v13267_v21  ;;  %v6607_v44 = vadd.f32 %v6606_v57, %v6594_v41  ;;  %v9091_v41 = vld [vmem:[#allocation5 + $0x890] sm:$0xf] }
 0x252   :  { %6740 = vmatpush.bf16.xpose.msrb.mxu0 %v9476_v52  ;;  %6753 = vmatpush.bf16.xpose.msrb.mxu1 %v9480_v62  ;;  %v12363_v57 = vld [vmem:[#allocation5 + $0x8cc] sm:$0xf0] }
 0x253   :  { %6766 = vmatpush.bf16.xpose.msrb.mxu2 %v9484_v63  ;;  %6735 = vmatmul.bf16.vlgmr.msra.gmra.mxu3 %v13265_v20  ;;  %v9092_v51 = vor.u32 %v12363_v57, %v9091_v41 }
 0x254   :  { %6779 = vmatpush.bf16.xpose.msrb.mxu3 %v9488_v1  ;;  %6722 = vmatmul.bf16.vlgmr.msra.gmra.mxu2 %v13261_v17  ;;  %v9219_v1 = vld [vmem:[#allocation5 + $0x990] sm:$0xf] }
 0x255   :  { %v9220_v11 = vor.u32 %v12395_v3, %v9219_v1  ;;  %v9491_v1 = vld [vmem:[#allocation5 + $0xba0] sm:$0xf] }
 0x256   :  { %v6632_v61 = vpop.f32.mrf.mxu3  ;;  %v6595_v52 = vpop.f32.mrf.mxu0  ;;  %v12461_v3 = vld [vmem:[#allocation5 + $0xbdc] sm:$0xf0] }
 0x257   :  { %v6619_v56 = vpop.f32.mrf.mxu2  ;;  %v6608_v62 = vpop.f32.mrf.mxu1  ;;  %v12340_v52 = vld [vmem:[#allocation5 + $0x81c] sm:$0xf] }
 0x258   :  { %v6620_v60 = vadd.f32 %v6619_v56, %v6607_v44  ;;  %v12355_v44 = vld [vmem:[#allocation5 + $0x894] sm:$0xf]  ;;  %v9027_v56 = vld [vmem:[#allocation5 + $0x810] sm:$0xf]  ;;  %v9037_v62 = vld [vmem:[#allocation5 + $0x858] sm:$0xf0] }
 0x259   :  { %v9096_v53 = vor.u32 %v12355_v44, %v9093_v46  ;;  %v9363_v44 = vld [vmem:[#allocation5 + $0xaa0] sm:$0xf] }
 0x25a   :  { %6741 = vmatpush.bf16.xpose.msrb.mxu0 %v9412_v12  ;;  %6754 = vmatpush.bf16.xpose.msrb.mxu1 %v9416_v13  ;;  %v13360_v63 = vadd.f32 %v6632_v61, %v6620_v60  ;;  %v9224_v12 = vor.u32 %v12387_v5, %v9221_v6  ;;  %v9228_v13 = vor.u32 %v12396_v8, %v9227_v7  ;;  %v9029_v60 = vld [vmem:[#allocation5 + $0x850] sm:$0xf0]  ;;  %v12348_v61 = vld [vmem:[#allocation5 + $0x854] sm:$0xf0]  ;;  %v12453_v5 = vld [vmem:[#allocation5 + $0xba4] sm:$0xf] }
 0x25b   :  { %6767 = vmatpush.bf16.xpose.msrb.mxu2 %v9420_v14  ;;  %v9493_v7 = vld [vmem:[#allocation5 + $0xbe0] sm:$0xf0]  ;;  %v9499_v8 = vld [vmem:[#allocation5 + $0xba8] sm:$0xf]  ;;  %v12429_v46 = vld [vmem:[#allocation5 + $0xadc] sm:$0xf0] }
 0x25c   :  { %6780 = vmatpush.bf16.xpose.msrb.mxu3 %v9424_v16  ;;  %v9232_v16 = vor.u32 %v12388_v9, %v9229_v10  ;;  %v12462_v9 = vld [vmem:[#allocation5 + $0xbe4] sm:$0xf0] }
 0x25e   :  { %v6634_v19 = vpop.f32.mrf.mxu3 }
 0x25f   :  { %v6621_v14 = vpop.f32.mrf.mxu2  ;;  %v9496_v19 = vor.u32 %v12453_v5, %v9493_v7  ;;  %v9307_v5 = vld [vmem:[#allocation5 + $0xa28] sm:$0xf]  ;;  %v12406_v7 = vld [vmem:[#allocation5 + $0xa2c] sm:$0xf] }
 0x260   :  { %v9040_v14 = vor.u32 %v12340_v52, %v9037_v62  ;;  %v9299_v52 = vld [vmem:[#allocation5 + $0xa20] sm:$0xf] }
 0x261   :  { %v12413_v62 = vld [vmem:[#allocation5 + $0xa5c] sm:$0xf0] }
 0x262   :  { %6742 = vmatpush.bf16.xpose.msrb.mxu0 %v9348_v31  ;;  %6755 = vmatpush.bf16.xpose.msrb.mxu1 %v9352_v35  ;;  %v9165_v31 = vld [vmem:[#allocation5 + $0x958] sm:$0xf0]  ;;  %v9156_v35 = vor.u32 %v12379_v25, %v9155_v22  ;;  %v9500_v22 = vor.u32 %v12462_v9, %v9499_v8  ;;  %v9309_v8 = vld [vmem:[#allocation5 + $0xa68] sm:$0xf0]  ;;  %v9300_v9 = vor.u32 %v12413_v62, %v9299_v52  ;;  %v12357_v52 = vld [vmem:[#allocation5 + $0x8a4] sm:$0xf] }
 0x263   :  { %6768 = vmatpush.bf16.xpose.msrb.mxu2 %v9356_v36  ;;  %v9160_v36 = vor.u32 %v12371_v26, %v9157_v27  ;;  %v9168_v40 = vor.u32 %v12372_v30, %v9165_v31  ;;  %v9427_v26 = vld [vmem:[#allocation5 + $0xb20] sm:$0xf]  ;;  %v9435_v30 = vld [vmem:[#allocation5 + $0xb28] sm:$0xf]  ;;  %v9109_v62 = vld [vmem:[#allocation5 + $0x8e0] sm:$0xf0] }
 0x264   :  { %6781 = vmatpush.bf16.xpose.msrb.mxu3 %v9360_v39  ;;  %v9164_v39 = vor.u32 %v12380_v29, %v9163_v45  ;;  %v12445_v27 = vld [vmem:[#allocation5 + $0xb5c] sm:$0xf0]  ;;  %v12437_v45 = vld [vmem:[#allocation5 + $0xb24] sm:$0xf]  ;;  %v12446_v31 = vld [vmem:[#allocation5 + $0xb64] sm:$0xf0] }
 0x265   :  { %v9429_v29 = vld [vmem:[#allocation5 + $0xb60] sm:$0xf0]  ;;  %v9436_v41 = vor.u32 %v12446_v31, %v9435_v30  ;;  %v9243_v30 = vld [vmem:[#allocation5 + $0x9a8] sm:$0xf] }
 0x266   :  { %v12398_v31 = vld [vmem:[#allocation5 + $0x9e4] sm:$0xf0] }
 0x26a   :  { %6743 = vmatpush.bf16.xpose.msrb.mxu0 %v9284_v55  ;;  %6756 = vmatpush.bf16.xpose.msrb.mxu1 %v9288_v58  ;;  %v9104_v55 = vor.u32 %v12356_v49, %v9101_v50  ;;  %v12347_v58 = vld [vmem:[#allocation5 + $0x84c] sm:$0xf0]  ;;  %v9371_v49 = vld [vmem:[#allocation5 + $0xaa8] sm:$0xf] }
 0x26b   :  { %6769 = vmatpush.bf16.xpose.msrb.mxu2 %v9292_v59  ;;  %v12339_v59 = vld [vmem:[#allocation5 + $0x814] sm:$0xf]  ;;  %v9028_v6 = vor.u32 %v12347_v58, %v9027_v56  ;;  %v12430_v50 = vld [vmem:[#allocation5 + $0xae4] sm:$0xf0] }
 0x26c   :  { %6782 = vmatpush.bf16.xpose.msrb.mxu3 %v9296_v0  ;;  %v9035_v0 = vld [vmem:[#allocation5 + $0x818] sm:$0xf]  ;;  %v9032_v10 = vor.u32 %v12339_v59, %v9029_v60  ;;  %v9372_v56 = vor.u32 %v12430_v50, %v9371_v49  ;;  %v12381_v49 = vld [vmem:[#allocation5 + $0x95c] sm:$0xf0]  ;;  %v12373_v50 = vld [vmem:[#allocation5 + $0x924] sm:$0xf] }
 0x272   :  { %6744 = vmatpush.bf16.xpose.msrb.mxu0 %v9220_v11  ;;  %6757 = vmatpush.bf16.xpose.msrb.mxu1 %v9224_v12  ;;  %v9036_v11 = vor.u32 %v12348_v61, %v9035_v0  ;;  %v12454_v12 = vld [vmem:[#allocation5 + $0xbac] sm:$0xf] }
 0x273   :  { %6770 = vmatpush.bf16.xpose.msrb.mxu2 %v9228_v13  ;;  %v9501_v13 = vld [vmem:[#allocation5 + $0xbe8] sm:$0xf0] }
 0x274   :  { %6783 = vmatpush.bf16.xpose.msrb.mxu3 %v9232_v16  ;;  %v9492_v16 = vor.u32 %v12461_v3, %v9491_v1  ;;  %v9504_v25 = vor.u32 %v12454_v12, %v9501_v13  ;;  %v12405_v1 = vld [vmem:[#allocation5 + $0xa24] sm:$0xf] }
 0x275   :  { %v9301_v3 = vld [vmem:[#allocation5 + $0xa60] sm:$0xf0] }
 0x27a   :  { %6745 = vmatpush.bf16.xpose.msrb.mxu0 %v9156_v35  ;;  %6758 = vmatpush.bf16.xpose.msrb.mxu1 %v9160_v36  ;;  %v12438_v35 = vld [vmem:[#allocation5 + $0xb2c] sm:$0xf] }
 0x27b   :  { %6771 = vmatpush.bf16.xpose.msrb.mxu2 %v9164_v39  ;;  %v9437_v36 = vld [vmem:[#allocation5 + $0xb68] sm:$0xf0]  ;;  %v9428_v39 = vor.u32 %v12445_v27, %v9427_v26  ;;  %v12397_v26 = vld [vmem:[#allocation5 + $0x9dc] sm:$0xf0]  ;;  %v12389_v27 = vld [vmem:[#allocation5 + $0x9a4] sm:$0xf] }
 0x27c   :  { %6784 = vmatpush.bf16.xpose.msrb.mxu3 %v9168_v40  ;;  %v9432_v40 = vor.u32 %v12437_v45, %v9429_v29  ;;  %v9440_v57 = vor.u32 %v12438_v35, %v9437_v36  ;;  %v9237_v45 = vld [vmem:[#allocation5 + $0x9e0] sm:$0xf0]  ;;  %v12390_v35 = vld [vmem:[#allocation5 + $0x9ac] sm:$0xf] }
 0x27d   :  { %v9245_v36 = vld [vmem:[#allocation5 + $0x9e8] sm:$0xf0] }
 0x282   :  { %6746 = vmatpush.bf16.xpose.msrb.mxu0 %v9092_v51  ;;  %6759 = vmatpush.bf16.xpose.msrb.mxu1 %v9096_v53  ;;  %v12422_v51 = vld [vmem:[#allocation5 + $0xaac] sm:$0xf] }
 0x283   :  { %6772 = vmatpush.bf16.xpose.msrb.mxu2 %v9100_v54  ;;  %v9373_v53 = vld [vmem:[#allocation5 + $0xae8] sm:$0xf0]  ;;  %v9364_v54 = vor.u32 %v12429_v46, %v9363_v44  ;;  %v9248_v46 = vor.u32 %v12390_v35, %v9245_v36 }
 0x284   :  { %6785 = vmatpush.bf16.xpose.msrb.mxu3 %v9104_v55  ;;  %v9368_v55 = vor.u32 %v12421_v47, %v9365_v32  ;;  %v9376_v58 = vor.u32 %v12422_v51, %v9373_v53  ;;  %v9171_v32 = vld [vmem:[#allocation5 + $0x920] sm:$0xf]  ;;  %v9173_v51 = vld [vmem:[#allocation5 + $0x960] sm:$0xf0]  ;;  %v9179_v53 = vld [vmem:[#allocation5 + $0x928] sm:$0xf] }
 0x28a   :  { %6747 = vmatpush.bf16.xpose.msrb.mxu0 %v9028_v6  ;;  %6760 = vmatpush.bf16.xpose.msrb.mxu1 %v9032_v10  ;;  %v12414_v6 = vld [vmem:[#allocation5 + $0xa64] sm:$0xf0] }
 0x28b   :  { %6773 = vmatpush.bf16.xpose.msrb.mxu2 %v9036_v11  ;;  %v9304_v11 = vor.u32 %v12405_v1, %v9301_v3  ;;  %v9308_v12 = vor.u32 %v12414_v6, %v9307_v5  ;;  %v9115_v1 = vld [vmem:[#allocation5 + $0x8a8] sm:$0xf]  ;;  %v12358_v5 = vld [vmem:[#allocation5 + $0x8ac] sm:$0xf] }
 0x28c   :  { %6786 = vmatpush.bf16.xpose.msrb.mxu3 %v9040_v14  ;;  %v12366_v3 = vld [vmem:[#allocation5 + $0x8e4] sm:$0xf0]  ;;  %v9117_v6 = vld [vmem:[#allocation5 + $0x8e8] sm:$0xf0] }
 0x28e   :  { %v6645_v59 = vpop.f32.mrf.mxu0  ;;  %v6658_v0 = vpop.f32.mrf.mxu1 }
 0x28f   :  { %v6646_v60 = vadd.f32 %v6645_v59, %v13360_v63  ;;  %v9312_v63 = vor.u32 %v12406_v7, %v9309_v8  ;;  %v9112_v8 = vor.u32 %v12357_v52, %v9109_v62  ;;  %v12431_v52 = vld [vmem:[#allocation5 + $0xaec] sm:$0xf0]  ;;  %v12423_v62 = vld [vmem:[#allocation5 + $0xab4] sm:$0xf] }
 0x291   :  { %6748 = vmatmul.bf16.vlgmr.msrb.gmra.mxu0 %v13277_v33  ;;  %6761 = vmatmul.bf16.vlgmr.msrb.gmra.mxu1 %v13281_v38  ;;  %v6659_v61 = vadd.f32 %v6658_v0, %v6646_v60  ;;  %v9107_v0 = vld [vmem:[#allocation5 + $0x8a0] sm:$0xf] }
 0x292   :  { %6792 = vmatpush.bf16.xpose.msra.mxu0 %v9492_v16  ;;  %6805 = vmatpush.bf16.xpose.msra.mxu1 %v9496_v19 }
 0x293   :  { %6818 = vmatpush.bf16.xpose.msra.mxu2 %v9500_v22  ;;  %6787 = vmatmul.bf16.vlgmr.msrb.gmra.mxu3 %v13283_v4 }
 0x294   :  { %6831 = vmatpush.bf16.xpose.msra.mxu3 %v9504_v25  ;;  %6774 = vmatmul.bf16.vlgmr.msrb.gmra.mxu2 %v13279_v34  ;;  %v9235_v25 = vld [vmem:[#allocation5 + $0x9a0] sm:$0xf] }
 0x296   :  { %v6684_v14 = vpop.f32.mrf.mxu3  ;;  %v6647_v16 = vpop.f32.mrf.mxu0 }
 0x297   :  { %v6671_v10 = vpop.f32.mrf.mxu2  ;;  %v6660_v19 = vpop.f32.mrf.mxu1  ;;  %v12350_v16 = vld [vmem:[#allocation5 + $0x864] sm:$0xf0] }
 0x298   :  { %v6672_v13 = vadd.f32 %v6671_v10, %v6659_v61  ;;  %v12365_v61 = vld [vmem:[#allocation5 + $0x8dc] sm:$0xf0]  ;;  %v9120_v10 = vor.u32 %v12358_v5, %v9117_v6  ;;  %v12342_v19 = vld [vmem:[#allocation5 + $0x82c] sm:$0xf]  ;;  %v12432_v5 = vld [vmem:[#allocation5 + $0xaf4] sm:$0xf0] }
 0x299   :  { %v9108_v7 = vor.u32 %v12365_v61, %v9107_v0  ;;  %v9379_v61 = vld [vmem:[#allocation5 + $0xab0] sm:$0xf]  ;;  %v12424_v6 = vld [vmem:[#allocation5 + $0xabc] sm:$0xf] }
 0x29a   :  { %6793 = vmatpush.bf16.xpose.msra.mxu0 %v9428_v39  ;;  %6806 = vmatpush.bf16.xpose.msra.mxu1 %v9432_v40  ;;  %v6685_v22 = vadd.f32 %v6684_v14, %v6672_v13  ;;  %v9236_v40 = vor.u32 %v12397_v26, %v9235_v25  ;;  %v12341_v13 = vld [vmem:[#allocation5 + $0x824] sm:$0xf]  ;;  %v9051_v14 = vld [vmem:[#allocation5 + $0x828] sm:$0xf]  ;;  %v9507_v25 = vld [vmem:[#allocation5 + $0xbb0] sm:$0xf] }
 0x29b   :  { %6819 = vmatpush.bf16.xpose.msra.mxu2 %v9436_v41  ;;  %v9240_v41 = vor.u32 %v12389_v27, %v9237_v45  ;;  %v12463_v26 = vld [vmem:[#allocation5 + $0xbec] sm:$0xf0]  ;;  %v12455_v27 = vld [vmem:[#allocation5 + $0xbb4] sm:$0xf]  ;;  %v9052_v36 = vor.u32 %v12350_v16, %v9051_v14  ;;  %v9323_v16 = vld [vmem:[#allocation5 + $0xa38] sm:$0xf] }
 0x29c   :  { %6832 = vmatpush.bf16.xpose.msra.mxu3 %v9440_v57  ;;  %v7944_v29 = vrot.slane %v6685_v22, 7  ;;  %v9244_v57 = vor.u32 %v12398_v31, %v9243_v30  ;;  %v9053_v22 = vld [vmem:[#allocation5 + $0x868] sm:$0xf0]  ;;  %v9515_v30 = vld [vmem:[#allocation5 + $0xbb8] sm:$0xf] }
 0x29d   :  { %v12464_v31 = vld [vmem:[#allocation5 + $0xbf4] sm:$0xf0]  ;;  %v9317_v14 = vld [vmem:[#allocation5 + $0xa70] sm:$0xf0] }
 0x29e   :  { %v13368_v39 = vsel %vm7951_vm0, %v13340_v2, %v7944_v29  ;;  %v6686_v47 = vpop.f32.mrf.mxu3  ;;  %v9172_v2 = vor.u32 %v12381_v49, %v9171_v32  ;;  %v9509_v29 = vld [vmem:[#allocation5 + $0xbf0] sm:$0xf0]  ;;  %v9443_v49 = vld [vmem:[#allocation5 + $0xb30] sm:$0xf] }
 0x29f   :  { %v6673_v44 = vpop.f32.mrf.mxu2  ;;  %v9516_v47 = vor.u32 %v12464_v31, %v9515_v30  ;;  %v9251_v30 = vld [vmem:[#allocation5 + $0x9b0] sm:$0xf] }
 0x2a0   :  { %v9508_v44 = vor.u32 %v12463_v26, %v9507_v25  ;;  %v9325_v25 = vld [vmem:[#allocation5 + $0xa78] sm:$0xf0]  ;;  %v12399_v31 = vld [vmem:[#allocation5 + $0x9ec] sm:$0xf0] }
 0x2a2   :  { %6794 = vmatpush.bf16.xpose.msra.mxu0 %v9364_v54  ;;  %6807 = vmatpush.bf16.xpose.msra.mxu1 %v9368_v55  ;;  %v12382_v54 = vld [vmem:[#allocation5 + $0x964] sm:$0xf0]  ;;  %v12374_v55 = vld [vmem:[#allocation5 + $0x92c] sm:$0xf] }
 0x2a3   :  { %6820 = vmatpush.bf16.xpose.msra.mxu2 %v9372_v56  ;;  %v9181_v56 = vld [vmem:[#allocation5 + $0x968] sm:$0xf0]  ;;  %v9180_v59 = vor.u32 %v12382_v54, %v9179_v53  ;;  %v9445_v53 = vld [vmem:[#allocation5 + $0xb70] sm:$0xf0]  ;;  %v9451_v54 = vld [vmem:[#allocation5 + $0xb38] sm:$0xf] }
 0x2a4   :  { %6833 = vmatpush.bf16.xpose.msra.mxu3 %v9376_v58  ;;  %v9176_v58 = vor.u32 %v12373_v50, %v9173_v51  ;;  %v9184_v60 = vor.u32 %v12374_v55, %v9181_v56  ;;  %v12447_v50 = vld [vmem:[#allocation5 + $0xb6c] sm:$0xf0]  ;;  %v12439_v51 = vld [vmem:[#allocation5 + $0xb34] sm:$0xf]  ;;  %v12448_v55 = vld [vmem:[#allocation5 + $0xb74] sm:$0xf0] }
 0x2a5   :  { %v12440_v56 = vld [vmem:[#allocation5 + $0xb3c] sm:$0xf] }
 0x2aa   :  { %6795 = vmatpush.bf16.xpose.msra.mxu0 %v9300_v9  ;;  %6808 = vmatpush.bf16.xpose.msra.mxu1 %v9304_v11  ;;  %v9116_v9 = vor.u32 %v12366_v3, %v9115_v1  ;;  %v9043_v11 = vld [vmem:[#allocation5 + $0x820] sm:$0xf]  ;;  %v9381_v1 = vld [vmem:[#allocation5 + $0xaf0] sm:$0xf0]  ;;  %v9387_v3 = vld [vmem:[#allocation5 + $0xab8] sm:$0xf] }
 0x2ab   :  { %6821 = vmatpush.bf16.xpose.msra.mxu2 %v9308_v12  ;;  %v12349_v12 = vld [vmem:[#allocation5 + $0x85c] sm:$0xf0] }
 0x2ac   :  { %6834 = vmatpush.bf16.xpose.msra.mxu3 %v9312_v63  ;;  %v9045_v63 = vld [vmem:[#allocation5 + $0x860] sm:$0xf0]  ;;  %v9044_v45 = vor.u32 %v12349_v12, %v9043_v11  ;;  %v9315_v12 = vld [vmem:[#allocation5 + $0xa30] sm:$0xf] }
 0x2ad   :  { %v9048_v35 = vor.u32 %v12341_v13, %v9045_v63  ;;  %v12415_v13 = vld [vmem:[#allocation5 + $0xa6c] sm:$0xf0]  ;;  %v12407_v63 = vld [vmem:[#allocation5 + $0xa34] sm:$0xf] }
 0x2ae   :  { %v9316_v26 = vor.u32 %v12415_v13, %v9315_v12  ;;  %v9123_v13 = vld [vmem:[#allocation5 + $0x8b0] sm:$0xf] }
 0x2b2   :  { %6796 = vmatpush.bf16.xpose.msra.mxu0 %v9236_v40  ;;  %6809 = vmatpush.bf16.xpose.msra.mxu1 %v9240_v41  ;;  %v12456_v40 = vld [vmem:[#allocation5 + $0xbbc] sm:$0xf] }
 0x2b3   :  { %6822 = vmatpush.bf16.xpose.msra.mxu2 %v9244_v57  ;;  %v9517_v41 = vld [vmem:[#allocation5 + $0xbf8] sm:$0xf0]  ;;  %v9056_v57 = vor.u32 %v12342_v19, %v9053_v22  ;;  %v12416_v19 = vld [vmem:[#allocation5 + $0xa74] sm:$0xf0] }
 0x2b4   :  { %6835 = vmatpush.bf16.xpose.msra.mxu3 %v9248_v46  ;;  %v9512_v46 = vor.u32 %v12455_v27, %v9509_v29  ;;  %v9520_v32 = vor.u32 %v12456_v40, %v9517_v41  ;;  %v12408_v22 = vld [vmem:[#allocation5 + $0xa3c] sm:$0xf]  ;;  %v9320_v27 = vor.u32 %v12407_v63, %v9317_v14  ;;  %v9259_v40 = vld [vmem:[#allocation5 + $0x9b8] sm:$0xf]  ;;  %v12367_v63 = vld [vmem:[#allocation5 + $0x8ec] sm:$0xf0] }
 0x2b5   :  { %v9328_v29 = vor.u32 %v12408_v22, %v9325_v25  ;;  %v12400_v41 = vld [vmem:[#allocation5 + $0x9f4] sm:$0xf0]  ;;  %v12359_v14 = vld [vmem:[#allocation5 + $0x8b4] sm:$0xf]  ;;  %v12360_v25 = vld [vmem:[#allocation5 + $0x8bc] sm:$0xf] }
 0x2b6   :  { %v12368_v22 = vld [vmem:[#allocation5 + $0x8f4] sm:$0xf0] }
 0x2ba   :  { %6797 = vmatpush.bf16.xpose.msra.mxu0 %v9172_v2  ;;  %6810 = vmatpush.bf16.xpose.msra.mxu1 %v9176_v58  ;;  %v9453_v2 = vld [vmem:[#allocation5 + $0xb78] sm:$0xf0]  ;;  %v9444_v58 = vor.u32 %v12447_v50, %v9443_v49 }
 0x2bb   :  { %6823 = vmatpush.bf16.xpose.msra.mxu2 %v9180_v59  ;;  %v9448_v59 = vor.u32 %v12439_v51, %v9445_v53  ;;  %v9456_v0 = vor.u32 %v12440_v56, %v9453_v2  ;;  %v9260_v51 = vor.u32 %v12400_v41, %v9259_v40  ;;  %v9187_v56 = vld [vmem:[#allocation5 + $0x930] sm:$0xf]  ;;  %v12343_v41 = vld [vmem:[#allocation5 + $0x834] sm:$0xf] }
 0x2bc   :  { %6836 = vmatpush.bf16.xpose.msra.mxu3 %v9184_v60  ;;  %v9452_v60 = vor.u32 %v12448_v55, %v9451_v54  ;;  %v12383_v2 = vld [vmem:[#allocation5 + $0x96c] sm:$0xf0] }
 0x2bd   :  { %v12351_v40 = vld [vmem:[#allocation5 + $0x86c] sm:$0xf0] }
 0x2c2   :  { %6798 = vmatpush.bf16.xpose.msra.mxu0 %v9108_v7  ;;  %6811 = vmatpush.bf16.xpose.msra.mxu1 %v9112_v8  ;;  %v9389_v7 = vld [vmem:[#allocation5 + $0xaf8] sm:$0xf0]  ;;  %v9380_v8 = vor.u32 %v12431_v52, %v9379_v61  ;;  %v12384_v61 = vld [vmem:[#allocation5 + $0x974] sm:$0xf0] }
 0x2c3   :  { %6824 = vmatpush.bf16.xpose.msra.mxu2 %v9116_v9  ;;  %v9384_v9 = vor.u32 %v12423_v62, %v9381_v1  ;;  %v9392_v11 = vor.u32 %v12424_v6, %v9389_v7  ;;  %v12376_v52 = vld [vmem:[#allocation5 + $0x93c] sm:$0xf]  ;;  %v9188_v1 = vor.u32 %v12383_v2, %v9187_v56  ;;  %v12586_v56 = vld [vmem:[#allocation5 + $0xfc4] sm:$0xf0] }
 0x2c4   :  { %6837 = vmatpush.bf16.xpose.msra.mxu3 %v9120_v10  ;;  %v9388_v10 = vor.u32 %v12432_v5, %v9387_v3  ;;  %v9197_v62 = vld [vmem:[#allocation5 + $0x978] sm:$0xf0] }
 0x2ca   :  { %6799 = vmatpush.bf16.xpose.msra.mxu0 %v9044_v45  ;;  %6812 = vmatpush.bf16.xpose.msra.mxu1 %v9048_v35  ;;  %v9324_v45 = vor.u32 %v12416_v19, %v9323_v16  ;;  %v12391_v35 = vld [vmem:[#allocation5 + $0x9b4] sm:$0xf]  ;;  %v9131_v19 = vld [vmem:[#allocation5 + $0x8b8] sm:$0xf] }
 0x2cb   :  { %6825 = vmatpush.bf16.xpose.msra.mxu2 %v9052_v36  ;;  %v9253_v36 = vld [vmem:[#allocation5 + $0x9f0] sm:$0xf0] }
 0x2cc   :  { %6838 = vmatpush.bf16.xpose.msra.mxu3 %v9056_v57  ;;  %v12392_v57 = vld [vmem:[#allocation5 + $0x9bc] sm:$0xf]  ;;  %v9256_v50 = vor.u32 %v12391_v35, %v9253_v36  ;;  %v9125_v16 = vld [vmem:[#allocation5 + $0x8f0] sm:$0xf0]  ;;  %v9059_v36 = vld [vmem:[#allocation5 + $0x830] sm:$0xf] }
 0x2ce   :  { %v6697_v49 = vpop.f32.mrf.mxu0  ;;  %v6710_v55 = vpop.f32.mrf.mxu1 }
 0x2d1   :  { %6800 = vmatmul.bf16.vlgmr.msra.gmra.mxu0 %v13295_v15  ;;  %6813 = vmatmul.bf16.vlgmr.msra.gmra.mxu1 %v13299_v24 }
 0x2d2   :  { %6844 = vmatpush.bf16.xpose.msrb.mxu0 %v9508_v44  ;;  %6857 = vmatpush.bf16.xpose.msrb.mxu1 %v9512_v46  ;;  %v9261_v44 = vld [vmem:[#allocation5 + $0x9f8] sm:$0xf0]  ;;  %v9252_v46 = vor.u32 %v12399_v31, %v9251_v30  ;;  %v9128_v30 = vor.u32 %v12359_v14, %v9125_v16  ;;  %v9132_v31 = vor.u32 %v12368_v22, %v9131_v19  ;;  %v9843_v19 = vld [vmem:[#allocation5 + $0xe80] sm:$0xf] }
 0x2d3   :  { %6870 = vmatpush.bf16.xpose.msrb.mxu2 %v9516_v47  ;;  %6839 = vmatmul.bf16.vlgmr.msra.gmra.mxu3 %v13301_v28  ;;  %v13112_v47 = vld [vmem:[#allocation7] sm:$0xff]  ;;  %v9264_v53 = vor.u32 %v12392_v57, %v9261_v44  ;;  %v9061_v57 = vld [vmem:[#allocation5 + $0x870] sm:$0xf0]  ;;  %v9067_v44 = vld [vmem:[#allocation5 + $0x838] sm:$0xf] }
 0x2d4   :  { %6883 = vmatpush.bf16.xpose.msrb.mxu3 %v9520_v32  ;;  %6826 = vmatmul.bf16.vlgmr.msra.gmra.mxu2 %v13297_v23  ;;  %v6258_v32 = vperm.slane %v13112_v47, 2  ;;  %v12344_v47 = vld [vmem:[#allocation5 + $0x83c] sm:$0xf]  ;;  %v9064_v2 = vor.u32 %v12343_v41, %v9061_v57  ;;  %v12553_v22 = vld [vmem:[#allocation5 + $0xebc] sm:$0xf0] }
 0x2d6   :  { %v6698_v54 = vadd.f32 %v6697_v49, %v6258_v32  ;;  %v6736_v5 = vpop.f32.mrf.mxu3  ;;  %v6712_v12 = vpop.f32.mrf.mxu1  ;;  %v9069_v32 = vld [vmem:[#allocation5 + $0x878] sm:$0xf0]  ;;  %v9971_v49 = vld [vmem:[#allocation5 + $0xf80] sm:$0xf] }
 0x2d7   :  { %v6723_v3 = vpop.f32.mrf.mxu2  ;;  %v9917_v12 = vld [vmem:[#allocation5 + $0xf48] sm:$0xf0] }
 0x2da   :  { %6845 = vmatpush.bf16.xpose.msrb.mxu0 %v9444_v58  ;;  %6858 = vmatpush.bf16.xpose.msrb.mxu1 %v9448_v59  ;;  %v12375_v58 = vld [vmem:[#allocation5 + $0x934] sm:$0xf]  ;;  %v6711_v59 = vadd.f32 %v6710_v55, %v6698_v54  ;;  %v9973_v54 = vld [vmem:[#allocation5 + $0xfc0] sm:$0xf0]  ;;  %v9979_v55 = vld [vmem:[#allocation5 + $0xf88] sm:$0xf] }
 0x2db   :  { %6871 = vmatpush.bf16.xpose.msrb.mxu2 %v9452_v60  ;;  %v9189_v60 = vld [vmem:[#allocation5 + $0x970] sm:$0xf0] }
 0x2dc   :  { %6884 = vmatpush.bf16.xpose.msrb.mxu3 %v9456_v0  ;;  %v9195_v0 = vld [vmem:[#allocation5 + $0x938] sm:$0xf]  ;;  %v9192_v6 = vor.u32 %v12375_v58, %v9189_v60  ;;  %v9981_v60 = vld [vmem:[#allocation5 + $0xfc8] sm:$0xf0] }
 0x2dd   :  { %v9196_v7 = vor.u32 %v12384_v61, %v9195_v0  ;;  %v9072_v0 = vor.u32 %v12344_v47, %v9069_v32  ;;  %v9779_v47 = vld [vmem:[#allocation5 + $0xe00] sm:$0xf] }
 0x2de   :  { %v12537_v32 = vld [vmem:[#allocation5 + $0xe3c] sm:$0xf0] }
 0x2e2   :  { %6846 = vmatpush.bf16.xpose.msrb.mxu0 %v9380_v8  ;;  %6859 = vmatpush.bf16.xpose.msrb.mxu1 %v9384_v9  ;;  %v6724_v8 = vadd.f32 %v6723_v3, %v6711_v59  ;;  %v6699_v9 = vpop.f32.mrf.mxu0  ;;  %v12578_v59 = vld [vmem:[#allocation5 + $0xf8c] sm:$0xf]  ;;  %v9907_v3 = vld [vmem:[#allocation5 + $0xf00] sm:$0xf] }
 0x2e3   :  { %6872 = vmatpush.bf16.xpose.msrb.mxu2 %v9388_v10  ;;  %v9200_v10 = vor.u32 %v12376_v52, %v9197_v62  ;;  %v9980_v62 = vor.u32 %v12586_v56, %v9979_v55  ;;  %v12570_v9 = vld [vmem:[#allocation5 + $0xf44] sm:$0xf0]  ;;  %v9789_v55 = vld [vmem:[#allocation5 + $0xe48] sm:$0xf0]  ;;  %v9780_v56 = vor.u32 %v12537_v32, %v9779_v47  ;;  %v9589_v47 = vld [vmem:[#allocation5 + $0xcc0] sm:$0xf0] }
 0x2e4   :  { %6885 = vmatpush.bf16.xpose.msrb.mxu3 %v9392_v11  ;;  %v13374_v11 = vadd.f32 %v6736_v5, %v6724_v8  ;;  %v12569_v5 = vld [vmem:[#allocation5 + $0xf3c] sm:$0xf0]  ;;  %v9915_v8 = vld [vmem:[#allocation5 + $0xf08] sm:$0xf] }
 0x2e5   :  { %v9916_v14 = vor.u32 %v12570_v9, %v9915_v8  ;;  %v12522_v8 = vld [vmem:[#allocation5 + $0xdc4] sm:$0xf0]  ;;  %v12514_v9 = vld [vmem:[#allocation5 + $0xd8c] sm:$0xf] }
 0x2e6   :  { %v9595_v32 = vld [vmem:[#allocation5 + $0xc88] sm:$0xf] }
 0x2ea   :  { %6847 = vmatpush.bf16.xpose.msrb.mxu0 %v9316_v26  ;;  %6860 = vmatpush.bf16.xpose.msrb.mxu1 %v9320_v27  ;;  %v9133_v26 = vld [vmem:[#allocation5 + $0x8f8] sm:$0xf0]  ;;  %v9124_v27 = vor.u32 %v12367_v63, %v9123_v13  ;;  %v9908_v13 = vor.u32 %v12569_v5, %v9907_v3  ;;  %v12521_v3 = vld [vmem:[#allocation5 + $0xdbc] sm:$0xf0]  ;;  %v12513_v5 = vld [vmem:[#allocation5 + $0xd84] sm:$0xf] }
 0x2eb   :  { %6873 = vmatpush.bf16.xpose.msrb.mxu2 %v9324_v45  ;;  %v6725_v45 = vpop.f32.mrf.mxu2  ;;  %v9136_v35 = vor.u32 %v12360_v25, %v9133_v26  ;;  %v12545_v25 = vld [vmem:[#allocation5 + $0xe84] sm:$0xf] }
 0x2ec   :  { %6886 = vmatpush.bf16.xpose.msrb.mxu3 %v9328_v29  ;;  %v6738_v29 = vpop.f32.mrf.mxu3  ;;  %v9845_v26 = vld [vmem:[#allocation5 + $0xec0] sm:$0xf0]  ;;  %v12554_v45 = vld [vmem:[#allocation5 + $0xec4] sm:$0xf0] }
 0x2ed   :  { %v12546_v29 = vld [vmem:[#allocation5 + $0xe8c] sm:$0xf] }
 0x2f2   :  { %6848 = vmatpush.bf16.xpose.msrb.mxu0 %v9252_v46  ;;  %6861 = vmatpush.bf16.xpose.msrb.mxu1 %v9256_v50  ;;  %v12352_v46 = vld [vmem:[#allocation5 + $0x874] sm:$0xf0]  ;;  %v12585_v50 = vld [vmem:[#allocation5 + $0xfbc] sm:$0xf0] }
 0x2f3   :  { %6874 = vmatpush.bf16.xpose.msrb.mxu2 %v9260_v51  ;;  %v12577_v51 = vld [vmem:[#allocation5 + $0xf84] sm:$0xf]  ;;  %v9068_v58 = vor.u32 %v12352_v46, %v9067_v44  ;;  %v9972_v61 = vor.u32 %v12585_v50, %v9971_v49 }
 0x2f4   :  { %6887 = vmatpush.bf16.xpose.msrb.mxu3 %v9264_v53  ;;  %v9060_v53 = vor.u32 %v12351_v40, %v9059_v36  ;;  %v9976_v52 = vor.u32 %v12577_v51, %v9973_v54  ;;  %v12529_v49 = vld [vmem:[#allocation5 + $0xe04] sm:$0xf]  ;;  %v9787_v51 = vld [vmem:[#allocation5 + $0xe08] sm:$0xf]  ;;  %v12530_v54 = vld [vmem:[#allocation5 + $0xe0c] sm:$0xf] }
 0x2f5   :  { %v9781_v50 = vld [vmem:[#allocation5 + $0xe40] sm:$0xf0] }
 0x2fa   :  { %6849 = vmatpush.bf16.xpose.msrb.mxu0 %v9188_v1  ;;  %6862 = vmatpush.bf16.xpose.msrb.mxu1 %v9192_v6  ;;  %v9984_v1 = vor.u32 %v12578_v59, %v9981_v60  ;;  %v12561_v6 = vld [vmem:[#allocation5 + $0xf04] sm:$0xf]  ;;  %v9792_v60 = vor.u32 %v12530_v54, %v9789_v55 }
 0x2fb   :  { %6875 = vmatpush.bf16.xpose.msrb.mxu2 %v9196_v7  ;;  %v9909_v7 = vld [vmem:[#allocation5 + $0xf40] sm:$0xf0] }
 0x2fc   :  { %6888 = vmatpush.bf16.xpose.msrb.mxu3 %v9200_v10  ;;  %v12562_v10 = vld [vmem:[#allocation5 + $0xf0c] sm:$0xf]  ;;  %v9912_v63 = vor.u32 %v12561_v6, %v9909_v7  ;;  %v9717_v6 = vld [vmem:[#allocation5 + $0xdc0] sm:$0xf0]  ;;  %v9723_v7 = vld [vmem:[#allocation5 + $0xd88] sm:$0xf] }
 0x2fd   :  { %v9920_v16 = vor.u32 %v12562_v10, %v9917_v12  ;;  %v9725_v10 = vld [vmem:[#allocation5 + $0xdc8] sm:$0xf0] }
 0x302   :  { %6850 = vmatpush.bf16.xpose.msrb.mxu0 %v9124_v27  ;;  %6863 = vmatpush.bf16.xpose.msrb.mxu1 %v9128_v30  ;;  %v9851_v27 = vld [vmem:[#allocation5 + $0xe88] sm:$0xf]  ;;  %v9853_v30 = vld [vmem:[#allocation5 + $0xec8] sm:$0xf0] }
 0x303   :  { %6876 = vmatpush.bf16.xpose.msrb.mxu2 %v9132_v31  ;;  %v9844_v31 = vor.u32 %v12553_v22, %v9843_v19  ;;  %v9852_v36 = vor.u32 %v12554_v45, %v9851_v27  ;;  %v9856_v40 = vor.u32 %v12546_v29, %v9853_v30  ;;  %v9651_v22 = vld [vmem:[#allocation5 + $0xd00] sm:$0xf]  ;;  %v9653_v27 = vld [vmem:[#allocation5 + $0xd40] sm:$0xf0]  ;;  %v9659_v45 = vld [vmem:[#allocation5 + $0xd08] sm:$0xf] }
 0x304   :  { %6889 = vmatpush.bf16.xpose.msrb.mxu3 %v9136_v35  ;;  %v9848_v35 = vor.u32 %v12545_v25, %v9845_v26  ;;  %v12505_v25 = vld [vmem:[#allocation5 + $0xd3c] sm:$0xf0]  ;;  %v12497_v26 = vld [vmem:[#allocation5 + $0xd04] sm:$0xf]  ;;  %v12506_v29 = vld [vmem:[#allocation5 + $0xd44] sm:$0xf0] }
 0x305   :  { %v12498_v30 = vld [vmem:[#allocation5 + $0xd0c] sm:$0xf] }
 0x30a   :  { %6851 = vmatpush.bf16.xpose.msrb.mxu0 %v9060_v53  ;;  %6864 = vmatpush.bf16.xpose.msrb.mxu1 %v9064_v2  ;;  %v12538_v53 = vld [vmem:[#allocation5 + $0xe44] sm:$0xf0]  ;;  %v9784_v2 = vor.u32 %v12529_v49, %v9781_v50  ;;  %v12482_v50 = vld [vmem:[#allocation5 + $0xc8c] sm:$0xf] }
 0x30b   :  { %6877 = vmatpush.bf16.xpose.msrb.mxu2 %v9068_v58  ;;  %v9788_v58 = vor.u32 %v12538_v53, %v9787_v51  ;;  %v12490_v49 = vld [vmem:[#allocation5 + $0xcc4] sm:$0xf0]  ;;  %v9597_v51 = vld [vmem:[#allocation5 + $0xcc8] sm:$0xf0] }
 0x30c   :  { %6890 = vmatpush.bf16.xpose.msrb.mxu3 %v9072_v0  ;;  %v9596_v55 = vor.u32 %v12490_v49, %v9595_v32  ;;  %v12547_v32 = vld [vmem:[#allocation5 + $0xe94] sm:$0xf] }
 0x30d   :  { %v9861_v49 = vld [vmem:[#allocation5 + $0xed0] sm:$0xf0] }
 0x30e   :  { %v6749_v41 = vpop.f32.mrf.mxu0  ;;  %v6762_v44 = vpop.f32.mrf.mxu1 }
 0x30f   :  { %v6750_v57 = vadd.f32 %v6749_v41, %v13374_v11 }
 0x311   :  { %6852 = vmatmul.bf16.vlgmr.msrb.gmra.mxu0 %v13313_v37  ;;  %6865 = vmatmul.bf16.vlgmr.msrb.gmra.mxu1 %v13317_v43  ;;  %v6763_v46 = vadd.f32 %v6762_v44, %v6750_v57  ;;  %v9587_v57 = vld [vmem:[#allocation5 + $0xc80] sm:$0xf] }
 0x312   :  { %6896 = vmatpush.bf16.xpose.msra.mxu0 %v9972_v61  ;;  %6909 = vmatpush.bf16.xpose.msra.mxu1 %v9976_v52  ;;  %v12489_v44 = vld [vmem:[#allocation5 + $0xcbc] sm:$0xf0] }
 0x313   :  { %6922 = vmatpush.bf16.xpose.msra.mxu2 %v9980_v62  ;;  %6891 = vmatmul.bf16.vlgmr.msrb.gmra.mxu3 %v13319_v48  ;;  %v9588_v53 = vor.u32 %v12489_v44, %v9587_v57 }
 0x314   :  { %6935 = vmatpush.bf16.xpose.msra.mxu3 %v9984_v1  ;;  %6878 = vmatmul.bf16.vlgmr.msrb.gmra.mxu2 %v13315_v42  ;;  %v9715_v1 = vld [vmem:[#allocation5 + $0xd80] sm:$0xf] }
 0x315   :  { %v9716_v12 = vor.u32 %v12521_v3, %v9715_v1  ;;  %v9987_v1 = vld [vmem:[#allocation5 + $0xf90] sm:$0xf] }
 0x316   :  { %v6788_v0 = vpop.f32.mrf.mxu3  ;;  %v6751_v61 = vpop.f32.mrf.mxu0  ;;  %v12587_v3 = vld [vmem:[#allocation5 + $0xfcc] sm:$0xf0] }
 0x317   :  { %v6775_v59 = vpop.f32.mrf.mxu2  ;;  %v6764_v52 = vpop.f32.mrf.mxu1  ;;  %v12466_v61 = vld [vmem:[#allocation5 + $0xc0c] sm:$0xf] }
 0x318   :  { %v6776_v11 = vadd.f32 %v6775_v59, %v6763_v46  ;;  %v12481_v46 = vld [vmem:[#allocation5 + $0xc84] sm:$0xf]  ;;  %v9533_v52 = vld [vmem:[#allocation5 + $0xc48] sm:$0xf0] }
 0x319   :  { %v9592_v54 = vor.u32 %v12481_v46, %v9589_v47  ;;  %v12465_v59 = vld [vmem:[#allocation5 + $0xc04] sm:$0xf]  ;;  %v9859_v46 = vld [vmem:[#allocation5 + $0xe90] sm:$0xf] }
 0x31a   :  { %6897 = vmatpush.bf16.xpose.msra.mxu0 %v9908_v13  ;;  %6910 = vmatpush.bf16.xpose.msra.mxu1 %v9912_v63  ;;  %v13381_v62 = vadd.f32 %v6788_v0, %v6776_v11  ;;  %v9720_v13 = vor.u32 %v12513_v5, %v9717_v6  ;;  %v9724_v63 = vor.u32 %v12522_v8, %v9723_v7  ;;  %v9531_v11 = vld [vmem:[#allocation5 + $0xc08] sm:$0xf]  ;;  %v12579_v5 = vld [vmem:[#allocation5 + $0xf94] sm:$0xf]  ;;  %v9995_v8 = vld [vmem:[#allocation5 + $0xf98] sm:$0xf] }
 0x31b   :  { %6923 = vmatpush.bf16.xpose.msra.mxu2 %v9916_v14  ;;  %v12474_v0 = vld [vmem:[#allocation5 + $0xc44] sm:$0xf0]  ;;  %v9989_v7 = vld [vmem:[#allocation5 + $0xfd0] sm:$0xf0]  ;;  %v12555_v47 = vld [vmem:[#allocation5 + $0xecc] sm:$0xf0] }
 0x31c   :  { %6936 = vmatpush.bf16.xpose.msra.mxu3 %v9920_v16  ;;  %v9728_v16 = vor.u32 %v12514_v9, %v9725_v10  ;;  %v12588_v9 = vld [vmem:[#allocation5 + $0xfd4] sm:$0xf0] }
 0x31e   :  { %v6790_v19 = vpop.f32.mrf.mxu3 }
 0x31f   :  { %v6777_v14 = vpop.f32.mrf.mxu2  ;;  %v9992_v19 = vor.u32 %v12579_v5, %v9989_v7  ;;  %v9803_v5 = vld [vmem:[#allocation5 + $0xe18] sm:$0xf]  ;;  %v12532_v7 = vld [vmem:[#allocation5 + $0xe1c] sm:$0xf] }
 0x320   :  { %v9536_v14 = vor.u32 %v12466_v61, %v9533_v52  ;;  %v9795_v61 = vld [vmem:[#allocation5 + $0xe10] sm:$0xf] }
 0x321   :  { %v12539_v52 = vld [vmem:[#allocation5 + $0xe4c] sm:$0xf0] }
 0x322   :  { %6898 = vmatpush.bf16.xpose.msra.mxu0 %v9844_v31  ;;  %6911 = vmatpush.bf16.xpose.msra.mxu1 %v9848_v35  ;;  %v9661_v31 = vld [vmem:[#allocation5 + $0xd48] sm:$0xf0]  ;;  %v9652_v35 = vor.u32 %v12505_v25, %v9651_v22  ;;  %v9996_v22 = vor.u32 %v12588_v9, %v9995_v8  ;;  %v9805_v8 = vld [vmem:[#allocation5 + $0xe58] sm:$0xf0]  ;;  %v9796_v9 = vor.u32 %v12539_v52, %v9795_v61  ;;  %v9605_v61 = vld [vmem:[#allocation5 + $0xcd0] sm:$0xf0] }
 0x323   :  { %6924 = vmatpush.bf16.xpose.msra.mxu2 %v9852_v36  ;;  %v9656_v36 = vor.u32 %v12497_v26, %v9653_v27  ;;  %v9664_v41 = vor.u32 %v12498_v30, %v9661_v31  ;;  %v9923_v26 = vld [vmem:[#allocation5 + $0xf10] sm:$0xf]  ;;  %v9931_v30 = vld [vmem:[#allocation5 + $0xf18] sm:$0xf] }
 0x324   :  { %6937 = vmatpush.bf16.xpose.msra.mxu3 %v9856_v40  ;;  %v9660_v40 = vor.u32 %v12506_v29, %v9659_v45  ;;  %v12571_v27 = vld [vmem:[#allocation5 + $0xf4c] sm:$0xf0]  ;;  %v12563_v45 = vld [vmem:[#allocation5 + $0xf14] sm:$0xf]  ;;  %v12572_v31 = vld [vmem:[#allocation5 + $0xf54] sm:$0xf0] }
 0x325   :  { %v9925_v29 = vld [vmem:[#allocation5 + $0xf50] sm:$0xf0]  ;;  %v9932_v57 = vor.u32 %v12572_v31, %v9931_v30  ;;  %v12524_v30 = vld [vmem:[#allocation5 + $0xdd4] sm:$0xf0]  ;;  %v12516_v31 = vld [vmem:[#allocation5 + $0xd9c] sm:$0xf] }
 0x326   :  { %v9611_v52 = vld [vmem:[#allocation5 + $0xc98] sm:$0xf] }
 0x32a   :  { %6899 = vmatpush.bf16.xpose.msra.mxu0 %v9780_v56  ;;  %6912 = vmatpush.bf16.xpose.msra.mxu1 %v9784_v2  ;;  %v9600_v56 = vor.u32 %v12482_v50, %v9597_v51  ;;  %v9523_v2 = vld [vmem:[#allocation5 + $0xc00] sm:$0xf]  ;;  %v9867_v50 = vld [vmem:[#allocation5 + $0xe98] sm:$0xf] }
 0x32b   :  { %6925 = vmatpush.bf16.xpose.msra.mxu2 %v9788_v58  ;;  %v12473_v58 = vld [vmem:[#allocation5 + $0xc3c] sm:$0xf0]  ;;  %v12556_v51 = vld [vmem:[#allocation5 + $0xed4] sm:$0xf0] }
 0x32c   :  { %6938 = vmatpush.bf16.xpose.msra.mxu3 %v9792_v60  ;;  %v9525_v60 = vld [vmem:[#allocation5 + $0xc40] sm:$0xf0]  ;;  %v9524_v6 = vor.u32 %v12473_v58, %v9523_v2  ;;  %v9868_v2 = vor.u32 %v12556_v51, %v9867_v50  ;;  %v9669_v50 = vld [vmem:[#allocation5 + $0xd50] sm:$0xf0]  ;;  %v9675_v51 = vld [vmem:[#allocation5 + $0xd18] sm:$0xf] }
 0x32d   :  { %v9528_v10 = vor.u32 %v12465_v59, %v9525_v60 }
 0x332   :  { %6900 = vmatpush.bf16.xpose.msra.mxu0 %v9716_v12  ;;  %6913 = vmatpush.bf16.xpose.msra.mxu1 %v9720_v13  ;;  %v9532_v12 = vor.u32 %v12474_v0, %v9531_v11  ;;  %v12580_v13 = vld [vmem:[#allocation5 + $0xf9c] sm:$0xf] }
 0x333   :  { %6926 = vmatpush.bf16.xpose.msra.mxu2 %v9724_v63  ;;  %v9997_v63 = vld [vmem:[#allocation5 + $0xfd8] sm:$0xf0] }
 0x334   :  { %6939 = vmatpush.bf16.xpose.msra.mxu3 %v9728_v16  ;;  %v9988_v16 = vor.u32 %v12587_v3, %v9987_v1  ;;  %v10000_v25 = vor.u32 %v12580_v13, %v9997_v63  ;;  %v12531_v1 = vld [vmem:[#allocation5 + $0xe14] sm:$0xf] }
 0x335   :  { %v9797_v3 = vld [vmem:[#allocation5 + $0xe50] sm:$0xf0] }
 0x33a   :  { %6901 = vmatpush.bf16.xpose.msra.mxu0 %v9652_v35  ;;  %6914 = vmatpush.bf16.xpose.msra.mxu1 %v9656_v36  ;;  %v12564_v35 = vld [vmem:[#allocation5 + $0xf1c] sm:$0xf] }
 0x33b   :  { %6927 = vmatpush.bf16.xpose.msra.mxu2 %v9660_v40  ;;  %v9933_v36 = vld [vmem:[#allocation5 + $0xf58] sm:$0xf0]  ;;  %v9924_v40 = vor.u32 %v12571_v27, %v9923_v26  ;;  %v12523_v26 = vld [vmem:[#allocation5 + $0xdcc] sm:$0xf0]  ;;  %v12515_v27 = vld [vmem:[#allocation5 + $0xd94] sm:$0xf] }
 0x33c   :  { %6940 = vmatpush.bf16.xpose.msra.mxu3 %v9664_v41  ;;  %v9928_v41 = vor.u32 %v12563_v45, %v9925_v29  ;;  %v9936_v44 = vor.u32 %v12564_v35, %v9933_v36  ;;  %v9733_v45 = vld [vmem:[#allocation5 + $0xdd0] sm:$0xf0]  ;;  %v9739_v29 = vld [vmem:[#allocation5 + $0xd98] sm:$0xf]  ;;  %v9741_v35 = vld [vmem:[#allocation5 + $0xdd8] sm:$0xf0] }
 0x342   :  { %6902 = vmatpush.bf16.xpose.msra.mxu0 %v9588_v53  ;;  %6915 = vmatpush.bf16.xpose.msra.mxu1 %v9592_v54  ;;  %v12548_v53 = vld [vmem:[#allocation5 + $0xe9c] sm:$0xf] }
 0x343   :  { %6928 = vmatpush.bf16.xpose.msra.mxu2 %v9596_v55  ;;  %v9869_v54 = vld [vmem:[#allocation5 + $0xed8] sm:$0xf0]  ;;  %v9860_v55 = vor.u32 %v12555_v47, %v9859_v46  ;;  %v9667_v47 = vld [vmem:[#allocation5 + $0xd10] sm:$0xf] }
 0x344   :  { %6941 = vmatpush.bf16.xpose.msra.mxu3 %v9600_v56  ;;  %v9864_v56 = vor.u32 %v12547_v32, %v9861_v49  ;;  %v9872_v58 = vor.u32 %v12548_v53, %v9869_v54  ;;  %v12507_v32 = vld [vmem:[#allocation5 + $0xd4c] sm:$0xf0]  ;;  %v12499_v49 = vld [vmem:[#allocation5 + $0xd14] sm:$0xf]  ;;  %v12508_v53 = vld [vmem:[#allocation5 + $0xd54] sm:$0xf0] }
 0x345   :  { %v12500_v54 = vld [vmem:[#allocation5 + $0xd1c] sm:$0xf] }
 0x34a   :  { %6903 = vmatpush.bf16.xpose.msra.mxu0 %v9524_v6  ;;  %6916 = vmatpush.bf16.xpose.msra.mxu1 %v9528_v10  ;;  %v12540_v6 = vld [vmem:[#allocation5 + $0xe54] sm:$0xf0] }
 0x34b   :  { %6929 = vmatpush.bf16.xpose.msra.mxu2 %v9532_v12  ;;  %v9800_v12 = vor.u32 %v12531_v1, %v9797_v3  ;;  %v9804_v13 = vor.u32 %v12540_v6, %v9803_v5  ;;  %v12492_v1 = vld [vmem:[#allocation5 + $0xcd4] sm:$0xf0]  ;;  %v12484_v3 = vld [vmem:[#allocation5 + $0xc9c] sm:$0xf] }
 0x34c   :  { %6942 = vmatpush.bf16.xpose.msra.mxu3 %v9536_v14  ;;  %v9613_v5 = vld [vmem:[#allocation5 + $0xcd8] sm:$0xf0] }
 0x34e   :  { %v6801_v59 = vpop.f32.mrf.mxu0  ;;  %v6814_v11 = vpop.f32.mrf.mxu1 }
 0x34f   :  { %v6802_v60 = vadd.f32 %v6801_v59, %v13381_v62  ;;  %v9808_v62 = vor.u32 %v12532_v7, %v9805_v8  ;;  %v9612_v8 = vor.u32 %v12492_v1, %v9611_v52  ;;  %v12549_v52 = vld [vmem:[#allocation5 + $0xea4] sm:$0xf] }
 0x350   :  { %v9877_v1 = vld [vmem:[#allocation5 + $0xee0] sm:$0xf0] }
 0x351   :  { %6904 = vmatmul.bf16.vlgmr.msra.gmra.mxu0 %v13263_v18  ;;  %6917 = vmatmul.bf16.vlgmr.msra.gmra.mxu1 %v13267_v21  ;;  %v6815_v0 = vadd.f32 %v6814_v11, %v6802_v60  ;;  %v9603_v60 = vld [vmem:[#allocation5 + $0xc90] sm:$0xf] }
 0x352   :  { %6948 = vmatpush.bf16.xpose.msrb.mxu0 %v9988_v16  ;;  %6961 = vmatpush.bf16.xpose.msrb.mxu1 %v9992_v19  ;;  %v12491_v11 = vld [vmem:[#allocation5 + $0xccc] sm:$0xf0] }
 0x353   :  { %6974 = vmatpush.bf16.xpose.msrb.mxu2 %v9996_v22  ;;  %6943 = vmatmul.bf16.vlgmr.msra.gmra.mxu3 %v13265_v20  ;;  %v9604_v6 = vor.u32 %v12491_v11, %v9603_v60 }
 0x354   :  { %6987 = vmatpush.bf16.xpose.msrb.mxu3 %v10000_v25  ;;  %6930 = vmatmul.bf16.vlgmr.msra.gmra.mxu2 %v13261_v17  ;;  %v9731_v25 = vld [vmem:[#allocation5 + $0xd90] sm:$0xf] }
 0x355   :  { %v9732_v36 = vor.u32 %v12523_v26, %v9731_v25  ;;  %v10003_v25 = vld [vmem:[#allocation5 + $0xfa0] sm:$0xf] }
 0x356   :  { %v6840_v14 = vpop.f32.mrf.mxu3  ;;  %v6803_v16 = vpop.f32.mrf.mxu0  ;;  %v12589_v26 = vld [vmem:[#allocation5 + $0xfdc] sm:$0xf0] }
 0x357   :  { %v6827_v10 = vpop.f32.mrf.mxu2  ;;  %v6816_v19 = vpop.f32.mrf.mxu1  ;;  %v12468_v16 = vld [vmem:[#allocation5 + $0xc1c] sm:$0xf] }
 0x358   :  { %v6828_v63 = vadd.f32 %v6827_v10, %v6815_v0  ;;  %v12483_v0 = vld [vmem:[#allocation5 + $0xc94] sm:$0xf]  ;;  %v9539_v10 = vld [vmem:[#allocation5 + $0xc10] sm:$0xf]  ;;  %v9549_v19 = vld [vmem:[#allocation5 + $0xc58] sm:$0xf0] }
 0x359   :  { %v9608_v7 = vor.u32 %v12483_v0, %v9605_v61  ;;  %v9875_v0 = vld [vmem:[#allocation5 + $0xea0] sm:$0xf] }
 0x35a   :  { %6949 = vmatpush.bf16.xpose.msrb.mxu0 %v9924_v40  ;;  %6962 = vmatpush.bf16.xpose.msrb.mxu1 %v9928_v41  ;;  %v13388_v22 = vadd.f32 %v6840_v14, %v6828_v63  ;;  %v9736_v40 = vor.u32 %v12515_v27, %v9733_v45  ;;  %v9740_v41 = vor.u32 %v12524_v30, %v9739_v29  ;;  %v9541_v63 = vld [vmem:[#allocation5 + $0xc50] sm:$0xf0]  ;;  %v12476_v14 = vld [vmem:[#allocation5 + $0xc54] sm:$0xf0]  ;;  %v12581_v27 = vld [vmem:[#allocation5 + $0xfa4] sm:$0xf] }
 0x35b   :  { %6975 = vmatpush.bf16.xpose.msrb.mxu2 %v9932_v57  ;;  %v10005_v29 = vld [vmem:[#allocation5 + $0xfe0] sm:$0xf0]  ;;  %v10011_v30 = vld [vmem:[#allocation5 + $0xfa8] sm:$0xf]  ;;  %v12557_v61 = vld [vmem:[#allocation5 + $0xedc] sm:$0xf0] }
 0x35c   :  { %6988 = vmatpush.bf16.xpose.msrb.mxu3 %v9936_v44  ;;  %v9744_v44 = vor.u32 %v12516_v31, %v9741_v35  ;;  %v12590_v31 = vld [vmem:[#allocation5 + $0xfe4] sm:$0xf0] }
 0x35e   :  { %v6842_v46 = vpop.f32.mrf.mxu3 }
 0x35f   :  { %v6829_v57 = vpop.f32.mrf.mxu2  ;;  %v10008_v46 = vor.u32 %v12581_v27, %v10005_v29  ;;  %v9819_v27 = vld [vmem:[#allocation5 + $0xe28] sm:$0xf]  ;;  %v12534_v29 = vld [vmem:[#allocation5 + $0xe2c] sm:$0xf] }
 0x360   :  { %v9552_v57 = vor.u32 %v12468_v16, %v9549_v19  ;;  %v9811_v16 = vld [vmem:[#allocation5 + $0xe20] sm:$0xf] }
 0x361   :  { %v12541_v19 = vld [vmem:[#allocation5 + $0xe5c] sm:$0xf0] }
 0x362   :  { %6950 = vmatpush.bf16.xpose.msrb.mxu0 %v9860_v55  ;;  %6963 = vmatpush.bf16.xpose.msrb.mxu1 %v9864_v56  ;;  %v9677_v55 = vld [vmem:[#allocation5 + $0xd58] sm:$0xf0]  ;;  %v9668_v56 = vor.u32 %v12507_v32, %v9667_v47  ;;  %v10012_v47 = vor.u32 %v12590_v31, %v10011_v30  ;;  %v9821_v30 = vld [vmem:[#allocation5 + $0xe68] sm:$0xf0]  ;;  %v9812_v31 = vor.u32 %v12541_v19, %v9811_v16  ;;  %v9621_v16 = vld [vmem:[#allocation5 + $0xce0] sm:$0xf0] }
 0x363   :  { %6976 = vmatpush.bf16.xpose.msrb.mxu2 %v9868_v2  ;;  %v9672_v2 = vor.u32 %v12499_v49, %v9669_v50  ;;  %v9680_v59 = vor.u32 %v12500_v54, %v9677_v55  ;;  %v9939_v49 = vld [vmem:[#allocation5 + $0xf20] sm:$0xf]  ;;  %v9947_v54 = vld [vmem:[#allocation5 + $0xf28] sm:$0xf] }
 0x364   :  { %6989 = vmatpush.bf16.xpose.msrb.mxu3 %v9872_v58  ;;  %v9676_v58 = vor.u32 %v12508_v53, %v9675_v51  ;;  %v12573_v50 = vld [vmem:[#allocation5 + $0xf5c] sm:$0xf0]  ;;  %v12565_v51 = vld [vmem:[#allocation5 + $0xf24] sm:$0xf]  ;;  %v12574_v55 = vld [vmem:[#allocation5 + $0xf64] sm:$0xf0] }
 0x365   :  { %v9941_v53 = vld [vmem:[#allocation5 + $0xf60] sm:$0xf0]  ;;  %v9948_v60 = vor.u32 %v12574_v55, %v9947_v54  ;;  %v12526_v54 = vld [vmem:[#allocation5 + $0xde4] sm:$0xf0]  ;;  %v12518_v55 = vld [vmem:[#allocation5 + $0xdac] sm:$0xf] }
 0x366   :  { %v9627_v19 = vld [vmem:[#allocation5 + $0xca8] sm:$0xf] }
 0x36a   :  { %6951 = vmatpush.bf16.xpose.msrb.mxu0 %v9796_v9  ;;  %6964 = vmatpush.bf16.xpose.msrb.mxu1 %v9800_v12  ;;  %v9616_v9 = vor.u32 %v12484_v3, %v9613_v5  ;;  %v12475_v12 = vld [vmem:[#allocation5 + $0xc4c] sm:$0xf0]  ;;  %v9883_v3 = vld [vmem:[#allocation5 + $0xea8] sm:$0xf] }
 0x36b   :  { %6977 = vmatpush.bf16.xpose.msrb.mxu2 %v9804_v13  ;;  %v12467_v13 = vld [vmem:[#allocation5 + $0xc14] sm:$0xf]  ;;  %v9540_v45 = vor.u32 %v12475_v12, %v9539_v10  ;;  %v12558_v5 = vld [vmem:[#allocation5 + $0xee4] sm:$0xf0] }
 0x36c   :  { %6990 = vmatpush.bf16.xpose.msrb.mxu3 %v9808_v62  ;;  %v9547_v62 = vld [vmem:[#allocation5 + $0xc18] sm:$0xf]  ;;  %v9544_v35 = vor.u32 %v12467_v13, %v9541_v63  ;;  %v9884_v10 = vor.u32 %v12558_v5, %v9883_v3  ;;  %v9685_v3 = vld [vmem:[#allocation5 + $0xd60] sm:$0xf0]  ;;  %v9691_v5 = vld [vmem:[#allocation5 + $0xd28] sm:$0xf] }
 0x372   :  { %6952 = vmatpush.bf16.xpose.msrb.mxu0 %v9732_v36  ;;  %6965 = vmatpush.bf16.xpose.msrb.mxu1 %v9736_v40  ;;  %v9548_v36 = vor.u32 %v12476_v14, %v9547_v62  ;;  %v12582_v40 = vld [vmem:[#allocation5 + $0xfac] sm:$0xf] }
 0x373   :  { %6978 = vmatpush.bf16.xpose.msrb.mxu2 %v9740_v41  ;;  %v10013_v41 = vld [vmem:[#allocation5 + $0xfe8] sm:$0xf0] }
 0x374   :  { %6991 = vmatpush.bf16.xpose.msrb.mxu3 %v9744_v44  ;;  %v10004_v44 = vor.u32 %v12589_v26, %v10003_v25  ;;  %v10016_v32 = vor.u32 %v12582_v40, %v10013_v41  ;;  %v12533_v25 = vld [vmem:[#allocation5 + $0xe24] sm:$0xf] }
 0x375   :  { %v9813_v26 = vld [vmem:[#allocation5 + $0xe60] sm:$0xf0] }
 0x37a   :  { %6953 = vmatpush.bf16.xpose.msrb.mxu0 %v9668_v56  ;;  %6966 = vmatpush.bf16.xpose.msrb.mxu1 %v9672_v2  ;;  %v12566_v56 = vld [vmem:[#allocation5 + $0xf2c] sm:$0xf] }
 0x37b   :  { %6979 = vmatpush.bf16.xpose.msrb.mxu2 %v9676_v58  ;;  %v9949_v2 = vld [vmem:[#allocation5 + $0xf68] sm:$0xf0]  ;;  %v9940_v58 = vor.u32 %v12573_v50, %v9939_v49  ;;  %v12525_v49 = vld [vmem:[#allocation5 + $0xddc] sm:$0xf0]  ;;  %v12517_v50 = vld [vmem:[#allocation5 + $0xda4] sm:$0xf] }
 0x37c   :  { %6992 = vmatpush.bf16.xpose.msrb.mxu3 %v9680_v59  ;;  %v9944_v59 = vor.u32 %v12565_v51, %v9941_v53  ;;  %v9952_v11 = vor.u32 %v12566_v56, %v9949_v2  ;;  %v9749_v51 = vld [vmem:[#allocation5 + $0xde0] sm:$0xf0]  ;;  %v9755_v53 = vld [vmem:[#allocation5 + $0xda8] sm:$0xf]  ;;  %v9757_v56 = vld [vmem:[#allocation5 + $0xde8] sm:$0xf0] }
 0x382   :  { %6954 = vmatpush.bf16.xpose.msrb.mxu0 %v9604_v6  ;;  %6967 = vmatpush.bf16.xpose.msrb.mxu1 %v9608_v7  ;;  %v12550_v6 = vld [vmem:[#allocation5 + $0xeac] sm:$0xf] }
 0x383   :  { %6980 = vmatpush.bf16.xpose.msrb.mxu2 %v9612_v8  ;;  %v9885_v7 = vld [vmem:[#allocation5 + $0xee8] sm:$0xf0]  ;;  %v9876_v8 = vor.u32 %v12557_v61, %v9875_v0  ;;  %v9683_v61 = vld [vmem:[#allocation5 + $0xd20] sm:$0xf] }
 0x384   :  { %6993 = vmatpush.bf16.xpose.msrb.mxu3 %v9616_v9  ;;  %v9880_v9 = vor.u32 %v12549_v52, %v9877_v1  ;;  %v9888_v12 = vor.u32 %v12550_v6, %v9885_v7  ;;  %v12509_v52 = vld [vmem:[#allocation5 + $0xd5c] sm:$0xf0]  ;;  %v12501_v1 = vld [vmem:[#allocation5 + $0xd24] sm:$0xf]  ;;  %v12510_v6 = vld [vmem:[#allocation5 + $0xd64] sm:$0xf0] }
 0x385   :  { %v12502_v7 = vld [vmem:[#allocation5 + $0xd2c] sm:$0xf] }
 0x38a   :  { %6955 = vmatpush.bf16.xpose.msrb.mxu0 %v9540_v45  ;;  %6968 = vmatpush.bf16.xpose.msrb.mxu1 %v9544_v35  ;;  %v12542_v45 = vld [vmem:[#allocation5 + $0xe64] sm:$0xf0] }
 0x38b   :  { %6981 = vmatpush.bf16.xpose.msrb.mxu2 %v9548_v36  ;;  %v9816_v36 = vor.u32 %v12533_v25, %v9813_v26  ;;  %v9820_v40 = vor.u32 %v12542_v45, %v9819_v27  ;;  %v12494_v25 = vld [vmem:[#allocation5 + $0xce4] sm:$0xf0]  ;;  %v12486_v26 = vld [vmem:[#allocation5 + $0xcac] sm:$0xf] }
 0x38c   :  { %6994 = vmatpush.bf16.xpose.msrb.mxu3 %v9552_v57  ;;  %v9629_v27 = vld [vmem:[#allocation5 + $0xce8] sm:$0xf0] }
 0x38e   :  { %v6853_v13 = vpop.f32.mrf.mxu0  ;;  %v6866_v62 = vpop.f32.mrf.mxu1 }
 0x38f   :  { %v6854_v63 = vadd.f32 %v6853_v13, %v13388_v22  ;;  %v9824_v22 = vor.u32 %v12534_v29, %v9821_v30  ;;  %v9628_v30 = vor.u32 %v12494_v25, %v9627_v19  ;;  %v12551_v19 = vld [vmem:[#allocation5 + $0xeb4] sm:$0xf] }
 0x390   :  { %v9893_v25 = vld [vmem:[#allocation5 + $0xef0] sm:$0xf0] }
 0x391   :  { %6956 = vmatmul.bf16.vlgmr.msrb.gmra.mxu0 %v13277_v33  ;;  %6969 = vmatmul.bf16.vlgmr.msrb.gmra.mxu1 %v13281_v38  ;;  %v6867_v14 = vadd.f32 %v6866_v62, %v6854_v63  ;;  %v9619_v63 = vld [vmem:[#allocation5 + $0xca0] sm:$0xf] }
 0x392   :  { %7000 = vmatpush.bf16.xpose.msra.mxu0 %v10004_v44  ;;  %7013 = vmatpush.bf16.xpose.msra.mxu1 %v10008_v46  ;;  %v12493_v62 = vld [vmem:[#allocation5 + $0xcdc] sm:$0xf0] }
 0x393   :  { %7026 = vmatpush.bf16.xpose.msra.mxu2 %v10012_v47  ;;  %6995 = vmatmul.bf16.vlgmr.msrb.gmra.mxu3 %v13283_v4  ;;  %v9620_v45 = vor.u32 %v12493_v62, %v9619_v63 }
 0x394   :  { %7039 = vmatpush.bf16.xpose.msra.mxu3 %v10016_v32  ;;  %6982 = vmatmul.bf16.vlgmr.msrb.gmra.mxu2 %v13279_v34  ;;  %v9747_v32 = vld [vmem:[#allocation5 + $0xda0] sm:$0xf] }
 0x395   :  { %v9748_v2 = vor.u32 %v12525_v49, %v9747_v32  ;;  %v10019_v32 = vld [vmem:[#allocation5 + $0xfb0] sm:$0xf] }
 0x396   :  { %v6892_v57 = vpop.f32.mrf.mxu3  ;;  %v6855_v44 = vpop.f32.mrf.mxu0  ;;  %v12591_v49 = vld [vmem:[#allocation5 + $0xfec] sm:$0xf0] }
 0x397   :  { %v6879_v35 = vpop.f32.mrf.mxu2  ;;  %v6868_v46 = vpop.f32.mrf.mxu1  ;;  %v12470_v44 = vld [vmem:[#allocation5 + $0xc2c] sm:$0xf] }
 0x398   :  { %v6880_v41 = vadd.f32 %v6879_v35, %v6867_v14  ;;  %v12485_v14 = vld [vmem:[#allocation5 + $0xca4] sm:$0xf]  ;;  %v9555_v35 = vld [vmem:[#allocation5 + $0xc20] sm:$0xf]  ;;  %v9565_v46 = vld [vmem:[#allocation5 + $0xc68] sm:$0xf0] }
 0x399   :  { %v9624_v29 = vor.u32 %v12485_v14, %v9621_v16  ;;  %v9891_v14 = vld [vmem:[#allocation5 + $0xeb0] sm:$0xf] }
 0x39a   :  { %7001 = vmatpush.bf16.xpose.msra.mxu0 %v9940_v58  ;;  %7014 = vmatpush.bf16.xpose.msra.mxu1 %v9944_v59  ;;  %v13395_v47 = vadd.f32 %v6892_v57, %v6880_v41  ;;  %v9752_v58 = vor.u32 %v12517_v50, %v9749_v51  ;;  %v9756_v59 = vor.u32 %v12526_v54, %v9755_v53  ;;  %v9557_v41 = vld [vmem:[#allocation5 + $0xc60] sm:$0xf0]  ;;  %v12478_v57 = vld [vmem:[#allocation5 + $0xc64] sm:$0xf0]  ;;  %v12583_v50 = vld [vmem:[#allocation5 + $0xfb4] sm:$0xf] }
 0x39b   :  { %7027 = vmatpush.bf16.xpose.msra.mxu2 %v9948_v60  ;;  %v10021_v53 = vld [vmem:[#allocation5 + $0xff0] sm:$0xf0]  ;;  %v10027_v54 = vld [vmem:[#allocation5 + $0xfb8] sm:$0xf]  ;;  %v12559_v16 = vld [vmem:[#allocation5 + $0xeec] sm:$0xf0] }
 0x39c   :  { %7040 = vmatpush.bf16.xpose.msra.mxu3 %v9952_v11  ;;  %v9760_v11 = vor.u32 %v12518_v55, %v9757_v56  ;;  %v12592_v55 = vld [vmem:[#allocation5 + $0xff4] sm:$0xf0] }
 0x39e   :  { %v6894_v0 = vpop.f32.mrf.mxu3 }
 0x39f   :  { %v6881_v60 = vpop.f32.mrf.mxu2  ;;  %v10024_v0 = vor.u32 %v12583_v50, %v10021_v53 }
 0x3a0   :  { %v9568_v60 = vor.u32 %v12470_v44, %v9565_v46  ;;  %v9835_v44 = vld [vmem:[#allocation5 + $0xe38] sm:$0xf] }
 0x3a1   :  { %v12544_v46 = vld [vmem:[#allocation5 + $0xe74] sm:$0xf0] }
 0x3a2   :  { %7002 = vmatpush.bf16.xpose.msra.mxu0 %v9876_v8  ;;  %7015 = vmatpush.bf16.xpose.msra.mxu1 %v9880_v9  ;;  %v9693_v8 = vld [vmem:[#allocation5 + $0xd68] sm:$0xf0]  ;;  %v9684_v9 = vor.u32 %v12509_v52, %v9683_v61  ;;  %v10028_v61 = vor.u32 %v12592_v55, %v10027_v54  ;;  %v9836_v53 = vor.u32 %v12544_v46, %v9835_v44  ;;  %v9763_v55 = vld [vmem:[#allocation5 + $0xdb0] sm:$0xf]  ;;  %v12487_v44 = vld [vmem:[#allocation5 + $0xcb4] sm:$0xf] }
 0x3a3   :  { %7028 = vmatpush.bf16.xpose.msra.mxu2 %v9884_v10  ;;  %v9688_v10 = vor.u32 %v12501_v1, %v9685_v3  ;;  %v9696_v13 = vor.u32 %v12502_v7, %v9693_v8  ;;  %v9955_v1 = vld [vmem:[#allocation5 + $0xf30] sm:$0xf]  ;;  %v9963_v7 = vld [vmem:[#allocation5 + $0xf38] sm:$0xf]  ;;  %v9637_v46 = vld [vmem:[#allocation5 + $0xcf0] sm:$0xf0] }
 0x3a4   :  { %7041 = vmatpush.bf16.xpose.msra.mxu3 %v9888_v12  ;;  %v9692_v12 = vor.u32 %v12510_v6, %v9691_v5  ;;  %v12575_v3 = vld [vmem:[#allocation5 + $0xf6c] sm:$0xf0]  ;;  %v12567_v5 = vld [vmem:[#allocation5 + $0xf34] sm:$0xf]  ;;  %v12576_v8 = vld [vmem:[#allocation5 + $0xf74] sm:$0xf0] }
 0x3a5   :  { %v9957_v6 = vld [vmem:[#allocation5 + $0xf70] sm:$0xf0]  ;;  %v9964_v63 = vor.u32 %v12576_v8, %v9963_v7 }
 0x3aa   :  { %7003 = vmatpush.bf16.xpose.msra.mxu0 %v9812_v31  ;;  %7016 = vmatpush.bf16.xpose.msra.mxu1 %v9816_v36  ;;  %v9632_v31 = vor.u32 %v12486_v26, %v9629_v27  ;;  %v12477_v36 = vld [vmem:[#allocation5 + $0xc5c] sm:$0xf0]  ;;  %v9899_v26 = vld [vmem:[#allocation5 + $0xeb8] sm:$0xf] }
 0x3ab   :  { %7029 = vmatpush.bf16.xpose.msra.mxu2 %v9820_v40  ;;  %v12469_v40 = vld [vmem:[#allocation5 + $0xc24] sm:$0xf]  ;;  %v9556_v51 = vor.u32 %v12477_v36, %v9555_v35  ;;  %v12560_v27 = vld [vmem:[#allocation5 + $0xef4] sm:$0xf0] }
 0x3ac   :  { %7042 = vmatpush.bf16.xpose.msra.mxu3 %v9824_v22  ;;  %v9563_v22 = vld [vmem:[#allocation5 + $0xc28] sm:$0xf]  ;;  %v9560_v56 = vor.u32 %v12469_v40, %v9557_v41  ;;  %v9900_v35 = vor.u32 %v12560_v27, %v9899_v26  ;;  %v9827_v40 = vld [vmem:[#allocation5 + $0xe30] sm:$0xf] }
 0x3ad   :  { %v12543_v41 = vld [vmem:[#allocation5 + $0xe6c] sm:$0xf0] }
 0x3ae   :  { %v9828_v50 = vor.u32 %v12543_v41, %v9827_v40 }
 0x3b2   :  { %7004 = vmatpush.bf16.xpose.msra.mxu0 %v9748_v2  ;;  %7017 = vmatpush.bf16.xpose.msra.mxu1 %v9752_v58  ;;  %v9564_v2 = vor.u32 %v12478_v57, %v9563_v22  ;;  %v12584_v58 = vld [vmem:[#allocation5 + $0xfbc] sm:$0xf]  ;;  %v12535_v22 = vld [vmem:[#allocation5 + $0xe34] sm:$0xf] }
 0x3b3   :  { %7030 = vmatpush.bf16.xpose.msra.mxu2 %v9756_v59  ;;  %v10029_v59 = vld [vmem:[#allocation5 + $0xff8] sm:$0xf0]  ;;  %v9829_v57 = vld [vmem:[#allocation5 + $0xe70] sm:$0xf0] }
 0x3b4   :  { %7043 = vmatpush.bf16.xpose.msra.mxu3 %v9760_v11  ;;  %v10020_v11 = vor.u32 %v12591_v49, %v10019_v32  ;;  %v10032_v52 = vor.u32 %v12584_v58, %v10029_v59  ;;  %v12536_v32 = vld [vmem:[#allocation5 + $0xe3c] sm:$0xf]  ;;  %v9765_v58 = vld [vmem:[#allocation5 + $0xdf0] sm:$0xf0]  ;;  %v9771_v59 = vld [vmem:[#allocation5 + $0xdb8] sm:$0xf] }
 0x3b5   :  { %v9837_v49 = vld [vmem:[#allocation5 + $0xe78] sm:$0xf0] }
 0x3b6   :  { %v9840_v54 = vor.u32 %v12536_v32, %v9837_v49  ;;  %v9643_v32 = vld [vmem:[#allocation5 + $0xcb8] sm:$0xf] }
 0x3b7   :  { %v12496_v49 = vld [vmem:[#allocation5 + $0xcf4] sm:$0xf0] }
 0x3ba   :  { %7005 = vmatpush.bf16.xpose.msra.mxu0 %v9684_v9  ;;  %7018 = vmatpush.bf16.xpose.msra.mxu1 %v9688_v10  ;;  %v12568_v9 = vld [vmem:[#allocation5 + $0xf3c] sm:$0xf] }
 0x3bb   :  { %7031 = vmatpush.bf16.xpose.msra.mxu2 %v9692_v12  ;;  %v9965_v10 = vld [vmem:[#allocation5 + $0xf78] sm:$0xf0]  ;;  %v9956_v12 = vor.u32 %v12575_v3, %v9955_v1 }
 0x3bc   :  { %7044 = vmatpush.bf16.xpose.msra.mxu3 %v9696_v13  ;;  %v9960_v13 = vor.u32 %v12567_v5, %v9957_v6  ;;  %v9968_v62 = vor.u32 %v12568_v9, %v9965_v10  ;;  %v9699_v10 = vld [vmem:[#allocation5 + $0xd30] sm:$0xf] }
 0x3c2   :  { %7006 = vmatpush.bf16.xpose.msra.mxu0 %v9620_v45  ;;  %7019 = vmatpush.bf16.xpose.msra.mxu1 %v9624_v29  ;;  %v12552_v45 = vld [vmem:[#allocation5 + $0xebc] sm:$0xf] }
 0x3c3   :  { %7032 = vmatpush.bf16.xpose.msra.mxu2 %v9628_v30  ;;  %v9901_v29 = vld [vmem:[#allocation5 + $0xef8] sm:$0xf0]  ;;  %v9892_v30 = vor.u32 %v12559_v16, %v9891_v14  ;;  %v9707_v14 = vld [vmem:[#allocation5 + $0xd38] sm:$0xf] }
 0x3c4   :  { %7045 = vmatpush.bf16.xpose.msra.mxu3 %v9632_v31  ;;  %v9896_v31 = vor.u32 %v12551_v19, %v9893_v25  ;;  %v9904_v36 = vor.u32 %v12552_v45, %v9901_v29  ;;  %v12512_v16 = vld [vmem:[#allocation5 + $0xd74] sm:$0xf0]  ;;  %v12504_v19 = vld [vmem:[#allocation5 + $0xd3c] sm:$0xf] }
 0x3c5   :  { %v9709_v25 = vld [vmem:[#allocation5 + $0xd78] sm:$0xf0] }
 0x3ca   :  { %7007 = vmatpush.bf16.xpose.msra.mxu0 %v9556_v51  ;;  %7020 = vmatpush.bf16.xpose.msra.mxu1 %v9560_v56  ;;  %v9832_v51 = vor.u32 %v12535_v22, %v9829_v57  ;;  %v12527_v56 = vld [vmem:[#allocation5 + $0xdec] sm:$0xf0] }
 0x3cb   :  { %7033 = vmatpush.bf16.xpose.msra.mxu2 %v9564_v2  ;;  %v12519_v2 = vld [vmem:[#allocation5 + $0xdb4] sm:$0xf]  ;;  %v9635_v22 = vld [vmem:[#allocation5 + $0xcb0] sm:$0xf] }
 0x3cc   :  { %7046 = vmatpush.bf16.xpose.msra.mxu3 %v9568_v60  ;;  %v12528_v60 = vld [vmem:[#allocation5 + $0xdf4] sm:$0xf0]  ;;  %v9768_v5 = vor.u32 %v12519_v2, %v9765_v58  ;;  %v12495_v57 = vld [vmem:[#allocation5 + $0xcec] sm:$0xf0]  ;;  %v9644_v2 = vor.u32 %v12496_v49, %v9643_v32  ;;  %v10355_v49 = vld [vmem:[#allocation5 + $0x1280] sm:$0xf] }
 0x3cd   :  { %v9772_v6 = vor.u32 %v12528_v60, %v9771_v59  ;;  %v9571_v59 = vld [vmem:[#allocation5 + $0xc30] sm:$0xf] }
 0x3ce   :  { %v6905_v3 = vpop.f32.mrf.mxu0  ;;  %v6918_v9 = vpop.f32.mrf.mxu1  ;;  %v12479_v60 = vld [vmem:[#allocation5 + $0xc6c] sm:$0xf0] }
 0x3d1   :  { %7008 = vmatmul.bf16.vlgmr.msra.gmra.mxu0 %v13295_v15  ;;  %7021 = vmatmul.bf16.vlgmr.msra.gmra.mxu1 %v13299_v24 }
 0x3d2   :  { %7052 = vmatpush.bf16.xpose.msrb.mxu0 %v10020_v11  ;;  %7065 = vmatpush.bf16.xpose.msrb.mxu1 %v10024_v0  ;;  %v12520_v11 = vld [vmem:[#allocation5 + $0xdbc] sm:$0xf] }
 0x3d3   :  { %7078 = vmatpush.bf16.xpose.msrb.mxu2 %v10028_v61  ;;  %7047 = vmatmul.bf16.vlgmr.msra.gmra.mxu3 %v13301_v28  ;;  %v9773_v0 = vld [vmem:[#allocation5 + $0xdf8] sm:$0xf0]  ;;  %v9764_v61 = vor.u32 %v12527_v56, %v9763_v55  ;;  %v9640_v56 = vor.u32 %v12487_v44, %v9637_v46 }
 0x3d4   :  { %7091 = vmatpush.bf16.xpose.msrb.mxu3 %v10032_v52  ;;  %7034 = vmatmul.bf16.vlgmr.msra.gmra.mxu2 %v13297_v23  ;;  %v13113_v52 = vld [vmem:[#allocation7] sm:$0xff]  ;;  %v9776_v7 = vor.u32 %v12520_v11, %v9773_v0  ;;  %v12471_v11 = vld [vmem:[#allocation5 + $0xc34] sm:$0xf] }
 0x3d5   :  { %v6259_v1 = vperm.slane %v13113_v52, 3  ;;  %v9573_v0 = vld [vmem:[#allocation5 + $0xc70] sm:$0xf0]  ;;  %v12480_v52 = vld [vmem:[#allocation5 + $0xc74] sm:$0xf0] }
 0x3d6   :  { %v6944_v45 = vpop.f32.mrf.mxu3  ;;  %v6920_v41 = vpop.f32.mrf.mxu1 }
 0x3d7   :  { %v6906_v8 = vadd.f32 %v6905_v3, %v6259_v1  ;;  %v6931_v27 = vpop.f32.mrf.mxu2  ;;  %v12472_v1 = vld [vmem:[#allocation5 + $0xc3c] sm:$0xf]  ;;  %v12690_v41 = vld [vmem:[#allocation5 + $0x130c] sm:$0xf] }
 0x3d8   :  { %v9581_v3 = vld [vmem:[#allocation5 + $0xc78] sm:$0xf0] }
 0x3da   :  { %7053 = vmatpush.bf16.xpose.msrb.mxu0 %v9956_v12  ;;  %7066 = vmatpush.bf16.xpose.msrb.mxu1 %v9960_v13  ;;  %v12511_v12 = vld [vmem:[#allocation5 + $0xd6c] sm:$0xf0]  ;;  %v12503_v13 = vld [vmem:[#allocation5 + $0xd34] sm:$0xf] }
 0x3db   :  { %7079 = vmatpush.bf16.xpose.msrb.mxu2 %v9964_v63  ;;  %v6919_v63 = vadd.f32 %v6918_v9, %v6906_v8  ;;  %v9700_v26 = vor.u32 %v12511_v12, %v9699_v10  ;;  %v9572_v8 = vor.u32 %v12479_v60, %v9571_v59  ;;  %v10485_v9 = vld [vmem:[#allocation5 + $0x13c0] sm:$0xf0]  ;;  %v10491_v10 = vld [vmem:[#allocation5 + $0x1388] sm:$0xf] }
 0x3dc   :  { %7092 = vmatpush.bf16.xpose.msrb.mxu3 %v9968_v62  ;;  %v9701_v62 = vld [vmem:[#allocation5 + $0xd70] sm:$0xf0]  ;;  %v12714_v12 = vld [vmem:[#allocation5 + $0x13c4] sm:$0xf0] }
 0x3dd   :  { %v9704_v29 = vor.u32 %v12503_v13, %v9701_v62  ;;  %v9576_v13 = vor.u32 %v12471_v11, %v9573_v0  ;;  %v12706_v62 = vld [vmem:[#allocation5 + $0x138c] sm:$0xf] }
 0x3de   :  { %v6946_v55 = vpop.f32.mrf.mxu3 }
 0x3df   :  { %v12682_v55 = vld [vmem:[#allocation5 + $0x12c4] sm:$0xf0] }
 0x3e2   :  { %7054 = vmatpush.bf16.xpose.msrb.mxu0 %v9892_v30  ;;  %7067 = vmatpush.bf16.xpose.msrb.mxu1 %v9896_v31  ;;  %v9708_v30 = vor.u32 %v12512_v16, %v9707_v14  ;;  %v6932_v31 = vadd.f32 %v6931_v27, %v6919_v63  ;;  %v10493_v14 = vld [vmem:[#allocation5 + $0x13c8] sm:$0xf0]  ;;  %v9584_v16 = vor.u32 %v12472_v1, %v9581_v3  ;;  %v10291_v3 = vld [vmem:[#allocation5 + $0x1200] sm:$0xf] }
 0x3e3   :  { %7080 = vmatpush.bf16.xpose.msrb.mxu2 %v9900_v35  ;;  %v6907_v35 = vpop.f32.mrf.mxu0  ;;  %v10496_v27 = vor.u32 %v12706_v62, %v10493_v14 }
 0x3e4   :  { %7093 = vmatpush.bf16.xpose.msrb.mxu3 %v9904_v36  ;;  %v9712_v36 = vor.u32 %v12504_v19, %v9709_v25  ;;  %v13401_v40 = vadd.f32 %v6944_v45, %v6932_v31  ;;  %v10419_v45 = vld [vmem:[#allocation5 + $0x1300] sm:$0xf]  ;;  %v10421_v31 = vld [vmem:[#allocation5 + $0x1340] sm:$0xf0]  ;;  %v10427_v35 = vld [vmem:[#allocation5 + $0x1308] sm:$0xf] }
 0x3ea   :  { %7055 = vmatpush.bf16.xpose.msrb.mxu0 %v9828_v50  ;;  %7068 = vmatpush.bf16.xpose.msrb.mxu1 %v9832_v51  ;;  %v12488_v50 = vld [vmem:[#allocation5 + $0xcbc] sm:$0xf] }
 0x3eb   :  { %7081 = vmatpush.bf16.xpose.msrb.mxu2 %v9836_v53  ;;  %v9645_v51 = vld [vmem:[#allocation5 + $0xcf8] sm:$0xf0]  ;;  %v9636_v53 = vor.u32 %v12495_v57, %v9635_v22  ;;  %v10429_v22 = vld [vmem:[#allocation5 + $0x1348] sm:$0xf0] }
 0x3ec   :  { %7094 = vmatpush.bf16.xpose.msrb.mxu3 %v9840_v54  ;;  %v6933_v54 = vpop.f32.mrf.mxu2  ;;  %v9648_v58 = vor.u32 %v12488_v50, %v9645_v51  ;;  %v10432_v32 = vor.u32 %v12690_v41, %v10429_v22  ;;  %v12681_v50 = vld [vmem:[#allocation5 + $0x12bc] sm:$0xf0]  ;;  %v12673_v51 = vld [vmem:[#allocation5 + $0x1284] sm:$0xf]  ;;  %v12642_v41 = vld [vmem:[#allocation5 + $0x118c] sm:$0xf] }
 0x3ed   :  { %v10363_v54 = vld [vmem:[#allocation5 + $0x1288] sm:$0xf]  ;;  %v10237_v22 = vld [vmem:[#allocation5 + $0x11c8] sm:$0xf0] }
 0x3ee   :  { %v10364_v60 = vor.u32 %v12682_v55, %v10363_v54  ;;  %v12625_v54 = vld [vmem:[#allocation5 + $0x1104] sm:$0xf] }
 0x3ef   :  { %v10165_v55 = vld [vmem:[#allocation5 + $0x1140] sm:$0xf0] }
 0x3f2   :  { %7056 = vmatpush.bf16.xpose.msrb.mxu0 %v9764_v61  ;;  %7069 = vmatpush.bf16.xpose.msrb.mxu1 %v9768_v5  ;;  %v9579_v61 = vld [vmem:[#allocation5 + $0xc38] sm:$0xf]  ;;  %v10483_v5 = vld [vmem:[#allocation5 + $0x1380] sm:$0xf] }
 0x3f3   :  { %7082 = vmatpush.bf16.xpose.msrb.mxu2 %v9772_v6  ;;  %v12713_v6 = vld [vmem:[#allocation5 + $0x13bc] sm:$0xf0]  ;;  %v9580_v63 = vor.u32 %v12480_v52, %v9579_v61 }
 0x3f4   :  { %7095 = vmatpush.bf16.xpose.msrb.mxu3 %v9776_v7  ;;  %v12705_v7 = vld [vmem:[#allocation5 + $0x1384] sm:$0xf]  ;;  %v10484_v19 = vor.u32 %v12713_v6, %v10483_v5  ;;  %v12665_v5 = vld [vmem:[#allocation5 + $0x123c] sm:$0xf0] }
 0x3f5   :  { %v10488_v25 = vor.u32 %v12705_v7, %v10485_v9  ;;  %v12657_v6 = vld [vmem:[#allocation5 + $0x1204] sm:$0xf]  ;;  %v12666_v9 = vld [vmem:[#allocation5 + $0x1244] sm:$0xf0] }
 0x3f6   :  { %v10293_v7 = vld [vmem:[#allocation5 + $0x1240] sm:$0xf0] }
 0x3fa   :  { %7057 = vmatpush.bf16.xpose.msrb.mxu0 %v9700_v26  ;;  %7070 = vmatpush.bf16.xpose.msrb.mxu1 %v9704_v29  ;;  %v10492_v26 = vor.u32 %v12714_v12, %v10491_v10  ;;  %v12697_v29 = vld [vmem:[#allocation5 + $0x133c] sm:$0xf0]  ;;  %v12658_v10 = vld [vmem:[#allocation5 + $0x120c] sm:$0xf] }
 0x3fb   :  { %7083 = vmatpush.bf16.xpose.msrb.mxu2 %v9708_v30  ;;  %v12689_v30 = vld [vmem:[#allocation5 + $0x1304] sm:$0xf]  ;;  %v10420_v57 = vor.u32 %v12697_v29, %v10419_v45  ;;  %v10301_v12 = vld [vmem:[#allocation5 + $0x1248] sm:$0xf0]  ;;  %v10227_v45 = vld [vmem:[#allocation5 + $0x1180] sm:$0xf] }
 0x3fc   :  { %7096 = vmatpush.bf16.xpose.msrb.mxu3 %v9712_v36  ;;  %v12698_v36 = vld [vmem:[#allocation5 + $0x1344] sm:$0xf0]  ;;  %v10424_v44 = vor.u32 %v12689_v30, %v10421_v31  ;;  %v12649_v29 = vld [vmem:[#allocation5 + $0x11bc] sm:$0xf0]  ;;  %v12641_v30 = vld [vmem:[#allocation5 + $0x1184] sm:$0xf] }
 0x3fd   :  { %v10428_v46 = vor.u32 %v12698_v36, %v10427_v35  ;;  %v10229_v31 = vld [vmem:[#allocation5 + $0x11c0] sm:$0xf0]  ;;  %v10235_v35 = vld [vmem:[#allocation5 + $0x1188] sm:$0xf] }
 0x3fe   :  { %v12650_v36 = vld [vmem:[#allocation5 + $0x11c4] sm:$0xf0] }
 0x402   :  { %7058 = vmatpush.bf16.xpose.msrb.mxu0 %v9636_v53  ;;  %7071 = vmatpush.bf16.xpose.msrb.mxu1 %v9640_v56  ;;  %v10357_v53 = vld [vmem:[#allocation5 + $0x12c0] sm:$0xf0]  ;;  %v12674_v56 = vld [vmem:[#allocation5 + $0x128c] sm:$0xf] }
 0x403   :  { %7084 = vmatpush.bf16.xpose.msrb.mxu2 %v9644_v2  ;;  %v10365_v2 = vld [vmem:[#allocation5 + $0x12c8] sm:$0xf0]  ;;  %v10360_v59 = vor.u32 %v12673_v51, %v10357_v53  ;;  %v10163_v51 = vld [vmem:[#allocation5 + $0x1100] sm:$0xf] }
 0x404   :  { %7097 = vmatpush.bf16.xpose.msrb.mxu3 %v9648_v58  ;;  %v10356_v58 = vor.u32 %v12681_v50, %v10355_v49  ;;  %v10368_v11 = vor.u32 %v12674_v56, %v10365_v2  ;;  %v10240_v49 = vor.u32 %v12642_v41, %v10237_v22  ;;  %v12633_v53 = vld [vmem:[#allocation5 + $0x113c] sm:$0xf0]  ;;  %v10171_v56 = vld [vmem:[#allocation5 + $0x1108] sm:$0xf]  ;;  %v10507_v41 = vld [vmem:[#allocation5 + $0x1398] sm:$0xf] }
 0x405   :  { %v12634_v2 = vld [vmem:[#allocation5 + $0x1144] sm:$0xf0]  ;;  %v12716_v22 = vld [vmem:[#allocation5 + $0x13d4] sm:$0xf0] }
 0x40a   :  { %7059 = vmatpush.bf16.xpose.msrb.mxu0 %v9572_v8  ;;  %7072 = vmatpush.bf16.xpose.msrb.mxu1 %v9576_v13  ;;  %v10299_v8 = vld [vmem:[#allocation5 + $0x1208] sm:$0xf]  ;;  %v10292_v13 = vor.u32 %v12665_v5, %v10291_v3  ;;  %v12609_v3 = vld [vmem:[#allocation5 + $0x1084] sm:$0xf] }
 0x40b   :  { %7085 = vmatpush.bf16.xpose.msrb.mxu2 %v9580_v63  ;;  %v10296_v63 = vor.u32 %v12657_v6, %v10293_v7  ;;  %v10300_v62 = vor.u32 %v12666_v9, %v10299_v8  ;;  %v10101_v5 = vld [vmem:[#allocation5 + $0x10c0] sm:$0xf0]  ;;  %v10107_v6 = vld [vmem:[#allocation5 + $0x1088] sm:$0xf]  ;;  %v12610_v8 = vld [vmem:[#allocation5 + $0x108c] sm:$0xf] }
 0x40c   :  { %7098 = vmatpush.bf16.xpose.msrb.mxu3 %v9584_v16  ;;  %v10304_v16 = vor.u32 %v12658_v10, %v10301_v12  ;;  %v12618_v7 = vld [vmem:[#allocation5 + $0x10c4] sm:$0xf0]  ;;  %v10109_v9 = vld [vmem:[#allocation5 + $0x10c8] sm:$0xf0]  ;;  %v10104_v12 = vor.u32 %v12609_v3, %v10101_v5  ;;  %v10371_v5 = vld [vmem:[#allocation5 + $0x1290] sm:$0xf] }
 0x40e   :  { %v6957_v0 = vpop.f32.mrf.mxu0  ;;  %v6970_v52 = vpop.f32.mrf.mxu1 }
 0x40f   :  { %v6958_v61 = vadd.f32 %v6957_v0, %v13401_v40  ;;  %v10172_v0 = vor.u32 %v12634_v2, %v10171_v56  ;;  %v12699_v56 = vld [vmem:[#allocation5 + $0x134c] sm:$0xf0]  ;;  %v12691_v2 = vld [vmem:[#allocation5 + $0x1314] sm:$0xf] }
 0x411   :  { %7060 = vmatmul.bf16.vlgmr.msrb.gmra.mxu0 %v13313_v37  ;;  %7073 = vmatmul.bf16.vlgmr.msrb.gmra.mxu1 %v13317_v43  ;;  %v6971_v1 = vadd.f32 %v6970_v52, %v6958_v61  ;;  %v10099_v52 = vld [vmem:[#allocation5 + $0x1080] sm:$0xf] }
 0x412   :  { %7104 = vmatpush.bf16.xpose.msra.mxu0 %v10484_v19  ;;  %7117 = vmatpush.bf16.xpose.msra.mxu1 %v10488_v25 }
 0x413   :  { %7130 = vmatpush.bf16.xpose.msra.mxu2 %v10492_v26  ;;  %7099 = vmatmul.bf16.vlgmr.msrb.gmra.mxu3 %v13319_v48 }
 0x414   :  { %7143 = vmatpush.bf16.xpose.msra.mxu3 %v10496_v27  ;;  %7086 = vmatmul.bf16.vlgmr.msrb.gmra.mxu2 %v13315_v42 }
 0x416   :  { %v6996_v19 = vpop.f32.mrf.mxu3  ;;  %v6959_v25 = vpop.f32.mrf.mxu0 }
 0x417   :  { %v6983_v14 = vpop.f32.mrf.mxu2  ;;  %v6972_v26 = vpop.f32.mrf.mxu1  ;;  %v12602_v25 = vld [vmem:[#allocation5 + $0x1044] sm:$0xf0] }
 0x418   :  { %v6984_v40 = vadd.f32 %v6983_v14, %v6971_v1  ;;  %v12617_v1 = vld [vmem:[#allocation5 + $0x10bc] sm:$0xf0]  ;;  %v12594_v26 = vld [vmem:[#allocation5 + $0x100c] sm:$0xf] }
 0x419   :  { %v10100_v10 = vor.u32 %v12617_v1, %v10099_v52  ;;  %v12601_v14 = vld [vmem:[#allocation5 + $0x103c] sm:$0xf0] }
 0x41a   :  { %7105 = vmatpush.bf16.xpose.msra.mxu0 %v10420_v57  ;;  %7118 = vmatpush.bf16.xpose.msra.mxu1 %v10424_v44  ;;  %v13408_v27 = vadd.f32 %v6996_v19, %v6984_v40  ;;  %v10228_v57 = vor.u32 %v12649_v29, %v10227_v45  ;;  %v10232_v44 = vor.u32 %v12641_v30, %v10229_v31  ;;  %v10037_v40 = vld [vmem:[#allocation5 + $0x1040] sm:$0xf0]  ;;  %v10043_v19 = vld [vmem:[#allocation5 + $0x1008] sm:$0xf]  ;;  %v10045_v45 = vld [vmem:[#allocation5 + $0x1048] sm:$0xf0] }
 0x41b   :  { %7131 = vmatpush.bf16.xpose.msra.mxu2 %v10428_v46  ;;  %v10236_v46 = vor.u32 %v12650_v36, %v10235_v35  ;;  %v10499_v29 = vld [vmem:[#allocation5 + $0x1390] sm:$0xf]  ;;  %v12707_v31 = vld [vmem:[#allocation5 + $0x1394] sm:$0xf] }
 0x41c   :  { %7144 = vmatpush.bf16.xpose.msra.mxu3 %v10432_v32  ;;  %v12715_v30 = vld [vmem:[#allocation5 + $0x13cc] sm:$0xf0]  ;;  %v10501_v36 = vld [vmem:[#allocation5 + $0x13d0] sm:$0xf0] }
 0x41e   :  { %v6998_v50 = vpop.f32.mrf.mxu3 }
 0x41f   :  { %v6985_v32 = vpop.f32.mrf.mxu2  ;;  %v10500_v50 = vor.u32 %v12715_v30, %v10499_v29  ;;  %v12667_v29 = vld [vmem:[#allocation5 + $0x124c] sm:$0xf0]  ;;  %v12659_v30 = vld [vmem:[#allocation5 + $0x1214] sm:$0xf] }
 0x420   :  { %v10509_v32 = vld [vmem:[#allocation5 + $0x13d8] sm:$0xf0] }
 0x422   :  { %7106 = vmatpush.bf16.xpose.msra.mxu0 %v10356_v58  ;;  %7119 = vmatpush.bf16.xpose.msra.mxu1 %v10360_v59  ;;  %v12626_v58 = vld [vmem:[#allocation5 + $0x110c] sm:$0xf] }
 0x423   :  { %7132 = vmatpush.bf16.xpose.msra.mxu2 %v10364_v60  ;;  %v10173_v59 = vld [vmem:[#allocation5 + $0x1148] sm:$0xf0]  ;;  %v10164_v60 = vor.u32 %v12633_v53, %v10163_v51  ;;  %v10504_v51 = vor.u32 %v12707_v31, %v10501_v36  ;;  %v10508_v53 = vor.u32 %v12716_v22, %v10507_v41  ;;  %v10309_v31 = vld [vmem:[#allocation5 + $0x1250] sm:$0xf0]  ;;  %v12668_v36 = vld [vmem:[#allocation5 + $0x1254] sm:$0xf0] }
 0x424   :  { %7145 = vmatpush.bf16.xpose.msra.mxu3 %v10368_v11  ;;  %v10168_v11 = vor.u32 %v12625_v54, %v10165_v55  ;;  %v10176_v61 = vor.u32 %v12626_v58, %v10173_v59  ;;  %v10435_v55 = vld [vmem:[#allocation5 + $0x1310] sm:$0xf]  ;;  %v10437_v58 = vld [vmem:[#allocation5 + $0x1350] sm:$0xf0]  ;;  %v10443_v59 = vld [vmem:[#allocation5 + $0x1318] sm:$0xf] }
 0x425   :  { %v10440_v52 = vor.u32 %v12691_v2, %v10437_v58  ;;  %v12660_v41 = vld [vmem:[#allocation5 + $0x121c] sm:$0xf]  ;;  %v12643_v2 = vld [vmem:[#allocation5 + $0x1194] sm:$0xf] }
 0x426   :  { %v10317_v22 = vld [vmem:[#allocation5 + $0x1258] sm:$0xf0]  ;;  %v10245_v58 = vld [vmem:[#allocation5 + $0x11d0] sm:$0xf0] }
 0x42a   :  { %7107 = vmatpush.bf16.xpose.msra.mxu0 %v10292_v13  ;;  %7120 = vmatpush.bf16.xpose.msra.mxu1 %v10296_v63  ;;  %v10108_v13 = vor.u32 %v12618_v7, %v10107_v6  ;;  %v10112_v63 = vor.u32 %v12610_v8, %v10109_v9  ;;  %v12683_v6 = vld [vmem:[#allocation5 + $0x12cc] sm:$0xf0]  ;;  %v12675_v7 = vld [vmem:[#allocation5 + $0x1294] sm:$0xf]  ;;  %v10379_v9 = vld [vmem:[#allocation5 + $0x1298] sm:$0xf] }
 0x42b   :  { %7133 = vmatpush.bf16.xpose.msra.mxu2 %v10300_v62  ;;  %v10035_v62 = vld [vmem:[#allocation5 + $0x1000] sm:$0xf]  ;;  %v10373_v8 = vld [vmem:[#allocation5 + $0x12d0] sm:$0xf0] }
 0x42c   :  { %7146 = vmatpush.bf16.xpose.msra.mxu3 %v10304_v16  ;;  %v12593_v16 = vld [vmem:[#allocation5 + $0x1004] sm:$0xf]  ;;  %v10036_v35 = vor.u32 %v12601_v14, %v10035_v62  ;;  %v10376_v62 = vor.u32 %v12675_v7, %v10373_v8  ;;  %v10179_v7 = vld [vmem:[#allocation5 + $0x1110] sm:$0xf] }
 0x42d   :  { %v12635_v8 = vld [vmem:[#allocation5 + $0x114c] sm:$0xf0] }
 0x432   :  { %7108 = vmatpush.bf16.xpose.msra.mxu0 %v10228_v57  ;;  %7121 = vmatpush.bf16.xpose.msra.mxu1 %v10232_v44  ;;  %v10040_v57 = vor.u32 %v12593_v16, %v10037_v40  ;;  %v10044_v44 = vor.u32 %v12602_v25, %v10043_v19 }
 0x433   :  { %7134 = vmatpush.bf16.xpose.msra.mxu2 %v10236_v46  ;;  %v12708_v46 = vld [vmem:[#allocation5 + $0x139c] sm:$0xf] }
 0x434   :  { %7147 = vmatpush.bf16.xpose.msra.mxu3 %v10240_v49  ;;  %v10048_v49 = vor.u32 %v12594_v26, %v10045_v45  ;;  %v10512_v54 = vor.u32 %v12708_v46, %v10509_v32  ;;  %v10307_v45 = vld [vmem:[#allocation5 + $0x1210] sm:$0xf]  ;;  %v10312_v46 = vor.u32 %v12659_v30, %v10309_v31  ;;  %v10123_v30 = vld [vmem:[#allocation5 + $0x1098] sm:$0xf] }
 0x435   :  { %v12620_v31 = vld [vmem:[#allocation5 + $0x10d4] sm:$0xf0] }
 0x43a   :  { %7109 = vmatpush.bf16.xpose.msra.mxu0 %v10164_v60  ;;  %7122 = vmatpush.bf16.xpose.msra.mxu1 %v10168_v11  ;;  %v12700_v60 = vld [vmem:[#allocation5 + $0x1354] sm:$0xf0]  ;;  %v12692_v11 = vld [vmem:[#allocation5 + $0x131c] sm:$0xf] }
 0x43b   :  { %7135 = vmatpush.bf16.xpose.msra.mxu2 %v10172_v0  ;;  %v10445_v0 = vld [vmem:[#allocation5 + $0x1358] sm:$0xf0]  ;;  %v10444_v1 = vor.u32 %v12700_v60, %v10443_v59  ;;  %v10251_v59 = vld [vmem:[#allocation5 + $0x1198] sm:$0xf] }
 0x43c   :  { %7148 = vmatpush.bf16.xpose.msra.mxu3 %v10176_v61  ;;  %v10436_v61 = vor.u32 %v12699_v56, %v10435_v55  ;;  %v10448_v3 = vor.u32 %v12692_v11, %v10445_v0  ;;  %v10243_v55 = vld [vmem:[#allocation5 + $0x1190] sm:$0xf]  ;;  %v12652_v60 = vld [vmem:[#allocation5 + $0x11d4] sm:$0xf0]  ;;  %v12644_v11 = vld [vmem:[#allocation5 + $0x119c] sm:$0xf] }
 0x43d   :  { %v12651_v56 = vld [vmem:[#allocation5 + $0x11cc] sm:$0xf0]  ;;  %v10253_v0 = vld [vmem:[#allocation5 + $0x11d8] sm:$0xf0] }
 0x442   :  { %7110 = vmatpush.bf16.xpose.msra.mxu0 %v10100_v10  ;;  %7123 = vmatpush.bf16.xpose.msra.mxu1 %v10104_v12  ;;  %v12684_v10 = vld [vmem:[#allocation5 + $0x12d4] sm:$0xf0]  ;;  %v12676_v12 = vld [vmem:[#allocation5 + $0x129c] sm:$0xf] }
 0x443   :  { %7136 = vmatpush.bf16.xpose.msra.mxu2 %v10108_v13  ;;  %v10381_v13 = vld [vmem:[#allocation5 + $0x12d8] sm:$0xf0]  ;;  %v10380_v14 = vor.u32 %v12684_v10, %v10379_v9  ;;  %v12627_v9 = vld [vmem:[#allocation5 + $0x1114] sm:$0xf] }
 0x444   :  { %7149 = vmatpush.bf16.xpose.msra.mxu3 %v10112_v63  ;;  %v10372_v63 = vor.u32 %v12683_v6, %v10371_v5  ;;  %v10384_v16 = vor.u32 %v12676_v12, %v10381_v13  ;;  %v10256_v5 = vor.u32 %v12644_v11, %v10253_v0  ;;  %v10181_v10 = vld [vmem:[#allocation5 + $0x1150] sm:$0xf0]  ;;  %v10187_v12 = vld [vmem:[#allocation5 + $0x1118] sm:$0xf]  ;;  %v10523_v11 = vld [vmem:[#allocation5 + $0x13a8] sm:$0xf] }
 0x445   :  { %v12636_v13 = vld [vmem:[#allocation5 + $0x1154] sm:$0xf0]  ;;  %v12718_v0 = vld [vmem:[#allocation5 + $0x13e4] sm:$0xf0] }
 0x44a   :  { %7111 = vmatpush.bf16.xpose.msra.mxu0 %v10036_v35  ;;  %7124 = vmatpush.bf16.xpose.msra.mxu1 %v10040_v57  ;;  %v10315_v35 = vld [vmem:[#allocation5 + $0x1218] sm:$0xf]  ;;  %v10308_v57 = vor.u32 %v12667_v29, %v10307_v45  ;;  %v12611_v45 = vld [vmem:[#allocation5 + $0x1094] sm:$0xf] }
 0x44b   :  { %7137 = vmatpush.bf16.xpose.msra.mxu2 %v10044_v44  ;;  %v10316_v32 = vor.u32 %v12668_v36, %v10315_v35  ;;  %v10117_v29 = vld [vmem:[#allocation5 + $0x10d0] sm:$0xf0]  ;;  %v12612_v35 = vld [vmem:[#allocation5 + $0x109c] sm:$0xf] }
 0x44c   :  { %7150 = vmatpush.bf16.xpose.msra.mxu3 %v10048_v49  ;;  %v10125_v36 = vld [vmem:[#allocation5 + $0x10d8] sm:$0xf0] }
 0x44e   :  { %v7009_v40 = vpop.f32.mrf.mxu0  ;;  %v7022_v25 = vpop.f32.mrf.mxu1 }
 0x44f   :  { %v7010_v19 = vadd.f32 %v7009_v40, %v13408_v27  ;;  %v10320_v27 = vor.u32 %v12660_v41, %v10317_v22  ;;  %v10188_v40 = vor.u32 %v12636_v13, %v10187_v12  ;;  %v10120_v22 = vor.u32 %v12611_v45, %v10117_v29  ;;  %v12701_v12 = vld [vmem:[#allocation5 + $0x135c] sm:$0xf0]  ;;  %v12693_v13 = vld [vmem:[#allocation5 + $0x1324] sm:$0xf] }
 0x450   :  { %v10387_v29 = vld [vmem:[#allocation5 + $0x12a0] sm:$0xf] }
 0x451   :  { %7112 = vmatmul.bf16.vlgmr.msra.gmra.mxu0 %v13263_v18  ;;  %7125 = vmatmul.bf16.vlgmr.msra.gmra.mxu1 %v13267_v21  ;;  %v7023_v26 = vadd.f32 %v7022_v25, %v7010_v19  ;;  %v10115_v25 = vld [vmem:[#allocation5 + $0x1090] sm:$0xf] }
 0x452   :  { %7156 = vmatpush.bf16.xpose.msrb.mxu0 %v10500_v50  ;;  %7169 = vmatpush.bf16.xpose.msrb.mxu1 %v10504_v51 }
 0x453   :  { %7182 = vmatpush.bf16.xpose.msrb.mxu2 %v10508_v53  ;;  %7151 = vmatmul.bf16.vlgmr.msra.gmra.mxu3 %v13265_v20 }
 0x454   :  { %7195 = vmatpush.bf16.xpose.msrb.mxu3 %v10512_v54  ;;  %7138 = vmatmul.bf16.vlgmr.msra.gmra.mxu2 %v13261_v17 }
 0x456   :  { %v7048_v50 = vpop.f32.mrf.mxu3  ;;  %v7011_v51 = vpop.f32.mrf.mxu0 }
 0x457   :  { %v7035_v44 = vpop.f32.mrf.mxu2  ;;  %v7024_v53 = vpop.f32.mrf.mxu1  ;;  %v12604_v51 = vld [vmem:[#allocation5 + $0x1054] sm:$0xf0] }
 0x458   :  { %v7036_v49 = vadd.f32 %v7035_v44, %v7023_v26  ;;  %v12619_v26 = vld [vmem:[#allocation5 + $0x10cc] sm:$0xf0]  ;;  %v10128_v44 = vor.u32 %v12612_v35, %v10125_v36  ;;  %v12596_v53 = vld [vmem:[#allocation5 + $0x101c] sm:$0xf]  ;;  %v10389_v35 = vld [vmem:[#allocation5 + $0x12e0] sm:$0xf0] }
 0x459   :  { %v10116_v41 = vor.u32 %v12619_v26, %v10115_v25  ;;  %v10395_v36 = vld [vmem:[#allocation5 + $0x12a8] sm:$0xf] }
 0x45a   :  { %7157 = vmatpush.bf16.xpose.msrb.mxu0 %v10436_v61  ;;  %7170 = vmatpush.bf16.xpose.msrb.mxu1 %v10440_v52  ;;  %v13415_v54 = vadd.f32 %v7048_v50, %v7036_v49  ;;  %v10244_v61 = vor.u32 %v12651_v56, %v10243_v55  ;;  %v10248_v52 = vor.u32 %v12643_v2, %v10245_v58  ;;  %v12595_v49 = vld [vmem:[#allocation5 + $0x1014] sm:$0xf]  ;;  %v10059_v50 = vld [vmem:[#allocation5 + $0x1018] sm:$0xf]  ;;  %v10061_v55 = vld [vmem:[#allocation5 + $0x1058] sm:$0xf0] }
 0x45b   :  { %7183 = vmatpush.bf16.xpose.msrb.mxu2 %v10444_v1  ;;  %v10252_v1 = vor.u32 %v12652_v60, %v10251_v59  ;;  %v10515_v56 = vld [vmem:[#allocation5 + $0x13a0] sm:$0xf]  ;;  %v12709_v58 = vld [vmem:[#allocation5 + $0x13a4] sm:$0xf] }
 0x45c   :  { %7196 = vmatpush.bf16.xpose.msrb.mxu3 %v10448_v3  ;;  %v12717_v2 = vld [vmem:[#allocation5 + $0x13dc] sm:$0xf0]  ;;  %v10517_v60 = vld [vmem:[#allocation5 + $0x13e0] sm:$0xf0] }
 0x45e   :  { %v7050_v6 = vpop.f32.mrf.mxu3 }
 0x45f   :  { %v7037_v3 = vpop.f32.mrf.mxu2  ;;  %v10516_v6 = vor.u32 %v12717_v2, %v10515_v56  ;;  %v12669_v56 = vld [vmem:[#allocation5 + $0x125c] sm:$0xf0]  ;;  %v12661_v2 = vld [vmem:[#allocation5 + $0x1224] sm:$0xf] }
 0x460   :  { %v10525_v3 = vld [vmem:[#allocation5 + $0x13e8] sm:$0xf0] }
 0x462   :  { %7158 = vmatpush.bf16.xpose.msrb.mxu0 %v10372_v63  ;;  %7171 = vmatpush.bf16.xpose.msrb.mxu1 %v10376_v62  ;;  %v12628_v63 = vld [vmem:[#allocation5 + $0x111c] sm:$0xf] }
 0x463   :  { %7184 = vmatpush.bf16.xpose.msrb.mxu2 %v10380_v14  ;;  %v10189_v62 = vld [vmem:[#allocation5 + $0x1158] sm:$0xf0]  ;;  %v10180_v14 = vor.u32 %v12635_v8, %v10179_v7  ;;  %v10520_v7 = vor.u32 %v12709_v58, %v10517_v60  ;;  %v10524_v8 = vor.u32 %v12718_v0, %v10523_v11  ;;  %v10325_v58 = vld [vmem:[#allocation5 + $0x1260] sm:$0xf0]  ;;  %v12670_v60 = vld [vmem:[#allocation5 + $0x1264] sm:$0xf0] }
 0x464   :  { %7197 = vmatpush.bf16.xpose.msrb.mxu3 %v10384_v16  ;;  %v10184_v16 = vor.u32 %v12627_v9, %v10181_v10  ;;  %v10192_v19 = vor.u32 %v12628_v63, %v10189_v62  ;;  %v10451_v10 = vld [vmem:[#allocation5 + $0x1320] sm:$0xf]  ;;  %v10453_v63 = vld [vmem:[#allocation5 + $0x1360] sm:$0xf0]  ;;  %v10459_v62 = vld [vmem:[#allocation5 + $0x1328] sm:$0xf] }
 0x465   :  { %v10456_v25 = vor.u32 %v12693_v13, %v10453_v63  ;;  %v12662_v11 = vld [vmem:[#allocation5 + $0x122c] sm:$0xf]  ;;  %v12653_v13 = vld [vmem:[#allocation5 + $0x11dc] sm:$0xf0]  ;;  %v12645_v63 = vld [vmem:[#allocation5 + $0x11a4] sm:$0xf] }
 0x466   :  { %v10333_v0 = vld [vmem:[#allocation5 + $0x1268] sm:$0xf0] }
 0x46a   :  { %7159 = vmatpush.bf16.xpose.msrb.mxu0 %v10308_v57  ;;  %7172 = vmatpush.bf16.xpose.msrb.mxu1 %v10312_v46  ;;  %v10124_v57 = vor.u32 %v12620_v31, %v10123_v30  ;;  %v10051_v46 = vld [vmem:[#allocation5 + $0x1010] sm:$0xf]  ;;  %v12685_v30 = vld [vmem:[#allocation5 + $0x12dc] sm:$0xf0]  ;;  %v12677_v31 = vld [vmem:[#allocation5 + $0x12a4] sm:$0xf] }
 0x46b   :  { %7185 = vmatpush.bf16.xpose.msrb.mxu2 %v10316_v32  ;;  %v12603_v32 = vld [vmem:[#allocation5 + $0x104c] sm:$0xf0] }
 0x46c   :  { %7198 = vmatpush.bf16.xpose.msrb.mxu3 %v10320_v27  ;;  %v10053_v27 = vld [vmem:[#allocation5 + $0x1050] sm:$0xf0]  ;;  %v10052_v59 = vor.u32 %v12603_v32, %v10051_v46  ;;  %v10392_v46 = vor.u32 %v12677_v31, %v10389_v35 }
 0x472   :  { %7160 = vmatpush.bf16.xpose.msrb.mxu0 %v10244_v61  ;;  %7173 = vmatpush.bf16.xpose.msrb.mxu1 %v10248_v52  ;;  %v10056_v61 = vor.u32 %v12595_v49, %v10053_v27  ;;  %v10060_v52 = vor.u32 %v12604_v51, %v10059_v50 }
 0x473   :  { %7186 = vmatpush.bf16.xpose.msrb.mxu2 %v10252_v1  ;;  %v12710_v1 = vld [vmem:[#allocation5 + $0x13ac] sm:$0xf] }
 0x474   :  { %7199 = vmatpush.bf16.xpose.msrb.mxu3 %v10256_v5  ;;  %v10064_v5 = vor.u32 %v12596_v53, %v10061_v55  ;;  %v10528_v9 = vor.u32 %v12710_v1, %v10525_v3  ;;  %v10323_v55 = vld [vmem:[#allocation5 + $0x1220] sm:$0xf]  ;;  %v10328_v1 = vor.u32 %v12661_v2, %v10325_v58  ;;  %v12613_v2 = vld [vmem:[#allocation5 + $0x10a4] sm:$0xf] }
 0x475   :  { %v10133_v58 = vld [vmem:[#allocation5 + $0x10e0] sm:$0xf0] }
 0x47a   :  { %7161 = vmatpush.bf16.xpose.msrb.mxu0 %v10180_v14  ;;  %7174 = vmatpush.bf16.xpose.msrb.mxu1 %v10184_v16  ;;  %v12702_v14 = vld [vmem:[#allocation5 + $0x1364] sm:$0xf0]  ;;  %v12694_v16 = vld [vmem:[#allocation5 + $0x132c] sm:$0xf] }
 0x47b   :  { %7187 = vmatpush.bf16.xpose.msrb.mxu2 %v10188_v40  ;;  %v10461_v40 = vld [vmem:[#allocation5 + $0x1368] sm:$0xf0]  ;;  %v10460_v26 = vor.u32 %v12702_v14, %v10459_v62  ;;  %v10261_v62 = vld [vmem:[#allocation5 + $0x11e0] sm:$0xf0] }
 0x47c   :  { %7200 = vmatpush.bf16.xpose.msrb.mxu3 %v10192_v19  ;;  %v10452_v19 = vor.u32 %v12701_v12, %v10451_v10  ;;  %v10464_v45 = vor.u32 %v12694_v16, %v10461_v40  ;;  %v10259_v12 = vld [vmem:[#allocation5 + $0x11a0] sm:$0xf]  ;;  %v10267_v16 = vld [vmem:[#allocation5 + $0x11a8] sm:$0xf] }
 0x47d   :  { %v12654_v40 = vld [vmem:[#allocation5 + $0x11e4] sm:$0xf0] }
 0x482   :  { %7162 = vmatpush.bf16.xpose.msrb.mxu0 %v10116_v41  ;;  %7175 = vmatpush.bf16.xpose.msrb.mxu1 %v10120_v22  ;;  %v12686_v41 = vld [vmem:[#allocation5 + $0x12e4] sm:$0xf0]  ;;  %v12678_v22 = vld [vmem:[#allocation5 + $0x12ac] sm:$0xf] }
 0x483   :  { %7188 = vmatpush.bf16.xpose.msrb.mxu2 %v10124_v57  ;;  %v10397_v57 = vld [vmem:[#allocation5 + $0x12e8] sm:$0xf0]  ;;  %v10396_v32 = vor.u32 %v12686_v41, %v10395_v36  ;;  %v10195_v41 = vld [vmem:[#allocation5 + $0x1120] sm:$0xf] }
 0x484   :  { %7201 = vmatpush.bf16.xpose.msrb.mxu3 %v10128_v44  ;;  %v10388_v44 = vor.u32 %v12685_v30, %v10387_v29  ;;  %v10400_v49 = vor.u32 %v12678_v22, %v10397_v57  ;;  %v10264_v29 = vor.u32 %v12645_v63, %v10261_v62  ;;  %v12637_v22 = vld [vmem:[#allocation5 + $0x115c] sm:$0xf0]  ;;  %v12629_v57 = vld [vmem:[#allocation5 + $0x1124] sm:$0xf]  ;;  %v12719_v63 = vld [vmem:[#allocation5 + $0x13ec] sm:$0xf0] }
 0x485   :  { %v12711_v62 = vld [vmem:[#allocation5 + $0x13b4] sm:$0xf] }
 0x48a   :  { %7163 = vmatpush.bf16.xpose.msrb.mxu0 %v10052_v59  ;;  %7176 = vmatpush.bf16.xpose.msrb.mxu1 %v10056_v61  ;;  %v10331_v59 = vld [vmem:[#allocation5 + $0x1228] sm:$0xf]  ;;  %v10324_v61 = vor.u32 %v12669_v56, %v10323_v55  ;;  %v12621_v56 = vld [vmem:[#allocation5 + $0x10dc] sm:$0xf0] }
 0x48b   :  { %7189 = vmatpush.bf16.xpose.msrb.mxu2 %v10060_v52  ;;  %v10332_v3 = vor.u32 %v12670_v60, %v10331_v59  ;;  %v10139_v59 = vld [vmem:[#allocation5 + $0x10a8] sm:$0xf] }
 0x48c   :  { %7202 = vmatpush.bf16.xpose.msrb.mxu3 %v10064_v5  ;;  %v12622_v60 = vld [vmem:[#allocation5 + $0x10e4] sm:$0xf0] }
 0x48e   :  { %v7061_v27 = vpop.f32.mrf.mxu0  ;;  %v7074_v51 = vpop.f32.mrf.mxu1 }
 0x48f   :  { %v7062_v50 = vadd.f32 %v7061_v27, %v13415_v54  ;;  %v10336_v54 = vor.u32 %v12662_v11, %v10333_v0  ;;  %v10205_v27 = vld [vmem:[#allocation5 + $0x1168] sm:$0xf0] }
 0x490   :  { %v12614_v11 = vld [vmem:[#allocation5 + $0x10ac] sm:$0xf] }
 0x491   :  { %7164 = vmatmul.bf16.vlgmr.msrb.gmra.mxu0 %v13277_v33  ;;  %7177 = vmatmul.bf16.vlgmr.msrb.gmra.mxu1 %v13281_v38  ;;  %v7075_v53 = vadd.f32 %v7074_v51, %v7062_v50  ;;  %v10196_v50 = vor.u32 %v12637_v22, %v10195_v41  ;;  %v10141_v0 = vld [vmem:[#allocation5 + $0x10e8] sm:$0xf0]  ;;  %v10467_v22 = vld [vmem:[#allocation5 + $0x1330] sm:$0xf] }
 0x492   :  { %7208 = vmatpush.bf16.xpose.msra.mxu0 %v10516_v6  ;;  %7221 = vmatpush.bf16.xpose.msra.mxu1 %v10520_v7 }
 0x493   :  { %7234 = vmatpush.bf16.xpose.msra.mxu2 %v10524_v8  ;;  %7203 = vmatmul.bf16.vlgmr.msrb.gmra.mxu3 %v13283_v4 }
 0x494   :  { %7247 = vmatpush.bf16.xpose.msra.mxu3 %v10528_v9  ;;  %7190 = vmatmul.bf16.vlgmr.msrb.gmra.mxu2 %v13279_v34  ;;  %v7945_v9 = vrot.slane %v13395_v47, 6  ;;  %v10268_v47 = vor.u32 %v12654_v40, %v10267_v16  ;;  %v10533_v16 = vld [vmem:[#allocation5 + $0x13f0] sm:$0xf0]  ;;  %v10539_v40 = vld [vmem:[#allocation5 + $0x13b8] sm:$0xf] }
 0x496   :  { %v7100_v6 = vpop.f32.mrf.mxu3  ;;  %v7063_v7 = vpop.f32.mrf.mxu0 }
 0x497   :  { %v7087_v52 = vpop.f32.mrf.mxu2  ;;  %v7076_v8 = vpop.f32.mrf.mxu1  ;;  %v10069_v7 = vld [vmem:[#allocation5 + $0x1060] sm:$0xf0] }
 0x498   :  { %v7088_v5 = vadd.f32 %v7087_v52, %v7075_v53  ;;  %v10136_v52 = vor.u32 %v12613_v2, %v10133_v58  ;;  %v10075_v8 = vld [vmem:[#allocation5 + $0x1028] sm:$0xf]  ;;  %v12687_v2 = vld [vmem:[#allocation5 + $0x12ec] sm:$0xf0]  ;;  %v12679_v58 = vld [vmem:[#allocation5 + $0x12b4] sm:$0xf] }
 0x49a   :  { %7209 = vmatpush.bf16.xpose.msra.mxu0 %v10452_v19  ;;  %7222 = vmatpush.bf16.xpose.msra.mxu1 %v10456_v25  ;;  %v7101_v10 = vadd.f32 %v7100_v6, %v7088_v5  ;;  %v12646_v19 = vld [vmem:[#allocation5 + $0x11ac] sm:$0xf]  ;;  %v10067_v5 = vld [vmem:[#allocation5 + $0x1020] sm:$0xf]  ;;  %v12597_v6 = vld [vmem:[#allocation5 + $0x1024] sm:$0xf] }
 0x49b   :  { %7235 = vmatpush.bf16.xpose.msra.mxu2 %v10460_v26  ;;  %v10269_v25 = vld [vmem:[#allocation5 + $0x11e8] sm:$0xf0] }
 0x49c   :  { %7248 = vmatpush.bf16.xpose.msra.mxu3 %v10464_v45  ;;  %v7946_v14 = vrot.slane %v7101_v10, 5  ;;  %v10260_v45 = vor.u32 %v12653_v13, %v10259_v12  ;;  %v10272_v35 = vor.u32 %v12646_v19, %v10269_v25  ;;  %v12598_v10 = vld [vmem:[#allocation5 + $0x102c] sm:$0xf]  ;;  %v10531_v13 = vld [vmem:[#allocation5 + $0x13b0] sm:$0xf]  ;;  %v10072_v25 = vor.u32 %v12597_v6, %v10069_v7 }
 0x49d   :  { %v10077_v12 = vld [vmem:[#allocation5 + $0x1068] sm:$0xf0]  ;;  %v12720_v19 = vld [vmem:[#allocation5 + $0x13f4] sm:$0xf0]  ;;  %v12671_v6 = vld [vmem:[#allocation5 + $0x126c] sm:$0xf0] }
 0x49e   :  { %v7954_v26 = vsel %vm7953_vm1, %v7945_v9, %v7946_v14  ;;  %v7102_v36 = vpop.f32.mrf.mxu3  ;;  %v12606_v9 = vld [vmem:[#allocation5 + $0x1064] sm:$0xf0]  ;;  %v12663_v7 = vld [vmem:[#allocation5 + $0x1234] sm:$0xf] }
 0x49f   :  { %v7089_v30 = vpop.f32.mrf.mxu2  ;;  %v13424_v31 = vsel %vm7955_vm2, %v13368_v39, %v7954_v26  ;;  %v10131_v39 = vld [vmem:[#allocation5 + $0x10a0] sm:$0xf]  ;;  %v10076_v26 = vor.u32 %v12606_v9, %v10075_v8  ;;  %v10540_v36 = vor.u32 %v12720_v19, %v10539_v40  ;;  %v10341_v8 = vld [vmem:[#allocation5 + $0x1270] sm:$0xf0]  ;;  %v10347_v9 = vld [vmem:[#allocation5 + $0x1238] sm:$0xf] }
 0x4a0   :  { %v10532_v30 = vor.u32 %v12719_v63, %v10531_v13  ;;  %v10349_v13 = vld [vmem:[#allocation5 + $0x1278] sm:$0xf0]  ;;  %v10275_v40 = vld [vmem:[#allocation5 + $0x11b0] sm:$0xf] }
 0x4a1   :  { %v12655_v19 = vld [vmem:[#allocation5 + $0x11ec] sm:$0xf0] }
 0x4a2   :  { %7210 = vmatpush.bf16.xpose.msra.mxu0 %v10388_v44  ;;  %7223 = vmatpush.bf16.xpose.msra.mxu1 %v10392_v46  ;;  %v10197_v44 = vld [vmem:[#allocation5 + $0x1160] sm:$0xf0]  ;;  %v10203_v46 = vld [vmem:[#allocation5 + $0x1128] sm:$0xf] }
 0x4a3   :  { %7236 = vmatpush.bf16.xpose.msra.mxu2 %v10396_v32  ;;  %v12638_v32 = vld [vmem:[#allocation5 + $0x1164] sm:$0xf0]  ;;  %v10200_v51 = vor.u32 %v12629_v57, %v10197_v44  ;;  %v12703_v57 = vld [vmem:[#allocation5 + $0x136c] sm:$0xf0]  ;;  %v12695_v44 = vld [vmem:[#allocation5 + $0x1334] sm:$0xf] }
 0x4a4   :  { %7249 = vmatpush.bf16.xpose.msra.mxu3 %v10400_v49  ;;  %v12630_v49 = vld [vmem:[#allocation5 + $0x112c] sm:$0xf]  ;;  %v10204_v53 = vor.u32 %v12638_v32, %v10203_v46  ;;  %v10469_v46 = vld [vmem:[#allocation5 + $0x1370] sm:$0xf0]  ;;  %v10475_v32 = vld [vmem:[#allocation5 + $0x1338] sm:$0xf] }
 0x4a5   :  { %v10208_v55 = vor.u32 %v12630_v49, %v10205_v27  ;;  %v12704_v49 = vld [vmem:[#allocation5 + $0x1374] sm:$0xf0]  ;;  %v12696_v27 = vld [vmem:[#allocation5 + $0x133c] sm:$0xf] }
 0x4aa   :  { %7211 = vmatpush.bf16.xpose.msra.mxu0 %v10324_v61  ;;  %7224 = vmatpush.bf16.xpose.msra.mxu1 %v10328_v1  ;;  %v10132_v61 = vor.u32 %v12621_v56, %v10131_v39  ;;  %v10140_v1 = vor.u32 %v12622_v60, %v10139_v59  ;;  %v10403_v56 = vld [vmem:[#allocation5 + $0x12b0] sm:$0xf]  ;;  %v10405_v59 = vld [vmem:[#allocation5 + $0x12f0] sm:$0xf0]  ;;  %v10411_v60 = vld [vmem:[#allocation5 + $0x12b8] sm:$0xf] }
 0x4ab   :  { %7237 = vmatpush.bf16.xpose.msra.mxu2 %v10332_v3  ;;  %v10144_v3 = vor.u32 %v12614_v11, %v10141_v0  ;;  %v12688_v11 = vld [vmem:[#allocation5 + $0x12f4] sm:$0xf0]  ;;  %v12680_v0 = vld [vmem:[#allocation5 + $0x12bc] sm:$0xf] }
 0x4ac   :  { %7250 = vmatpush.bf16.xpose.msra.mxu3 %v10336_v54  ;;  %v12605_v54 = vld [vmem:[#allocation5 + $0x105c] sm:$0xf0] }
 0x4ad   :  { %v10068_v14 = vor.u32 %v12605_v54, %v10067_v5  ;;  %v10339_v54 = vld [vmem:[#allocation5 + $0x1230] sm:$0xf] }
 0x4ae   :  { %v10340_v63 = vor.u32 %v12671_v6, %v10339_v54  ;;  %v10147_v6 = vld [vmem:[#allocation5 + $0x10b0] sm:$0xf] }
 0x4b2   :  { %7212 = vmatpush.bf16.xpose.msra.mxu0 %v10260_v45  ;;  %7225 = vmatpush.bf16.xpose.msra.mxu1 %v10264_v29  ;;  %v12712_v45 = vld [vmem:[#allocation5 + $0x13bc] sm:$0xf] }
 0x4b3   :  { %7238 = vmatpush.bf16.xpose.msra.mxu2 %v10268_v47  ;;  %v10541_v29 = vld [vmem:[#allocation5 + $0x13f8] sm:$0xf0]  ;;  %v10080_v47 = vor.u32 %v12598_v10, %v10077_v12  ;;  %v12672_v10 = vld [vmem:[#allocation5 + $0x1274] sm:$0xf0] }
 0x4b4   :  { %7251 = vmatpush.bf16.xpose.msra.mxu3 %v10272_v35  ;;  %v10536_v35 = vor.u32 %v12711_v62, %v10533_v16  ;;  %v10544_v41 = vor.u32 %v12712_v45, %v10541_v29  ;;  %v12664_v12 = vld [vmem:[#allocation5 + $0x123c] sm:$0xf]  ;;  %v10344_v62 = vor.u32 %v12663_v7, %v10341_v8  ;;  %v10283_v45 = vld [vmem:[#allocation5 + $0x11b8] sm:$0xf]  ;;  %v12623_v7 = vld [vmem:[#allocation5 + $0x10ec] sm:$0xf0] }
 0x4b5   :  { %v10352_v16 = vor.u32 %v12664_v12, %v10349_v13  ;;  %v12656_v29 = vld [vmem:[#allocation5 + $0x11f4] sm:$0xf0]  ;;  %v12615_v8 = vld [vmem:[#allocation5 + $0x10b4] sm:$0xf]  ;;  %v12616_v13 = vld [vmem:[#allocation5 + $0x10bc] sm:$0xf] }
 0x4b6   :  { %v12624_v12 = vld [vmem:[#allocation5 + $0x10f4] sm:$0xf0] }
 0x4ba   :  { %7213 = vmatpush.bf16.xpose.msra.mxu0 %v10196_v50  ;;  %7226 = vmatpush.bf16.xpose.msra.mxu1 %v10200_v51  ;;  %v10477_v50 = vld [vmem:[#allocation5 + $0x1378] sm:$0xf0]  ;;  %v10468_v51 = vor.u32 %v12703_v57, %v10467_v22 }
 0x4bb   :  { %7239 = vmatpush.bf16.xpose.msra.mxu2 %v10204_v53  ;;  %v10472_v53 = vor.u32 %v12695_v44, %v10469_v46  ;;  %v10480_v39 = vor.u32 %v12696_v27, %v10477_v50  ;;  %v10284_v44 = vor.u32 %v12656_v29, %v10283_v45  ;;  %v10211_v27 = vld [vmem:[#allocation5 + $0x1130] sm:$0xf]  ;;  %v12599_v29 = vld [vmem:[#allocation5 + $0x1034] sm:$0xf] }
 0x4bc   :  { %7252 = vmatpush.bf16.xpose.msra.mxu3 %v10208_v55  ;;  %v10476_v55 = vor.u32 %v12704_v49, %v10475_v32  ;;  %v12639_v50 = vld [vmem:[#allocation5 + $0x116c] sm:$0xf0] }
 0x4bd   :  { %v12607_v45 = vld [vmem:[#allocation5 + $0x106c] sm:$0xf0] }
 0x4c2   :  { %7214 = vmatpush.bf16.xpose.msra.mxu0 %v10132_v61  ;;  %7227 = vmatpush.bf16.xpose.msra.mxu1 %v10136_v52  ;;  %v10413_v61 = vld [vmem:[#allocation5 + $0x12f8] sm:$0xf0]  ;;  %v10404_v52 = vor.u32 %v12687_v2, %v10403_v56  ;;  %v12640_v56 = vld [vmem:[#allocation5 + $0x1174] sm:$0xf0] }
 0x4c3   :  { %7240 = vmatpush.bf16.xpose.msra.mxu2 %v10140_v1  ;;  %v10408_v1 = vor.u32 %v12679_v58, %v10405_v59  ;;  %v10416_v5 = vor.u32 %v12680_v0, %v10413_v61  ;;  %v12632_v2 = vld [vmem:[#allocation5 + $0x113c] sm:$0xf]  ;;  %v10212_v59 = vor.u32 %v12639_v50, %v10211_v27  ;;  %v12842_v27 = vld [vmem:[#allocation5 + $0x17c4] sm:$0xf0] }
 0x4c4   :  { %7253 = vmatpush.bf16.xpose.msra.mxu3 %v10144_v3  ;;  %v10412_v3 = vor.u32 %v12688_v11, %v10411_v60  ;;  %v10221_v58 = vld [vmem:[#allocation5 + $0x1178] sm:$0xf0] }
 0x4ca   :  { %7215 = vmatpush.bf16.xpose.msra.mxu0 %v10068_v14  ;;  %7228 = vmatpush.bf16.xpose.msra.mxu1 %v10072_v25  ;;  %v10348_v14 = vor.u32 %v12672_v10, %v10347_v9  ;;  %v12647_v25 = vld [vmem:[#allocation5 + $0x11b4] sm:$0xf]  ;;  %v10155_v10 = vld [vmem:[#allocation5 + $0x10b8] sm:$0xf] }
 0x4cb   :  { %7241 = vmatpush.bf16.xpose.msra.mxu2 %v10076_v26  ;;  %v10277_v26 = vld [vmem:[#allocation5 + $0x11f0] sm:$0xf0] }
 0x4cc   :  { %7254 = vmatpush.bf16.xpose.msra.mxu3 %v10080_v47  ;;  %v12648_v47 = vld [vmem:[#allocation5 + $0x11bc] sm:$0xf]  ;;  %v10280_v57 = vor.u32 %v12647_v25, %v10277_v26  ;;  %v10149_v9 = vld [vmem:[#allocation5 + $0x10f0] sm:$0xf0]  ;;  %v10083_v26 = vld [vmem:[#allocation5 + $0x1030] sm:$0xf] }
 0x4ce   :  { %v7113_v22 = vpop.f32.mrf.mxu0  ;;  %v7126_v49 = vpop.f32.mrf.mxu1 }
 0x4d1   :  { %7216 = vmatmul.bf16.vlgmr.msra.gmra.mxu0 %v13295_v15  ;;  %7229 = vmatmul.bf16.vlgmr.msra.gmra.mxu1 %v13299_v24 }
 0x4d2   :  { %7260 = vmatpush.bf16.xpose.msrb.mxu0 %v10532_v30  ;;  %7273 = vmatpush.bf16.xpose.msrb.mxu1 %v10536_v35  ;;  %v10285_v30 = vld [vmem:[#allocation5 + $0x11f8] sm:$0xf0]  ;;  %v10276_v35 = vor.u32 %v12655_v19, %v10275_v40  ;;  %v10152_v40 = vor.u32 %v12615_v8, %v10149_v9  ;;  %v10156_v19 = vor.u32 %v12624_v12, %v10155_v10  ;;  %v10867_v10 = vld [vmem:[#allocation5 + $0x1680] sm:$0xf] }
 0x4d3   :  { %7286 = vmatpush.bf16.xpose.msrb.mxu2 %v10540_v36  ;;  %7255 = vmatmul.bf16.vlgmr.msra.gmra.mxu3 %v13301_v28  ;;  %v13114_v36 = vld [vmem:[#allocation7] sm:$0xff]  ;;  %v10288_v46 = vor.u32 %v12648_v47, %v10285_v30  ;;  %v10085_v47 = vld [vmem:[#allocation5 + $0x1070] sm:$0xf0]  ;;  %v10091_v30 = vld [vmem:[#allocation5 + $0x1038] sm:$0xf] }
 0x4d4   :  { %7299 = vmatpush.bf16.xpose.msrb.mxu3 %v10544_v41  ;;  %7242 = vmatmul.bf16.vlgmr.msra.gmra.mxu2 %v13297_v23  ;;  %v6260_v41 = vperm.slane %v13114_v36, 4  ;;  %v12600_v36 = vld [vmem:[#allocation5 + $0x103c] sm:$0xf]  ;;  %v10088_v50 = vor.u32 %v12599_v29, %v10085_v47  ;;  %v12809_v12 = vld [vmem:[#allocation5 + $0x16bc] sm:$0xf0] }
 0x4d6   :  { %v7114_v32 = vadd.f32 %v7113_v22, %v6260_v41  ;;  %v7152_v11 = vpop.f32.mrf.mxu3  ;;  %v7128_v54 = vpop.f32.mrf.mxu1  ;;  %v10093_v41 = vld [vmem:[#allocation5 + $0x1078] sm:$0xf0]  ;;  %v10995_v22 = vld [vmem:[#allocation5 + $0x1780] sm:$0xf] }
 0x4d7   :  { %v7139_v60 = vpop.f32.mrf.mxu2  ;;  %v10941_v54 = vld [vmem:[#allocation5 + $0x1748] sm:$0xf0] }
 0x4da   :  { %7261 = vmatpush.bf16.xpose.msrb.mxu0 %v10468_v51  ;;  %7274 = vmatpush.bf16.xpose.msrb.mxu1 %v10472_v53  ;;  %v12631_v51 = vld [vmem:[#allocation5 + $0x1134] sm:$0xf]  ;;  %v7127_v53 = vadd.f32 %v7126_v49, %v7114_v32  ;;  %v10997_v32 = vld [vmem:[#allocation5 + $0x17c0] sm:$0xf0]  ;;  %v11003_v49 = vld [vmem:[#allocation5 + $0x1788] sm:$0xf] }
 0x4db   :  { %7287 = vmatpush.bf16.xpose.msrb.mxu2 %v10476_v55  ;;  %v10213_v55 = vld [vmem:[#allocation5 + $0x1170] sm:$0xf0] }
 0x4dc   :  { %7300 = vmatpush.bf16.xpose.msrb.mxu3 %v10480_v39  ;;  %v10219_v39 = vld [vmem:[#allocation5 + $0x1138] sm:$0xf]  ;;  %v10216_v0 = vor.u32 %v12631_v51, %v10213_v55  ;;  %v11005_v55 = vld [vmem:[#allocation5 + $0x17c8] sm:$0xf0] }
 0x4dd   :  { %v10220_v61 = vor.u32 %v12640_v56, %v10219_v39  ;;  %v10096_v39 = vor.u32 %v12600_v36, %v10093_v41  ;;  %v10803_v36 = vld [vmem:[#allocation5 + $0x1600] sm:$0xf] }
 0x4de   :  { %v12793_v41 = vld [vmem:[#allocation5 + $0x163c] sm:$0xf0] }
 0x4e2   :  { %7262 = vmatpush.bf16.xpose.msrb.mxu0 %v10404_v52  ;;  %7275 = vmatpush.bf16.xpose.msrb.mxu1 %v10408_v1  ;;  %v7140_v52 = vadd.f32 %v7139_v60, %v7127_v53  ;;  %v7115_v1 = vpop.f32.mrf.mxu0  ;;  %v12834_v53 = vld [vmem:[#allocation5 + $0x178c] sm:$0xf]  ;;  %v10931_v60 = vld [vmem:[#allocation5 + $0x1700] sm:$0xf] }
 0x4e3   :  { %7288 = vmatpush.bf16.xpose.msrb.mxu2 %v10412_v3  ;;  %v10224_v3 = vor.u32 %v12632_v2, %v10221_v58  ;;  %v11004_v58 = vor.u32 %v12842_v27, %v11003_v49  ;;  %v12826_v1 = vld [vmem:[#allocation5 + $0x1744] sm:$0xf0]  ;;  %v10813_v49 = vld [vmem:[#allocation5 + $0x1648] sm:$0xf0]  ;;  %v10804_v27 = vor.u32 %v12793_v41, %v10803_v36  ;;  %v10613_v36 = vld [vmem:[#allocation5 + $0x14c0] sm:$0xf0] }
 0x4e4   :  { %7301 = vmatpush.bf16.xpose.msrb.mxu3 %v10416_v5  ;;  %v13430_v5 = vadd.f32 %v7152_v11, %v7140_v52  ;;  %v12825_v11 = vld [vmem:[#allocation5 + $0x173c] sm:$0xf0]  ;;  %v10939_v52 = vld [vmem:[#allocation5 + $0x1708] sm:$0xf] }
 0x4e5   :  { %v10940_v8 = vor.u32 %v12826_v1, %v10939_v52  ;;  %v12778_v52 = vld [vmem:[#allocation5 + $0x15c4] sm:$0xf0]  ;;  %v12770_v1 = vld [vmem:[#allocation5 + $0x158c] sm:$0xf] }
 0x4e6   :  { %v10619_v41 = vld [vmem:[#allocation5 + $0x1488] sm:$0xf] }
 0x4ea   :  { %7263 = vmatpush.bf16.xpose.msrb.mxu0 %v10340_v63  ;;  %7276 = vmatpush.bf16.xpose.msrb.mxu1 %v10344_v62  ;;  %v10157_v63 = vld [vmem:[#allocation5 + $0x10f8] sm:$0xf0]  ;;  %v10148_v62 = vor.u32 %v12623_v7, %v10147_v6  ;;  %v10932_v6 = vor.u32 %v12825_v11, %v10931_v60  ;;  %v12777_v60 = vld [vmem:[#allocation5 + $0x15bc] sm:$0xf0]  ;;  %v12769_v11 = vld [vmem:[#allocation5 + $0x1584] sm:$0xf] }
 0x4eb   :  { %7289 = vmatpush.bf16.xpose.msrb.mxu2 %v10348_v14  ;;  %v7141_v14 = vpop.f32.mrf.mxu2  ;;  %v10160_v25 = vor.u32 %v12616_v13, %v10157_v63  ;;  %v12801_v13 = vld [vmem:[#allocation5 + $0x1684] sm:$0xf] }
 0x4ec   :  { %7302 = vmatpush.bf16.xpose.msrb.mxu3 %v10352_v16  ;;  %v7154_v16 = vpop.f32.mrf.mxu3  ;;  %v10869_v63 = vld [vmem:[#allocation5 + $0x16c0] sm:$0xf0]  ;;  %v12810_v14 = vld [vmem:[#allocation5 + $0x16c4] sm:$0xf0] }
 0x4ed   :  { %v12802_v16 = vld [vmem:[#allocation5 + $0x168c] sm:$0xf] }
 0x4f2   :  { %7264 = vmatpush.bf16.xpose.msrb.mxu0 %v10276_v35  ;;  %7277 = vmatpush.bf16.xpose.msrb.mxu1 %v10280_v57  ;;  %v12608_v35 = vld [vmem:[#allocation5 + $0x1074] sm:$0xf0]  ;;  %v12841_v57 = vld [vmem:[#allocation5 + $0x17bc] sm:$0xf0] }
 0x4f3   :  { %7290 = vmatpush.bf16.xpose.msrb.mxu2 %v10284_v44  ;;  %v12833_v44 = vld [vmem:[#allocation5 + $0x1784] sm:$0xf]  ;;  %v10092_v51 = vor.u32 %v12608_v35, %v10091_v30  ;;  %v10996_v56 = vor.u32 %v12841_v57, %v10995_v22 }
 0x4f4   :  { %7303 = vmatpush.bf16.xpose.msrb.mxu3 %v10288_v46  ;;  %v10084_v46 = vor.u32 %v12607_v45, %v10083_v26  ;;  %v11000_v2 = vor.u32 %v12833_v44, %v10997_v32  ;;  %v12785_v22 = vld [vmem:[#allocation5 + $0x1604] sm:$0xf]  ;;  %v10811_v44 = vld [vmem:[#allocation5 + $0x1608] sm:$0xf]  ;;  %v12786_v32 = vld [vmem:[#allocation5 + $0x160c] sm:$0xf] }
 0x4f5   :  { %v10805_v57 = vld [vmem:[#allocation5 + $0x1640] sm:$0xf0] }
 0x4fa   :  { %7265 = vmatpush.bf16.xpose.msrb.mxu0 %v10212_v59  ;;  %7278 = vmatpush.bf16.xpose.msrb.mxu1 %v10216_v0  ;;  %v11008_v59 = vor.u32 %v12834_v53, %v11005_v55  ;;  %v12817_v0 = vld [vmem:[#allocation5 + $0x1704] sm:$0xf]  ;;  %v10816_v55 = vor.u32 %v12786_v32, %v10813_v49 }
 0x4fb   :  { %7291 = vmatpush.bf16.xpose.msrb.mxu2 %v10220_v61  ;;  %v10933_v61 = vld [vmem:[#allocation5 + $0x1740] sm:$0xf0] }
 0x4fc   :  { %7304 = vmatpush.bf16.xpose.msrb.mxu3 %v10224_v3  ;;  %v12818_v3 = vld [vmem:[#allocation5 + $0x170c] sm:$0xf]  ;;  %v10936_v7 = vor.u32 %v12817_v0, %v10933_v61  ;;  %v10741_v0 = vld [vmem:[#allocation5 + $0x15c0] sm:$0xf0]  ;;  %v10747_v61 = vld [vmem:[#allocation5 + $0x1588] sm:$0xf] }
 0x4fd   :  { %v10944_v9 = vor.u32 %v12818_v3, %v10941_v54  ;;  %v10749_v3 = vld [vmem:[#allocation5 + $0x15c8] sm:$0xf0] }
 0x502   :  { %7266 = vmatpush.bf16.xpose.msrb.mxu0 %v10148_v62  ;;  %7279 = vmatpush.bf16.xpose.msrb.mxu1 %v10152_v40  ;;  %v10875_v62 = vld [vmem:[#allocation5 + $0x1688] sm:$0xf]  ;;  %v10877_v40 = vld [vmem:[#allocation5 + $0x16c8] sm:$0xf0] }
 0x503   :  { %7292 = vmatpush.bf16.xpose.msrb.mxu2 %v10156_v19  ;;  %v10868_v19 = vor.u32 %v12809_v12, %v10867_v10  ;;  %v10876_v26 = vor.u32 %v12810_v14, %v10875_v62  ;;  %v10880_v45 = vor.u32 %v12802_v16, %v10877_v40  ;;  %v10675_v12 = vld [vmem:[#allocation5 + $0x1500] sm:$0xf]  ;;  %v10677_v62 = vld [vmem:[#allocation5 + $0x1540] sm:$0xf0]  ;;  %v10683_v14 = vld [vmem:[#allocation5 + $0x1508] sm:$0xf] }
 0x504   :  { %7305 = vmatpush.bf16.xpose.msrb.mxu3 %v10160_v25  ;;  %v10872_v25 = vor.u32 %v12801_v13, %v10869_v63  ;;  %v12761_v13 = vld [vmem:[#allocation5 + $0x153c] sm:$0xf0]  ;;  %v12753_v63 = vld [vmem:[#allocation5 + $0x1504] sm:$0xf]  ;;  %v12762_v16 = vld [vmem:[#allocation5 + $0x1544] sm:$0xf0] }
 0x505   :  { %v12754_v40 = vld [vmem:[#allocation5 + $0x150c] sm:$0xf] }
 0x50a   :  { %7267 = vmatpush.bf16.xpose.msrb.mxu0 %v10084_v46  ;;  %7280 = vmatpush.bf16.xpose.msrb.mxu1 %v10088_v50  ;;  %v12794_v46 = vld [vmem:[#allocation5 + $0x1644] sm:$0xf0]  ;;  %v10808_v50 = vor.u32 %v12785_v22, %v10805_v57  ;;  %v12738_v57 = vld [vmem:[#allocation5 + $0x148c] sm:$0xf] }
 0x50b   :  { %7293 = vmatpush.bf16.xpose.msrb.mxu2 %v10092_v51  ;;  %v10812_v51 = vor.u32 %v12794_v46, %v10811_v44  ;;  %v12746_v22 = vld [vmem:[#allocation5 + $0x14c4] sm:$0xf0]  ;;  %v10621_v44 = vld [vmem:[#allocation5 + $0x14c8] sm:$0xf0] }
 0x50c   :  { %7306 = vmatpush.bf16.xpose.msrb.mxu3 %v10096_v39  ;;  %v10620_v49 = vor.u32 %v12746_v22, %v10619_v41  ;;  %v12803_v41 = vld [vmem:[#allocation5 + $0x1694] sm:$0xf] }
 0x50d   :  { %v10885_v22 = vld [vmem:[#allocation5 + $0x16d0] sm:$0xf0] }
 0x50e   :  { %v7165_v29 = vpop.f32.mrf.mxu0  ;;  %v7178_v30 = vpop.f32.mrf.mxu1 }
 0x50f   :  { %v7166_v47 = vadd.f32 %v7165_v29, %v13430_v5 }
 0x511   :  { %7268 = vmatmul.bf16.vlgmr.msrb.gmra.mxu0 %v13313_v37  ;;  %7281 = vmatmul.bf16.vlgmr.msrb.gmra.mxu1 %v13317_v43  ;;  %v7179_v35 = vadd.f32 %v7178_v30, %v7166_v47  ;;  %v10611_v47 = vld [vmem:[#allocation5 + $0x1480] sm:$0xf] }
 0x512   :  { %7312 = vmatpush.bf16.xpose.msra.mxu0 %v10996_v56  ;;  %7325 = vmatpush.bf16.xpose.msra.mxu1 %v11000_v2  ;;  %v12745_v30 = vld [vmem:[#allocation5 + $0x14bc] sm:$0xf0] }
 0x513   :  { %7338 = vmatpush.bf16.xpose.msra.mxu2 %v11004_v58  ;;  %7307 = vmatmul.bf16.vlgmr.msrb.gmra.mxu3 %v13319_v48  ;;  %v10612_v46 = vor.u32 %v12745_v30, %v10611_v47 }
 0x514   :  { %7351 = vmatpush.bf16.xpose.msra.mxu3 %v11008_v59  ;;  %7294 = vmatmul.bf16.vlgmr.msrb.gmra.mxu2 %v13315_v42  ;;  %v10739_v59 = vld [vmem:[#allocation5 + $0x1580] sm:$0xf] }
 0x515   :  { %v10740_v54 = vor.u32 %v12777_v60, %v10739_v59  ;;  %v11011_v59 = vld [vmem:[#allocation5 + $0x1790] sm:$0xf] }
 0x516   :  { %v7204_v39 = vpop.f32.mrf.mxu3  ;;  %v7167_v56 = vpop.f32.mrf.mxu0  ;;  %v12843_v60 = vld [vmem:[#allocation5 + $0x17cc] sm:$0xf0] }
 0x517   :  { %v7191_v53 = vpop.f32.mrf.mxu2  ;;  %v7180_v2 = vpop.f32.mrf.mxu1  ;;  %v12722_v56 = vld [vmem:[#allocation5 + $0x140c] sm:$0xf] }
 0x518   :  { %v7192_v5 = vadd.f32 %v7191_v53, %v7179_v35  ;;  %v12737_v35 = vld [vmem:[#allocation5 + $0x1484] sm:$0xf]  ;;  %v10557_v2 = vld [vmem:[#allocation5 + $0x1448] sm:$0xf0] }
 0x519   :  { %v10616_v32 = vor.u32 %v12737_v35, %v10613_v36  ;;  %v12721_v53 = vld [vmem:[#allocation5 + $0x1404] sm:$0xf]  ;;  %v10883_v35 = vld [vmem:[#allocation5 + $0x1690] sm:$0xf] }
 0x51a   :  { %7313 = vmatpush.bf16.xpose.msra.mxu0 %v10932_v6  ;;  %7326 = vmatpush.bf16.xpose.msra.mxu1 %v10936_v7  ;;  %v13437_v58 = vadd.f32 %v7204_v39, %v7192_v5  ;;  %v10744_v6 = vor.u32 %v12769_v11, %v10741_v0  ;;  %v10748_v7 = vor.u32 %v12778_v52, %v10747_v61  ;;  %v10555_v5 = vld [vmem:[#allocation5 + $0x1408] sm:$0xf]  ;;  %v12835_v11 = vld [vmem:[#allocation5 + $0x1794] sm:$0xf]  ;;  %v11019_v52 = vld [vmem:[#allocation5 + $0x1798] sm:$0xf] }
 0x51b   :  { %7339 = vmatpush.bf16.xpose.msra.mxu2 %v10940_v8  ;;  %v12730_v39 = vld [vmem:[#allocation5 + $0x1444] sm:$0xf0]  ;;  %v11013_v61 = vld [vmem:[#allocation5 + $0x17d0] sm:$0xf0]  ;;  %v12811_v36 = vld [vmem:[#allocation5 + $0x16cc] sm:$0xf0] }
 0x51c   :  { %7352 = vmatpush.bf16.xpose.msra.mxu3 %v10944_v9  ;;  %v10752_v9 = vor.u32 %v12770_v1, %v10749_v3  ;;  %v12844_v1 = vld [vmem:[#allocation5 + $0x17d4] sm:$0xf0] }
 0x51e   :  { %v7206_v10 = vpop.f32.mrf.mxu3 }
 0x51f   :  { %v7193_v8 = vpop.f32.mrf.mxu2  ;;  %v11016_v10 = vor.u32 %v12835_v11, %v11013_v61  ;;  %v10827_v11 = vld [vmem:[#allocation5 + $0x1618] sm:$0xf]  ;;  %v12788_v61 = vld [vmem:[#allocation5 + $0x161c] sm:$0xf] }
 0x520   :  { %v10560_v8 = vor.u32 %v12722_v56, %v10557_v2  ;;  %v10819_v56 = vld [vmem:[#allocation5 + $0x1610] sm:$0xf] }
 0x521   :  { %v12795_v2 = vld [vmem:[#allocation5 + $0x164c] sm:$0xf0] }
 0x522   :  { %7314 = vmatpush.bf16.xpose.msra.mxu0 %v10868_v19  ;;  %7327 = vmatpush.bf16.xpose.msra.mxu1 %v10872_v25  ;;  %v10685_v19 = vld [vmem:[#allocation5 + $0x1548] sm:$0xf0]  ;;  %v10676_v25 = vor.u32 %v12761_v13, %v10675_v12  ;;  %v11020_v12 = vor.u32 %v12844_v1, %v11019_v52  ;;  %v10829_v52 = vld [vmem:[#allocation5 + $0x1658] sm:$0xf0]  ;;  %v10820_v1 = vor.u32 %v12795_v2, %v10819_v56  ;;  %v10629_v56 = vld [vmem:[#allocation5 + $0x14d0] sm:$0xf0] }
 0x523   :  { %7340 = vmatpush.bf16.xpose.msra.mxu2 %v10876_v26  ;;  %v10680_v26 = vor.u32 %v12753_v63, %v10677_v62  ;;  %v10688_v29 = vor.u32 %v12754_v40, %v10685_v19  ;;  %v10947_v63 = vld [vmem:[#allocation5 + $0x1710] sm:$0xf]  ;;  %v10955_v40 = vld [vmem:[#allocation5 + $0x1718] sm:$0xf] }
 0x524   :  { %7353 = vmatpush.bf16.xpose.msra.mxu3 %v10880_v45  ;;  %v10684_v45 = vor.u32 %v12762_v16, %v10683_v14  ;;  %v12827_v62 = vld [vmem:[#allocation5 + $0x174c] sm:$0xf0]  ;;  %v12819_v14 = vld [vmem:[#allocation5 + $0x1714] sm:$0xf]  ;;  %v12828_v19 = vld [vmem:[#allocation5 + $0x1754] sm:$0xf0] }
 0x525   :  { %v10949_v16 = vld [vmem:[#allocation5 + $0x1750] sm:$0xf0]  ;;  %v10956_v47 = vor.u32 %v12828_v19, %v10955_v40  ;;  %v12780_v40 = vld [vmem:[#allocation5 + $0x15d4] sm:$0xf0]  ;;  %v12772_v19 = vld [vmem:[#allocation5 + $0x159c] sm:$0xf] }
 0x526   :  { %v10635_v2 = vld [vmem:[#allocation5 + $0x1498] sm:$0xf] }
 0x52a   :  { %7315 = vmatpush.bf16.xpose.msra.mxu0 %v10804_v27  ;;  %7328 = vmatpush.bf16.xpose.msra.mxu1 %v10808_v50  ;;  %v10624_v27 = vor.u32 %v12738_v57, %v10621_v44  ;;  %v10547_v50 = vld [vmem:[#allocation5 + $0x1400] sm:$0xf]  ;;  %v10891_v57 = vld [vmem:[#allocation5 + $0x1698] sm:$0xf] }
 0x52b   :  { %7341 = vmatpush.bf16.xpose.msra.mxu2 %v10812_v51  ;;  %v12729_v51 = vld [vmem:[#allocation5 + $0x143c] sm:$0xf0]  ;;  %v12812_v44 = vld [vmem:[#allocation5 + $0x16d4] sm:$0xf0] }
 0x52c   :  { %7354 = vmatpush.bf16.xpose.msra.mxu3 %v10816_v55  ;;  %v10549_v55 = vld [vmem:[#allocation5 + $0x1440] sm:$0xf0]  ;;  %v10548_v0 = vor.u32 %v12729_v51, %v10547_v50  ;;  %v10892_v50 = vor.u32 %v12812_v44, %v10891_v57  ;;  %v10693_v57 = vld [vmem:[#allocation5 + $0x1550] sm:$0xf0]  ;;  %v10699_v44 = vld [vmem:[#allocation5 + $0x1518] sm:$0xf] }
 0x52d   :  { %v10552_v3 = vor.u32 %v12721_v53, %v10549_v55 }
 0x532   :  { %7316 = vmatpush.bf16.xpose.msra.mxu0 %v10740_v54  ;;  %7329 = vmatpush.bf16.xpose.msra.mxu1 %v10744_v6  ;;  %v10556_v54 = vor.u32 %v12730_v39, %v10555_v5  ;;  %v12836_v6 = vld [vmem:[#allocation5 + $0x179c] sm:$0xf] }
 0x533   :  { %7342 = vmatpush.bf16.xpose.msra.mxu2 %v10748_v7  ;;  %v11021_v7 = vld [vmem:[#allocation5 + $0x17d8] sm:$0xf0] }
 0x534   :  { %7355 = vmatpush.bf16.xpose.msra.mxu3 %v10752_v9  ;;  %v11012_v9 = vor.u32 %v12843_v60, %v11011_v59  ;;  %v11024_v13 = vor.u32 %v12836_v6, %v11021_v7  ;;  %v12787_v59 = vld [vmem:[#allocation5 + $0x1614] sm:$0xf] }
 0x535   :  { %v10821_v60 = vld [vmem:[#allocation5 + $0x1650] sm:$0xf0] }
 0x53a   :  { %7317 = vmatpush.bf16.xpose.msra.mxu0 %v10676_v25  ;;  %7330 = vmatpush.bf16.xpose.msra.mxu1 %v10680_v26  ;;  %v12820_v25 = vld [vmem:[#allocation5 + $0x171c] sm:$0xf] }
 0x53b   :  { %7343 = vmatpush.bf16.xpose.msra.mxu2 %v10684_v45  ;;  %v10957_v26 = vld [vmem:[#allocation5 + $0x1758] sm:$0xf0]  ;;  %v10948_v45 = vor.u32 %v12827_v62, %v10947_v63  ;;  %v12779_v63 = vld [vmem:[#allocation5 + $0x15cc] sm:$0xf0]  ;;  %v12771_v62 = vld [vmem:[#allocation5 + $0x1594] sm:$0xf] }
 0x53c   :  { %7356 = vmatpush.bf16.xpose.msra.mxu3 %v10688_v29  ;;  %v10952_v29 = vor.u32 %v12819_v14, %v10949_v16  ;;  %v10960_v30 = vor.u32 %v12820_v25, %v10957_v26  ;;  %v10757_v14 = vld [vmem:[#allocation5 + $0x15d0] sm:$0xf0]  ;;  %v10763_v16 = vld [vmem:[#allocation5 + $0x1598] sm:$0xf]  ;;  %v10765_v25 = vld [vmem:[#allocation5 + $0x15d8] sm:$0xf0] }
 0x542   :  { %7318 = vmatpush.bf16.xpose.msra.mxu0 %v10612_v46  ;;  %7331 = vmatpush.bf16.xpose.msra.mxu1 %v10616_v32  ;;  %v12804_v46 = vld [vmem:[#allocation5 + $0x169c] sm:$0xf] }
 0x543   :  { %7344 = vmatpush.bf16.xpose.msra.mxu2 %v10620_v49  ;;  %v10893_v32 = vld [vmem:[#allocation5 + $0x16d8] sm:$0xf0]  ;;  %v10884_v49 = vor.u32 %v12811_v36, %v10883_v35  ;;  %v10691_v36 = vld [vmem:[#allocation5 + $0x1510] sm:$0xf] }
 0x544   :  { %7357 = vmatpush.bf16.xpose.msra.mxu3 %v10624_v27  ;;  %v10888_v27 = vor.u32 %v12803_v41, %v10885_v22  ;;  %v10896_v51 = vor.u32 %v12804_v46, %v10893_v32  ;;  %v12763_v41 = vld [vmem:[#allocation5 + $0x154c] sm:$0xf0]  ;;  %v12755_v22 = vld [vmem:[#allocation5 + $0x1514] sm:$0xf]  ;;  %v12764_v46 = vld [vmem:[#allocation5 + $0x1554] sm:$0xf0] }
 0x545   :  { %v12756_v32 = vld [vmem:[#allocation5 + $0x151c] sm:$0xf] }
 0x54a   :  { %7319 = vmatpush.bf16.xpose.msra.mxu0 %v10548_v0  ;;  %7332 = vmatpush.bf16.xpose.msra.mxu1 %v10552_v3  ;;  %v12796_v0 = vld [vmem:[#allocation5 + $0x1654] sm:$0xf0] }
 0x54b   :  { %7345 = vmatpush.bf16.xpose.msra.mxu2 %v10556_v54  ;;  %v10824_v54 = vor.u32 %v12787_v59, %v10821_v60  ;;  %v10828_v6 = vor.u32 %v12796_v0, %v10827_v11  ;;  %v12748_v59 = vld [vmem:[#allocation5 + $0x14d4] sm:$0xf0]  ;;  %v12740_v60 = vld [vmem:[#allocation5 + $0x149c] sm:$0xf] }
 0x54c   :  { %7358 = vmatpush.bf16.xpose.msra.mxu3 %v10560_v8  ;;  %v10637_v11 = vld [vmem:[#allocation5 + $0x14d8] sm:$0xf0] }
 0x54e   :  { %v7217_v53 = vpop.f32.mrf.mxu0  ;;  %v7230_v5 = vpop.f32.mrf.mxu1 }
 0x54f   :  { %v7218_v55 = vadd.f32 %v7217_v53, %v13437_v58  ;;  %v10832_v58 = vor.u32 %v12788_v61, %v10829_v52  ;;  %v10636_v52 = vor.u32 %v12748_v59, %v10635_v2  ;;  %v12805_v2 = vld [vmem:[#allocation5 + $0x16a4] sm:$0xf] }
 0x550   :  { %v10901_v59 = vld [vmem:[#allocation5 + $0x16e0] sm:$0xf0] }
 0x551   :  { %7320 = vmatmul.bf16.vlgmr.msra.gmra.mxu0 %v13263_v18  ;;  %7333 = vmatmul.bf16.vlgmr.msra.gmra.mxu1 %v13267_v21  ;;  %v7231_v39 = vadd.f32 %v7230_v5, %v7218_v55  ;;  %v10627_v55 = vld [vmem:[#allocation5 + $0x1490] sm:$0xf] }
 0x552   :  { %7364 = vmatpush.bf16.xpose.msrb.mxu0 %v11012_v9  ;;  %7377 = vmatpush.bf16.xpose.msrb.mxu1 %v11016_v10  ;;  %v12747_v5 = vld [vmem:[#allocation5 + $0x14cc] sm:$0xf0] }
 0x553   :  { %7390 = vmatpush.bf16.xpose.msrb.mxu2 %v11020_v12  ;;  %7359 = vmatmul.bf16.vlgmr.msra.gmra.mxu3 %v13265_v20  ;;  %v10628_v0 = vor.u32 %v12747_v5, %v10627_v55 }
 0x554   :  { %7403 = vmatpush.bf16.xpose.msrb.mxu3 %v11024_v13  ;;  %7346 = vmatmul.bf16.vlgmr.msra.gmra.mxu2 %v13261_v17  ;;  %v10755_v13 = vld [vmem:[#allocation5 + $0x1590] sm:$0xf] }
 0x555   :  { %v10756_v26 = vor.u32 %v12779_v63, %v10755_v13  ;;  %v11027_v13 = vld [vmem:[#allocation5 + $0x17a0] sm:$0xf] }
 0x556   :  { %v7256_v8 = vpop.f32.mrf.mxu3  ;;  %v7219_v9 = vpop.f32.mrf.mxu0  ;;  %v12845_v63 = vld [vmem:[#allocation5 + $0x17dc] sm:$0xf0] }
 0x557   :  { %v7243_v3 = vpop.f32.mrf.mxu2  ;;  %v7232_v10 = vpop.f32.mrf.mxu1  ;;  %v12724_v9 = vld [vmem:[#allocation5 + $0x141c] sm:$0xf] }
 0x558   :  { %v7244_v7 = vadd.f32 %v7243_v3, %v7231_v39  ;;  %v12739_v39 = vld [vmem:[#allocation5 + $0x1494] sm:$0xf]  ;;  %v10563_v3 = vld [vmem:[#allocation5 + $0x1410] sm:$0xf]  ;;  %v10573_v10 = vld [vmem:[#allocation5 + $0x1458] sm:$0xf0] }
 0x559   :  { %v10632_v61 = vor.u32 %v12739_v39, %v10629_v56  ;;  %v10899_v39 = vld [vmem:[#allocation5 + $0x16a0] sm:$0xf] }
 0x55a   :  { %7365 = vmatpush.bf16.xpose.msrb.mxu0 %v10948_v45  ;;  %7378 = vmatpush.bf16.xpose.msrb.mxu1 %v10952_v29  ;;  %v13444_v12 = vadd.f32 %v7256_v8, %v7244_v7  ;;  %v10760_v45 = vor.u32 %v12771_v62, %v10757_v14  ;;  %v10764_v29 = vor.u32 %v12780_v40, %v10763_v16  ;;  %v10565_v7 = vld [vmem:[#allocation5 + $0x1450] sm:$0xf0]  ;;  %v12732_v8 = vld [vmem:[#allocation5 + $0x1454] sm:$0xf0]  ;;  %v12837_v62 = vld [vmem:[#allocation5 + $0x17a4] sm:$0xf] }
 0x55b   :  { %7391 = vmatpush.bf16.xpose.msrb.mxu2 %v10956_v47  ;;  %v11029_v16 = vld [vmem:[#allocation5 + $0x17e0] sm:$0xf0]  ;;  %v11035_v40 = vld [vmem:[#allocation5 + $0x17a8] sm:$0xf]  ;;  %v12813_v56 = vld [vmem:[#allocation5 + $0x16dc] sm:$0xf0] }
 0x55c   :  { %7404 = vmatpush.bf16.xpose.msrb.mxu3 %v10960_v30  ;;  %v10768_v30 = vor.u32 %v12772_v19, %v10765_v25  ;;  %v12846_v19 = vld [vmem:[#allocation5 + $0x17e4] sm:$0xf0] }
 0x55e   :  { %v7258_v35 = vpop.f32.mrf.mxu3 }
 0x55f   :  { %v7245_v47 = vpop.f32.mrf.mxu2  ;;  %v11032_v35 = vor.u32 %v12837_v62, %v11029_v16  ;;  %v10843_v62 = vld [vmem:[#allocation5 + $0x1628] sm:$0xf]  ;;  %v12790_v16 = vld [vmem:[#allocation5 + $0x162c] sm:$0xf] }
 0x560   :  { %v10576_v47 = vor.u32 %v12724_v9, %v10573_v10  ;;  %v10835_v9 = vld [vmem:[#allocation5 + $0x1620] sm:$0xf] }
 0x561   :  { %v12797_v10 = vld [vmem:[#allocation5 + $0x165c] sm:$0xf0] }
 0x562   :  { %7366 = vmatpush.bf16.xpose.msrb.mxu0 %v10884_v49  ;;  %7379 = vmatpush.bf16.xpose.msrb.mxu1 %v10888_v27  ;;  %v10701_v49 = vld [vmem:[#allocation5 + $0x1558] sm:$0xf0]  ;;  %v10692_v27 = vor.u32 %v12763_v41, %v10691_v36  ;;  %v11036_v36 = vor.u32 %v12846_v19, %v11035_v40  ;;  %v10845_v40 = vld [vmem:[#allocation5 + $0x1668] sm:$0xf0]  ;;  %v10836_v19 = vor.u32 %v12797_v10, %v10835_v9  ;;  %v10645_v9 = vld [vmem:[#allocation5 + $0x14e0] sm:$0xf0] }
 0x563   :  { %7392 = vmatpush.bf16.xpose.msrb.mxu2 %v10892_v50  ;;  %v10696_v50 = vor.u32 %v12755_v22, %v10693_v57  ;;  %v10704_v53 = vor.u32 %v12756_v32, %v10701_v49  ;;  %v10963_v22 = vld [vmem:[#allocation5 + $0x1720] sm:$0xf]  ;;  %v10971_v32 = vld [vmem:[#allocation5 + $0x1728] sm:$0xf] }
 0x564   :  { %7405 = vmatpush.bf16.xpose.msrb.mxu3 %v10896_v51  ;;  %v10700_v51 = vor.u32 %v12764_v46, %v10699_v44  ;;  %v12829_v57 = vld [vmem:[#allocation5 + $0x175c] sm:$0xf0]  ;;  %v12821_v44 = vld [vmem:[#allocation5 + $0x1724] sm:$0xf]  ;;  %v12830_v49 = vld [vmem:[#allocation5 + $0x1764] sm:$0xf0] }
 0x565   :  { %v10965_v46 = vld [vmem:[#allocation5 + $0x1760] sm:$0xf0]  ;;  %v10972_v55 = vor.u32 %v12830_v49, %v10971_v32  ;;  %v12782_v32 = vld [vmem:[#allocation5 + $0x15e4] sm:$0xf0]  ;;  %v12774_v49 = vld [vmem:[#allocation5 + $0x15ac] sm:$0xf] }
 0x566   :  { %v10651_v10 = vld [vmem:[#allocation5 + $0x14a8] sm:$0xf] }
 0x56a   :  { %7367 = vmatpush.bf16.xpose.msrb.mxu0 %v10820_v1  ;;  %7380 = vmatpush.bf16.xpose.msrb.mxu1 %v10824_v54  ;;  %v10640_v1 = vor.u32 %v12740_v60, %v10637_v11  ;;  %v12731_v54 = vld [vmem:[#allocation5 + $0x144c] sm:$0xf0]  ;;  %v10907_v60 = vld [vmem:[#allocation5 + $0x16a8] sm:$0xf] }
 0x56b   :  { %7393 = vmatpush.bf16.xpose.msrb.mxu2 %v10828_v6  ;;  %v12723_v6 = vld [vmem:[#allocation5 + $0x1414] sm:$0xf]  ;;  %v10564_v14 = vor.u32 %v12731_v54, %v10563_v3  ;;  %v12814_v11 = vld [vmem:[#allocation5 + $0x16e4] sm:$0xf0] }
 0x56c   :  { %7406 = vmatpush.bf16.xpose.msrb.mxu3 %v10832_v58  ;;  %v10571_v58 = vld [vmem:[#allocation5 + $0x1418] sm:$0xf]  ;;  %v10568_v25 = vor.u32 %v12723_v6, %v10565_v7  ;;  %v10908_v3 = vor.u32 %v12814_v11, %v10907_v60  ;;  %v10709_v60 = vld [vmem:[#allocation5 + $0x1560] sm:$0xf0]  ;;  %v10715_v11 = vld [vmem:[#allocation5 + $0x1528] sm:$0xf] }
 0x572   :  { %7368 = vmatpush.bf16.xpose.msrb.mxu0 %v10756_v26  ;;  %7381 = vmatpush.bf16.xpose.msrb.mxu1 %v10760_v45  ;;  %v10572_v26 = vor.u32 %v12732_v8, %v10571_v58  ;;  %v12838_v45 = vld [vmem:[#allocation5 + $0x17ac] sm:$0xf] }
 0x573   :  { %7394 = vmatpush.bf16.xpose.msrb.mxu2 %v10764_v29  ;;  %v11037_v29 = vld [vmem:[#allocation5 + $0x17e8] sm:$0xf0] }
 0x574   :  { %7407 = vmatpush.bf16.xpose.msrb.mxu3 %v10768_v30  ;;  %v11028_v30 = vor.u32 %v12845_v63, %v11027_v13  ;;  %v11040_v41 = vor.u32 %v12838_v45, %v11037_v29  ;;  %v12789_v13 = vld [vmem:[#allocation5 + $0x1624] sm:$0xf] }
 0x575   :  { %v10837_v63 = vld [vmem:[#allocation5 + $0x1660] sm:$0xf0] }
 0x57a   :  { %7369 = vmatpush.bf16.xpose.msrb.mxu0 %v10692_v27  ;;  %7382 = vmatpush.bf16.xpose.msrb.mxu1 %v10696_v50  ;;  %v12822_v27 = vld [vmem:[#allocation5 + $0x172c] sm:$0xf] }
 0x57b   :  { %7395 = vmatpush.bf16.xpose.msrb.mxu2 %v10700_v51  ;;  %v10973_v50 = vld [vmem:[#allocation5 + $0x1768] sm:$0xf0]  ;;  %v10964_v51 = vor.u32 %v12829_v57, %v10963_v22  ;;  %v12781_v22 = vld [vmem:[#allocation5 + $0x15dc] sm:$0xf0]  ;;  %v12773_v57 = vld [vmem:[#allocation5 + $0x15a4] sm:$0xf] }
 0x57c   :  { %7408 = vmatpush.bf16.xpose.msrb.mxu3 %v10704_v53  ;;  %v10968_v53 = vor.u32 %v12821_v44, %v10965_v46  ;;  %v10976_v5 = vor.u32 %v12822_v27, %v10973_v50  ;;  %v10773_v44 = vld [vmem:[#allocation5 + $0x15e0] sm:$0xf0]  ;;  %v10779_v46 = vld [vmem:[#allocation5 + $0x15a8] sm:$0xf]  ;;  %v10781_v27 = vld [vmem:[#allocation5 + $0x15e8] sm:$0xf0] }
 0x582   :  { %7370 = vmatpush.bf16.xpose.msrb.mxu0 %v10628_v0  ;;  %7383 = vmatpush.bf16.xpose.msrb.mxu1 %v10632_v61  ;;  %v12806_v0 = vld [vmem:[#allocation5 + $0x16ac] sm:$0xf] }
 0x583   :  { %7396 = vmatpush.bf16.xpose.msrb.mxu2 %v10636_v52  ;;  %v10909_v61 = vld [vmem:[#allocation5 + $0x16e8] sm:$0xf0]  ;;  %v10900_v52 = vor.u32 %v12813_v56, %v10899_v39  ;;  %v10707_v56 = vld [vmem:[#allocation5 + $0x1520] sm:$0xf] }
 0x584   :  { %7409 = vmatpush.bf16.xpose.msrb.mxu3 %v10640_v1  ;;  %v10904_v1 = vor.u32 %v12805_v2, %v10901_v59  ;;  %v10912_v54 = vor.u32 %v12806_v0, %v10909_v61  ;;  %v12765_v2 = vld [vmem:[#allocation5 + $0x155c] sm:$0xf0]  ;;  %v12757_v59 = vld [vmem:[#allocation5 + $0x1524] sm:$0xf]  ;;  %v12766_v0 = vld [vmem:[#allocation5 + $0x1564] sm:$0xf0] }
 0x585   :  { %v12758_v61 = vld [vmem:[#allocation5 + $0x152c] sm:$0xf] }
 0x58a   :  { %7371 = vmatpush.bf16.xpose.msrb.mxu0 %v10564_v14  ;;  %7384 = vmatpush.bf16.xpose.msrb.mxu1 %v10568_v25  ;;  %v12798_v14 = vld [vmem:[#allocation5 + $0x1664] sm:$0xf0] }
 0x58b   :  { %7397 = vmatpush.bf16.xpose.msrb.mxu2 %v10572_v26  ;;  %v10840_v26 = vor.u32 %v12789_v13, %v10837_v63  ;;  %v10844_v45 = vor.u32 %v12798_v14, %v10843_v62  ;;  %v12750_v13 = vld [vmem:[#allocation5 + $0x14e4] sm:$0xf0]  ;;  %v12742_v63 = vld [vmem:[#allocation5 + $0x14ac] sm:$0xf] }
 0x58c   :  { %7410 = vmatpush.bf16.xpose.msrb.mxu3 %v10576_v47  ;;  %v10653_v62 = vld [vmem:[#allocation5 + $0x14e8] sm:$0xf0] }
 0x58e   :  { %v7269_v6 = vpop.f32.mrf.mxu0  ;;  %v7282_v58 = vpop.f32.mrf.mxu1 }
 0x58f   :  { %v7270_v7 = vadd.f32 %v7269_v6, %v13444_v12  ;;  %v10848_v12 = vor.u32 %v12790_v16, %v10845_v40  ;;  %v10652_v40 = vor.u32 %v12750_v13, %v10651_v10  ;;  %v12807_v10 = vld [vmem:[#allocation5 + $0x16b4] sm:$0xf] }
 0x590   :  { %v10917_v13 = vld [vmem:[#allocation5 + $0x16f0] sm:$0xf0] }
 0x591   :  { %7372 = vmatmul.bf16.vlgmr.msrb.gmra.mxu0 %v13277_v33  ;;  %7385 = vmatmul.bf16.vlgmr.msrb.gmra.mxu1 %v13281_v38  ;;  %v7283_v8 = vadd.f32 %v7282_v58, %v7270_v7  ;;  %v10643_v7 = vld [vmem:[#allocation5 + $0x14a0] sm:$0xf] }
 0x592   :  { %7416 = vmatpush.bf16.xpose.msra.mxu0 %v11028_v30  ;;  %7429 = vmatpush.bf16.xpose.msra.mxu1 %v11032_v35  ;;  %v12749_v58 = vld [vmem:[#allocation5 + $0x14dc] sm:$0xf0] }
 0x593   :  { %7442 = vmatpush.bf16.xpose.msra.mxu2 %v11036_v36  ;;  %7411 = vmatmul.bf16.vlgmr.msrb.gmra.mxu3 %v13283_v4  ;;  %v10644_v14 = vor.u32 %v12749_v58, %v10643_v7 }
 0x594   :  { %7455 = vmatpush.bf16.xpose.msra.mxu3 %v11040_v41  ;;  %7398 = vmatmul.bf16.vlgmr.msrb.gmra.mxu2 %v13279_v34  ;;  %v10771_v41 = vld [vmem:[#allocation5 + $0x15a0] sm:$0xf] }
 0x595   :  { %v10772_v50 = vor.u32 %v12781_v22, %v10771_v41  ;;  %v11043_v41 = vld [vmem:[#allocation5 + $0x17b0] sm:$0xf] }
 0x596   :  { %v7308_v47 = vpop.f32.mrf.mxu3  ;;  %v7271_v30 = vpop.f32.mrf.mxu0  ;;  %v12847_v22 = vld [vmem:[#allocation5 + $0x17ec] sm:$0xf0] }
 0x597   :  { %v7295_v25 = vpop.f32.mrf.mxu2  ;;  %v7284_v35 = vpop.f32.mrf.mxu1  ;;  %v12726_v30 = vld [vmem:[#allocation5 + $0x142c] sm:$0xf] }
 0x598   :  { %v7296_v29 = vadd.f32 %v7295_v25, %v7283_v8  ;;  %v12741_v8 = vld [vmem:[#allocation5 + $0x14a4] sm:$0xf]  ;;  %v10579_v25 = vld [vmem:[#allocation5 + $0x1420] sm:$0xf]  ;;  %v10589_v35 = vld [vmem:[#allocation5 + $0x1468] sm:$0xf0] }
 0x599   :  { %v10648_v16 = vor.u32 %v12741_v8, %v10645_v9  ;;  %v10915_v8 = vld [vmem:[#allocation5 + $0x16b0] sm:$0xf] }
 0x59a   :  { %7417 = vmatpush.bf16.xpose.msra.mxu0 %v10964_v51  ;;  %7430 = vmatpush.bf16.xpose.msra.mxu1 %v10968_v53  ;;  %v13451_v36 = vadd.f32 %v7308_v47, %v7296_v29  ;;  %v10776_v51 = vor.u32 %v12773_v57, %v10773_v44  ;;  %v10780_v53 = vor.u32 %v12782_v32, %v10779_v46  ;;  %v10581_v29 = vld [vmem:[#allocation5 + $0x1460] sm:$0xf0]  ;;  %v12734_v47 = vld [vmem:[#allocation5 + $0x1464] sm:$0xf0]  ;;  %v12839_v57 = vld [vmem:[#allocation5 + $0x17b4] sm:$0xf] }
 0x59b   :  { %7443 = vmatpush.bf16.xpose.msra.mxu2 %v10972_v55  ;;  %v11045_v46 = vld [vmem:[#allocation5 + $0x17f0] sm:$0xf0]  ;;  %v11051_v32 = vld [vmem:[#allocation5 + $0x17b8] sm:$0xf]  ;;  %v12815_v9 = vld [vmem:[#allocation5 + $0x16ec] sm:$0xf0] }
 0x59c   :  { %7456 = vmatpush.bf16.xpose.msra.mxu3 %v10976_v5  ;;  %v10784_v5 = vor.u32 %v12774_v49, %v10781_v27  ;;  %v12848_v49 = vld [vmem:[#allocation5 + $0x17f4] sm:$0xf0] }
 0x59e   :  { %v7310_v39 = vpop.f32.mrf.mxu3 }
 0x59f   :  { %v7297_v55 = vpop.f32.mrf.mxu2  ;;  %v11048_v39 = vor.u32 %v12839_v57, %v11045_v46 }
 0x5a0   :  { %v10592_v55 = vor.u32 %v12726_v30, %v10589_v35  ;;  %v10859_v30 = vld [vmem:[#allocation5 + $0x1638] sm:$0xf] }
 0x5a1   :  { %v12800_v35 = vld [vmem:[#allocation5 + $0x1674] sm:$0xf0] }
 0x5a2   :  { %7418 = vmatpush.bf16.xpose.msra.mxu0 %v10900_v52  ;;  %7431 = vmatpush.bf16.xpose.msra.mxu1 %v10904_v1  ;;  %v10717_v52 = vld [vmem:[#allocation5 + $0x1568] sm:$0xf0]  ;;  %v10708_v1 = vor.u32 %v12765_v2, %v10707_v56  ;;  %v11052_v56 = vor.u32 %v12848_v49, %v11051_v32  ;;  %v10860_v46 = vor.u32 %v12800_v35, %v10859_v30  ;;  %v10787_v49 = vld [vmem:[#allocation5 + $0x15b0] sm:$0xf]  ;;  %v12743_v30 = vld [vmem:[#allocation5 + $0x14b4] sm:$0xf] }
 0x5a3   :  { %7444 = vmatpush.bf16.xpose.msra.mxu2 %v10908_v3  ;;  %v10712_v3 = vor.u32 %v12757_v59, %v10709_v60  ;;  %v10720_v6 = vor.u32 %v12758_v61, %v10717_v52  ;;  %v10979_v59 = vld [vmem:[#allocation5 + $0x1730] sm:$0xf]  ;;  %v10987_v61 = vld [vmem:[#allocation5 + $0x1738] sm:$0xf]  ;;  %v10661_v35 = vld [vmem:[#allocation5 + $0x14f0] sm:$0xf0] }
 0x5a4   :  { %7457 = vmatpush.bf16.xpose.msra.mxu3 %v10912_v54  ;;  %v10716_v54 = vor.u32 %v12766_v0, %v10715_v11  ;;  %v12831_v60 = vld [vmem:[#allocation5 + $0x176c] sm:$0xf0]  ;;  %v12823_v11 = vld [vmem:[#allocation5 + $0x1734] sm:$0xf]  ;;  %v12832_v52 = vld [vmem:[#allocation5 + $0x1774] sm:$0xf0] }
 0x5a5   :  { %v10981_v0 = vld [vmem:[#allocation5 + $0x1770] sm:$0xf0]  ;;  %v10988_v7 = vor.u32 %v12832_v52, %v10987_v61 }
 0x5aa   :  { %7419 = vmatpush.bf16.xpose.msra.mxu0 %v10836_v19  ;;  %7432 = vmatpush.bf16.xpose.msra.mxu1 %v10840_v26  ;;  %v10656_v19 = vor.u32 %v12742_v63, %v10653_v62  ;;  %v12733_v26 = vld [vmem:[#allocation5 + $0x145c] sm:$0xf0]  ;;  %v10923_v63 = vld [vmem:[#allocation5 + $0x16b8] sm:$0xf] }
 0x5ab   :  { %7445 = vmatpush.bf16.xpose.msra.mxu2 %v10844_v45  ;;  %v12725_v45 = vld [vmem:[#allocation5 + $0x1424] sm:$0xf]  ;;  %v10580_v44 = vor.u32 %v12733_v26, %v10579_v25  ;;  %v12816_v62 = vld [vmem:[#allocation5 + $0x16f4] sm:$0xf0] }
 0x5ac   :  { %7458 = vmatpush.bf16.xpose.msra.mxu3 %v10848_v12  ;;  %v10587_v12 = vld [vmem:[#allocation5 + $0x1428] sm:$0xf]  ;;  %v10584_v27 = vor.u32 %v12725_v45, %v10581_v29  ;;  %v10924_v25 = vor.u32 %v12816_v62, %v10923_v63  ;;  %v10851_v45 = vld [vmem:[#allocation5 + $0x1630] sm:$0xf] }
 0x5ad   :  { %v12799_v29 = vld [vmem:[#allocation5 + $0x166c] sm:$0xf0] }
 0x5ae   :  { %v10852_v57 = vor.u32 %v12799_v29, %v10851_v45 }
 0x5b2   :  { %7420 = vmatpush.bf16.xpose.msra.mxu0 %v10772_v50  ;;  %7433 = vmatpush.bf16.xpose.msra.mxu1 %v10776_v51  ;;  %v10588_v50 = vor.u32 %v12734_v47, %v10587_v12  ;;  %v12840_v51 = vld [vmem:[#allocation5 + $0x17bc] sm:$0xf]  ;;  %v12791_v12 = vld [vmem:[#allocation5 + $0x1634] sm:$0xf] }
 0x5b3   :  { %7446 = vmatpush.bf16.xpose.msra.mxu2 %v10780_v53  ;;  %v11053_v53 = vld [vmem:[#allocation5 + $0x17f8] sm:$0xf0]  ;;  %v10853_v47 = vld [vmem:[#allocation5 + $0x1670] sm:$0xf0] }
 0x5b4   :  { %7459 = vmatpush.bf16.xpose.msra.mxu3 %v10784_v5  ;;  %v11044_v5 = vor.u32 %v12847_v22, %v11043_v41  ;;  %v11056_v2 = vor.u32 %v12840_v51, %v11053_v53  ;;  %v12792_v41 = vld [vmem:[#allocation5 + $0x163c] sm:$0xf]  ;;  %v10789_v51 = vld [vmem:[#allocation5 + $0x15f0] sm:$0xf0]  ;;  %v10795_v53 = vld [vmem:[#allocation5 + $0x15b8] sm:$0xf] }
 0x5b5   :  { %v10861_v22 = vld [vmem:[#allocation5 + $0x1678] sm:$0xf0] }
 0x5b6   :  { %v10864_v32 = vor.u32 %v12792_v41, %v10861_v22  ;;  %v10667_v41 = vld [vmem:[#allocation5 + $0x14b8] sm:$0xf] }
 0x5b7   :  { %v12752_v22 = vld [vmem:[#allocation5 + $0x14f4] sm:$0xf0] }
 0x5ba   :  { %7421 = vmatpush.bf16.xpose.msra.mxu0 %v10708_v1  ;;  %7434 = vmatpush.bf16.xpose.msra.mxu1 %v10712_v3  ;;  %v12824_v1 = vld [vmem:[#allocation5 + $0x173c] sm:$0xf] }
 0x5bb   :  { %7447 = vmatpush.bf16.xpose.msra.mxu2 %v10716_v54  ;;  %v10989_v3 = vld [vmem:[#allocation5 + $0x1778] sm:$0xf0]  ;;  %v10980_v54 = vor.u32 %v12831_v60, %v10979_v59 }
 0x5bc   :  { %7460 = vmatpush.bf16.xpose.msra.mxu3 %v10720_v6  ;;  %v10984_v6 = vor.u32 %v12823_v11, %v10981_v0  ;;  %v10992_v58 = vor.u32 %v12824_v1, %v10989_v3  ;;  %v10723_v3 = vld [vmem:[#allocation5 + $0x1530] sm:$0xf] }
 0x5c2   :  { %7422 = vmatpush.bf16.xpose.msra.mxu0 %v10644_v14  ;;  %7435 = vmatpush.bf16.xpose.msra.mxu1 %v10648_v16  ;;  %v12808_v14 = vld [vmem:[#allocation5 + $0x16bc] sm:$0xf] }
 0x5c3   :  { %7448 = vmatpush.bf16.xpose.msra.mxu2 %v10652_v40  ;;  %v10925_v16 = vld [vmem:[#allocation5 + $0x16f8] sm:$0xf0]  ;;  %v10916_v40 = vor.u32 %v12815_v9, %v10915_v8  ;;  %v10731_v8 = vld [vmem:[#allocation5 + $0x1538] sm:$0xf] }
 0x5c4   :  { %7461 = vmatpush.bf16.xpose.msra.mxu3 %v10656_v19  ;;  %v10920_v19 = vor.u32 %v12807_v10, %v10917_v13  ;;  %v10928_v26 = vor.u32 %v12808_v14, %v10925_v16  ;;  %v12768_v9 = vld [vmem:[#allocation5 + $0x1574] sm:$0xf0]  ;;  %v12760_v10 = vld [vmem:[#allocation5 + $0x153c] sm:$0xf] }
 0x5c5   :  { %v10733_v13 = vld [vmem:[#allocation5 + $0x1578] sm:$0xf0] }
 0x5ca   :  { %7423 = vmatpush.bf16.xpose.msra.mxu0 %v10580_v44  ;;  %7436 = vmatpush.bf16.xpose.msra.mxu1 %v10584_v27  ;;  %v10856_v44 = vor.u32 %v12791_v12, %v10853_v47  ;;  %v12783_v27 = vld [vmem:[#allocation5 + $0x15ec] sm:$0xf0] }
 0x5cb   :  { %7449 = vmatpush.bf16.xpose.msra.mxu2 %v10588_v50  ;;  %v12775_v50 = vld [vmem:[#allocation5 + $0x15b4] sm:$0xf]  ;;  %v10659_v12 = vld [vmem:[#allocation5 + $0x14b0] sm:$0xf] }
 0x5cc   :  { %7462 = vmatpush.bf16.xpose.msra.mxu3 %v10592_v55  ;;  %v12784_v55 = vld [vmem:[#allocation5 + $0x15f4] sm:$0xf0]  ;;  %v10792_v11 = vor.u32 %v12775_v50, %v10789_v51  ;;  %v12751_v47 = vld [vmem:[#allocation5 + $0x14ec] sm:$0xf0]  ;;  %v10668_v50 = vor.u32 %v12752_v22, %v10667_v41  ;;  %v11379_v22 = vld [vmem:[#allocation5 + $0x1a80] sm:$0xf] }
 0x5cd   :  { %v10796_v0 = vor.u32 %v12784_v55, %v10795_v53  ;;  %v10595_v53 = vld [vmem:[#allocation5 + $0x1430] sm:$0xf] }
 0x5ce   :  { %v7321_v60 = vpop.f32.mrf.mxu0  ;;  %v7334_v1 = vpop.f32.mrf.mxu1  ;;  %v12735_v55 = vld [vmem:[#allocation5 + $0x146c] sm:$0xf0] }
 0x5d1   :  { %7424 = vmatmul.bf16.vlgmr.msra.gmra.mxu0 %v13295_v15  ;;  %7437 = vmatmul.bf16.vlgmr.msra.gmra.mxu1 %v13299_v24 }
 0x5d2   :  { %7468 = vmatpush.bf16.xpose.msrb.mxu0 %v11044_v5  ;;  %7481 = vmatpush.bf16.xpose.msrb.mxu1 %v11048_v39  ;;  %v12776_v5 = vld [vmem:[#allocation5 + $0x15bc] sm:$0xf] }
 0x5d3   :  { %7494 = vmatpush.bf16.xpose.msrb.mxu2 %v11052_v56  ;;  %7463 = vmatmul.bf16.vlgmr.msra.gmra.mxu3 %v13301_v28  ;;  %v10797_v39 = vld [vmem:[#allocation5 + $0x15f8] sm:$0xf0]  ;;  %v10788_v56 = vor.u32 %v12783_v27, %v10787_v49  ;;  %v10664_v27 = vor.u32 %v12743_v30, %v10661_v35 }
 0x5d4   :  { %7507 = vmatpush.bf16.xpose.msrb.mxu3 %v11056_v2  ;;  %7450 = vmatmul.bf16.vlgmr.msra.gmra.mxu2 %v13297_v23  ;;  %v13115_v2 = vld [vmem:[#allocation7] sm:$0xff]  ;;  %v10800_v61 = vor.u32 %v12776_v5, %v10797_v39  ;;  %v12727_v5 = vld [vmem:[#allocation5 + $0x1434] sm:$0xf] }
 0x5d5   :  { %v6261_v59 = vperm.slane %v13115_v2, 5  ;;  %v10597_v39 = vld [vmem:[#allocation5 + $0x1470] sm:$0xf0]  ;;  %v12736_v2 = vld [vmem:[#allocation5 + $0x1474] sm:$0xf0] }
 0x5d6   :  { %v7360_v14 = vpop.f32.mrf.mxu3  ;;  %v7336_v29 = vpop.f32.mrf.mxu1 }
 0x5d7   :  { %v7322_v52 = vadd.f32 %v7321_v60, %v6261_v59  ;;  %v7347_v62 = vpop.f32.mrf.mxu2  ;;  %v12728_v59 = vld [vmem:[#allocation5 + $0x143c] sm:$0xf]  ;;  %v12946_v29 = vld [vmem:[#allocation5 + $0x1b0c] sm:$0xf] }
 0x5d8   :  { %v10605_v60 = vld [vmem:[#allocation5 + $0x1478] sm:$0xf0] }
 0x5da   :  { %7469 = vmatpush.bf16.xpose.msrb.mxu0 %v10980_v54  ;;  %7482 = vmatpush.bf16.xpose.msrb.mxu1 %v10984_v6  ;;  %v12767_v54 = vld [vmem:[#allocation5 + $0x156c] sm:$0xf0]  ;;  %v12759_v6 = vld [vmem:[#allocation5 + $0x1534] sm:$0xf] }
 0x5db   :  { %7495 = vmatpush.bf16.xpose.msrb.mxu2 %v10988_v7  ;;  %v7335_v7 = vadd.f32 %v7334_v1, %v7322_v52  ;;  %v10724_v63 = vor.u32 %v12767_v54, %v10723_v3  ;;  %v10596_v52 = vor.u32 %v12735_v55, %v10595_v53  ;;  %v11509_v1 = vld [vmem:[#allocation5 + $0x1bc0] sm:$0xf0]  ;;  %v11515_v3 = vld [vmem:[#allocation5 + $0x1b88] sm:$0xf] }
 0x5dc   :  { %7508 = vmatpush.bf16.xpose.msrb.mxu3 %v10992_v58  ;;  %v10725_v58 = vld [vmem:[#allocation5 + $0x1570] sm:$0xf0]  ;;  %v12970_v54 = vld [vmem:[#allocation5 + $0x1bc4] sm:$0xf0] }
 0x5dd   :  { %v10728_v16 = vor.u32 %v12759_v6, %v10725_v58  ;;  %v10600_v6 = vor.u32 %v12727_v5, %v10597_v39  ;;  %v12962_v58 = vld [vmem:[#allocation5 + $0x1b8c] sm:$0xf] }
 0x5de   :  { %v7362_v49 = vpop.f32.mrf.mxu3 }
 0x5df   :  { %v12938_v49 = vld [vmem:[#allocation5 + $0x1ac4] sm:$0xf0] }
 0x5e2   :  { %7470 = vmatpush.bf16.xpose.msrb.mxu0 %v10916_v40  ;;  %7483 = vmatpush.bf16.xpose.msrb.mxu1 %v10920_v19  ;;  %v10732_v40 = vor.u32 %v12768_v9, %v10731_v8  ;;  %v7348_v19 = vadd.f32 %v7347_v62, %v7335_v7  ;;  %v11517_v8 = vld [vmem:[#allocation5 + $0x1bc8] sm:$0xf0]  ;;  %v10608_v9 = vor.u32 %v12728_v59, %v10605_v60  ;;  %v11315_v60 = vld [vmem:[#allocation5 + $0x1a00] sm:$0xf] }
 0x5e3   :  { %7496 = vmatpush.bf16.xpose.msrb.mxu2 %v10924_v25  ;;  %v7323_v25 = vpop.f32.mrf.mxu0  ;;  %v11520_v62 = vor.u32 %v12962_v58, %v11517_v8 }
 0x5e4   :  { %7509 = vmatpush.bf16.xpose.msrb.mxu3 %v10928_v26  ;;  %v10736_v26 = vor.u32 %v12760_v10, %v10733_v13  ;;  %v13457_v45 = vadd.f32 %v7360_v14, %v7348_v19  ;;  %v11443_v14 = vld [vmem:[#allocation5 + $0x1b00] sm:$0xf]  ;;  %v11445_v19 = vld [vmem:[#allocation5 + $0x1b40] sm:$0xf0]  ;;  %v11451_v25 = vld [vmem:[#allocation5 + $0x1b08] sm:$0xf] }
 0x5ea   :  { %7471 = vmatpush.bf16.xpose.msrb.mxu0 %v10852_v57  ;;  %7484 = vmatpush.bf16.xpose.msrb.mxu1 %v10856_v44  ;;  %v12744_v57 = vld [vmem:[#allocation5 + $0x14bc] sm:$0xf] }
 0x5eb   :  { %7497 = vmatpush.bf16.xpose.msrb.mxu2 %v10860_v46  ;;  %v10669_v44 = vld [vmem:[#allocation5 + $0x14f8] sm:$0xf0]  ;;  %v10660_v46 = vor.u32 %v12751_v47, %v10659_v12  ;;  %v11453_v12 = vld [vmem:[#allocation5 + $0x1b48] sm:$0xf0] }
 0x5ec   :  { %7510 = vmatpush.bf16.xpose.msrb.mxu3 %v10864_v32  ;;  %v7349_v32 = vpop.f32.mrf.mxu2  ;;  %v10672_v51 = vor.u32 %v12744_v57, %v10669_v44  ;;  %v11456_v41 = vor.u32 %v12946_v29, %v11453_v12  ;;  %v12937_v57 = vld [vmem:[#allocation5 + $0x1abc] sm:$0xf0]  ;;  %v12929_v44 = vld [vmem:[#allocation5 + $0x1a84] sm:$0xf]  ;;  %v12898_v29 = vld [vmem:[#allocation5 + $0x198c] sm:$0xf] }
 0x5ed   :  { %v11387_v32 = vld [vmem:[#allocation5 + $0x1a88] sm:$0xf]  ;;  %v11261_v12 = vld [vmem:[#allocation5 + $0x19c8] sm:$0xf0] }
 0x5ee   :  { %v11388_v55 = vor.u32 %v12938_v49, %v11387_v32  ;;  %v12881_v32 = vld [vmem:[#allocation5 + $0x1904] sm:$0xf] }
 0x5ef   :  { %v11189_v49 = vld [vmem:[#allocation5 + $0x1940] sm:$0xf0] }
 0x5f2   :  { %7472 = vmatpush.bf16.xpose.msrb.mxu0 %v10788_v56  ;;  %7485 = vmatpush.bf16.xpose.msrb.mxu1 %v10792_v11  ;;  %v10603_v56 = vld [vmem:[#allocation5 + $0x1438] sm:$0xf]  ;;  %v11507_v11 = vld [vmem:[#allocation5 + $0x1b80] sm:$0xf] }
 0x5f3   :  { %7498 = vmatpush.bf16.xpose.msrb.mxu2 %v10796_v0  ;;  %v12969_v0 = vld [vmem:[#allocation5 + $0x1bbc] sm:$0xf0]  ;;  %v10604_v7 = vor.u32 %v12736_v2, %v10603_v56 }
 0x5f4   :  { %7511 = vmatpush.bf16.xpose.msrb.mxu3 %v10800_v61  ;;  %v12961_v61 = vld [vmem:[#allocation5 + $0x1b84] sm:$0xf]  ;;  %v11508_v10 = vor.u32 %v12969_v0, %v11507_v11  ;;  %v12921_v11 = vld [vmem:[#allocation5 + $0x1a3c] sm:$0xf0] }
 0x5f5   :  { %v11512_v13 = vor.u32 %v12961_v61, %v11509_v1  ;;  %v12913_v0 = vld [vmem:[#allocation5 + $0x1a04] sm:$0xf]  ;;  %v12922_v1 = vld [vmem:[#allocation5 + $0x1a44] sm:$0xf0] }
 0x5f6   :  { %v11317_v61 = vld [vmem:[#allocation5 + $0x1a40] sm:$0xf0] }
 0x5fa   :  { %7473 = vmatpush.bf16.xpose.msrb.mxu0 %v10724_v63  ;;  %7486 = vmatpush.bf16.xpose.msrb.mxu1 %v10728_v16  ;;  %v11516_v63 = vor.u32 %v12970_v54, %v11515_v3  ;;  %v12953_v16 = vld [vmem:[#allocation5 + $0x1b3c] sm:$0xf0]  ;;  %v12914_v3 = vld [vmem:[#allocation5 + $0x1a0c] sm:$0xf] }
 0x5fb   :  { %7499 = vmatpush.bf16.xpose.msrb.mxu2 %v10732_v40  ;;  %v12945_v40 = vld [vmem:[#allocation5 + $0x1b04] sm:$0xf]  ;;  %v11444_v47 = vor.u32 %v12953_v16, %v11443_v14  ;;  %v11325_v54 = vld [vmem:[#allocation5 + $0x1a48] sm:$0xf0]  ;;  %v11251_v14 = vld [vmem:[#allocation5 + $0x1980] sm:$0xf] }
 0x5fc   :  { %7512 = vmatpush.bf16.xpose.msrb.mxu3 %v10736_v26  ;;  %v12954_v26 = vld [vmem:[#allocation5 + $0x1b44] sm:$0xf0]  ;;  %v11448_v30 = vor.u32 %v12945_v40, %v11445_v19  ;;  %v12905_v16 = vld [vmem:[#allocation5 + $0x19bc] sm:$0xf0]  ;;  %v12897_v40 = vld [vmem:[#allocation5 + $0x1984] sm:$0xf] }
 0x5fd   :  { %v11452_v35 = vor.u32 %v12954_v26, %v11451_v25  ;;  %v11253_v19 = vld [vmem:[#allocation5 + $0x19c0] sm:$0xf0]  ;;  %v11259_v25 = vld [vmem:[#allocation5 + $0x1988] sm:$0xf] }
 0x5fe   :  { %v12906_v26 = vld [vmem:[#allocation5 + $0x19c4] sm:$0xf0] }
 0x602   :  { %7474 = vmatpush.bf16.xpose.msrb.mxu0 %v10660_v46  ;;  %7487 = vmatpush.bf16.xpose.msrb.mxu1 %v10664_v27  ;;  %v11381_v46 = vld [vmem:[#allocation5 + $0x1ac0] sm:$0xf0]  ;;  %v12930_v27 = vld [vmem:[#allocation5 + $0x1a8c] sm:$0xf] }
 0x603   :  { %7500 = vmatpush.bf16.xpose.msrb.mxu2 %v10668_v50  ;;  %v11389_v50 = vld [vmem:[#allocation5 + $0x1ac8] sm:$0xf0]  ;;  %v11384_v53 = vor.u32 %v12929_v44, %v11381_v46  ;;  %v11187_v44 = vld [vmem:[#allocation5 + $0x1900] sm:$0xf] }
 0x604   :  { %7513 = vmatpush.bf16.xpose.msrb.mxu3 %v10672_v51  ;;  %v11380_v51 = vor.u32 %v12937_v57, %v11379_v22  ;;  %v11392_v5 = vor.u32 %v12930_v27, %v11389_v50  ;;  %v11264_v22 = vor.u32 %v12898_v29, %v11261_v12  ;;  %v12889_v46 = vld [vmem:[#allocation5 + $0x193c] sm:$0xf0]  ;;  %v11195_v27 = vld [vmem:[#allocation5 + $0x1908] sm:$0xf]  ;;  %v11531_v29 = vld [vmem:[#allocation5 + $0x1b98] sm:$0xf] }
 0x605   :  { %v12890_v50 = vld [vmem:[#allocation5 + $0x1944] sm:$0xf0]  ;;  %v12972_v12 = vld [vmem:[#allocation5 + $0x1bd4] sm:$0xf0] }
 0x60a   :  { %7475 = vmatpush.bf16.xpose.msrb.mxu0 %v10596_v52  ;;  %7488 = vmatpush.bf16.xpose.msrb.mxu1 %v10600_v6  ;;  %v11323_v52 = vld [vmem:[#allocation5 + $0x1a08] sm:$0xf]  ;;  %v11316_v6 = vor.u32 %v12921_v11, %v11315_v60  ;;  %v12865_v60 = vld [vmem:[#allocation5 + $0x1884] sm:$0xf] }
 0x60b   :  { %7501 = vmatpush.bf16.xpose.msrb.mxu2 %v10604_v7  ;;  %v11320_v7 = vor.u32 %v12913_v0, %v11317_v61  ;;  %v11324_v58 = vor.u32 %v12922_v1, %v11323_v52  ;;  %v11125_v11 = vld [vmem:[#allocation5 + $0x18c0] sm:$0xf0]  ;;  %v11131_v0 = vld [vmem:[#allocation5 + $0x1888] sm:$0xf]  ;;  %v12866_v52 = vld [vmem:[#allocation5 + $0x188c] sm:$0xf] }
 0x60c   :  { %7514 = vmatpush.bf16.xpose.msrb.mxu3 %v10608_v9  ;;  %v11328_v9 = vor.u32 %v12914_v3, %v11325_v54  ;;  %v12874_v61 = vld [vmem:[#allocation5 + $0x18c4] sm:$0xf0]  ;;  %v11133_v1 = vld [vmem:[#allocation5 + $0x18c8] sm:$0xf0]  ;;  %v11128_v54 = vor.u32 %v12865_v60, %v11125_v11  ;;  %v11395_v11 = vld [vmem:[#allocation5 + $0x1a90] sm:$0xf] }
 0x60e   :  { %v7373_v39 = vpop.f32.mrf.mxu0  ;;  %v7386_v2 = vpop.f32.mrf.mxu1 }
 0x60f   :  { %v7374_v56 = vadd.f32 %v7373_v39, %v13457_v45  ;;  %v11196_v39 = vor.u32 %v12890_v50, %v11195_v27  ;;  %v12955_v27 = vld [vmem:[#allocation5 + $0x1b4c] sm:$0xf0]  ;;  %v12947_v50 = vld [vmem:[#allocation5 + $0x1b14] sm:$0xf] }
 0x611   :  { %7476 = vmatmul.bf16.vlgmr.msrb.gmra.mxu0 %v13313_v37  ;;  %7489 = vmatmul.bf16.vlgmr.msrb.gmra.mxu1 %v13317_v43  ;;  %v7387_v59 = vadd.f32 %v7386_v2, %v7374_v56  ;;  %v11123_v2 = vld [vmem:[#allocation5 + $0x1880] sm:$0xf] }
 0x612   :  { %7520 = vmatpush.bf16.xpose.msra.mxu0 %v11508_v10  ;;  %7533 = vmatpush.bf16.xpose.msra.mxu1 %v11512_v13 }
 0x613   :  { %7546 = vmatpush.bf16.xpose.msra.mxu2 %v11516_v63  ;;  %7515 = vmatmul.bf16.vlgmr.msrb.gmra.mxu3 %v13319_v48 }
 0x614   :  { %7559 = vmatpush.bf16.xpose.msra.mxu3 %v11520_v62  ;;  %7502 = vmatmul.bf16.vlgmr.msrb.gmra.mxu2 %v13315_v42 }
 0x616   :  { %v7412_v10 = vpop.f32.mrf.mxu3  ;;  %v7375_v13 = vpop.f32.mrf.mxu0 }
 0x617   :  { %v7399_v8 = vpop.f32.mrf.mxu2  ;;  %v7388_v63 = vpop.f32.mrf.mxu1  ;;  %v12858_v13 = vld [vmem:[#allocation5 + $0x1844] sm:$0xf0] }
 0x618   :  { %v7400_v45 = vadd.f32 %v7399_v8, %v7387_v59  ;;  %v12873_v59 = vld [vmem:[#allocation5 + $0x18bc] sm:$0xf0]  ;;  %v12850_v63 = vld [vmem:[#allocation5 + $0x180c] sm:$0xf] }
 0x619   :  { %v11124_v3 = vor.u32 %v12873_v59, %v11123_v2  ;;  %v12857_v8 = vld [vmem:[#allocation5 + $0x183c] sm:$0xf0] }
 0x61a   :  { %7521 = vmatpush.bf16.xpose.msra.mxu0 %v11444_v47  ;;  %7534 = vmatpush.bf16.xpose.msra.mxu1 %v11448_v30  ;;  %v13464_v62 = vadd.f32 %v7412_v10, %v7400_v45  ;;  %v11252_v47 = vor.u32 %v12905_v16, %v11251_v14  ;;  %v11256_v30 = vor.u32 %v12897_v40, %v11253_v19  ;;  %v11061_v45 = vld [vmem:[#allocation5 + $0x1840] sm:$0xf0]  ;;  %v11067_v10 = vld [vmem:[#allocation5 + $0x1808] sm:$0xf]  ;;  %v11069_v14 = vld [vmem:[#allocation5 + $0x1848] sm:$0xf0] }
 0x61b   :  { %7547 = vmatpush.bf16.xpose.msra.mxu2 %v11452_v35  ;;  %v11260_v35 = vor.u32 %v12906_v26, %v11259_v25  ;;  %v11523_v16 = vld [vmem:[#allocation5 + $0x1b90] sm:$0xf]  ;;  %v12963_v19 = vld [vmem:[#allocation5 + $0x1b94] sm:$0xf] }
 0x61c   :  { %7560 = vmatpush.bf16.xpose.msra.mxu3 %v11456_v41  ;;  %v12971_v40 = vld [vmem:[#allocation5 + $0x1bcc] sm:$0xf0]  ;;  %v11525_v26 = vld [vmem:[#allocation5 + $0x1bd0] sm:$0xf0] }
 0x61e   :  { %v7414_v57 = vpop.f32.mrf.mxu3 }
 0x61f   :  { %v7401_v41 = vpop.f32.mrf.mxu2  ;;  %v11524_v57 = vor.u32 %v12971_v40, %v11523_v16  ;;  %v12923_v16 = vld [vmem:[#allocation5 + $0x1a4c] sm:$0xf0]  ;;  %v12915_v40 = vld [vmem:[#allocation5 + $0x1a14] sm:$0xf] }
 0x620   :  { %v11533_v41 = vld [vmem:[#allocation5 + $0x1bd8] sm:$0xf0] }
 0x622   :  { %7522 = vmatpush.bf16.xpose.msra.mxu0 %v11380_v51  ;;  %7535 = vmatpush.bf16.xpose.msra.mxu1 %v11384_v53  ;;  %v12882_v51 = vld [vmem:[#allocation5 + $0x190c] sm:$0xf] }
 0x623   :  { %7548 = vmatpush.bf16.xpose.msra.mxu2 %v11388_v55  ;;  %v11197_v53 = vld [vmem:[#allocation5 + $0x1948] sm:$0xf0]  ;;  %v11188_v55 = vor.u32 %v12889_v46, %v11187_v44  ;;  %v11528_v44 = vor.u32 %v12963_v19, %v11525_v26  ;;  %v11532_v46 = vor.u32 %v12972_v12, %v11531_v29  ;;  %v11333_v19 = vld [vmem:[#allocation5 + $0x1a50] sm:$0xf0]  ;;  %v12924_v26 = vld [vmem:[#allocation5 + $0x1a54] sm:$0xf0] }
 0x624   :  { %7561 = vmatpush.bf16.xpose.msra.mxu3 %v11392_v5  ;;  %v11192_v5 = vor.u32 %v12881_v32, %v11189_v49  ;;  %v11200_v56 = vor.u32 %v12882_v51, %v11197_v53  ;;  %v11459_v49 = vld [vmem:[#allocation5 + $0x1b10] sm:$0xf]  ;;  %v11461_v51 = vld [vmem:[#allocation5 + $0x1b50] sm:$0xf0]  ;;  %v11467_v53 = vld [vmem:[#allocation5 + $0x1b18] sm:$0xf] }
 0x625   :  { %v11464_v2 = vor.u32 %v12947_v50, %v11461_v51  ;;  %v12916_v29 = vld [vmem:[#allocation5 + $0x1a1c] sm:$0xf]  ;;  %v12899_v50 = vld [vmem:[#allocation5 + $0x1994] sm:$0xf] }
 0x626   :  { %v11341_v12 = vld [vmem:[#allocation5 + $0x1a58] sm:$0xf0]  ;;  %v11269_v51 = vld [vmem:[#allocation5 + $0x19d0] sm:$0xf0] }
 0x62a   :  { %7523 = vmatpush.bf16.xpose.msra.mxu0 %v11316_v6  ;;  %7536 = vmatpush.bf16.xpose.msra.mxu1 %v11320_v7  ;;  %v11132_v6 = vor.u32 %v12874_v61, %v11131_v0  ;;  %v11136_v7 = vor.u32 %v12866_v52, %v11133_v1  ;;  %v12939_v0 = vld [vmem:[#allocation5 + $0x1acc] sm:$0xf0]  ;;  %v12931_v61 = vld [vmem:[#allocation5 + $0x1a94] sm:$0xf]  ;;  %v11403_v1 = vld [vmem:[#allocation5 + $0x1a98] sm:$0xf] }
 0x62b   :  { %7549 = vmatpush.bf16.xpose.msra.mxu2 %v11324_v58  ;;  %v11059_v58 = vld [vmem:[#allocation5 + $0x1800] sm:$0xf]  ;;  %v11397_v52 = vld [vmem:[#allocation5 + $0x1ad0] sm:$0xf0] }
 0x62c   :  { %7562 = vmatpush.bf16.xpose.msra.mxu3 %v11328_v9  ;;  %v12849_v9 = vld [vmem:[#allocation5 + $0x1804] sm:$0xf]  ;;  %v11060_v25 = vor.u32 %v12857_v8, %v11059_v58  ;;  %v11400_v58 = vor.u32 %v12931_v61, %v11397_v52  ;;  %v11203_v61 = vld [vmem:[#allocation5 + $0x1910] sm:$0xf] }
 0x62d   :  { %v12891_v52 = vld [vmem:[#allocation5 + $0x194c] sm:$0xf0] }
 0x632   :  { %7524 = vmatpush.bf16.xpose.msra.mxu0 %v11252_v47  ;;  %7537 = vmatpush.bf16.xpose.msra.mxu1 %v11256_v30  ;;  %v11064_v47 = vor.u32 %v12849_v9, %v11061_v45  ;;  %v11068_v30 = vor.u32 %v12858_v13, %v11067_v10 }
 0x633   :  { %7550 = vmatpush.bf16.xpose.msra.mxu2 %v11260_v35  ;;  %v12964_v35 = vld [vmem:[#allocation5 + $0x1b9c] sm:$0xf] }
 0x634   :  { %7563 = vmatpush.bf16.xpose.msra.mxu3 %v11264_v22  ;;  %v11072_v22 = vor.u32 %v12850_v63, %v11069_v14  ;;  %v11536_v32 = vor.u32 %v12964_v35, %v11533_v41  ;;  %v11331_v14 = vld [vmem:[#allocation5 + $0x1a10] sm:$0xf]  ;;  %v11336_v35 = vor.u32 %v12915_v40, %v11333_v19  ;;  %v11147_v40 = vld [vmem:[#allocation5 + $0x1898] sm:$0xf] }
 0x635   :  { %v12876_v19 = vld [vmem:[#allocation5 + $0x18d4] sm:$0xf0] }
 0x63a   :  { %7525 = vmatpush.bf16.xpose.msra.mxu0 %v11188_v55  ;;  %7538 = vmatpush.bf16.xpose.msra.mxu1 %v11192_v5  ;;  %v12956_v55 = vld [vmem:[#allocation5 + $0x1b54] sm:$0xf0]  ;;  %v12948_v5 = vld [vmem:[#allocation5 + $0x1b1c] sm:$0xf] }
 0x63b   :  { %7551 = vmatpush.bf16.xpose.msra.mxu2 %v11196_v39  ;;  %v11469_v39 = vld [vmem:[#allocation5 + $0x1b58] sm:$0xf0]  ;;  %v11468_v59 = vor.u32 %v12956_v55, %v11467_v53  ;;  %v11275_v53 = vld [vmem:[#allocation5 + $0x1998] sm:$0xf] }
 0x63c   :  { %7564 = vmatpush.bf16.xpose.msra.mxu3 %v11200_v56  ;;  %v11460_v56 = vor.u32 %v12955_v27, %v11459_v49  ;;  %v11472_v60 = vor.u32 %v12948_v5, %v11469_v39  ;;  %v11267_v49 = vld [vmem:[#allocation5 + $0x1990] sm:$0xf]  ;;  %v12908_v55 = vld [vmem:[#allocation5 + $0x19d4] sm:$0xf0]  ;;  %v12900_v5 = vld [vmem:[#allocation5 + $0x199c] sm:$0xf] }
 0x63d   :  { %v12907_v27 = vld [vmem:[#allocation5 + $0x19cc] sm:$0xf0]  ;;  %v11277_v39 = vld [vmem:[#allocation5 + $0x19d8] sm:$0xf0] }
 0x642   :  { %7526 = vmatpush.bf16.xpose.msra.mxu0 %v11124_v3  ;;  %7539 = vmatpush.bf16.xpose.msra.mxu1 %v11128_v54  ;;  %v12940_v3 = vld [vmem:[#allocation5 + $0x1ad4] sm:$0xf0]  ;;  %v12932_v54 = vld [vmem:[#allocation5 + $0x1a9c] sm:$0xf] }
 0x643   :  { %7552 = vmatpush.bf16.xpose.msra.mxu2 %v11132_v6  ;;  %v11405_v6 = vld [vmem:[#allocation5 + $0x1ad8] sm:$0xf0]  ;;  %v11404_v8 = vor.u32 %v12940_v3, %v11403_v1  ;;  %v12883_v1 = vld [vmem:[#allocation5 + $0x1914] sm:$0xf] }
 0x644   :  { %7565 = vmatpush.bf16.xpose.msra.mxu3 %v11136_v7  ;;  %v11396_v7 = vor.u32 %v12939_v0, %v11395_v11  ;;  %v11408_v9 = vor.u32 %v12932_v54, %v11405_v6  ;;  %v11280_v11 = vor.u32 %v12900_v5, %v11277_v39  ;;  %v11205_v3 = vld [vmem:[#allocation5 + $0x1950] sm:$0xf0]  ;;  %v11211_v54 = vld [vmem:[#allocation5 + $0x1918] sm:$0xf]  ;;  %v11547_v5 = vld [vmem:[#allocation5 + $0x1ba8] sm:$0xf] }
 0x645   :  { %v12892_v6 = vld [vmem:[#allocation5 + $0x1954] sm:$0xf0]  ;;  %v12974_v39 = vld [vmem:[#allocation5 + $0x1be4] sm:$0xf0] }
 0x64a   :  { %7527 = vmatpush.bf16.xpose.msra.mxu0 %v11060_v25  ;;  %7540 = vmatpush.bf16.xpose.msra.mxu1 %v11064_v47  ;;  %v11339_v25 = vld [vmem:[#allocation5 + $0x1a18] sm:$0xf]  ;;  %v11332_v47 = vor.u32 %v12923_v16, %v11331_v14  ;;  %v12867_v14 = vld [vmem:[#allocation5 + $0x1894] sm:$0xf] }
 0x64b   :  { %7553 = vmatpush.bf16.xpose.msra.mxu2 %v11068_v30  ;;  %v11340_v41 = vor.u32 %v12924_v26, %v11339_v25  ;;  %v11141_v16 = vld [vmem:[#allocation5 + $0x18d0] sm:$0xf0]  ;;  %v12868_v25 = vld [vmem:[#allocation5 + $0x189c] sm:$0xf] }
 0x64c   :  { %7566 = vmatpush.bf16.xpose.msra.mxu3 %v11072_v22  ;;  %v11149_v26 = vld [vmem:[#allocation5 + $0x18d8] sm:$0xf0] }
 0x64e   :  { %v7425_v45 = vpop.f32.mrf.mxu0  ;;  %v7438_v13 = vpop.f32.mrf.mxu1 }
 0x64f   :  { %v7426_v10 = vadd.f32 %v7425_v45, %v13464_v62  ;;  %v11344_v62 = vor.u32 %v12916_v29, %v11341_v12  ;;  %v11212_v45 = vor.u32 %v12892_v6, %v11211_v54  ;;  %v11144_v12 = vor.u32 %v12867_v14, %v11141_v16  ;;  %v12957_v54 = vld [vmem:[#allocation5 + $0x1b5c] sm:$0xf0]  ;;  %v12949_v6 = vld [vmem:[#allocation5 + $0x1b24] sm:$0xf] }
 0x650   :  { %v11411_v16 = vld [vmem:[#allocation5 + $0x1aa0] sm:$0xf] }
 0x651   :  { %7528 = vmatmul.bf16.vlgmr.msra.gmra.mxu0 %v13263_v18  ;;  %7541 = vmatmul.bf16.vlgmr.msra.gmra.mxu1 %v13267_v21  ;;  %v7439_v63 = vadd.f32 %v7438_v13, %v7426_v10  ;;  %v11139_v13 = vld [vmem:[#allocation5 + $0x1890] sm:$0xf] }
 0x652   :  { %7572 = vmatpush.bf16.xpose.msrb.mxu0 %v11524_v57  ;;  %7585 = vmatpush.bf16.xpose.msrb.mxu1 %v11528_v44 }
 0x653   :  { %7598 = vmatpush.bf16.xpose.msrb.mxu2 %v11532_v46  ;;  %7567 = vmatmul.bf16.vlgmr.msra.gmra.mxu3 %v13265_v20 }
 0x654   :  { %7611 = vmatpush.bf16.xpose.msrb.mxu3 %v11536_v32  ;;  %7554 = vmatmul.bf16.vlgmr.msra.gmra.mxu2 %v13261_v17 }
 0x656   :  { %v7464_v57 = vpop.f32.mrf.mxu3  ;;  %v7427_v44 = vpop.f32.mrf.mxu0 }
 0x657   :  { %v7451_v30 = vpop.f32.mrf.mxu2  ;;  %v7440_v46 = vpop.f32.mrf.mxu1  ;;  %v12860_v44 = vld [vmem:[#allocation5 + $0x1854] sm:$0xf0] }
 0x658   :  { %v7452_v22 = vadd.f32 %v7451_v30, %v7439_v63  ;;  %v12875_v63 = vld [vmem:[#allocation5 + $0x18cc] sm:$0xf0]  ;;  %v11152_v30 = vor.u32 %v12868_v25, %v11149_v26  ;;  %v12852_v46 = vld [vmem:[#allocation5 + $0x181c] sm:$0xf]  ;;  %v11413_v25 = vld [vmem:[#allocation5 + $0x1ae0] sm:$0xf0] }
 0x659   :  { %v11140_v29 = vor.u32 %v12875_v63, %v11139_v13  ;;  %v11419_v26 = vld [vmem:[#allocation5 + $0x1aa8] sm:$0xf] }
 0x65a   :  { %7573 = vmatpush.bf16.xpose.msrb.mxu0 %v11460_v56  ;;  %7586 = vmatpush.bf16.xpose.msrb.mxu1 %v11464_v2  ;;  %v13471_v32 = vadd.f32 %v7464_v57, %v7452_v22  ;;  %v11268_v56 = vor.u32 %v12907_v27, %v11267_v49  ;;  %v11272_v2 = vor.u32 %v12899_v50, %v11269_v51  ;;  %v12851_v22 = vld [vmem:[#allocation5 + $0x1814] sm:$0xf]  ;;  %v11083_v57 = vld [vmem:[#allocation5 + $0x1818] sm:$0xf]  ;;  %v11085_v49 = vld [vmem:[#allocation5 + $0x1858] sm:$0xf0] }
 0x65b   :  { %7599 = vmatpush.bf16.xpose.msrb.mxu2 %v11468_v59  ;;  %v11276_v59 = vor.u32 %v12908_v55, %v11275_v53  ;;  %v11539_v27 = vld [vmem:[#allocation5 + $0x1ba0] sm:$0xf]  ;;  %v12965_v51 = vld [vmem:[#allocation5 + $0x1ba4] sm:$0xf] }
 0x65c   :  { %7612 = vmatpush.bf16.xpose.msrb.mxu3 %v11472_v60  ;;  %v12973_v50 = vld [vmem:[#allocation5 + $0x1bdc] sm:$0xf0]  ;;  %v11541_v55 = vld [vmem:[#allocation5 + $0x1be0] sm:$0xf0] }
 0x65e   :  { %v7466_v0 = vpop.f32.mrf.mxu3 }
 0x65f   :  { %v7453_v60 = vpop.f32.mrf.mxu2  ;;  %v11540_v0 = vor.u32 %v12973_v50, %v11539_v27  ;;  %v12925_v27 = vld [vmem:[#allocation5 + $0x1a5c] sm:$0xf0]  ;;  %v12917_v50 = vld [vmem:[#allocation5 + $0x1a24] sm:$0xf] }
 0x660   :  { %v11549_v60 = vld [vmem:[#allocation5 + $0x1be8] sm:$0xf0] }
 0x662   :  { %7574 = vmatpush.bf16.xpose.msrb.mxu0 %v11396_v7  ;;  %7587 = vmatpush.bf16.xpose.msrb.mxu1 %v11400_v58  ;;  %v12884_v7 = vld [vmem:[#allocation5 + $0x191c] sm:$0xf] }
 0x663   :  { %7600 = vmatpush.bf16.xpose.msrb.mxu2 %v11404_v8  ;;  %v11213_v58 = vld [vmem:[#allocation5 + $0x1958] sm:$0xf0]  ;;  %v11204_v8 = vor.u32 %v12891_v52, %v11203_v61  ;;  %v11544_v61 = vor.u32 %v12965_v51, %v11541_v55  ;;  %v11548_v52 = vor.u32 %v12974_v39, %v11547_v5  ;;  %v11349_v51 = vld [vmem:[#allocation5 + $0x1a60] sm:$0xf0]  ;;  %v12926_v55 = vld [vmem:[#allocation5 + $0x1a64] sm:$0xf0] }
 0x664   :  { %7613 = vmatpush.bf16.xpose.msrb.mxu3 %v11408_v9  ;;  %v11208_v9 = vor.u32 %v12883_v1, %v11205_v3  ;;  %v11216_v10 = vor.u32 %v12884_v7, %v11213_v58  ;;  %v11475_v3 = vld [vmem:[#allocation5 + $0x1b20] sm:$0xf]  ;;  %v11477_v7 = vld [vmem:[#allocation5 + $0x1b60] sm:$0xf0]  ;;  %v11483_v58 = vld [vmem:[#allocation5 + $0x1b28] sm:$0xf] }
 0x665   :  { %v11480_v13 = vor.u32 %v12949_v6, %v11477_v7  ;;  %v12918_v5 = vld [vmem:[#allocation5 + $0x1a2c] sm:$0xf]  ;;  %v12901_v6 = vld [vmem:[#allocation5 + $0x19a4] sm:$0xf] }
 0x666   :  { %v11357_v39 = vld [vmem:[#allocation5 + $0x1a68] sm:$0xf0]  ;;  %v11285_v7 = vld [vmem:[#allocation5 + $0x19e0] sm:$0xf0] }
 0x66a   :  { %7575 = vmatpush.bf16.xpose.msrb.mxu0 %v11332_v47  ;;  %7588 = vmatpush.bf16.xpose.msrb.mxu1 %v11336_v35  ;;  %v11148_v47 = vor.u32 %v12876_v19, %v11147_v40  ;;  %v11075_v35 = vld [vmem:[#allocation5 + $0x1810] sm:$0xf]  ;;  %v12941_v40 = vld [vmem:[#allocation5 + $0x1adc] sm:$0xf0]  ;;  %v12933_v19 = vld [vmem:[#allocation5 + $0x1aa4] sm:$0xf] }
 0x66b   :  { %7601 = vmatpush.bf16.xpose.msrb.mxu2 %v11340_v41  ;;  %v12859_v41 = vld [vmem:[#allocation5 + $0x184c] sm:$0xf0] }
 0x66c   :  { %7614 = vmatpush.bf16.xpose.msrb.mxu3 %v11344_v62  ;;  %v11077_v62 = vld [vmem:[#allocation5 + $0x1850] sm:$0xf0]  ;;  %v11076_v53 = vor.u32 %v12859_v41, %v11075_v35  ;;  %v11416_v35 = vor.u32 %v12933_v19, %v11413_v25 }
 0x672   :  { %7576 = vmatpush.bf16.xpose.msrb.mxu0 %v11268_v56  ;;  %7589 = vmatpush.bf16.xpose.msrb.mxu1 %v11272_v2  ;;  %v11080_v56 = vor.u32 %v12851_v22, %v11077_v62  ;;  %v11084_v2 = vor.u32 %v12860_v44, %v11083_v57 }
 0x673   :  { %7602 = vmatpush.bf16.xpose.msrb.mxu2 %v11276_v59  ;;  %v12966_v59 = vld [vmem:[#allocation5 + $0x1bac] sm:$0xf] }
 0x674   :  { %7615 = vmatpush.bf16.xpose.msrb.mxu3 %v11280_v11  ;;  %v11088_v11 = vor.u32 %v12852_v46, %v11085_v49  ;;  %v11552_v1 = vor.u32 %v12966_v59, %v11549_v60  ;;  %v11347_v49 = vld [vmem:[#allocation5 + $0x1a20] sm:$0xf]  ;;  %v11352_v59 = vor.u32 %v12917_v50, %v11349_v51  ;;  %v12869_v50 = vld [vmem:[#allocation5 + $0x18a4] sm:$0xf] }
 0x675   :  { %v11157_v51 = vld [vmem:[#allocation5 + $0x18e0] sm:$0xf0] }
 0x67a   :  { %7577 = vmatpush.bf16.xpose.msrb.mxu0 %v11204_v8  ;;  %7590 = vmatpush.bf16.xpose.msrb.mxu1 %v11208_v9  ;;  %v12958_v8 = vld [vmem:[#allocation5 + $0x1b64] sm:$0xf0]  ;;  %v12950_v9 = vld [vmem:[#allocation5 + $0x1b2c] sm:$0xf] }
 0x67b   :  { %7603 = vmatpush.bf16.xpose.msrb.mxu2 %v11212_v45  ;;  %v11485_v45 = vld [vmem:[#allocation5 + $0x1b68] sm:$0xf0]  ;;  %v11484_v63 = vor.u32 %v12958_v8, %v11483_v58  ;;  %v7947_v58 = vrot.slane %v13451_v36, 4  ;;  %v12885_v36 = vld [vmem:[#allocation5 + $0x1924] sm:$0xf] }
 0x67c   :  { %7616 = vmatpush.bf16.xpose.msrb.mxu3 %v11216_v10  ;;  %v11476_v10 = vor.u32 %v12957_v54, %v11475_v3  ;;  %v11488_v14 = vor.u32 %v12950_v9, %v11485_v45  ;;  %v11283_v3 = vld [vmem:[#allocation5 + $0x19a0] sm:$0xf]  ;;  %v11291_v9 = vld [vmem:[#allocation5 + $0x19a8] sm:$0xf] }
 0x67d   :  { %v12909_v54 = vld [vmem:[#allocation5 + $0x19dc] sm:$0xf0]  ;;  %v12910_v45 = vld [vmem:[#allocation5 + $0x19e4] sm:$0xf0] }
 0x682   :  { %7578 = vmatpush.bf16.xpose.msrb.mxu0 %v11140_v29  ;;  %7591 = vmatpush.bf16.xpose.msrb.mxu1 %v11144_v12  ;;  %v12942_v29 = vld [vmem:[#allocation5 + $0x1ae4] sm:$0xf0]  ;;  %v12934_v12 = vld [vmem:[#allocation5 + $0x1aac] sm:$0xf] }
 0x683   :  { %7604 = vmatpush.bf16.xpose.msrb.mxu2 %v11148_v47  ;;  %v11421_v47 = vld [vmem:[#allocation5 + $0x1ae8] sm:$0xf0]  ;;  %v11420_v41 = vor.u32 %v12942_v29, %v11419_v26  ;;  %v11219_v29 = vld [vmem:[#allocation5 + $0x1920] sm:$0xf] }
 0x684   :  { %7617 = vmatpush.bf16.xpose.msrb.mxu3 %v11152_v30  ;;  %v11412_v30 = vor.u32 %v12941_v40, %v11411_v16  ;;  %v11424_v22 = vor.u32 %v12934_v12, %v11421_v47  ;;  %v11288_v16 = vor.u32 %v12901_v6, %v11285_v7  ;;  %v11292_v40 = vor.u32 %v12910_v45, %v11291_v9  ;;  %v12893_v12 = vld [vmem:[#allocation5 + $0x195c] sm:$0xf0]  ;;  %v11221_v47 = vld [vmem:[#allocation5 + $0x1960] sm:$0xf0]  ;;  %v11555_v6 = vld [vmem:[#allocation5 + $0x1bb0] sm:$0xf] }
 0x685   :  { %v12975_v7 = vld [vmem:[#allocation5 + $0x1bec] sm:$0xf0]  ;;  %v11557_v9 = vld [vmem:[#allocation5 + $0x1bf0] sm:$0xf0]  ;;  %v11563_v45 = vld [vmem:[#allocation5 + $0x1bb8] sm:$0xf] }
 0x68a   :  { %7579 = vmatpush.bf16.xpose.msrb.mxu0 %v11076_v53  ;;  %7592 = vmatpush.bf16.xpose.msrb.mxu1 %v11080_v56  ;;  %v11355_v53 = vld [vmem:[#allocation5 + $0x1a28] sm:$0xf]  ;;  %v11348_v56 = vor.u32 %v12925_v27, %v11347_v49  ;;  %v11155_v49 = vld [vmem:[#allocation5 + $0x18a0] sm:$0xf] }
 0x68b   :  { %7605 = vmatpush.bf16.xpose.msrb.mxu2 %v11084_v2  ;;  %v11356_v60 = vor.u32 %v12926_v55, %v11355_v53  ;;  %v12877_v27 = vld [vmem:[#allocation5 + $0x18dc] sm:$0xf0]  ;;  %v11163_v53 = vld [vmem:[#allocation5 + $0x18a8] sm:$0xf] }
 0x68c   :  { %7618 = vmatpush.bf16.xpose.msrb.mxu3 %v11088_v11  ;;  %v12878_v55 = vld [vmem:[#allocation5 + $0x18e4] sm:$0xf0] }
 0x68e   :  { %v7477_v62 = vpop.f32.mrf.mxu0  ;;  %v7490_v44 = vpop.f32.mrf.mxu1 }
 0x68f   :  { %v7478_v57 = vadd.f32 %v7477_v62, %v13471_v32  ;;  %v11360_v32 = vor.u32 %v12918_v5, %v11357_v39  ;;  %v11220_v62 = vor.u32 %v12893_v12, %v11219_v29  ;;  %v12870_v5 = vld [vmem:[#allocation5 + $0x18ac] sm:$0xf] }
 0x690   :  { %v11165_v39 = vld [vmem:[#allocation5 + $0x18e8] sm:$0xf0] }
 0x691   :  { %7580 = vmatmul.bf16.vlgmr.msrb.gmra.mxu0 %v13277_v33  ;;  %7593 = vmatmul.bf16.vlgmr.msrb.gmra.mxu1 %v13281_v38  ;;  %v7491_v46 = vadd.f32 %v7490_v44, %v7478_v57  ;;  %v11224_v57 = vor.u32 %v12885_v36, %v11221_v47  ;;  %v11491_v36 = vld [vmem:[#allocation5 + $0x1b30] sm:$0xf] }
 0x692   :  { %7624 = vmatpush.bf16.xpose.msra.mxu0 %v11540_v0  ;;  %7637 = vmatpush.bf16.xpose.msra.mxu1 %v11544_v61  ;;  %v12959_v47 = vld [vmem:[#allocation5 + $0x1b6c] sm:$0xf0] }
 0x693   :  { %7650 = vmatpush.bf16.xpose.msra.mxu2 %v11548_v52  ;;  %7619 = vmatmul.bf16.vlgmr.msrb.gmra.mxu3 %v13283_v4 }
 0x694   :  { %7663 = vmatpush.bf16.xpose.msra.mxu3 %v11552_v1  ;;  %7606 = vmatmul.bf16.vlgmr.msrb.gmra.mxu2 %v13279_v34 }
 0x696   :  { %v7516_v0 = vpop.f32.mrf.mxu3  ;;  %v7479_v61 = vpop.f32.mrf.mxu0 }
 0x697   :  { %v7503_v2 = vpop.f32.mrf.mxu2  ;;  %v7492_v52 = vpop.f32.mrf.mxu1  ;;  %v11093_v61 = vld [vmem:[#allocation5 + $0x1860] sm:$0xf0] }
 0x698   :  { %v7504_v11 = vadd.f32 %v7503_v2, %v7491_v46  ;;  %v11160_v2 = vor.u32 %v12869_v50, %v11157_v51  ;;  %v11099_v52 = vld [vmem:[#allocation5 + $0x1828] sm:$0xf]  ;;  %v11427_v50 = vld [vmem:[#allocation5 + $0x1ab0] sm:$0xf] }
 0x699   :  { %v12943_v51 = vld [vmem:[#allocation5 + $0x1aec] sm:$0xf0] }
 0x69a   :  { %7625 = vmatpush.bf16.xpose.msra.mxu0 %v11476_v10  ;;  %7638 = vmatpush.bf16.xpose.msra.mxu1 %v11480_v13  ;;  %v7517_v1 = vadd.f32 %v7516_v0, %v7504_v11  ;;  %v12902_v10 = vld [vmem:[#allocation5 + $0x19ac] sm:$0xf]  ;;  %v11091_v11 = vld [vmem:[#allocation5 + $0x1820] sm:$0xf]  ;;  %v12853_v0 = vld [vmem:[#allocation5 + $0x1824] sm:$0xf] }
 0x69b   :  { %7651 = vmatpush.bf16.xpose.msra.mxu2 %v11484_v63  ;;  %v11293_v13 = vld [vmem:[#allocation5 + $0x19e8] sm:$0xf0] }
 0x69c   :  { %7664 = vmatpush.bf16.xpose.msra.mxu3 %v11488_v14  ;;  %v7948_v8 = vrot.slane %v7517_v1, 3  ;;  %v11284_v14 = vor.u32 %v12909_v54, %v11283_v3  ;;  %v11296_v25 = vor.u32 %v12902_v10, %v11293_v13  ;;  %v12862_v1 = vld [vmem:[#allocation5 + $0x1864] sm:$0xf0]  ;;  %v12854_v3 = vld [vmem:[#allocation5 + $0x182c] sm:$0xf]  ;;  %v11096_v13 = vor.u32 %v12853_v0, %v11093_v61 }
 0x69d   :  { %v11101_v54 = vld [vmem:[#allocation5 + $0x1868] sm:$0xf0]  ;;  %v12976_v10 = vld [vmem:[#allocation5 + $0x1bf4] sm:$0xf0]  ;;  %v11363_v0 = vld [vmem:[#allocation5 + $0x1a30] sm:$0xf] }
 0x69e   :  { %v13479_v63 = vsel %vm7957_vm3, %v7947_v58, %v7948_v8  ;;  %v7518_v26 = vpop.f32.mrf.mxu3  ;;  %v12967_v58 = vld [vmem:[#allocation5 + $0x1bb4] sm:$0xf]  ;;  %v11564_v29 = vor.u32 %v12976_v10, %v11563_v45  ;;  %v12927_v61 = vld [vmem:[#allocation5 + $0x1a6c] sm:$0xf0] }
 0x69f   :  { %v7505_v19 = vpop.f32.mrf.mxu2  ;;  %v11560_v26 = vor.u32 %v12967_v58, %v11557_v9  ;;  %v11364_v58 = vor.u32 %v12927_v61, %v11363_v0  ;;  %v11299_v10 = vld [vmem:[#allocation5 + $0x19b0] sm:$0xf] }
 0x6a0   :  { %v11104_v19 = vor.u32 %v12854_v3, %v11101_v54  ;;  %v11371_v3 = vld [vmem:[#allocation5 + $0x1a38] sm:$0xf] }
 0x6a1   :  { %v12928_v54 = vld [vmem:[#allocation5 + $0x1a74] sm:$0xf0] }
 0x6a2   :  { %7626 = vmatpush.bf16.xpose.msra.mxu0 %v11412_v30  ;;  %7639 = vmatpush.bf16.xpose.msra.mxu1 %v11416_v35  ;;  %v11227_v30 = vld [vmem:[#allocation5 + $0x1928] sm:$0xf]  ;;  %v11372_v9 = vor.u32 %v12928_v54, %v11371_v3  ;;  %v12871_v3 = vld [vmem:[#allocation5 + $0x18b4] sm:$0xf] }
 0x6a3   :  { %7652 = vmatpush.bf16.xpose.msra.mxu2 %v11420_v41  ;;  %v12894_v35 = vld [vmem:[#allocation5 + $0x1964] sm:$0xf0]  ;;  %v12886_v41 = vld [vmem:[#allocation5 + $0x192c] sm:$0xf]  ;;  %v11173_v54 = vld [vmem:[#allocation5 + $0x18f0] sm:$0xf0] }
 0x6a4   :  { %7665 = vmatpush.bf16.xpose.msra.mxu3 %v11424_v22  ;;  %v11229_v22 = vld [vmem:[#allocation5 + $0x1968] sm:$0xf0]  ;;  %v11228_v44 = vor.u32 %v12894_v35, %v11227_v30  ;;  %v12951_v30 = vld [vmem:[#allocation5 + $0x1b34] sm:$0xf] }
 0x6a5   :  { %v11232_v46 = vor.u32 %v12886_v41, %v11229_v22  ;;  %v11493_v35 = vld [vmem:[#allocation5 + $0x1b70] sm:$0xf0]  ;;  %v11499_v41 = vld [vmem:[#allocation5 + $0x1b38] sm:$0xf] }
 0x6a6   :  { %v12960_v22 = vld [vmem:[#allocation5 + $0x1b74] sm:$0xf0] }
 0x6aa   :  { %7627 = vmatpush.bf16.xpose.msra.mxu0 %v11348_v56  ;;  %7640 = vmatpush.bf16.xpose.msra.mxu1 %v11352_v59  ;;  %v11156_v56 = vor.u32 %v12877_v27, %v11155_v49  ;;  %v11164_v59 = vor.u32 %v12878_v55, %v11163_v53  ;;  %v11500_v49 = vor.u32 %v12960_v22, %v11499_v41  ;;  %v12935_v53 = vld [vmem:[#allocation5 + $0x1ab4] sm:$0xf] }
 0x6ab   :  { %7653 = vmatpush.bf16.xpose.msra.mxu2 %v11356_v60  ;;  %v11168_v60 = vor.u32 %v12870_v5, %v11165_v39  ;;  %v11429_v55 = vld [vmem:[#allocation5 + $0x1af0] sm:$0xf0]  ;;  %v11435_v5 = vld [vmem:[#allocation5 + $0x1ab8] sm:$0xf] }
 0x6ac   :  { %7666 = vmatpush.bf16.xpose.msra.mxu3 %v11360_v32  ;;  %v12861_v32 = vld [vmem:[#allocation5 + $0x185c] sm:$0xf0]  ;;  %v12944_v39 = vld [vmem:[#allocation5 + $0x1af4] sm:$0xf0] }
 0x6ad   :  { %v11092_v8 = vor.u32 %v12861_v32, %v11091_v11  ;;  %v11436_v11 = vor.u32 %v12944_v39, %v11435_v5 }
 0x6b2   :  { %7628 = vmatpush.bf16.xpose.msra.mxu0 %v11284_v14  ;;  %7641 = vmatpush.bf16.xpose.msra.mxu1 %v11288_v16  ;;  %v11100_v14 = vor.u32 %v12862_v1, %v11099_v52  ;;  %v12968_v16 = vld [vmem:[#allocation5 + $0x1bbc] sm:$0xf]  ;;  %v12919_v52 = vld [vmem:[#allocation5 + $0x1a34] sm:$0xf] }
 0x6b3   :  { %7654 = vmatpush.bf16.xpose.msra.mxu2 %v11292_v40  ;;  %v11565_v40 = vld [vmem:[#allocation5 + $0x1bf8] sm:$0xf0]  ;;  %v11365_v1 = vld [vmem:[#allocation5 + $0x1a70] sm:$0xf0] }
 0x6b4   :  { %7667 = vmatpush.bf16.xpose.msra.mxu3 %v11296_v25  ;;  %v11556_v25 = vor.u32 %v12975_v7, %v11555_v6  ;;  %v11568_v12 = vor.u32 %v12968_v16, %v11565_v40  ;;  %v12920_v6 = vld [vmem:[#allocation5 + $0x1a3c] sm:$0xf]  ;;  %v11301_v16 = vld [vmem:[#allocation5 + $0x19f0] sm:$0xf0]  ;;  %v11307_v40 = vld [vmem:[#allocation5 + $0x19b8] sm:$0xf] }
 0x6b5   :  { %v11373_v7 = vld [vmem:[#allocation5 + $0x1a78] sm:$0xf0] }
 0x6b6   :  { %v11376_v45 = vor.u32 %v12920_v6, %v11373_v7  ;;  %v11179_v6 = vld [vmem:[#allocation5 + $0x18b8] sm:$0xf] }
 0x6b7   :  { %v12880_v7 = vld [vmem:[#allocation5 + $0x18f4] sm:$0xf0] }
 0x6ba   :  { %7629 = vmatpush.bf16.xpose.msra.mxu0 %v11220_v62  ;;  %7642 = vmatpush.bf16.xpose.msra.mxu1 %v11224_v57  ;;  %v12952_v62 = vld [vmem:[#allocation5 + $0x1b3c] sm:$0xf] }
 0x6bb   :  { %7655 = vmatpush.bf16.xpose.msra.mxu2 %v11228_v44  ;;  %v11501_v57 = vld [vmem:[#allocation5 + $0x1b78] sm:$0xf0]  ;;  %v11492_v44 = vor.u32 %v12959_v47, %v11491_v36 }
 0x6bc   :  { %7668 = vmatpush.bf16.xpose.msra.mxu3 %v11232_v46  ;;  %v11496_v46 = vor.u32 %v12951_v30, %v11493_v35  ;;  %v11504_v27 = vor.u32 %v12952_v62, %v11501_v57  ;;  %v11235_v57 = vld [vmem:[#allocation5 + $0x1930] sm:$0xf] }
 0x6c2   :  { %7630 = vmatpush.bf16.xpose.msra.mxu0 %v11156_v56  ;;  %7643 = vmatpush.bf16.xpose.msra.mxu1 %v11160_v2  ;;  %v12936_v56 = vld [vmem:[#allocation5 + $0x1abc] sm:$0xf] }
 0x6c3   :  { %7656 = vmatpush.bf16.xpose.msra.mxu2 %v11164_v59  ;;  %v11437_v2 = vld [vmem:[#allocation5 + $0x1af8] sm:$0xf0]  ;;  %v11428_v59 = vor.u32 %v12943_v51, %v11427_v50  ;;  %v11243_v50 = vld [vmem:[#allocation5 + $0x1938] sm:$0xf] }
 0x6c4   :  { %7669 = vmatpush.bf16.xpose.msra.mxu3 %v11168_v60  ;;  %v11432_v60 = vor.u32 %v12935_v53, %v11429_v55  ;;  %v11440_v32 = vor.u32 %v12936_v56, %v11437_v2  ;;  %v12896_v51 = vld [vmem:[#allocation5 + $0x1974] sm:$0xf0]  ;;  %v12888_v53 = vld [vmem:[#allocation5 + $0x193c] sm:$0xf] }
 0x6c5   :  { %v11245_v55 = vld [vmem:[#allocation5 + $0x1978] sm:$0xf0] }
 0x6ca   :  { %7631 = vmatpush.bf16.xpose.msra.mxu0 %v11092_v8  ;;  %7644 = vmatpush.bf16.xpose.msra.mxu1 %v11096_v13  ;;  %v11368_v8 = vor.u32 %v12919_v52, %v11365_v1  ;;  %v12911_v13 = vld [vmem:[#allocation5 + $0x19ec] sm:$0xf0] }
 0x6cb   :  { %7657 = vmatpush.bf16.xpose.msra.mxu2 %v11100_v14  ;;  %v12903_v14 = vld [vmem:[#allocation5 + $0x19b4] sm:$0xf]  ;;  %v11171_v52 = vld [vmem:[#allocation5 + $0x18b0] sm:$0xf] }
 0x6cc   :  { %7670 = vmatpush.bf16.xpose.msra.mxu3 %v11104_v19  ;;  %v12912_v19 = vld [vmem:[#allocation5 + $0x19f4] sm:$0xf0]  ;;  %v11304_v30 = vor.u32 %v12903_v14, %v11301_v16  ;;  %v12879_v1 = vld [vmem:[#allocation5 + $0x18ec] sm:$0xf0]  ;;  %v11180_v14 = vor.u32 %v12880_v7, %v11179_v6  ;;  %v11891_v7 = vld [vmem:[#allocation5 + $0x1e80] sm:$0xf] }
 0x6cd   :  { %v11308_v35 = vor.u32 %v12912_v19, %v11307_v40  ;;  %v11107_v40 = vld [vmem:[#allocation5 + $0x1830] sm:$0xf] }
 0x6ce   :  { %v7529_v47 = vpop.f32.mrf.mxu0  ;;  %v7542_v62 = vpop.f32.mrf.mxu1  ;;  %v12863_v19 = vld [vmem:[#allocation5 + $0x186c] sm:$0xf0] }
 0x6d1   :  { %7632 = vmatmul.bf16.vlgmr.msra.gmra.mxu0 %v13295_v15  ;;  %7645 = vmatmul.bf16.vlgmr.msra.gmra.mxu1 %v13299_v24 }
 0x6d2   :  { %7676 = vmatpush.bf16.xpose.msrb.mxu0 %v11556_v25  ;;  %7689 = vmatpush.bf16.xpose.msrb.mxu1 %v11560_v26  ;;  %v12904_v25 = vld [vmem:[#allocation5 + $0x19bc] sm:$0xf] }
 0x6d3   :  { %7702 = vmatpush.bf16.xpose.msrb.mxu2 %v11564_v29  ;;  %7671 = vmatmul.bf16.vlgmr.msra.gmra.mxu3 %v13301_v28  ;;  %v11309_v26 = vld [vmem:[#allocation5 + $0x19f8] sm:$0xf0]  ;;  %v11300_v29 = vor.u32 %v12911_v13, %v11299_v10  ;;  %v11176_v13 = vor.u32 %v12871_v3, %v11173_v54 }
 0x6d4   :  { %7715 = vmatpush.bf16.xpose.msrb.mxu3 %v11568_v12  ;;  %7658 = vmatmul.bf16.vlgmr.msra.gmra.mxu2 %v13297_v23  ;;  %v13116_v12 = vld [vmem:[#allocation7] sm:$0xff]  ;;  %v11312_v41 = vor.u32 %v12904_v25, %v11309_v26  ;;  %v12855_v25 = vld [vmem:[#allocation5 + $0x1834] sm:$0xf] }
 0x6d5   :  { %v6262_v36 = vperm.slane %v13116_v12, 6  ;;  %v11109_v26 = vld [vmem:[#allocation5 + $0x1870] sm:$0xf0]  ;;  %v12864_v12 = vld [vmem:[#allocation5 + $0x1874] sm:$0xf0] }
 0x6d6   :  { %v7568_v56 = vpop.f32.mrf.mxu3  ;;  %v7544_v61 = vpop.f32.mrf.mxu1 }
 0x6d7   :  { %v7530_v22 = vadd.f32 %v7529_v47, %v6262_v36  ;;  %v7555_v39 = vpop.f32.mrf.mxu2  ;;  %v12856_v36 = vld [vmem:[#allocation5 + $0x183c] sm:$0xf]  ;;  %v13074_v61 = vld [vmem:[#allocation5 + $0x1f0c] sm:$0xf] }
 0x6d8   :  { %v11117_v47 = vld [vmem:[#allocation5 + $0x1878] sm:$0xf0] }
 0x6da   :  { %7677 = vmatpush.bf16.xpose.msrb.mxu0 %v11492_v44  ;;  %7690 = vmatpush.bf16.xpose.msrb.mxu1 %v11496_v46  ;;  %v12895_v44 = vld [vmem:[#allocation5 + $0x196c] sm:$0xf0]  ;;  %v12887_v46 = vld [vmem:[#allocation5 + $0x1934] sm:$0xf] }
 0x6db   :  { %7703 = vmatpush.bf16.xpose.msrb.mxu2 %v11500_v49  ;;  %v7543_v49 = vadd.f32 %v7542_v62, %v7530_v22  ;;  %v11236_v5 = vor.u32 %v12895_v44, %v11235_v57  ;;  %v11108_v22 = vor.u32 %v12863_v19, %v11107_v40  ;;  %v12021_v62 = vld [vmem:[#allocation5 + $0x1fc0] sm:$0xf0]  ;;  %v12027_v57 = vld [vmem:[#allocation5 + $0x1f88] sm:$0xf] }
 0x6dc   :  { %7716 = vmatpush.bf16.xpose.msrb.mxu3 %v11504_v27  ;;  %v11237_v27 = vld [vmem:[#allocation5 + $0x1970] sm:$0xf0]  ;;  %v13098_v44 = vld [vmem:[#allocation5 + $0x1fc4] sm:$0xf0] }
 0x6dd   :  { %v11240_v2 = vor.u32 %v12887_v46, %v11237_v27  ;;  %v11112_v46 = vor.u32 %v12855_v25, %v11109_v26  ;;  %v13090_v27 = vld [vmem:[#allocation5 + $0x1f8c] sm:$0xf] }
 0x6de   :  { %v7570_v10 = vpop.f32.mrf.mxu3 }
 0x6df   :  { %v13066_v10 = vld [vmem:[#allocation5 + $0x1ec4] sm:$0xf0] }
 0x6e2   :  { %7678 = vmatpush.bf16.xpose.msrb.mxu0 %v11428_v59  ;;  %7691 = vmatpush.bf16.xpose.msrb.mxu1 %v11432_v60  ;;  %v11244_v59 = vor.u32 %v12896_v51, %v11243_v50  ;;  %v7556_v60 = vadd.f32 %v7555_v39, %v7543_v49  ;;  %v12029_v50 = vld [vmem:[#allocation5 + $0x1fc8] sm:$0xf0]  ;;  %v11120_v51 = vor.u32 %v12856_v36, %v11117_v47  ;;  %v11827_v47 = vld [vmem:[#allocation5 + $0x1e00] sm:$0xf] }
 0x6e3   :  { %7704 = vmatpush.bf16.xpose.msrb.mxu2 %v11436_v11  ;;  %v7531_v11 = vpop.f32.mrf.mxu0  ;;  %v12032_v39 = vor.u32 %v13090_v27, %v12029_v50 }
 0x6e4   :  { %7717 = vmatpush.bf16.xpose.msrb.mxu3 %v11440_v32  ;;  %v11248_v32 = vor.u32 %v12888_v53, %v11245_v55  ;;  %v13485_v0 = vadd.f32 %v7568_v56, %v7556_v60  ;;  %v11955_v56 = vld [vmem:[#allocation5 + $0x1f00] sm:$0xf]  ;;  %v11957_v60 = vld [vmem:[#allocation5 + $0x1f40] sm:$0xf0]  ;;  %v11963_v11 = vld [vmem:[#allocation5 + $0x1f08] sm:$0xf] }
 0x6ea   :  { %7679 = vmatpush.bf16.xpose.msrb.mxu0 %v11364_v58  ;;  %7692 = vmatpush.bf16.xpose.msrb.mxu1 %v11368_v8  ;;  %v12872_v58 = vld [vmem:[#allocation5 + $0x18bc] sm:$0xf] }
 0x6eb   :  { %7705 = vmatpush.bf16.xpose.msrb.mxu2 %v11372_v9  ;;  %v11181_v8 = vld [vmem:[#allocation5 + $0x18f8] sm:$0xf0]  ;;  %v11172_v9 = vor.u32 %v12879_v1, %v11171_v52  ;;  %v11965_v52 = vld [vmem:[#allocation5 + $0x1f48] sm:$0xf0] }
 0x6ec   :  { %7718 = vmatpush.bf16.xpose.msrb.mxu3 %v11376_v45  ;;  %v7557_v45 = vpop.f32.mrf.mxu2  ;;  %v11184_v16 = vor.u32 %v12872_v58, %v11181_v8  ;;  %v11968_v6 = vor.u32 %v13074_v61, %v11965_v52  ;;  %v13065_v58 = vld [vmem:[#allocation5 + $0x1ebc] sm:$0xf0]  ;;  %v13057_v8 = vld [vmem:[#allocation5 + $0x1e84] sm:$0xf]  ;;  %v13026_v61 = vld [vmem:[#allocation5 + $0x1d8c] sm:$0xf] }
 0x6ed   :  { %v11899_v45 = vld [vmem:[#allocation5 + $0x1e88] sm:$0xf]  ;;  %v11773_v52 = vld [vmem:[#allocation5 + $0x1dc8] sm:$0xf0] }
 0x6ee   :  { %v11900_v19 = vor.u32 %v13066_v10, %v11899_v45  ;;  %v13009_v45 = vld [vmem:[#allocation5 + $0x1d04] sm:$0xf] }
 0x6ef   :  { %v11701_v10 = vld [vmem:[#allocation5 + $0x1d40] sm:$0xf0] }
 0x6f2   :  { %7680 = vmatpush.bf16.xpose.msrb.mxu0 %v11300_v29  ;;  %7693 = vmatpush.bf16.xpose.msrb.mxu1 %v11304_v30  ;;  %v11115_v29 = vld [vmem:[#allocation5 + $0x1838] sm:$0xf]  ;;  %v12019_v30 = vld [vmem:[#allocation5 + $0x1f80] sm:$0xf] }
 0x6f3   :  { %7706 = vmatpush.bf16.xpose.msrb.mxu2 %v11308_v35  ;;  %v13097_v35 = vld [vmem:[#allocation5 + $0x1fbc] sm:$0xf0]  ;;  %v11116_v49 = vor.u32 %v12864_v12, %v11115_v29 }
 0x6f4   :  { %7719 = vmatpush.bf16.xpose.msrb.mxu3 %v11312_v41  ;;  %v13089_v41 = vld [vmem:[#allocation5 + $0x1f84] sm:$0xf]  ;;  %v12020_v53 = vor.u32 %v13097_v35, %v12019_v30  ;;  %v13049_v30 = vld [vmem:[#allocation5 + $0x1e3c] sm:$0xf0] }
 0x6f5   :  { %v12024_v55 = vor.u32 %v13089_v41, %v12021_v62  ;;  %v13041_v35 = vld [vmem:[#allocation5 + $0x1e04] sm:$0xf]  ;;  %v13050_v62 = vld [vmem:[#allocation5 + $0x1e44] sm:$0xf0] }
 0x6f6   :  { %v11829_v41 = vld [vmem:[#allocation5 + $0x1e40] sm:$0xf0] }
 0x6fa   :  { %7681 = vmatpush.bf16.xpose.msrb.mxu0 %v11236_v5  ;;  %7694 = vmatpush.bf16.xpose.msrb.mxu1 %v11240_v2  ;;  %v12028_v5 = vor.u32 %v13098_v44, %v12027_v57  ;;  %v13081_v2 = vld [vmem:[#allocation5 + $0x1f3c] sm:$0xf0]  ;;  %v13042_v57 = vld [vmem:[#allocation5 + $0x1e0c] sm:$0xf] }
 0x6fb   :  { %7707 = vmatpush.bf16.xpose.msrb.mxu2 %v11244_v59  ;;  %v13073_v59 = vld [vmem:[#allocation5 + $0x1f04] sm:$0xf]  ;;  %v11956_v1 = vor.u32 %v13081_v2, %v11955_v56  ;;  %v11837_v44 = vld [vmem:[#allocation5 + $0x1e48] sm:$0xf0]  ;;  %v11763_v56 = vld [vmem:[#allocation5 + $0x1d80] sm:$0xf] }
 0x6fc   :  { %7720 = vmatpush.bf16.xpose.msrb.mxu3 %v11248_v32  ;;  %v13082_v32 = vld [vmem:[#allocation5 + $0x1f44] sm:$0xf0]  ;;  %v11960_v3 = vor.u32 %v13073_v59, %v11957_v60  ;;  %v13033_v2 = vld [vmem:[#allocation5 + $0x1dbc] sm:$0xf0]  ;;  %v13025_v59 = vld [vmem:[#allocation5 + $0x1d84] sm:$0xf] }
 0x6fd   :  { %v11964_v54 = vor.u32 %v13082_v32, %v11963_v11  ;;  %v11765_v60 = vld [vmem:[#allocation5 + $0x1dc0] sm:$0xf0]  ;;  %v11771_v11 = vld [vmem:[#allocation5 + $0x1d88] sm:$0xf] }
 0x6fe   :  { %v13034_v32 = vld [vmem:[#allocation5 + $0x1dc4] sm:$0xf0] }
 0x702   :  { %7682 = vmatpush.bf16.xpose.msrb.mxu0 %v11172_v9  ;;  %7695 = vmatpush.bf16.xpose.msrb.mxu1 %v11176_v13  ;;  %v11893_v9 = vld [vmem:[#allocation5 + $0x1ec0] sm:$0xf0]  ;;  %v13058_v13 = vld [vmem:[#allocation5 + $0x1e8c] sm:$0xf] }
 0x703   :  { %7708 = vmatpush.bf16.xpose.msrb.mxu2 %v11180_v14  ;;  %v11901_v14 = vld [vmem:[#allocation5 + $0x1ec8] sm:$0xf0]  ;;  %v11896_v40 = vor.u32 %v13057_v8, %v11893_v9  ;;  %v11699_v8 = vld [vmem:[#allocation5 + $0x1d00] sm:$0xf] }
 0x704   :  { %7721 = vmatpush.bf16.xpose.msrb.mxu3 %v11184_v16  ;;  %v11892_v16 = vor.u32 %v13065_v58, %v11891_v7  ;;  %v11904_v25 = vor.u32 %v13058_v13, %v11901_v14  ;;  %v11776_v7 = vor.u32 %v13026_v61, %v11773_v52  ;;  %v13017_v9 = vld [vmem:[#allocation5 + $0x1d3c] sm:$0xf0]  ;;  %v11707_v13 = vld [vmem:[#allocation5 + $0x1d08] sm:$0xf]  ;;  %v12043_v61 = vld [vmem:[#allocation5 + $0x1f98] sm:$0xf] }
 0x705   :  { %v13018_v14 = vld [vmem:[#allocation5 + $0x1d44] sm:$0xf0]  ;;  %v13100_v52 = vld [vmem:[#allocation5 + $0x1fd4] sm:$0xf0] }
 0x70a   :  { %7683 = vmatpush.bf16.xpose.msrb.mxu0 %v11108_v22  ;;  %7696 = vmatpush.bf16.xpose.msrb.mxu1 %v11112_v46  ;;  %v11835_v22 = vld [vmem:[#allocation5 + $0x1e08] sm:$0xf]  ;;  %v11828_v46 = vor.u32 %v13049_v30, %v11827_v47  ;;  %v12993_v47 = vld [vmem:[#allocation5 + $0x1c84] sm:$0xf] }
 0x70b   :  { %7709 = vmatpush.bf16.xpose.msrb.mxu2 %v11116_v49  ;;  %v11832_v49 = vor.u32 %v13041_v35, %v11829_v41  ;;  %v11836_v27 = vor.u32 %v13050_v62, %v11835_v22  ;;  %v11637_v30 = vld [vmem:[#allocation5 + $0x1cc0] sm:$0xf0]  ;;  %v11643_v35 = vld [vmem:[#allocation5 + $0x1c88] sm:$0xf]  ;;  %v12994_v22 = vld [vmem:[#allocation5 + $0x1c8c] sm:$0xf] }
 0x70c   :  { %7722 = vmatpush.bf16.xpose.msrb.mxu3 %v11120_v51  ;;  %v11840_v51 = vor.u32 %v13042_v57, %v11837_v44  ;;  %v13002_v41 = vld [vmem:[#allocation5 + $0x1cc4] sm:$0xf0]  ;;  %v11645_v62 = vld [vmem:[#allocation5 + $0x1cc8] sm:$0xf0]  ;;  %v11640_v44 = vor.u32 %v12993_v47, %v11637_v30  ;;  %v11907_v30 = vld [vmem:[#allocation5 + $0x1e90] sm:$0xf] }
 0x70e   :  { %v7581_v26 = vpop.f32.mrf.mxu0  ;;  %v7594_v12 = vpop.f32.mrf.mxu1 }
 0x70f   :  { %v7582_v29 = vadd.f32 %v7581_v26, %v13485_v0  ;;  %v11708_v26 = vor.u32 %v13018_v14, %v11707_v13  ;;  %v13083_v13 = vld [vmem:[#allocation5 + $0x1f4c] sm:$0xf0]  ;;  %v13075_v14 = vld [vmem:[#allocation5 + $0x1f14] sm:$0xf] }
 0x711   :  { %7684 = vmatmul.bf16.vlgmr.msrb.gmra.mxu0 %v13313_v37  ;;  %7697 = vmatmul.bf16.vlgmr.msrb.gmra.mxu1 %v13317_v43  ;;  %v7595_v36 = vadd.f32 %v7594_v12, %v7582_v29  ;;  %v11635_v12 = vld [vmem:[#allocation5 + $0x1c80] sm:$0xf] }
 0x712   :  { %7728 = vmatpush.bf16.xpose.msra.mxu0 %v12020_v53  ;;  %7741 = vmatpush.bf16.xpose.msra.mxu1 %v12024_v55 }
 0x713   :  { %7754 = vmatpush.bf16.xpose.msra.mxu2 %v12028_v5  ;;  %7723 = vmatmul.bf16.vlgmr.msrb.gmra.mxu3 %v13319_v48 }
 0x714   :  { %7767 = vmatpush.bf16.xpose.msra.mxu3 %v12032_v39  ;;  %7710 = vmatmul.bf16.vlgmr.msrb.gmra.mxu2 %v13315_v42 }
 0x716   :  { %v7620_v53 = vpop.f32.mrf.mxu3  ;;  %v7583_v55 = vpop.f32.mrf.mxu0 }
 0x717   :  { %v7607_v50 = vpop.f32.mrf.mxu2  ;;  %v7596_v5 = vpop.f32.mrf.mxu1  ;;  %v12986_v55 = vld [vmem:[#allocation5 + $0x1c44] sm:$0xf0] }
 0x718   :  { %v7608_v0 = vadd.f32 %v7607_v50, %v7595_v36  ;;  %v13001_v36 = vld [vmem:[#allocation5 + $0x1cbc] sm:$0xf0]  ;;  %v12978_v5 = vld [vmem:[#allocation5 + $0x1c0c] sm:$0xf] }
 0x719   :  { %v11636_v57 = vor.u32 %v13001_v36, %v11635_v12  ;;  %v12985_v50 = vld [vmem:[#allocation5 + $0x1c3c] sm:$0xf0] }
 0x71a   :  { %7729 = vmatpush.bf16.xpose.msra.mxu0 %v11956_v1  ;;  %7742 = vmatpush.bf16.xpose.msra.mxu1 %v11960_v3  ;;  %v13492_v39 = vadd.f32 %v7620_v53, %v7608_v0  ;;  %v11764_v1 = vor.u32 %v13033_v2, %v11763_v56  ;;  %v11768_v3 = vor.u32 %v13025_v59, %v11765_v60  ;;  %v11573_v0 = vld [vmem:[#allocation5 + $0x1c40] sm:$0xf0]  ;;  %v11579_v53 = vld [vmem:[#allocation5 + $0x1c08] sm:$0xf]  ;;  %v11581_v56 = vld [vmem:[#allocation5 + $0x1c48] sm:$0xf0] }
 0x71b   :  { %7755 = vmatpush.bf16.xpose.msra.mxu2 %v11964_v54  ;;  %v11772_v54 = vor.u32 %v13034_v32, %v11771_v11  ;;  %v12035_v2 = vld [vmem:[#allocation5 + $0x1f90] sm:$0xf]  ;;  %v13091_v60 = vld [vmem:[#allocation5 + $0x1f94] sm:$0xf] }
 0x71c   :  { %7768 = vmatpush.bf16.xpose.msra.mxu3 %v11968_v6  ;;  %v13099_v59 = vld [vmem:[#allocation5 + $0x1fcc] sm:$0xf0]  ;;  %v12037_v32 = vld [vmem:[#allocation5 + $0x1fd0] sm:$0xf0] }
 0x71e   :  { %v7622_v58 = vpop.f32.mrf.mxu3 }
 0x71f   :  { %v7609_v6 = vpop.f32.mrf.mxu2  ;;  %v12036_v58 = vor.u32 %v13099_v59, %v12035_v2  ;;  %v13052_v2 = vld [vmem:[#allocation5 + $0x1e54] sm:$0xf0]  ;;  %v13044_v59 = vld [vmem:[#allocation5 + $0x1e1c] sm:$0xf] }
 0x720   :  { %v12045_v6 = vld [vmem:[#allocation5 + $0x1fd8] sm:$0xf0] }
 0x722   :  { %7730 = vmatpush.bf16.xpose.msra.mxu0 %v11892_v16  ;;  %7743 = vmatpush.bf16.xpose.msra.mxu1 %v11896_v40  ;;  %v13010_v16 = vld [vmem:[#allocation5 + $0x1d0c] sm:$0xf] }
 0x723   :  { %7756 = vmatpush.bf16.xpose.msra.mxu2 %v11900_v19  ;;  %v11709_v40 = vld [vmem:[#allocation5 + $0x1d48] sm:$0xf0]  ;;  %v11700_v19 = vor.u32 %v13017_v9, %v11699_v8  ;;  %v12040_v8 = vor.u32 %v13091_v60, %v12037_v32  ;;  %v12044_v9 = vor.u32 %v13100_v52, %v12043_v61  ;;  %v11853_v60 = vld [vmem:[#allocation5 + $0x1e58] sm:$0xf0] }
 0x724   :  { %7769 = vmatpush.bf16.xpose.msra.mxu3 %v11904_v25  ;;  %v11704_v25 = vor.u32 %v13009_v45, %v11701_v10  ;;  %v11712_v29 = vor.u32 %v13010_v16, %v11709_v40  ;;  %v11971_v10 = vld [vmem:[#allocation5 + $0x1f10] sm:$0xf]  ;;  %v11973_v16 = vld [vmem:[#allocation5 + $0x1f50] sm:$0xf0]  ;;  %v11979_v40 = vld [vmem:[#allocation5 + $0x1f18] sm:$0xf] }
 0x725   :  { %v11976_v12 = vor.u32 %v13075_v14, %v11973_v16  ;;  %v13028_v14 = vld [vmem:[#allocation5 + $0x1d9c] sm:$0xf] }
 0x726   :  { %v11789_v16 = vld [vmem:[#allocation5 + $0x1dd8] sm:$0xf0] }
 0x72a   :  { %7731 = vmatpush.bf16.xpose.msra.mxu0 %v11828_v46  ;;  %7744 = vmatpush.bf16.xpose.msra.mxu1 %v11832_v49  ;;  %v11644_v46 = vor.u32 %v13002_v41, %v11643_v35  ;;  %v11648_v49 = vor.u32 %v12994_v22, %v11645_v62  ;;  %v13067_v35 = vld [vmem:[#allocation5 + $0x1ecc] sm:$0xf0]  ;;  %v13059_v41 = vld [vmem:[#allocation5 + $0x1e94] sm:$0xf]  ;;  %v11915_v62 = vld [vmem:[#allocation5 + $0x1e98] sm:$0xf] }
 0x72b   :  { %7757 = vmatpush.bf16.xpose.msra.mxu2 %v11836_v27  ;;  %v11571_v27 = vld [vmem:[#allocation5 + $0x1c00] sm:$0xf]  ;;  %v11909_v22 = vld [vmem:[#allocation5 + $0x1ed0] sm:$0xf0] }
 0x72c   :  { %7770 = vmatpush.bf16.xpose.msra.mxu3 %v11840_v51  ;;  %v12977_v51 = vld [vmem:[#allocation5 + $0x1c04] sm:$0xf]  ;;  %v11572_v11 = vor.u32 %v12985_v50, %v11571_v27 }
 0x732   :  { %7732 = vmatpush.bf16.xpose.msra.mxu0 %v11764_v1  ;;  %7745 = vmatpush.bf16.xpose.msra.mxu1 %v11768_v3  ;;  %v11576_v1 = vor.u32 %v12977_v51, %v11573_v0  ;;  %v11580_v3 = vor.u32 %v12986_v55, %v11579_v53  ;;  %v11843_v0 = vld [vmem:[#allocation5 + $0x1e10] sm:$0xf]  ;;  %v13043_v55 = vld [vmem:[#allocation5 + $0x1e14] sm:$0xf] }
 0x733   :  { %7758 = vmatpush.bf16.xpose.msra.mxu2 %v11772_v54  ;;  %v13092_v54 = vld [vmem:[#allocation5 + $0x1f9c] sm:$0xf]  ;;  %v13051_v53 = vld [vmem:[#allocation5 + $0x1e4c] sm:$0xf0] }
 0x734   :  { %7771 = vmatpush.bf16.xpose.msra.mxu3 %v11776_v7  ;;  %v11584_v7 = vor.u32 %v12978_v5, %v11581_v56  ;;  %v12048_v45 = vor.u32 %v13092_v54, %v12045_v6  ;;  %v11845_v5 = vld [vmem:[#allocation5 + $0x1e50] sm:$0xf0]  ;;  %v11851_v56 = vld [vmem:[#allocation5 + $0x1e18] sm:$0xf] }
 0x735   :  { %v11848_v61 = vor.u32 %v13043_v55, %v11845_v5  ;;  %v11852_v52 = vor.u32 %v13052_v2, %v11851_v56 }
 0x73a   :  { %7733 = vmatpush.bf16.xpose.msra.mxu0 %v11700_v19  ;;  %7746 = vmatpush.bf16.xpose.msra.mxu1 %v11704_v25  ;;  %v13084_v19 = vld [vmem:[#allocation5 + $0x1f54] sm:$0xf0]  ;;  %v13076_v25 = vld [vmem:[#allocation5 + $0x1f1c] sm:$0xf] }
 0x73b   :  { %7759 = vmatpush.bf16.xpose.msra.mxu2 %v11708_v26  ;;  %v11981_v26 = vld [vmem:[#allocation5 + $0x1f58] sm:$0xf0]  ;;  %v11980_v36 = vor.u32 %v13084_v19, %v11979_v40 }
 0x73c   :  { %7772 = vmatpush.bf16.xpose.msra.mxu3 %v11712_v29  ;;  %v11972_v29 = vor.u32 %v13083_v13, %v11971_v10  ;;  %v11984_v47 = vor.u32 %v13076_v25, %v11981_v26  ;;  %v11787_v10 = vld [vmem:[#allocation5 + $0x1d98] sm:$0xf] }
 0x73d   :  { %v13036_v13 = vld [vmem:[#allocation5 + $0x1dd4] sm:$0xf0] }
 0x73e   :  { %v11788_v25 = vor.u32 %v13036_v13, %v11787_v10 }
 0x742   :  { %7734 = vmatpush.bf16.xpose.msra.mxu0 %v11636_v57  ;;  %7747 = vmatpush.bf16.xpose.msra.mxu1 %v11640_v44  ;;  %v13068_v57 = vld [vmem:[#allocation5 + $0x1ed4] sm:$0xf0]  ;;  %v13060_v44 = vld [vmem:[#allocation5 + $0x1e9c] sm:$0xf] }
 0x743   :  { %7760 = vmatpush.bf16.xpose.msra.mxu2 %v11644_v46  ;;  %v11917_v46 = vld [vmem:[#allocation5 + $0x1ed8] sm:$0xf0]  ;;  %v11916_v27 = vor.u32 %v13068_v57, %v11915_v62 }
 0x744   :  { %7773 = vmatpush.bf16.xpose.msra.mxu3 %v11648_v49  ;;  %v11912_v49 = vor.u32 %v13059_v41, %v11909_v22  ;;  %v11723_v41 = vld [vmem:[#allocation5 + $0x1d18] sm:$0xf]  ;;  %v13012_v62 = vld [vmem:[#allocation5 + $0x1d1c] sm:$0xf] }
 0x745   :  { %v13020_v22 = vld [vmem:[#allocation5 + $0x1d54] sm:$0xf0]  ;;  %v11725_v57 = vld [vmem:[#allocation5 + $0x1d58] sm:$0xf0] }
 0x74a   :  { %7735 = vmatpush.bf16.xpose.msra.mxu0 %v11572_v11  ;;  %7748 = vmatpush.bf16.xpose.msra.mxu1 %v11576_v1  ;;  %v11844_v11 = vor.u32 %v13051_v53, %v11843_v0  ;;  %v12996_v0 = vld [vmem:[#allocation5 + $0x1c9c] sm:$0xf] }
 0x74b   :  { %7761 = vmatpush.bf16.xpose.msra.mxu2 %v11580_v3  ;;  %v11661_v53 = vld [vmem:[#allocation5 + $0x1cd8] sm:$0xf0] }
 0x74c   :  { %7774 = vmatpush.bf16.xpose.msra.mxu3 %v11584_v7  ;;  %v11664_v2 = vor.u32 %v12996_v0, %v11661_v53  ;;  %v11933_v0 = vld [vmem:[#allocation5 + $0x1ee8] sm:$0xf0] }
 0x74e   :  { %v7633_v50 = vpop.f32.mrf.mxu0 }
 0x751   :  { %7736 = vmatmul.bf16.vlgmr.msra.gmra.mxu0 %v13263_v18  ;;  %7749 = vmatmul.bf16.vlgmr.msra.gmra.mxu1 %v13267_v21  ;;  %v11908_v18 = vor.u32 %v13067_v35, %v11907_v30  ;;  %v7634_v21 = vadd.f32 %v7633_v50, %v13492_v39  ;;  %v11856_v39 = vor.u32 %v13044_v59, %v11853_v60  ;;  %v13011_v30 = vld [vmem:[#allocation5 + $0x1d14] sm:$0xf]  ;;  %v11587_v59 = vld [vmem:[#allocation5 + $0x1c10] sm:$0xf] }
 0x752   :  { %7780 = vmatpush.bf16.xpose.msrb.mxu0 %v12036_v58  ;;  %7793 = vmatpush.bf16.xpose.msrb.mxu1 %v12040_v8  ;;  %v11779_v58 = vld [vmem:[#allocation5 + $0x1d90] sm:$0xf]  ;;  %v11717_v35 = vld [vmem:[#allocation5 + $0x1d50] sm:$0xf0] }
 0x753   :  { %7806 = vmatpush.bf16.xpose.msrb.mxu2 %v12044_v9  ;;  %7775 = vmatmul.bf16.vlgmr.msra.gmra.mxu3 %v13265_v20  ;;  %v7646_v20 = vpop.f32.mrf.mxu1  ;;  %v13035_v8 = vld [vmem:[#allocation5 + $0x1dcc] sm:$0xf0]  ;;  %v13027_v9 = vld [vmem:[#allocation5 + $0x1d94] sm:$0xf] }
 0x754   :  { %7819 = vmatpush.bf16.xpose.msrb.mxu3 %v12048_v45  ;;  %7762 = vmatmul.bf16.vlgmr.msra.gmra.mxu2 %v13261_v17  ;;  %v11920_v17 = vor.u32 %v13060_v44, %v11917_v46  ;;  %v7647_v51 = vadd.f32 %v7646_v20, %v7634_v21  ;;  %v11781_v45 = vld [vmem:[#allocation5 + $0x1dd0] sm:$0xf0]  ;;  %v11780_v40 = vor.u32 %v13035_v8, %v11779_v58  ;;  %v11659_v20 = vld [vmem:[#allocation5 + $0x1c98] sm:$0xf]  ;;  %v12987_v60 = vld [vmem:[#allocation5 + $0x1c4c] sm:$0xf0] }
 0x755   :  { %v11784_v19 = vor.u32 %v13027_v9, %v11781_v45  ;;  %v11720_v46 = vor.u32 %v13011_v30, %v11717_v35  ;;  %v12995_v50 = vld [vmem:[#allocation5 + $0x1c94] sm:$0xf]  ;;  %v11588_v58 = vor.u32 %v12987_v60, %v11587_v59  ;;  %v12053_v8 = vld [vmem:[#allocation5 + $0x1fe0] sm:$0xf0]  ;;  %v12059_v9 = vld [vmem:[#allocation5 + $0x1fa8] sm:$0xf] }
 0x756   :  { %v7672_v3 = vpop.f32.mrf.mxu3  ;;  %v7635_v54 = vpop.f32.mrf.mxu0  ;;  %v11653_v21 = vld [vmem:[#allocation5 + $0x1cd0] sm:$0xf0]  ;;  %v13102_v45 = vld [vmem:[#allocation5 + $0x1fe4] sm:$0xf0]  ;;  %v11989_v30 = vld [vmem:[#allocation5 + $0x1f60] sm:$0xf0] }
 0x757   :  { %v7659_v32 = vpop.f32.mrf.mxu2  ;;  %v11656_v5 = vor.u32 %v12995_v50, %v11653_v21  ;;  %v13101_v54 = vld [vmem:[#allocation5 + $0x1fdc] sm:$0xf0]  ;;  %v11995_v35 = vld [vmem:[#allocation5 + $0x1f28] sm:$0xf]  ;;  %v11925_v50 = vld [vmem:[#allocation5 + $0x1ee0] sm:$0xf0] }
 0x758   :  { %v7660_v1 = vadd.f32 %v7659_v32, %v7647_v51  ;;  %v13004_v51 = vld [vmem:[#allocation5 + $0x1cd4] sm:$0xf0]  ;;  %v11589_v32 = vld [vmem:[#allocation5 + $0x1c50] sm:$0xf0]  ;;  %v11931_v21 = vld [vmem:[#allocation5 + $0x1ea8] sm:$0xf] }
 0x759   :  { %v11660_v56 = vor.u32 %v13004_v51, %v11659_v20  ;;  %v13070_v20 = vld [vmem:[#allocation5 + $0x1ee4] sm:$0xf0]  ;;  %v13062_v51 = vld [vmem:[#allocation5 + $0x1eac] sm:$0xf]  ;;  %v13053_v59 = vld [vmem:[#allocation5 + $0x1e5c] sm:$0xf0] }
 0x75a   :  { %7781 = vmatpush.bf16.xpose.msrb.mxu0 %v11972_v29  ;;  %7794 = vmatpush.bf16.xpose.msrb.mxu1 %v11976_v12  ;;  %v13499_v7 = vadd.f32 %v7672_v3, %v7660_v1  ;;  %v11792_v29 = vor.u32 %v13028_v14, %v11789_v16  ;;  %v12980_v1 = vld [vmem:[#allocation5 + $0x1c1c] sm:$0xf]  ;;  %v12051_v3 = vld [vmem:[#allocation5 + $0x1fa0] sm:$0xf]  ;;  %v13094_v14 = vld [vmem:[#allocation5 + $0x1fac] sm:$0xf] }
 0x75b   :  { %7807 = vmatpush.bf16.xpose.msrb.mxu2 %v11980_v36  ;;  %v7648_v6 = vpop.f32.mrf.mxu1  ;;  %v11715_v36 = vld [vmem:[#allocation5 + $0x1d10] sm:$0xf]  ;;  %v12061_v16 = vld [vmem:[#allocation5 + $0x1fe8] sm:$0xf0]  ;;  %v13045_v60 = vld [vmem:[#allocation5 + $0x1e24] sm:$0xf] }
 0x75c   :  { %7820 = vmatpush.bf16.xpose.msrb.mxu3 %v11984_v47  ;;  %v13019_v47 = vld [vmem:[#allocation5 + $0x1d4c] sm:$0xf0]  ;;  %v13093_v6 = vld [vmem:[#allocation5 + $0x1fa4] sm:$0xf] }
 0x75d   :  { %v11716_v44 = vor.u32 %v13019_v47, %v11715_v36  ;;  %v13085_v36 = vld [vmem:[#allocation5 + $0x1f5c] sm:$0xf0]  ;;  %v13077_v47 = vld [vmem:[#allocation5 + $0x1f24] sm:$0xf] }
 0x75e   :  { %v7674_v12 = vpop.f32.mrf.mxu3 }
 0x75f   :  { %v7661_v26 = vpop.f32.mrf.mxu2  ;;  %v11987_v12 = vld [vmem:[#allocation5 + $0x1f20] sm:$0xf] }
 0x760   :  { %v12060_v26 = vor.u32 %v13102_v45, %v12059_v9 }
 0x762   :  { %7782 = vmatpush.bf16.xpose.msrb.mxu0 %v11908_v18  ;;  %7795 = vmatpush.bf16.xpose.msrb.mxu1 %v11912_v49  ;;  %v11724_v18 = vor.u32 %v13020_v22, %v11723_v41  ;;  %v11728_v49 = vor.u32 %v13012_v62, %v11725_v57  ;;  %v13086_v41 = vld [vmem:[#allocation5 + $0x1f64] sm:$0xf0]  ;;  %v13078_v22 = vld [vmem:[#allocation5 + $0x1f2c] sm:$0xf]  ;;  %v11988_v57 = vor.u32 %v13085_v36, %v11987_v12 }
 0x763   :  { %7808 = vmatpush.bf16.xpose.msrb.mxu2 %v11916_v27  ;;  %v11651_v27 = vld [vmem:[#allocation5 + $0x1c90] sm:$0xf]  ;;  %v11997_v62 = vld [vmem:[#allocation5 + $0x1f68] sm:$0xf0] }
 0x764   :  { %7821 = vmatpush.bf16.xpose.msrb.mxu3 %v11920_v17  ;;  %v13003_v17 = vld [vmem:[#allocation5 + $0x1ccc] sm:$0xf0] }
 0x765   :  { %v11652_v55 = vor.u32 %v13003_v17, %v11651_v27  ;;  %v13069_v27 = vld [vmem:[#allocation5 + $0x1edc] sm:$0xf0]  ;;  %v13061_v17 = vld [vmem:[#allocation5 + $0x1ea4] sm:$0xf] }
 0x766   :  { %v11928_v53 = vor.u32 %v13061_v17, %v11925_v50 }
 0x76a   :  { %7783 = vmatpush.bf16.xpose.msrb.mxu0 %v11844_v11  ;;  %7796 = vmatpush.bf16.xpose.msrb.mxu1 %v11848_v61  ;;  %v12979_v11 = vld [vmem:[#allocation5 + $0x1c14] sm:$0xf]  ;;  %v11595_v61 = vld [vmem:[#allocation5 + $0x1c18] sm:$0xf] }
 0x76b   :  { %7809 = vmatpush.bf16.xpose.msrb.mxu2 %v11852_v52  ;;  %v12988_v52 = vld [vmem:[#allocation5 + $0x1c54] sm:$0xf0]  ;;  %v11592_v10 = vor.u32 %v12979_v11, %v11589_v32  ;;  %v11861_v11 = vld [vmem:[#allocation5 + $0x1e60] sm:$0xf0]  ;;  %v11867_v32 = vld [vmem:[#allocation5 + $0x1e28] sm:$0xf] }
 0x76c   :  { %7822 = vmatpush.bf16.xpose.msrb.mxu3 %v11856_v39  ;;  %v11597_v39 = vld [vmem:[#allocation5 + $0x1c58] sm:$0xf0]  ;;  %v11596_v13 = vor.u32 %v12988_v52, %v11595_v61  ;;  %v13054_v61 = vld [vmem:[#allocation5 + $0x1e64] sm:$0xf0]  ;;  %v13046_v52 = vld [vmem:[#allocation5 + $0x1e2c] sm:$0xf] }
 0x772   :  { %7784 = vmatpush.bf16.xpose.msrb.mxu0 %v11780_v40  ;;  %7797 = vmatpush.bf16.xpose.msrb.mxu1 %v11784_v19  ;;  %v11600_v40 = vor.u32 %v12980_v1, %v11597_v39  ;;  %v12052_v19 = vor.u32 %v13101_v54, %v12051_v3  ;;  %v11869_v1 = vld [vmem:[#allocation5 + $0x1e68] sm:$0xf0]  ;;  %v11864_v54 = vor.u32 %v13045_v60, %v11861_v11  ;;  %v11603_v60 = vld [vmem:[#allocation5 + $0x1c20] sm:$0xf] }
 0x773   :  { %7810 = vmatpush.bf16.xpose.msrb.mxu2 %v11788_v25  ;;  %v12056_v25 = vor.u32 %v13093_v6, %v12053_v8  ;;  %v11868_v6 = vor.u32 %v13054_v61, %v11867_v32  ;;  %v12989_v11 = vld [vmem:[#allocation5 + $0x1c5c] sm:$0xf0]  ;;  %v12981_v32 = vld [vmem:[#allocation5 + $0x1c24] sm:$0xf] }
 0x774   :  { %7823 = vmatpush.bf16.xpose.msrb.mxu3 %v11792_v29  ;;  %v12064_v29 = vor.u32 %v13094_v14, %v12061_v16  ;;  %v13037_v14 = vld [vmem:[#allocation5 + $0x1ddc] sm:$0xf0]  ;;  %v13029_v16 = vld [vmem:[#allocation5 + $0x1da4] sm:$0xf] }
 0x775   :  { %v11605_v61 = vld [vmem:[#allocation5 + $0x1c60] sm:$0xf0] }
 0x77a   :  { %7785 = vmatpush.bf16.xpose.msrb.mxu0 %v11716_v44  ;;  %7798 = vmatpush.bf16.xpose.msrb.mxu1 %v11720_v46  ;;  %v11992_v44 = vor.u32 %v13077_v47, %v11989_v30  ;;  %v11996_v46 = vor.u32 %v13086_v41, %v11995_v35 }
 0x77b   :  { %7811 = vmatpush.bf16.xpose.msrb.mxu2 %v11724_v18  ;;  %v12000_v18 = vor.u32 %v13078_v22, %v11997_v62  ;;  %v11731_v22 = vld [vmem:[#allocation5 + $0x1d20] sm:$0xf] }
 0x77c   :  { %7824 = vmatpush.bf16.xpose.msrb.mxu3 %v11728_v49  ;;  %v11923_v49 = vld [vmem:[#allocation5 + $0x1ea0] sm:$0xf] }
 0x77d   :  { %v13021_v62 = vld [vmem:[#allocation5 + $0x1d5c] sm:$0xf0] }
 0x77e   :  { %v11732_v17 = vor.u32 %v13021_v62, %v11731_v22  ;;  %v13088_v22 = vld [vmem:[#allocation5 + $0x1f74] sm:$0xf0]  ;;  %v13080_v62 = vld [vmem:[#allocation5 + $0x1f3c] sm:$0xf] }
 0x782   :  { %7786 = vmatpush.bf16.xpose.msrb.mxu0 %v11652_v55  ;;  %7799 = vmatpush.bf16.xpose.msrb.mxu1 %v11656_v5  ;;  %v11936_v55 = vor.u32 %v13062_v51, %v11933_v0  ;;  %v11667_v51 = vld [vmem:[#allocation5 + $0x1ca0] sm:$0xf] }
 0x783   :  { %7812 = vmatpush.bf16.xpose.msrb.mxu2 %v11660_v56  ;;  %v13005_v0 = vld [vmem:[#allocation5 + $0x1cdc] sm:$0xf0] }
 0x784   :  { %7825 = vmatpush.bf16.xpose.msrb.mxu3 %v11664_v2  ;;  %v11859_v2 = vld [vmem:[#allocation5 + $0x1e20] sm:$0xf] }
 0x785   :  { %v11860_v39 = vor.u32 %v13053_v59, %v11859_v2 }
 0x78a   :  { %7787 = vmatpush.bf16.xpose.msrb.mxu0 %v11588_v58  ;;  %7800 = vmatpush.bf16.xpose.msrb.mxu1 %v11592_v10 }
 0x78b   :  { %7813 = vmatpush.bf16.xpose.msrb.mxu2 %v11596_v13  ;;  %v11795_v13 = vld [vmem:[#allocation5 + $0x1da0] sm:$0xf] }
 0x78c   :  { %7826 = vmatpush.bf16.xpose.msrb.mxu3 %v11600_v40  ;;  %v11797_v40 = vld [vmem:[#allocation5 + $0x1de0] sm:$0xf0]  ;;  %v11796_v12 = vor.u32 %v13037_v14, %v11795_v13  ;;  %v11608_v13 = vor.u32 %v12981_v32, %v11605_v61  ;;  %v11811_v61 = vld [vmem:[#allocation5 + $0x1db0] sm:$0xf] }
 0x78d   :  { %v11800_v36 = vor.u32 %v13029_v16, %v11797_v40  ;;  %v13096_v16 = vld [vmem:[#allocation5 + $0x1fbc] sm:$0xf] }
 0x78e   :  { %v7685_v5 = vpop.f32.mrf.mxu0  ;;  %v12077_v40 = vld [vmem:[#allocation5 + $0x1ff8] sm:$0xf0] }
 0x791   :  { %7788 = vmatmul.bf16.vlgmr.msrb.gmra.mxu0 %v13277_v33  ;;  %7801 = vmatmul.bf16.vlgmr.msrb.gmra.mxu1 %v13281_v38  ;;  %v11924_v33 = vor.u32 %v13069_v27, %v11923_v49  ;;  %v7686_v38 = vadd.f32 %v7685_v5, %v13499_v7  ;;  %v11872_v7 = vor.u32 %v13046_v52, %v11869_v1  ;;  %v13014_v49 = vld [vmem:[#allocation5 + $0x1d2c] sm:$0xf]  ;;  %v11611_v52 = vld [vmem:[#allocation5 + $0x1c28] sm:$0xf] }
 0x792   :  { %7832 = vmatpush.bf16.xpose.msra.mxu0 %v12052_v19  ;;  %7845 = vmatpush.bf16.xpose.msra.mxu1 %v12056_v25  ;;  %v11803_v19 = vld [vmem:[#allocation5 + $0x1da8] sm:$0xf]  ;;  %v11741_v27 = vld [vmem:[#allocation5 + $0x1d68] sm:$0xf0] }
 0x793   :  { %7858 = vmatpush.bf16.xpose.msra.mxu2 %v12060_v26  ;;  %7827 = vmatmul.bf16.vlgmr.msrb.gmra.mxu3 %v13283_v4  ;;  %v7698_v4 = vpop.f32.mrf.mxu1  ;;  %v13038_v25 = vld [vmem:[#allocation5 + $0x1de4] sm:$0xf0]  ;;  %v13030_v26 = vld [vmem:[#allocation5 + $0x1dac] sm:$0xf] }
 0x794   :  { %7871 = vmatpush.bf16.xpose.msra.mxu3 %v12064_v29  ;;  %7814 = vmatmul.bf16.vlgmr.msrb.gmra.mxu2 %v13279_v34  ;;  %v11932_v34 = vor.u32 %v13070_v20, %v11931_v21  ;;  %v7699_v56 = vadd.f32 %v7698_v4, %v7686_v38  ;;  %v11805_v29 = vld [vmem:[#allocation5 + $0x1de8] sm:$0xf0]  ;;  %v11804_v47 = vor.u32 %v13038_v25, %v11803_v19  ;;  %v12990_v1 = vld [vmem:[#allocation5 + $0x1c64] sm:$0xf0] }
 0x795   :  { %v11808_v35 = vor.u32 %v13030_v26, %v11805_v29  ;;  %v11744_v20 = vor.u32 %v13014_v49, %v11741_v27  ;;  %v12998_v5 = vld [vmem:[#allocation5 + $0x1cac] sm:$0xf]  ;;  %v11668_v4 = vor.u32 %v13005_v0, %v11667_v51  ;;  %v11612_v14 = vor.u32 %v12990_v1, %v11611_v52  ;;  %v11939_v27 = vld [vmem:[#allocation5 + $0x1eb0] sm:$0xf]  ;;  %v13072_v51 = vld [vmem:[#allocation5 + $0x1ef4] sm:$0xf0] }
 0x796   :  { %v7724_v8 = vpop.f32.mrf.mxu3  ;;  %v7687_v9 = vpop.f32.mrf.mxu0  ;;  %v11677_v38 = vld [vmem:[#allocation5 + $0x1ce8] sm:$0xf0]  ;;  %v11949_v0 = vld [vmem:[#allocation5 + $0x1ef8] sm:$0xf0]  ;;  %v13039_v52 = vld [vmem:[#allocation5 + $0x1dec] sm:$0xf0] }
 0x797   :  { %v7711_v3 = vpop.f32.mrf.mxu2  ;;  %v11680_v59 = vor.u32 %v12998_v5, %v11677_v38  ;;  %v12075_v9 = vld [vmem:[#allocation5 + $0x1fb8] sm:$0xf]  ;;  %v11877_v5 = vld [vmem:[#allocation5 + $0x1e70] sm:$0xf0] }
 0x798   :  { %v7712_v58 = vadd.f32 %v7711_v3, %v7699_v56  ;;  %v11613_v3 = vld [vmem:[#allocation5 + $0x1c68] sm:$0xf0]  ;;  %v11883_v38 = vld [vmem:[#allocation5 + $0x1e38] sm:$0xf]  ;;  %v13031_v1 = vld [vmem:[#allocation5 + $0x1db4] sm:$0xf] }
 0x79a   :  { %7833 = vmatpush.bf16.xpose.msra.mxu0 %v11988_v57  ;;  %7846 = vmatpush.bf16.xpose.msra.mxu1 %v11992_v44  ;;  %v13506_v10 = vadd.f32 %v7724_v8, %v7712_v58  ;;  %v13013_v57 = vld [vmem:[#allocation5 + $0x1d24] sm:$0xf]  ;;  %v13095_v58 = vld [vmem:[#allocation5 + $0x1fb4] sm:$0xf] }
 0x79b   :  { %7859 = vmatpush.bf16.xpose.msra.mxu2 %v11996_v46  ;;  %v7700_v45 = vpop.f32.mrf.mxu1  ;;  %v11733_v44 = vld [vmem:[#allocation5 + $0x1d60] sm:$0xf0]  ;;  %v11739_v46 = vld [vmem:[#allocation5 + $0x1d28] sm:$0xf]  ;;  %v12069_v8 = vld [vmem:[#allocation5 + $0x1ff0] sm:$0xf0] }
 0x79c   :  { %7872 = vmatpush.bf16.xpose.msra.mxu3 %v12000_v18  ;;  %v13022_v18 = vld [vmem:[#allocation5 + $0x1d64] sm:$0xf0]  ;;  %v11736_v50 = vor.u32 %v13013_v57, %v11733_v44  ;;  %v13104_v45 = vld [vmem:[#allocation5 + $0x1ff4] sm:$0xf0]  ;;  %v12072_v26 = vor.u32 %v13095_v58, %v12069_v8  ;;  %v12013_v57 = vld [vmem:[#allocation5 + $0x1f78] sm:$0xf0] }
 0x79d   :  { %v11740_v21 = vor.u32 %v13022_v18, %v11739_v46  ;;  %v12076_v29 = vor.u32 %v13104_v45, %v12075_v9  ;;  %v12016_v49 = vor.u32 %v13080_v62, %v12013_v57  ;;  %v13032_v8 = vld [vmem:[#allocation5 + $0x1dbc] sm:$0xf]  ;;  %v11812_v45 = vor.u32 %v13039_v52, %v11811_v61 }
 0x79e   :  { %v7726_v41 = vpop.f32.mrf.mxu3  ;;  %v11821_v9 = vld [vmem:[#allocation5 + $0x1df8] sm:$0xf0] }
 0x79f   :  { %v7713_v30 = vpop.f32.mrf.mxu2  ;;  %v12011_v41 = vld [vmem:[#allocation5 + $0x1f38] sm:$0xf]  ;;  %v13016_v62 = vld [vmem:[#allocation5 + $0x1d3c] sm:$0xf] }
 0x7a0   :  { %v13079_v30 = vld [vmem:[#allocation5 + $0x1f34] sm:$0xf]  ;;  %v12012_v18 = vor.u32 %v13088_v22, %v12011_v41  ;;  %v11757_v57 = vld [vmem:[#allocation5 + $0x1d78] sm:$0xf0] }
 0x7a1   :  { %v11629_v61 = vld [vmem:[#allocation5 + $0x1c78] sm:$0xf0] }
 0x7a2   :  { %7834 = vmatpush.bf16.xpose.msra.mxu0 %v11924_v33  ;;  %7847 = vmatpush.bf16.xpose.msra.mxu1 %v11928_v53  ;;  %v12997_v33 = vld [vmem:[#allocation5 + $0x1ca4] sm:$0xf] }
 0x7a3   :  { %7860 = vmatpush.bf16.xpose.msra.mxu2 %v11932_v34  ;;  %v11669_v53 = vld [vmem:[#allocation5 + $0x1ce0] sm:$0xf0]  ;;  %v11675_v34 = vld [vmem:[#allocation5 + $0x1ca8] sm:$0xf] }
 0x7a4   :  { %7873 = vmatpush.bf16.xpose.msra.mxu3 %v11936_v55  ;;  %v13006_v55 = vld [vmem:[#allocation5 + $0x1ce4] sm:$0xf0]  ;;  %v11672_v56 = vor.u32 %v12997_v33, %v11669_v53 }
 0x7a5   :  { %v11676_v2 = vor.u32 %v13006_v55, %v11675_v34  ;;  %v13047_v55 = vld [vmem:[#allocation5 + $0x1e34] sm:$0xf] }
 0x7aa   :  { %7835 = vmatpush.bf16.xpose.msra.mxu0 %v11860_v39  ;;  %7848 = vmatpush.bf16.xpose.msra.mxu1 %v11864_v54  ;;  %v12982_v39 = vld [vmem:[#allocation5 + $0x1c2c] sm:$0xf]  ;;  %v12067_v54 = vld [vmem:[#allocation5 + $0x1fb0] sm:$0xf] }
 0x7ab   :  { %7861 = vmatpush.bf16.xpose.msra.mxu2 %v11868_v6  ;;  %v13103_v6 = vld [vmem:[#allocation5 + $0x1fec] sm:$0xf0]  ;;  %v11616_v19 = vor.u32 %v12982_v39, %v11613_v3  ;;  %v11813_v39 = vld [vmem:[#allocation5 + $0x1df0] sm:$0xf0]  ;;  %v11819_v3 = vld [vmem:[#allocation5 + $0x1db8] sm:$0xf] }
 0x7ac   :  { %7874 = vmatpush.bf16.xpose.msra.mxu3 %v11872_v7  ;;  %v11604_v7 = vor.u32 %v12989_v11, %v11603_v60  ;;  %v12068_v25 = vor.u32 %v13103_v6, %v12067_v54  ;;  %v11880_v60 = vor.u32 %v13047_v55, %v11877_v5  ;;  %v13040_v54 = vld [vmem:[#allocation5 + $0x1df4] sm:$0xf0]  ;;  %v13117_v6 = vld [vmem:[#allocation7] sm:$0xff] }
 0x7ad   :  { %v6263_v58 = vperm.slane %v13117_v6, 7 }
 0x7b2   :  { %7836 = vmatpush.bf16.xpose.msra.mxu0 %v11796_v12  ;;  %7849 = vmatpush.bf16.xpose.msra.mxu1 %v11800_v36  ;;  %v12080_v12 = vor.u32 %v13096_v16, %v12077_v40  ;;  %v12003_v36 = vld [vmem:[#allocation5 + $0x1f30] sm:$0xf]  ;;  %v11824_v16 = vor.u32 %v13032_v8, %v11821_v9 }
 0x7b3   :  { %7862 = vmatpush.bf16.xpose.msra.mxu2 %v11804_v47  ;;  %v13087_v47 = vld [vmem:[#allocation5 + $0x1f6c] sm:$0xf0] }
 0x7b4   :  { %7875 = vmatpush.bf16.xpose.msra.mxu3 %v11808_v35  ;;  %v12005_v35 = vld [vmem:[#allocation5 + $0x1f70] sm:$0xf0]  ;;  %v12004_v44 = vor.u32 %v13087_v47, %v12003_v36  ;;  %v11755_v47 = vld [vmem:[#allocation5 + $0x1d38] sm:$0xf] }
 0x7b5   :  { %v12008_v46 = vor.u32 %v13079_v30, %v12005_v35  ;;  %v11749_v36 = vld [vmem:[#allocation5 + $0x1d70] sm:$0xf0]  ;;  %v13024_v30 = vld [vmem:[#allocation5 + $0x1d74] sm:$0xf0] }
 0x7ba   :  { %7837 = vmatpush.bf16.xpose.msra.mxu0 %v11732_v17  ;;  %7850 = vmatpush.bf16.xpose.msra.mxu1 %v11736_v50  ;;  %v13071_v17 = vld [vmem:[#allocation5 + $0x1eec] sm:$0xf0]  ;;  %v13063_v50 = vld [vmem:[#allocation5 + $0x1eb4] sm:$0xf] }
 0x7bb   :  { %7863 = vmatpush.bf16.xpose.msra.mxu2 %v11740_v21  ;;  %v11941_v21 = vld [vmem:[#allocation5 + $0x1ef0] sm:$0xf0]  ;;  %v11940_v33 = vor.u32 %v13071_v17, %v11939_v27  ;;  %v11760_v27 = vor.u32 %v13016_v62, %v11757_v57 }
 0x7bc   :  { %7876 = vmatpush.bf16.xpose.msra.mxu3 %v11744_v20  ;;  %v11947_v20 = vld [vmem:[#allocation5 + $0x1eb8] sm:$0xf]  ;;  %v11944_v53 = vor.u32 %v13063_v50, %v11941_v21  ;;  %v11683_v50 = vld [vmem:[#allocation5 + $0x1cb0] sm:$0xf] }
 0x7bd   :  { %v13007_v21 = vld [vmem:[#allocation5 + $0x1cec] sm:$0xf0] }
 0x7c2   :  { %7838 = vmatpush.bf16.xpose.msra.mxu0 %v11668_v4  ;;  %7851 = vmatpush.bf16.xpose.msra.mxu1 %v11672_v56  ;;  %v13056_v4 = vld [vmem:[#allocation5 + $0x1e74] sm:$0xf0]  ;;  %v13048_v56 = vld [vmem:[#allocation5 + $0x1e3c] sm:$0xf] }
 0x7c3   :  { %7864 = vmatpush.bf16.xpose.msra.mxu2 %v11676_v2  ;;  %v11885_v2 = vld [vmem:[#allocation5 + $0x1e78] sm:$0xf0]  ;;  %v11884_v11 = vor.u32 %v13056_v4, %v11883_v38  ;;  %v11619_v4 = vld [vmem:[#allocation5 + $0x1c30] sm:$0xf] }
 0x7c4   :  { %7877 = vmatpush.bf16.xpose.msra.mxu3 %v11680_v59  ;;  %v11888_v32 = vor.u32 %v13048_v56, %v11885_v2  ;;  %v12991_v56 = vld [vmem:[#allocation5 + $0x1c6c] sm:$0xf0]  ;;  %v12983_v2 = vld [vmem:[#allocation5 + $0x1c34] sm:$0xf] }
 0x7c5   :  { %v11620_v52 = vor.u32 %v12991_v56, %v11619_v4 }
 0x7ca   :  { %7839 = vmatpush.bf16.xpose.msra.mxu0 %v11604_v7  ;;  %7852 = vmatpush.bf16.xpose.msra.mxu1 %v11608_v13  ;;  %v11816_v13 = vor.u32 %v13031_v1, %v11813_v39 }
 0x7cb   :  { %7865 = vmatpush.bf16.xpose.msra.mxu2 %v11612_v14  ;;  %v11820_v14 = vor.u32 %v13040_v54, %v11819_v3 }
 0x7cc   :  { %7878 = vmatpush.bf16.xpose.msra.mxu3 %v11616_v19  ;;  %v11747_v19 = vld [vmem:[#allocation5 + $0x1d30] sm:$0xf] }
 0x7ce   :  { %v7737_v7 = vpop.f32.mrf.mxu0 }
 0x7cf   :  { %v7738_v40 = vadd.f32 %v7737_v7, %v6263_v58 }
 0x7d1   :  { %7840 = vmatmul.bf16.vlgmr.msra.gmra.mxu0 %v13295_v15  ;;  %7853 = vmatmul.bf16.vlgmr.msra.gmra.mxu1 %v13299_v24  ;;  %v13064_v15 = vld [vmem:[#allocation5 + $0x1ebc] sm:$0xf]  ;;  %v11875_v24 = vld [vmem:[#allocation5 + $0x1e30] sm:$0xf] }
 0x7d2   :  { %7884 = vmatpush.bf16.xpose.msrb.mxu0 %v12068_v25  ;;  %7897 = vmatpush.bf16.xpose.msrb.mxu1 %v12072_v26  ;;  %v11952_v34 = vor.u32 %v13064_v15, %v11949_v0  ;;  %v13023_v25 = vld [vmem:[#allocation5 + $0x1d6c] sm:$0xf0]  ;;  %v13015_v26 = vld [vmem:[#allocation5 + $0x1d34] sm:$0xf] }
 0x7d3   :  { %7910 = vmatpush.bf16.xpose.msrb.mxu2 %v12076_v29  ;;  %7879 = vmatmul.bf16.vlgmr.msra.gmra.mxu3 %v13301_v28  ;;  %v13055_v28 = vld [vmem:[#allocation5 + $0x1e6c] sm:$0xf0]  ;;  %v7750_v29 = vpop.f32.mrf.mxu1  ;;  %v11685_v0 = vld [vmem:[#allocation5 + $0x1cf0] sm:$0xf0] }
 0x7d4   :  { %7923 = vmatpush.bf16.xpose.msrb.mxu3 %v12080_v12  ;;  %7866 = vmatmul.bf16.vlgmr.msra.gmra.mxu2 %v13297_v23  ;;  %v11948_v23 = vor.u32 %v13072_v51, %v11947_v20  ;;  %v11876_v59 = vor.u32 %v13055_v28, %v11875_v24  ;;  %v7751_v35 = vadd.f32 %v7750_v29, %v7738_v40  ;;  %v12999_v20 = vld [vmem:[#allocation5 + $0x1cb4] sm:$0xf]  ;;  %v11693_v24 = vld [vmem:[#allocation5 + $0x1cf8] sm:$0xf0] }
 0x7d5   :  { %v11684_v28 = vor.u32 %v13007_v21, %v11683_v50  ;;  %v11688_v55 = vor.u32 %v12999_v20, %v11685_v0  ;;  %v7949_v50 = vrot.slane %v13506_v10, 2 }
 0x7d6   :  { %v7776_v41 = vpop.f32.mrf.mxu3  ;;  %v7739_v22 = vpop.f32.mrf.mxu0 }
 0x7d7   :  { %v7763_v12 = vpop.f32.mrf.mxu2 }
 0x7da   :  { %7885 = vmatpush.bf16.xpose.msrb.mxu0 %v12004_v44  ;;  %7898 = vmatpush.bf16.xpose.msrb.mxu1 %v12008_v46  ;;  %v11748_v44 = vor.u32 %v13023_v25, %v11747_v19  ;;  %v7764_v46 = vadd.f32 %v7763_v12, %v7751_v35 }
 0x7db   :  { %7911 = vmatpush.bf16.xpose.msrb.mxu2 %v12012_v18  ;;  %v11752_v18 = vor.u32 %v13015_v26, %v11749_v36  ;;  %v7752_v51 = vpop.f32.mrf.mxu1 }
 0x7dc   :  { %7924 = vmatpush.bf16.xpose.msrb.mxu3 %v12016_v49  ;;  %v11756_v49 = vor.u32 %v13024_v30, %v11755_v47  ;;  %v7777_v17 = vadd.f32 %v7776_v41, %v7764_v46 }
 0x7df   :  { %v7765_v15 = vpop.f32.mrf.mxu2 }
 0x7e2   :  { %7886 = vmatpush.bf16.xpose.msrb.mxu0 %v11940_v33  ;;  %7899 = vmatpush.bf16.xpose.msrb.mxu1 %v11944_v53  ;;  %v11691_v33 = vld [vmem:[#allocation5 + $0x1cb8] sm:$0xf] }
 0x7e3   :  { %7912 = vmatpush.bf16.xpose.msrb.mxu2 %v11948_v23  ;;  %v13008_v53 = vld [vmem:[#allocation5 + $0x1cf4] sm:$0xf0]  ;;  %v7778_v23 = vpop.f32.mrf.mxu3 }
 0x7e4   :  { %7925 = vmatpush.bf16.xpose.msrb.mxu3 %v11952_v34  ;;  %v13000_v34 = vld [vmem:[#allocation5 + $0x1cbc] sm:$0xf]  ;;  %v11692_v5 = vor.u32 %v13008_v53, %v11691_v33 }
 0x7e5   :  { %v11696_v38 = vor.u32 %v13000_v34, %v11693_v24 }
 0x7ea   :  { %7887 = vmatpush.bf16.xpose.msrb.mxu0 %v11876_v59  ;;  %7900 = vmatpush.bf16.xpose.msrb.mxu1 %v11880_v60  ;;  %v11621_v59 = vld [vmem:[#allocation5 + $0x1c70] sm:$0xf0]  ;;  %v11627_v60 = vld [vmem:[#allocation5 + $0x1c38] sm:$0xf] }
 0x7eb   :  { %7913 = vmatpush.bf16.xpose.msrb.mxu2 %v11884_v11  ;;  %v12992_v11 = vld [vmem:[#allocation5 + $0x1c74] sm:$0xf0]  ;;  %v11624_v1 = vor.u32 %v12983_v2, %v11621_v59 }
 0x7ec   :  { %7926 = vmatpush.bf16.xpose.msrb.mxu3 %v11888_v32  ;;  %v12984_v32 = vld [vmem:[#allocation5 + $0x1c3c] sm:$0xf]  ;;  %v11628_v39 = vor.u32 %v12992_v11, %v11627_v60 }
 0x7ed   :  { %v11632_v3 = vor.u32 %v12984_v32, %v11629_v61 }
 0x7f2   :  { %7888 = vmatpush.bf16.xpose.msrb.mxu0 %v11812_v45  ;;  %7901 = vmatpush.bf16.xpose.msrb.mxu1 %v11816_v13 }
 0x7f3   :  { %7914 = vmatpush.bf16.xpose.msrb.mxu2 %v11820_v14 }
 0x7f4   :  { %7927 = vmatpush.bf16.xpose.msrb.mxu3 %v11824_v16 }
 0x7fa   :  { %7889 = vmatpush.bf16.xpose.msrb.mxu0 %v11748_v44  ;;  %7902 = vmatpush.bf16.xpose.msrb.mxu1 %v11752_v18 }
 0x7fb   :  { %7915 = vmatpush.bf16.xpose.msrb.mxu2 %v11756_v49 }
 0x7fc   :  { %7928 = vmatpush.bf16.xpose.msrb.mxu3 %v11760_v27 }
 0x802   :  { %7890 = vmatpush.bf16.xpose.msrb.mxu0 %v11684_v28  ;;  %7903 = vmatpush.bf16.xpose.msrb.mxu1 %v11688_v55 }
 0x803   :  { %7916 = vmatpush.bf16.xpose.msrb.mxu2 %v11692_v5 }
 0x804   :  { %7929 = vmatpush.bf16.xpose.msrb.mxu3 %v11696_v38 }
 0x80a   :  { %7891 = vmatpush.bf16.xpose.msrb.mxu0 %v11620_v52  ;;  %7904 = vmatpush.bf16.xpose.msrb.mxu1 %v11624_v1 }
 0x80b   :  { %7917 = vmatpush.bf16.xpose.msrb.mxu2 %v11628_v39 }
 0x80c   :  { %7930 = vmatpush.bf16.xpose.msrb.mxu3 %v11632_v3 }
 0x80e   :  { %v7789_v54 = vpop.f32.mrf.mxu0  ;;  %v7802_v58 = vpop.f32.mrf.mxu1 }
 0x80f   :  { %v7790_v6 = vadd.f32 %v7789_v54, %v7777_v17 }
 0x811   :  { %7892 = vmatmul.bf16.vlgmr.msrb.gmra.mxu0 %v13313_v37  ;;  %7905 = vmatmul.bf16.vlgmr.msrb.gmra.mxu1 %v13317_v43  ;;  %v7803_v7 = vadd.f32 %v7802_v58, %v7790_v6 }
 0x812   :  { %7918 = vmatmul.bf16.vlgmr.msrb.gmra.mxu2 %v13315_v42 }
 0x813   :  { %7931 = vmatmul.bf16.vlgmr.msrb.gmra.mxu3 %v13319_v48 }
 0x816   :  { %v7828_v45 = vpop.f32.mrf.mxu3  ;;  %v7791_v13 = vpop.f32.mrf.mxu0 }
 0x817   :  { %v7815_v8 = vpop.f32.mrf.mxu2  ;;  %v7804_v14 = vpop.f32.mrf.mxu1 }
 0x818   :  { %v7816_v9 = vadd.f32 %v7815_v8, %v7803_v7 }
 0x81a   :  { %v7829_v16 = vadd.f32 %v7828_v45, %v7816_v9 }
 0x81e   :  { %v7830_v19 = vpop.f32.mrf.mxu3 }
 0x81f   :  { %v7817_v40 = vpop.f32.mrf.mxu2 }
 0x84e   :  { %v7841_v25 = vpop.f32.mrf.mxu0  ;;  %v7854_v37 = vpop.f32.mrf.mxu1 }
 0x84f   :  { %v7842_v36 = vadd.f32 %v7841_v25, %v7829_v16 }
 0x851   :  { %v7855_v47 = vadd.f32 %v7854_v37, %v7842_v36 }
 0x856   :  { %v7880_v43 = vpop.f32.mrf.mxu3  ;;  %v7843_v29 = vpop.f32.mrf.mxu0 }
 0x857   :  { %v7867_v26 = vpop.f32.mrf.mxu2  ;;  %v7856_v42 = vpop.f32.mrf.mxu1 }
 0x858   :  { %v7868_v30 = vadd.f32 %v7867_v26, %v7855_v47 }
 0x85a   :  { %v7881_v35 = vadd.f32 %v7880_v43, %v7868_v30 }
 0x85e   :  { %v7882_v48 = vpop.f32.mrf.mxu3 }
 0x85f   :  { %v7869_v12 = vpop.f32.mrf.mxu2 }
 0x88e   :  { %v7893_v41 = vpop.f32.mrf.mxu0  ;;  %v7906_v22 = vpop.f32.mrf.mxu1 }
 0x88f   :  { %v7894_v62 = vadd.f32 %v7893_v41, %v7881_v35 }
 0x891   :  { %v7907_v57 = vadd.f32 %v7906_v22, %v7894_v62 }
 0x895   :  { %v7919_v44 = vpop.f32.mrf.mxu2 }
 0x896   :  { %v7920_v46 = vadd.f32 %v7919_v44, %v7907_v57  ;;  %v7932_v18 = vpop.f32.mrf.mxu3  ;;  %v7895_v49 = vpop.f32.mrf.mxu0 }
 0x897   :  { %v7908_v27 = vpop.f32.mrf.mxu1 }
 0x898   :  { %v7933_v17 = vadd.f32 %v7932_v18, %v7920_v46 }
 0x89a   :  { %v7950_v21 = vrot.slane %v7933_v17, 1 }
 0x89c   :  { %v7960_v20 = vsel %vm7959_vm4, %v7949_v50, %v7950_v21 }
 0x89d   :  { %v7921_v51 = vpop.f32.mrf.mxu2  ;;  %v7962_v15 = vsel %vm7961_vm5, %v13479_v63, %v7960_v20 }
 0x89e   :  { %v7934_v0 = vpop.f32.mrf.mxu3  ;;  %v7964_v33 = vsel %vm7963_vm6, %v13424_v31, %v7962_v15 }
 0x89f   :  { %7966 = vst [vmem:[#allocation8] sm:$0xff] %v7964_v33 }
 0x8a0   :  { %7977 = dma.vmem_to_hbm [thread:$0]  %s7973_s2, 128, %s7975_s30, [#allocation4]  }
 0x8a1   :  { %13218 = dma.done.wait [#allocation4], 128  }
 0x8a2   :  { %13219 = vsyncadd [#allocation4], 4294967168 }
 0x8a3   :  { %7982 = vsyncpa [#allocation3], 1 }
 0x8a4   :  { %7983 = vsyncpa [#allocation6], 1 }
 0x8a5   :  { %7984 = vsyncpa [#allocation4], 1 }

</bundles_post_ra>
